<compile_context>
chip_gen: v6e
topology: v6e:2x2x1
jax: 0.10.0
libtpu: 0.0.40
codegen_flags: <defaults>
</compile_context>

<pallas_src>
import functools

import jax
import jax.numpy as jnp
from jax import lax
from jax.experimental import pallas as pl
from jax.experimental.pallas import tpu as pltpu

EPS = 1e-5
LANES = 128


def _round_up(x, m):
    return (x + m - 1) // m * m


def _vmem_limit_bytes():
    """~75% of this generation's physical VMEM (96 MiB v5e/v6e, 48 MiB v7x)."""
    try:
        cap = int(pltpu.get_tpu_info().vmem_capacity_bytes)
    except Exception:
        cap = 64 * 1024 * 1024
    return int(min(cap * 3 // 4, 100 * 1024 * 1024))


def _cparams(semantics):
    return pltpu.CompilerParams(dimension_semantics=semantics,
                                vmem_limit_bytes=_vmem_limit_bytes())


def _const_block_spec(shape):
    """Resident weight block (constant index_map, 2-D grid): single-buffer if possible."""
    ndim = len(shape)
    index_map = lambda n, d: (0,) * ndim
    try:
        return pl.BlockSpec(shape, index_map, pipeline_mode=pl.Buffered(1))
    except Exception:                      # pipeline_mode/Buffered unsupported -> default
        return pl.BlockSpec(shape, index_map)


# ----------------------------- Pallas kernels ------------------------------

def _conv_taps_accumulate(slab_refs, w_ref, *, cin, cp, hh, ww):
    """3x3x3 conv of one output D-slice.

    slab_refs: three (H+2, W+2, cin) bf16 refs (D taps kd=0,1,2, spatially padded).
    w_ref:     (27*cin, cp) bf16 weight ref, tap-major rows.
    Returns (hh*ww, cp) f32 accumulator.
    """
    acc = jnp.zeros((hh * ww, cp), jnp.float32)
    for kd in range(3):
        sref = slab_refs[kd]
        for kh in range(3):
            for kw in range(3):
                tap = sref[kh:kh + hh, kw:kw + ww, :].reshape(hh * ww, cin)
                t0 = (kd * 9 + kh * 3 + kw) * cin
                acc = acc + jnp.dot(tap, w_ref[t0:t0 + cin, :],
                                    preferred_element_type=jnp.float32)
    return acc


def _bn_partials(y, cp, rows):
    """Sublane-dense (8, cp) partials: row0 = sum, row1 = centred sum of squares."""
    s = jnp.sum(y, axis=0, keepdims=True)
    mu = s * (1.0 / rows)
    d = y - mu
    m2 = jnp.sum(d * d, axis=0, keepdims=True)
    return jnp.concatenate([s, m2, jnp.zeros((6, cp), jnp.float32)], axis=0)


def conv1_res_stats_kernel(xm_ref, x0_ref, xp_ref, w_ref, wres_ref,
                           y_ref, r_ref, st_ref, *, cin, cp, hh, ww):
    """conv1 (in-kernel taps) + fused centre-tap 1x1x1 res_conv + BN1 Welford partials."""
    acc = _conv_taps_accumulate((xm_ref, x0_ref, xp_ref), w_ref,
                                cin=cin, cp=cp, hh=hh, ww=ww)
    y_ref[...] = acc.astype(y_ref.dtype)                       # bf16 intermediate
    centre = x0_ref[1:1 + hh, 1:1 + ww, :].reshape(hh * ww, cin)
    r_ref[...] = jnp.dot(centre, wres_ref[...],
                         preferred_element_type=jnp.float32).astype(r_ref.dtype)
    st_ref[...] = _bn_partials(acc, cp, hh * ww)               # f32 stats (all rows real)


def conv2_stats_kernel(xm_ref, x0_ref, xp_ref, w_ref, y_ref, st_ref,
                       *, cin, cp, hh, ww):
    """conv2 (in-kernel taps) + BN2 Welford partials."""
    acc = _conv_taps_accumulate((xm_ref, x0_ref, xp_ref), w_ref,
                                cin=cin, cp=cp, hh=hh, ww=ww)
    y_ref[...] = acc.astype(y_ref.dtype)
    st_ref[...] = _bn_partials(acc, cp, hh * ww)


def bn_add_relu_kernel(y_ref, r_ref, sc_ref, sh_ref, o_ref):
    """Fused BN2 affine + residual add + ReLU (bres already folded into the shift)."""
    v = (y_ref[...].astype(jnp.float32) * sc_ref[...] + sh_ref[...]
         + r_ref[...].astype(jnp.float32))
    o_ref[...] = jnp.maximum(v, 0.0)


# ------------------------------ glue (JAX) ---------------------------------

def _pad_c(v, cp):
    return jnp.pad(v, (0, cp - v.shape[0])).reshape(1, cp)


def _bn_affine(stats, rows_per_tile, m_total, gamma, beta, cp, extra_shift=None):
    """stats: (T, 8, Cp); row0 = per-tile sum, row1 = per-tile centred sum-of-squares.
    Chan/Welford combine (all tiles have rows_per_tile rows) -> (scale, shift), (1, Cp)."""
    sum_t = stats[:, 0, :]
    m2_t = stats[:, 1, :]
    mu_t = sum_t / rows_per_tile
    mu = jnp.sum(sum_t, axis=0) / m_total
    var = (jnp.sum(m2_t, axis=0)
           + rows_per_tile * jnp.sum((mu_t - mu) ** 2, axis=0)) / m_total
    var = jnp.maximum(var, 0.0)
    inv = lax.rsqrt(var + EPS).reshape(1, cp)
    scale = _pad_c(gamma, cp) * inv
    shift = _pad_c(beta, cp) - mu.reshape(1, cp) * scale
    if extra_shift is not None:
        shift = shift + extra_shift
    return scale, shift


def res_block_forward(x, params):
    """x: (N, D, H, W, Cin) float32.  Returns (N, D, H, W, Cout) float32."""
    N, D, H, W, Cin = x.shape
    Cout = params["w1"].shape[-1]
    Cp = _round_up(Cout, LANES)            # lane-dense padded channel dim
    Hp2, Wp2 = H + 2, W + 2
    HW = H * W
    ND = N * D
    M = ND * HW
    grid = (N, D)                          # one output D-slice per step, both parallel

    def shifted_in_spec(kd, hp, wp, c):    # D-tap kd: block at padded-D index d + kd
        return pl.BlockSpec((None, None, hp, wp, c),
                            lambda n, d, _kd=kd: (n, d + _kd, 0, 0, 0))

    out_row = lambda n, d: (n * D + d, 0, 0)

    # ---------- pass A: conv1 + fused res_conv + BN1 partials ----------
    xpad = jnp.pad(x.astype(jnp.bfloat16),
                   ((0, 0), (1, 1), (1, 1), (1, 1), (0, 0)))     # (N, D+2, H+2, W+2, Cin)

    w1 = jnp.zeros((27 * Cin, Cp), jnp.float32)
    w1 = w1.at[:, :Cout].set(params["w1"].reshape(27 * Cin, Cout)).astype(jnp.bfloat16)
    wres = jnp.zeros((Cin, Cp), jnp.float32)
    wres = wres.at[:, :Cout].set(params["wres"]).astype(jnp.bfloat16)

    y1raw, res, st1 = pl.pallas_call(
        functools.partial(conv1_res_stats_kernel, cin=Cin, cp=Cp, hh=H, ww=W),
        grid=grid,
        in_specs=[shifted_in_spec(0, Hp2, Wp2, Cin),
                  shifted_in_spec(1, Hp2, Wp2, Cin),
                  shifted_in_spec(2, Hp2, Wp2, Cin),
                  _const_block_spec((27 * Cin, Cp)),
                  _const_block_spec((Cin, Cp))],
        out_specs=(pl.BlockSpec((None, HW, Cp), out_row),
                   pl.BlockSpec((None, HW, Cp), out_row),
                   pl.BlockSpec((None, 8, Cp), out_row)),
        out_shape=(jax.ShapeDtypeStruct((ND, HW, Cp), jnp.bfloat16),
                   jax.ShapeDtypeStruct((ND, HW, Cp), jnp.bfloat16),
                   jax.ShapeDtypeStruct((ND, 8, Cp), jnp.float32)),
        compiler_params=_cparams(("parallel", "parallel")),
    )(xpad, xpad, xpad, w1, wres)

    # ---------- BN1 apply + ReLU + bf16 cast + pad: plain jnp, fused by XLA ----------
    scale1, shift1 = _bn_affine(st1, HW, M, params["g1"], params["be1"], Cp)
    y1act = jnp.maximum(y1raw.astype(jnp.float32) * scale1 + shift1, 0.0)
    y1pad = jnp.pad(y1act.astype(jnp.bfloat16).reshape(N, D, H, W, Cp),
                    ((0, 0), (1, 1), (1, 1), (1, 1), (0, 0)))    # (N, D+2, H+2, W+2, Cp)

    # ---------- pass C: conv2 + BN2 partials (contraction over padded Cp, 128-aligned) --
    w2p = jnp.zeros((27, Cp, Cp), jnp.float32)
    w2p = w2p.at[:, :Cout, :Cout].set(params["w2"].reshape(27, Cout, Cout))
    w2p = w2p.reshape(27 * Cp, Cp).astype(jnp.bfloat16)

    y2raw, st2 = pl.pallas_call(
        functools.partial(conv2_stats_kernel, cin=Cp, cp=Cp, hh=H, ww=W),
        grid=grid,
        in_specs=[shifted_in_spec(0, Hp2, Wp2, Cp),
                  shifted_in_spec(1, Hp2, Wp2, Cp),
                  shifted_in_spec(2, Hp2, Wp2, Cp),
                  _const_block_spec((27 * Cp, Cp))],
        out_specs=(pl.BlockSpec((None, HW, Cp), out_row),
                   pl.BlockSpec((None, 8, Cp), out_row)),
        out_shape=(jax.ShapeDtypeStruct((ND, HW, Cp), jnp.bfloat16),
                   jax.ShapeDtypeStruct((ND, 8, Cp), jnp.float32)),
        compiler_params=_cparams(("parallel", "parallel")),
    )(y1pad, y1pad, y1pad, w2p)

    # ---------- pass D: BN2 affine + residual add + ReLU (large streaming tiles) -------
    scale2, shift2 = _bn_affine(st2, HW, M, params["g2"], params["be2"], Cp,
                                extra_shift=_pad_c(params["bres"], Cp))

    # Tile rows = (multiple of H*W) that divides M exactly -> no padded rows, dense stores.
    dt = 1
    for cand in range(1, ND + 1):
        if ND % cand == 0 and cand * HW <= 4096:
            dt = cand
    tm = dt * HW
    y2m = y2raw.reshape(M, Cp)
    resm = res.reshape(M, Cp)

    out = pl.pallas_call(
        bn_add_relu_kernel,
        grid=(M // tm,),
        in_specs=[pl.BlockSpec((tm, Cp), lambda i: (i, 0)),
                  pl.BlockSpec((tm, Cp), lambda i: (i, 0)),
                  pl.BlockSpec((1, Cp), lambda i: (0, 0)),
                  pl.BlockSpec((1, Cp), lambda i: (0, 0))],
        out_specs=pl.BlockSpec((tm, Cp), lambda i: (i, 0)),
        out_shape=jax.ShapeDtypeStruct((M, Cp), jnp.float32),
        compiler_params=_cparams(("parallel",)),
    )(y2m, resm, scale2, shift2)

    return out[:, :Cout].reshape(N, D, H, W, Cout)


# --------------------------- pure-JAX reference ----------------------------

def ref_forward(x, p):
    def conv3(x, w, b):
        y = lax.conv_general_dilated(
            x, w, window_strides=(1, 1, 1), padding="SAME",
            dimension_numbers=("NDHWC", "DHWIO", "NDHWC"))
        return y + b

    def bn(y, g, be):
        mean = jnp.mean(y, axis=(0, 1, 2, 3), keepdims=True)
        var = jnp.mean((y - mean) ** 2, axis=(0, 1, 2, 3), keepdims=True)
        return (y - mean) * lax.rsqrt(var + EPS) * g + be

    res = jnp.einsum("ndhwi,io->ndhwo", x, p["wres"]) + p["bres"]
    h = jax.nn.relu(bn(conv3(x, p["w1"], p["b1"]), p["g1"], p["be1"]))
    h = bn(conv3(h, p["w2"], p["b2"]), p["g2"], p["be2"])
    return jax.nn.relu(h + res)


# --------------------------------- main ------------------------------------

if __name__ == "__main__":
    N, D, H, W = 2, 8, 8, 8
    Cin, Cout = 4, 8          # in_channels != out_channels -> res_conv path exercised

    ks = jax.random.split(jax.random.PRNGKey(0), 12)
    x = jax.random.normal(ks[0], (N, D, H, W, Cin), jnp.float32)

    def nrm(k, shape, scale):
        return scale * jax.random.normal(k, shape, jnp.float32)

    params = {
        "w1":   nrm(ks[1], (3, 3, 3, Cin, Cout),  (27 * Cin) ** -0.5),
        "b1":   nrm(ks[2], (Cout,), 0.1),   # cancels through training-mode BN (ref only)
        "g1":   1.0 + nrm(ks[3], (Cout,), 0.1),
        "be1":  nrm(ks[4], (Cout,), 0.1),
        "w2":   nrm(ks[5], (3, 3, 3, Cout, Cout), (27 * Cout) ** -0.5),
        "b2":   nrm(ks[6], (Cout,), 0.1),   # cancels through training-mode BN (ref only)
        "g2":   1.0 + nrm(ks[7], (Cout,), 0.1),
        "be2":  nrm(ks[8], (Cout,), 0.1),
        "wres": nrm(ks[9], (Cin, Cout), Cin ** -0.5),
        "bres": nrm(ks[10], (Cout,), 0.1),
    }

    out = jax.jit(res_block_forward)(x, params)
    out = jax.block_until_ready(out)

    ref = ref_forward(x, params)
    err = float(jnp.max(jnp.abs(out - ref)))
    scale = float(jnp.max(jnp.abs(ref))) + 1e-6
    if not (err / scale < 2.5e-2):
        raise AssertionError(
            f"Pallas output mismatch vs reference: max abs err = {err}, ref scale = {scale}")

    print("KERNEL_OK")
</pallas_src>

<mosaic_0001>
module attributes {stable_mosaic.version = 11 : i64} {
  func.func @conv1_res_stats_kernel(%arg0: i32, %arg1: i32, %arg2: memref<1x1x10x10x4xbf16, #tpu.memory_space<vmem>>, %arg3: memref<1x1x10x10x4xbf16, #tpu.memory_space<vmem>>, %arg4: memref<1x1x10x10x4xbf16, #tpu.memory_space<vmem>>, %arg5: memref<108x128xbf16, #tpu.memory_space<vmem>>, %arg6: memref<4x128xbf16, #tpu.memory_space<vmem>>, %arg7: memref<1x64x128xbf16, #tpu.memory_space<vmem>>, %arg8: memref<1x64x128xbf16, #tpu.memory_space<vmem>>, %arg9: memref<1x8x128xf32, #tpu.memory_space<vmem>>) attributes {dimension_semantics = [#tpu.dimension_semantics<parallel>, #tpu.dimension_semantics<parallel>], iteration_bounds = array<i64: 2, 8>, scalar_prefetch = 0 : i64, scratch_operands = 0 : i64, tpu.core_type = #tpu.core_type<tc>, window_params = [{transform_indices = @transform_0, window_bounds = array<i64: 1, 1, 10, 10, 4>}, {transform_indices = @transform_1, window_bounds = array<i64: 1, 1, 10, 10, 4>}, {transform_indices = @transform_2, window_bounds = array<i64: 1, 1, 10, 10, 4>}, {pipeline_mode = #tpu.pipeline_mode<synchronous>, transform_indices = @transform_3, window_bounds = array<i64: 108, 128>}, {pipeline_mode = #tpu.pipeline_mode<synchronous>, transform_indices = @transform_4, window_bounds = array<i64: 4, 128>}, {transform_indices = @transform_5, window_bounds = array<i64: 1, 64, 128>}, {transform_indices = @transform_6, window_bounds = array<i64: 1, 64, 128>}, {transform_indices = @transform_7, window_bounds = array<i64: 1, 8, 128>}]} {
    %cst = arith.constant 0.000000e+00 : f32
    %0 = vector.broadcast %cst : f32 to vector<64x128xf32>
    %c0 = arith.constant 0 : index
    %c0_0 = arith.constant 0 : index
    %c0_1 = arith.constant 0 : index
    %c0_2 = arith.constant 0 : index
    %c0_3 = arith.constant 0 : index
    %1 = vector.load %arg2[%c0, %c0_0, %c0_1, %c0_2, %c0_3] : memref<1x1x10x10x4xbf16, #tpu.memory_space<vmem>>, vector<1x1x8x8x4xbf16>
    %2 = vector.shape_cast %1 : vector<1x1x8x8x4xbf16> to vector<8x8x4xbf16>
    %3 = vector.shape_cast %2 : vector<8x8x4xbf16> to vector<64x4xbf16>
    %c0_4 = arith.constant 0 : index
    %c0_5 = arith.constant 0 : index
    %4 = vector.load %arg5[%c0_4, %c0_5] : memref<108x128xbf16, #tpu.memory_space<vmem>>, vector<4x128xbf16>
    %cst_6 = arith.constant dense<0.000000e+00> : vector<64x128xf32>
    %5 = tpu.matmul %3, %4, %cst_6 {dimension_numbers = #tpu.dot_dimension_numbers<[1], [0], [0], [1], [0, 0, 1, 1], [], []>} : vector<64x4xbf16>, vector<4x128xbf16>, vector<64x128xf32> -> vector<64x128xf32>
    %6 = arith.addf %0, %5 : vector<64x128xf32>
    %c0_7 = arith.constant 0 : index
    %c0_8 = arith.constant 0 : index
    %c0_9 = arith.constant 0 : index
    %c1 = arith.constant 1 : index
    %c0_10 = arith.constant 0 : index
    %7 = vector.load %arg2[%c0_7, %c0_8, %c0_9, %c1, %c0_10] : memref<1x1x10x10x4xbf16, #tpu.memory_space<vmem>>, vector<1x1x8x8x4xbf16>
    %8 = vector.shape_cast %7 : vector<1x1x8x8x4xbf16> to vector<8x8x4xbf16>
    %9 = vector.shape_cast %8 : vector<8x8x4xbf16> to vector<64x4xbf16>
    %c4 = arith.constant 4 : index
    %c0_11 = arith.constant 0 : index
    %10 = vector.load %arg5[%c4, %c0_11] : memref<108x128xbf16, #tpu.memory_space<vmem>>, vector<4x128xbf16>
    %cst_12 = arith.constant dense<0.000000e+00> : vector<64x128xf32>
    %11 = tpu.matmul %9, %10, %cst_12 {dimension_numbers = #tpu.dot_dimension_numbers<[1], [0], [0], [1], [0, 0, 1, 1], [], []>} : vector<64x4xbf16>, vector<4x128xbf16>, vector<64x128xf32> -> vector<64x128xf32>
    %12 = arith.addf %6, %11 : vector<64x128xf32>
    %c0_13 = arith.constant 0 : index
    %c0_14 = arith.constant 0 : index
    %c0_15 = arith.constant 0 : index
    %c2 = arith.constant 2 : index
    %c0_16 = arith.constant 0 : index
    %13 = vector.load %arg2[%c0_13, %c0_14, %c0_15, %c2, %c0_16] : memref<1x1x10x10x4xbf16, #tpu.memory_space<vmem>>, vector<1x1x8x8x4xbf16>
    %14 = vector.shape_cast %13 : vector<1x1x8x8x4xbf16> to vector<8x8x4xbf16>
    %15 = vector.shape_cast %14 : vector<8x8x4xbf16> to vector<64x4xbf16>
    %c8 = arith.constant 8 : index
    %c0_17 = arith.constant 0 : index
    %16 = vector.load %arg5[%c8, %c0_17] : memref<108x128xbf16, #tpu.memory_space<vmem>>, vector<4x128xbf16>
    %cst_18 = arith.constant dense<0.000000e+00> : vector<64x128xf32>
    %17 = tpu.matmul %15, %16, %cst_18 {dimension_numbers = #tpu.dot_dimension_numbers<[1], [0], [0], [1], [0, 0, 1, 1], [], []>} : vector<64x4xbf16>, vector<4x128xbf16>, vector<64x128xf32> -> vector<64x128xf32>
    %18 = arith.addf %12, %17 : vector<64x128xf32>
    %c0_19 = arith.constant 0 : index
    %c0_20 = arith.constant 0 : index
    %c1_21 = arith.constant 1 : index
    %c0_22 = arith.constant 0 : index
    %c0_23 = arith.constant 0 : index
    %19 = vector.load %arg2[%c0_19, %c0_20, %c1_21, %c0_22, %c0_23] : memref<1x1x10x10x4xbf16, #tpu.memory_space<vmem>>, vector<1x1x8x8x4xbf16>
    %20 = vector.shape_cast %19 : vector<1x1x8x8x4xbf16> to vector<8x8x4xbf16>
    %21 = vector.shape_cast %20 : vector<8x8x4xbf16> to vector<64x4xbf16>
    %c12 = arith.constant 12 : index
    %c0_24 = arith.constant 0 : index
    %22 = vector.load %arg5[%c12, %c0_24] : memref<108x128xbf16, #tpu.memory_space<vmem>>, vector<4x128xbf16>
    %cst_25 = arith.constant dense<0.000000e+00> : vector<64x128xf32>
    %23 = tpu.matmul %21, %22, %cst_25 {dimension_numbers = #tpu.dot_dimension_numbers<[1], [0], [0], [1], [0, 0, 1, 1], [], []>} : vector<64x4xbf16>, vector<4x128xbf16>, vector<64x128xf32> -> vector<64x128xf32>
    %24 = arith.addf %18, %23 : vector<64x128xf32>
    %c0_26 = arith.constant 0 : index
    %c0_27 = arith.constant 0 : index
    %c1_28 = arith.constant 1 : index
    %c1_29 = arith.constant 1 : index
    %c0_30 = arith.constant 0 : index
    %25 = vector.load %arg2[%c0_26, %c0_27, %c1_28, %c1_29, %c0_30] : memref<1x1x10x10x4xbf16, #tpu.memory_space<vmem>>, vector<1x1x8x8x4xbf16>
    %26 = vector.shape_cast %25 : vector<1x1x8x8x4xbf16> to vector<8x8x4xbf16>
    %27 = vector.shape_cast %26 : vector<8x8x4xbf16> to vector<64x4xbf16>
    %c16 = arith.constant 16 : index
    %c0_31 = arith.constant 0 : index
    %28 = vector.load %arg5[%c16, %c0_31] : memref<108x128xbf16, #tpu.memory_space<vmem>>, vector<4x128xbf16>
    %cst_32 = arith.constant dense<0.000000e+00> : vector<64x128xf32>
    %29 = tpu.matmul %27, %28, %cst_32 {dimension_numbers = #tpu.dot_dimension_numbers<[1], [0], [0], [1], [0, 0, 1, 1], [], []>} : vector<64x4xbf16>, vector<4x128xbf16>, vector<64x128xf32> -> vector<64x128xf32>
    %30 = arith.addf %24, %29 : vector<64x128xf32>
    %c0_33 = arith.constant 0 : index
    %c0_34 = arith.constant 0 : index
    %c1_35 = arith.constant 1 : index
    %c2_36 = arith.constant 2 : index
    %c0_37 = arith.constant 0 : index
    %31 = vector.load %arg2[%c0_33, %c0_34, %c1_35, %c2_36, %c0_37] : memref<1x1x10x10x4xbf16, #tpu.memory_space<vmem>>, vector<1x1x8x8x4xbf16>
    %32 = vector.shape_cast %31 : vector<1x1x8x8x4xbf16> to vector<8x8x4xbf16>
    %33 = vector.shape_cast %32 : vector<8x8x4xbf16> to vector<64x4xbf16>
    %c20 = arith.constant 20 : index
    %c0_38 = arith.constant 0 : index
    %34 = vector.load %arg5[%c20, %c0_38] : memref<108x128xbf16, #tpu.memory_space<vmem>>, vector<4x128xbf16>
    %cst_39 = arith.constant dense<0.000000e+00> : vector<64x128xf32>
    %35 = tpu.matmul %33, %34, %cst_39 {dimension_numbers = #tpu.dot_dimension_numbers<[1], [0], [0], [1], [0, 0, 1, 1], [], []>} : vector<64x4xbf16>, vector<4x128xbf16>, vector<64x128xf32> -> vector<64x128xf32>
    %36 = arith.addf %30, %35 : vector<64x128xf32>
    %c0_40 = arith.constant 0 : index
    %c0_41 = arith.constant 0 : index
    %c2_42 = arith.constant 2 : index
    %c0_43 = arith.constant 0 : index
    %c0_44 = arith.constant 0 : index
    %37 = vector.load %arg2[%c0_40, %c0_41, %c2_42, %c0_43, %c0_44] : memref<1x1x10x10x4xbf16, #tpu.memory_space<vmem>>, vector<1x1x8x8x4xbf16>
    %38 = vector.shape_cast %37 : vector<1x1x8x8x4xbf16> to vector<8x8x4xbf16>
    %39 = vector.shape_cast %38 : vector<8x8x4xbf16> to vector<64x4xbf16>
    %c24 = arith.constant 24 : index
    %c0_45 = arith.constant 0 : index
    %40 = vector.load %arg5[%c24, %c0_45] : memref<108x128xbf16, #tpu.memory_space<vmem>>, vector<4x128xbf16>
    %cst_46 = arith.constant dense<0.000000e+00> : vector<64x128xf32>
    %41 = tpu.matmul %39, %40, %cst_46 {dimension_numbers = #tpu.dot_dimension_numbers<[1], [0], [0], [1], [0, 0, 1, 1], [], []>} : vector<64x4xbf16>, vector<4x128xbf16>, vector<64x128xf32> -> vector<64x128xf32>
    %42 = arith.addf %36, %41 : vector<64x128xf32>
    %c0_47 = arith.constant 0 : index
    %c0_48 = arith.constant 0 : index
    %c2_49 = arith.constant 2 : index
    %c1_50 = arith.constant 1 : index
    %c0_51 = arith.constant 0 : index
    %43 = vector.load %arg2[%c0_47, %c0_48, %c2_49, %c1_50, %c0_51] : memref<1x1x10x10x4xbf16, #tpu.memory_space<vmem>>, vector<1x1x8x8x4xbf16>
    %44 = vector.shape_cast %43 : vector<1x1x8x8x4xbf16> to vector<8x8x4xbf16>
    %45 = vector.shape_cast %44 : vector<8x8x4xbf16> to vector<64x4xbf16>
    %c28 = arith.constant 28 : index
    %c0_52 = arith.constant 0 : index
    %46 = vector.load %arg5[%c28, %c0_52] : memref<108x128xbf16, #tpu.memory_space<vmem>>, vector<4x128xbf16>
    %cst_53 = arith.constant dense<0.000000e+00> : vector<64x128xf32>
    %47 = tpu.matmul %45, %46, %cst_53 {dimension_numbers = #tpu.dot_dimension_numbers<[1], [0], [0], [1], [0, 0, 1, 1], [], []>} : vector<64x4xbf16>, vector<4x128xbf16>, vector<64x128xf32> -> vector<64x128xf32>
    %48 = arith.addf %42, %47 : vector<64x128xf32>
    %c0_54 = arith.constant 0 : index
    %c0_55 = arith.constant 0 : index
    %c2_56 = arith.constant 2 : index
    %c2_57 = arith.constant 2 : index
    %c0_58 = arith.constant 0 : index
    %49 = vector.load %arg2[%c0_54, %c0_55, %c2_56, %c2_57, %c0_58] : memref<1x1x10x10x4xbf16, #tpu.memory_space<vmem>>, vector<1x1x8x8x4xbf16>
    %50 = vector.shape_cast %49 : vector<1x1x8x8x4xbf16> to vector<8x8x4xbf16>
    %51 = vector.shape_cast %50 : vector<8x8x4xbf16> to vector<64x4xbf16>
    %c32 = arith.constant 32 : index
    %c0_59 = arith.constant 0 : index
    %52 = vector.load %arg5[%c32, %c0_59] : memref<108x128xbf16, #tpu.memory_space<vmem>>, vector<4x128xbf16>
    %cst_60 = arith.constant dense<0.000000e+00> : vector<64x128xf32>
    %53 = tpu.matmul %51, %52, %cst_60 {dimension_numbers = #tpu.dot_dimension_numbers<[1], [0], [0], [1], [0, 0, 1, 1], [], []>} : vector<64x4xbf16>, vector<4x128xbf16>, vector<64x128xf32> -> vector<64x128xf32>
    %54 = arith.addf %48, %53 : vector<64x128xf32>
    %c0_61 = arith.constant 0 : index
    %c0_62 = arith.constant 0 : index
    %c0_63 = arith.constant 0 : index
    %c0_64 = arith.constant 0 : index
    %c0_65 = arith.constant 0 : index
    %55 = vector.load %arg3[%c0_61, %c0_62, %c0_63, %c0_64, %c0_65] : memref<1x1x10x10x4xbf16, #tpu.memory_space<vmem>>, vector<1x1x8x8x4xbf16>
    %56 = vector.shape_cast %55 : vector<1x1x8x8x4xbf16> to vector<8x8x4xbf16>
    %57 = vector.shape_cast %56 : vector<8x8x4xbf16> to vector<64x4xbf16>
    %c36 = arith.constant 36 : index
    %c0_66 = arith.constant 0 : index
    %58 = vector.load %arg5[%c36, %c0_66] : memref<108x128xbf16, #tpu.memory_space<vmem>>, vector<4x128xbf16>
    %cst_67 = arith.constant dense<0.000000e+00> : vector<64x128xf32>
    %59 = tpu.matmul %57, %58, %cst_67 {dimension_numbers = #tpu.dot_dimension_numbers<[1], [0], [0], [1], [0, 0, 1, 1], [], []>} : vector<64x4xbf16>, vector<4x128xbf16>, vector<64x128xf32> -> vector<64x128xf32>
    %60 = arith.addf %54, %59 : vector<64x128xf32>
    %c0_68 = arith.constant 0 : index
    %c0_69 = arith.constant 0 : index
    %c0_70 = arith.constant 0 : index
    %c1_71 = arith.constant 1 : index
    %c0_72 = arith.constant 0 : index
    %61 = vector.load %arg3[%c0_68, %c0_69, %c0_70, %c1_71, %c0_72] : memref<1x1x10x10x4xbf16, #tpu.memory_space<vmem>>, vector<1x1x8x8x4xbf16>
    %62 = vector.shape_cast %61 : vector<1x1x8x8x4xbf16> to vector<8x8x4xbf16>
    %63 = vector.shape_cast %62 : vector<8x8x4xbf16> to vector<64x4xbf16>
    %c40 = arith.constant 40 : index
    %c0_73 = arith.constant 0 : index
    %64 = vector.load %arg5[%c40, %c0_73] : memref<108x128xbf16, #tpu.memory_space<vmem>>, vector<4x128xbf16>
    %cst_74 = arith.constant dense<0.000000e+00> : vector<64x128xf32>
    %65 = tpu.matmul %63, %64, %cst_74 {dimension_numbers = #tpu.dot_dimension_numbers<[1], [0], [0], [1], [0, 0, 1, 1], [], []>} : vector<64x4xbf16>, vector<4x128xbf16>, vector<64x128xf32> -> vector<64x128xf32>
    %66 = arith.addf %60, %65 : vector<64x128xf32>
    %c0_75 = arith.constant 0 : index
    %c0_76 = arith.constant 0 : index
    %c0_77 = arith.constant 0 : index
    %c2_78 = arith.constant 2 : index
    %c0_79 = arith.constant 0 : index
    %67 = vector.load %arg3[%c0_75, %c0_76, %c0_77, %c2_78, %c0_79] : memref<1x1x10x10x4xbf16, #tpu.memory_space<vmem>>, vector<1x1x8x8x4xbf16>
    %68 = vector.shape_cast %67 : vector<1x1x8x8x4xbf16> to vector<8x8x4xbf16>
    %69 = vector.shape_cast %68 : vector<8x8x4xbf16> to vector<64x4xbf16>
    %c44 = arith.constant 44 : index
    %c0_80 = arith.constant 0 : index
    %70 = vector.load %arg5[%c44, %c0_80] : memref<108x128xbf16, #tpu.memory_space<vmem>>, vector<4x128xbf16>
    %cst_81 = arith.constant dense<0.000000e+00> : vector<64x128xf32>
    %71 = tpu.matmul %69, %70, %cst_81 {dimension_numbers = #tpu.dot_dimension_numbers<[1], [0], [0], [1], [0, 0, 1, 1], [], []>} : vector<64x4xbf16>, vector<4x128xbf16>, vector<64x128xf32> -> vector<64x128xf32>
    %72 = arith.addf %66, %71 : vector<64x128xf32>
    %c0_82 = arith.constant 0 : index
    %c0_83 = arith.constant 0 : index
    %c1_84 = arith.constant 1 : index
    %c0_85 = arith.constant 0 : index
    %c0_86 = arith.constant 0 : index
    %73 = vector.load %arg3[%c0_82, %c0_83, %c1_84, %c0_85, %c0_86] : memref<1x1x10x10x4xbf16, #tpu.memory_space<vmem>>, vector<1x1x8x8x4xbf16>
    %74 = vector.shape_cast %73 : vector<1x1x8x8x4xbf16> to vector<8x8x4xbf16>
    %75 = vector.shape_cast %74 : vector<8x8x4xbf16> to vector<64x4xbf16>
    %c48 = arith.constant 48 : index
    %c0_87 = arith.constant 0 : index
    %76 = vector.load %arg5[%c48, %c0_87] : memref<108x128xbf16, #tpu.memory_space<vmem>>, vector<4x128xbf16>
    %cst_88 = arith.constant dense<0.000000e+00> : vector<64x128xf32>
    %77 = tpu.matmul %75, %76, %cst_88 {dimension_numbers = #tpu.dot_dimension_numbers<[1], [0], [0], [1], [0, 0, 1, 1], [], []>} : vector<64x4xbf16>, vector<4x128xbf16>, vector<64x128xf32> -> vector<64x128xf32>
    %78 = arith.addf %72, %77 : vector<64x128xf32>
    %c0_89 = arith.constant 0 : index
    %c0_90 = arith.constant 0 : index
    %c1_91 = arith.constant 1 : index
    %c1_92 = arith.constant 1 : index
    %c0_93 = arith.constant 0 : index
    %79 = vector.load %arg3[%c0_89, %c0_90, %c1_91, %c1_92, %c0_93] : memref<1x1x10x10x4xbf16, #tpu.memory_space<vmem>>, vector<1x1x8x8x4xbf16>
    %80 = vector.shape_cast %79 : vector<1x1x8x8x4xbf16> to vector<8x8x4xbf16>
    %81 = vector.shape_cast %80 : vector<8x8x4xbf16> to vector<64x4xbf16>
    %c52 = arith.constant 52 : index
    %c0_94 = arith.constant 0 : index
    %82 = vector.load %arg5[%c52, %c0_94] : memref<108x128xbf16, #tpu.memory_space<vmem>>, vector<4x128xbf16>
    %cst_95 = arith.constant dense<0.000000e+00> : vector<64x128xf32>
    %83 = tpu.matmul %81, %82, %cst_95 {dimension_numbers = #tpu.dot_dimension_numbers<[1], [0], [0], [1], [0, 0, 1, 1], [], []>} : vector<64x4xbf16>, vector<4x128xbf16>, vector<64x128xf32> -> vector<64x128xf32>
    %84 = arith.addf %78, %83 : vector<64x128xf32>
    %c0_96 = arith.constant 0 : index
    %c0_97 = arith.constant 0 : index
    %c1_98 = arith.constant 1 : index
    %c2_99 = arith.constant 2 : index
    %c0_100 = arith.constant 0 : index
    %85 = vector.load %arg3[%c0_96, %c0_97, %c1_98, %c2_99, %c0_100] : memref<1x1x10x10x4xbf16, #tpu.memory_space<vmem>>, vector<1x1x8x8x4xbf16>
    %86 = vector.shape_cast %85 : vector<1x1x8x8x4xbf16> to vector<8x8x4xbf16>
    %87 = vector.shape_cast %86 : vector<8x8x4xbf16> to vector<64x4xbf16>
    %c56 = arith.constant 56 : index
    %c0_101 = arith.constant 0 : index
    %88 = vector.load %arg5[%c56, %c0_101] : memref<108x128xbf16, #tpu.memory_space<vmem>>, vector<4x128xbf16>
    %cst_102 = arith.constant dense<0.000000e+00> : vector<64x128xf32>
    %89 = tpu.matmul %87, %88, %cst_102 {dimension_numbers = #tpu.dot_dimension_numbers<[1], [0], [0], [1], [0, 0, 1, 1], [], []>} : vector<64x4xbf16>, vector<4x128xbf16>, vector<64x128xf32> -> vector<64x128xf32>
    %90 = arith.addf %84, %89 : vector<64x128xf32>
    %c0_103 = arith.constant 0 : index
    %c0_104 = arith.constant 0 : index
    %c2_105 = arith.constant 2 : index
    %c0_106 = arith.constant 0 : index
    %c0_107 = arith.constant 0 : index
    %91 = vector.load %arg3[%c0_103, %c0_104, %c2_105, %c0_106, %c0_107] : memref<1x1x10x10x4xbf16, #tpu.memory_space<vmem>>, vector<1x1x8x8x4xbf16>
    %92 = vector.shape_cast %91 : vector<1x1x8x8x4xbf16> to vector<8x8x4xbf16>
    %93 = vector.shape_cast %92 : vector<8x8x4xbf16> to vector<64x4xbf16>
    %c60 = arith.constant 60 : index
    %c0_108 = arith.constant 0 : index
    %94 = vector.load %arg5[%c60, %c0_108] : memref<108x128xbf16, #tpu.memory_space<vmem>>, vector<4x128xbf16>
    %cst_109 = arith.constant dense<0.000000e+00> : vector<64x128xf32>
    %95 = tpu.matmul %93, %94, %cst_109 {dimension_numbers = #tpu.dot_dimension_numbers<[1], [0], [0], [1], [0, 0, 1, 1], [], []>} : vector<64x4xbf16>, vector<4x128xbf16>, vector<64x128xf32> -> vector<64x128xf32>
    %96 = arith.addf %90, %95 : vector<64x128xf32>
    %c0_110 = arith.constant 0 : index
    %c0_111 = arith.constant 0 : index
    %c2_112 = arith.constant 2 : index
    %c1_113 = arith.constant 1 : index
    %c0_114 = arith.constant 0 : index
    %97 = vector.load %arg3[%c0_110, %c0_111, %c2_112, %c1_113, %c0_114] : memref<1x1x10x10x4xbf16, #tpu.memory_space<vmem>>, vector<1x1x8x8x4xbf16>
    %98 = vector.shape_cast %97 : vector<1x1x8x8x4xbf16> to vector<8x8x4xbf16>
    %99 = vector.shape_cast %98 : vector<8x8x4xbf16> to vector<64x4xbf16>
    %c64 = arith.constant 64 : index
    %c0_115 = arith.constant 0 : index
    %100 = vector.load %arg5[%c64, %c0_115] : memref<108x128xbf16, #tpu.memory_space<vmem>>, vector<4x128xbf16>
    %cst_116 = arith.constant dense<0.000000e+00> : vector<64x128xf32>
    %101 = tpu.matmul %99, %100, %cst_116 {dimension_numbers = #tpu.dot_dimension_numbers<[1], [0], [0], [1], [0, 0, 1, 1], [], []>} : vector<64x4xbf16>, vector<4x128xbf16>, vector<64x128xf32> -> vector<64x128xf32>
    %102 = arith.addf %96, %101 : vector<64x128xf32>
    %c0_117 = arith.constant 0 : index
    %c0_118 = arith.constant 0 : index
    %c2_119 = arith.constant 2 : index
    %c2_120 = arith.constant 2 : index
    %c0_121 = arith.constant 0 : index
    %103 = vector.load %arg3[%c0_117, %c0_118, %c2_119, %c2_120, %c0_121] : memref<1x1x10x10x4xbf16, #tpu.memory_space<vmem>>, vector<1x1x8x8x4xbf16>
    %104 = vector.shape_cast %103 : vector<1x1x8x8x4xbf16> to vector<8x8x4xbf16>
    %105 = vector.shape_cast %104 : vector<8x8x4xbf16> to vector<64x4xbf16>
    %c68 = arith.constant 68 : index
    %c0_122 = arith.constant 0 : index
    %106 = vector.load %arg5[%c68, %c0_122] : memref<108x128xbf16, #tpu.memory_space<vmem>>, vector<4x128xbf16>
    %cst_123 = arith.constant dense<0.000000e+00> : vector<64x128xf32>
    %107 = tpu.matmul %105, %106, %cst_123 {dimension_numbers = #tpu.dot_dimension_numbers<[1], [0], [0], [1], [0, 0, 1, 1], [], []>} : vector<64x4xbf16>, vector<4x128xbf16>, vector<64x128xf32> -> vector<64x128xf32>
    %108 = arith.addf %102, %107 : vector<64x128xf32>
    %c0_124 = arith.constant 0 : index
    %c0_125 = arith.constant 0 : index
    %c0_126 = arith.constant 0 : index
    %c0_127 = arith.constant 0 : index
    %c0_128 = arith.constant 0 : index
    %109 = vector.load %arg4[%c0_124, %c0_125, %c0_126, %c0_127, %c0_128] : memref<1x1x10x10x4xbf16, #tpu.memory_space<vmem>>, vector<1x1x8x8x4xbf16>
    %110 = vector.shape_cast %109 : vector<1x1x8x8x4xbf16> to vector<8x8x4xbf16>
    %111 = vector.shape_cast %110 : vector<8x8x4xbf16> to vector<64x4xbf16>
    %c72 = arith.constant 72 : index
    %c0_129 = arith.constant 0 : index
    %112 = vector.load %arg5[%c72, %c0_129] : memref<108x128xbf16, #tpu.memory_space<vmem>>, vector<4x128xbf16>
    %cst_130 = arith.constant dense<0.000000e+00> : vector<64x128xf32>
    %113 = tpu.matmul %111, %112, %cst_130 {dimension_numbers = #tpu.dot_dimension_numbers<[1], [0], [0], [1], [0, 0, 1, 1], [], []>} : vector<64x4xbf16>, vector<4x128xbf16>, vector<64x128xf32> -> vector<64x128xf32>
    %114 = arith.addf %108, %113 : vector<64x128xf32>
    %c0_131 = arith.constant 0 : index
    %c0_132 = arith.constant 0 : index
    %c0_133 = arith.constant 0 : index
    %c1_134 = arith.constant 1 : index
    %c0_135 = arith.constant 0 : index
    %115 = vector.load %arg4[%c0_131, %c0_132, %c0_133, %c1_134, %c0_135] : memref<1x1x10x10x4xbf16, #tpu.memory_space<vmem>>, vector<1x1x8x8x4xbf16>
    %116 = vector.shape_cast %115 : vector<1x1x8x8x4xbf16> to vector<8x8x4xbf16>
    %117 = vector.shape_cast %116 : vector<8x8x4xbf16> to vector<64x4xbf16>
    %c76 = arith.constant 76 : index
    %c0_136 = arith.constant 0 : index
    %118 = vector.load %arg5[%c76, %c0_136] : memref<108x128xbf16, #tpu.memory_space<vmem>>, vector<4x128xbf16>
    %cst_137 = arith.constant dense<0.000000e+00> : vector<64x128xf32>
    %119 = tpu.matmul %117, %118, %cst_137 {dimension_numbers = #tpu.dot_dimension_numbers<[1], [0], [0], [1], [0, 0, 1, 1], [], []>} : vector<64x4xbf16>, vector<4x128xbf16>, vector<64x128xf32> -> vector<64x128xf32>
    %120 = arith.addf %114, %119 : vector<64x128xf32>
    %c0_138 = arith.constant 0 : index
    %c0_139 = arith.constant 0 : index
    %c0_140 = arith.constant 0 : index
    %c2_141 = arith.constant 2 : index
    %c0_142 = arith.constant 0 : index
    %121 = vector.load %arg4[%c0_138, %c0_139, %c0_140, %c2_141, %c0_142] : memref<1x1x10x10x4xbf16, #tpu.memory_space<vmem>>, vector<1x1x8x8x4xbf16>
    %122 = vector.shape_cast %121 : vector<1x1x8x8x4xbf16> to vector<8x8x4xbf16>
    %123 = vector.shape_cast %122 : vector<8x8x4xbf16> to vector<64x4xbf16>
    %c80 = arith.constant 80 : index
    %c0_143 = arith.constant 0 : index
    %124 = vector.load %arg5[%c80, %c0_143] : memref<108x128xbf16, #tpu.memory_space<vmem>>, vector<4x128xbf16>
    %cst_144 = arith.constant dense<0.000000e+00> : vector<64x128xf32>
    %125 = tpu.matmul %123, %124, %cst_144 {dimension_numbers = #tpu.dot_dimension_numbers<[1], [0], [0], [1], [0, 0, 1, 1], [], []>} : vector<64x4xbf16>, vector<4x128xbf16>, vector<64x128xf32> -> vector<64x128xf32>
    %126 = arith.addf %120, %125 : vector<64x128xf32>
    %c0_145 = arith.constant 0 : index
    %c0_146 = arith.constant 0 : index
    %c1_147 = arith.constant 1 : index
    %c0_148 = arith.constant 0 : index
    %c0_149 = arith.constant 0 : index
    %127 = vector.load %arg4[%c0_145, %c0_146, %c1_147, %c0_148, %c0_149] : memref<1x1x10x10x4xbf16, #tpu.memory_space<vmem>>, vector<1x1x8x8x4xbf16>
    %128 = vector.shape_cast %127 : vector<1x1x8x8x4xbf16> to vector<8x8x4xbf16>
    %129 = vector.shape_cast %128 : vector<8x8x4xbf16> to vector<64x4xbf16>
    %c84 = arith.constant 84 : index
    %c0_150 = arith.constant 0 : index
    %130 = vector.load %arg5[%c84, %c0_150] : memref<108x128xbf16, #tpu.memory_space<vmem>>, vector<4x128xbf16>
    %cst_151 = arith.constant dense<0.000000e+00> : vector<64x128xf32>
    %131 = tpu.matmul %129, %130, %cst_151 {dimension_numbers = #tpu.dot_dimension_numbers<[1], [0], [0], [1], [0, 0, 1, 1], [], []>} : vector<64x4xbf16>, vector<4x128xbf16>, vector<64x128xf32> -> vector<64x128xf32>
    %132 = arith.addf %126, %131 : vector<64x128xf32>
    %c0_152 = arith.constant 0 : index
    %c0_153 = arith.constant 0 : index
    %c1_154 = arith.constant 1 : index
    %c1_155 = arith.constant 1 : index
    %c0_156 = arith.constant 0 : index
    %133 = vector.load %arg4[%c0_152, %c0_153, %c1_154, %c1_155, %c0_156] : memref<1x1x10x10x4xbf16, #tpu.memory_space<vmem>>, vector<1x1x8x8x4xbf16>
    %134 = vector.shape_cast %133 : vector<1x1x8x8x4xbf16> to vector<8x8x4xbf16>
    %135 = vector.shape_cast %134 : vector<8x8x4xbf16> to vector<64x4xbf16>
    %c88 = arith.constant 88 : index
    %c0_157 = arith.constant 0 : index
    %136 = vector.load %arg5[%c88, %c0_157] : memref<108x128xbf16, #tpu.memory_space<vmem>>, vector<4x128xbf16>
    %cst_158 = arith.constant dense<0.000000e+00> : vector<64x128xf32>
    %137 = tpu.matmul %135, %136, %cst_158 {dimension_numbers = #tpu.dot_dimension_numbers<[1], [0], [0], [1], [0, 0, 1, 1], [], []>} : vector<64x4xbf16>, vector<4x128xbf16>, vector<64x128xf32> -> vector<64x128xf32>
    %138 = arith.addf %132, %137 : vector<64x128xf32>
    %c0_159 = arith.constant 0 : index
    %c0_160 = arith.constant 0 : index
    %c1_161 = arith.constant 1 : index
    %c2_162 = arith.constant 2 : index
    %c0_163 = arith.constant 0 : index
    %139 = vector.load %arg4[%c0_159, %c0_160, %c1_161, %c2_162, %c0_163] : memref<1x1x10x10x4xbf16, #tpu.memory_space<vmem>>, vector<1x1x8x8x4xbf16>
    %140 = vector.shape_cast %139 : vector<1x1x8x8x4xbf16> to vector<8x8x4xbf16>
    %141 = vector.shape_cast %140 : vector<8x8x4xbf16> to vector<64x4xbf16>
    %c92 = arith.constant 92 : index
    %c0_164 = arith.constant 0 : index
    %142 = vector.load %arg5[%c92, %c0_164] : memref<108x128xbf16, #tpu.memory_space<vmem>>, vector<4x128xbf16>
    %cst_165 = arith.constant dense<0.000000e+00> : vector<64x128xf32>
    %143 = tpu.matmul %141, %142, %cst_165 {dimension_numbers = #tpu.dot_dimension_numbers<[1], [0], [0], [1], [0, 0, 1, 1], [], []>} : vector<64x4xbf16>, vector<4x128xbf16>, vector<64x128xf32> -> vector<64x128xf32>
    %144 = arith.addf %138, %143 : vector<64x128xf32>
    %c0_166 = arith.constant 0 : index
    %c0_167 = arith.constant 0 : index
    %c2_168 = arith.constant 2 : index
    %c0_169 = arith.constant 0 : index
    %c0_170 = arith.constant 0 : index
    %145 = vector.load %arg4[%c0_166, %c0_167, %c2_168, %c0_169, %c0_170] : memref<1x1x10x10x4xbf16, #tpu.memory_space<vmem>>, vector<1x1x8x8x4xbf16>
    %146 = vector.shape_cast %145 : vector<1x1x8x8x4xbf16> to vector<8x8x4xbf16>
    %147 = vector.shape_cast %146 : vector<8x8x4xbf16> to vector<64x4xbf16>
    %c96 = arith.constant 96 : index
    %c0_171 = arith.constant 0 : index
    %148 = vector.load %arg5[%c96, %c0_171] : memref<108x128xbf16, #tpu.memory_space<vmem>>, vector<4x128xbf16>
    %cst_172 = arith.constant dense<0.000000e+00> : vector<64x128xf32>
    %149 = tpu.matmul %147, %148, %cst_172 {dimension_numbers = #tpu.dot_dimension_numbers<[1], [0], [0], [1], [0, 0, 1, 1], [], []>} : vector<64x4xbf16>, vector<4x128xbf16>, vector<64x128xf32> -> vector<64x128xf32>
    %150 = arith.addf %144, %149 : vector<64x128xf32>
    %c0_173 = arith.constant 0 : index
    %c0_174 = arith.constant 0 : index
    %c2_175 = arith.constant 2 : index
    %c1_176 = arith.constant 1 : index
    %c0_177 = arith.constant 0 : index
    %151 = vector.load %arg4[%c0_173, %c0_174, %c2_175, %c1_176, %c0_177] : memref<1x1x10x10x4xbf16, #tpu.memory_space<vmem>>, vector<1x1x8x8x4xbf16>
    %152 = vector.shape_cast %151 : vector<1x1x8x8x4xbf16> to vector<8x8x4xbf16>
    %153 = vector.shape_cast %152 : vector<8x8x4xbf16> to vector<64x4xbf16>
    %c100 = arith.constant 100 : index
    %c0_178 = arith.constant 0 : index
    %154 = vector.load %arg5[%c100, %c0_178] : memref<108x128xbf16, #tpu.memory_space<vmem>>, vector<4x128xbf16>
    %cst_179 = arith.constant dense<0.000000e+00> : vector<64x128xf32>
    %155 = tpu.matmul %153, %154, %cst_179 {dimension_numbers = #tpu.dot_dimension_numbers<[1], [0], [0], [1], [0, 0, 1, 1], [], []>} : vector<64x4xbf16>, vector<4x128xbf16>, vector<64x128xf32> -> vector<64x128xf32>
    %156 = arith.addf %150, %155 : vector<64x128xf32>
    %c0_180 = arith.constant 0 : index
    %c0_181 = arith.constant 0 : index
    %c2_182 = arith.constant 2 : index
    %c2_183 = arith.constant 2 : index
    %c0_184 = arith.constant 0 : index
    %157 = vector.load %arg4[%c0_180, %c0_181, %c2_182, %c2_183, %c0_184] : memref<1x1x10x10x4xbf16, #tpu.memory_space<vmem>>, vector<1x1x8x8x4xbf16>
    %158 = vector.shape_cast %157 : vector<1x1x8x8x4xbf16> to vector<8x8x4xbf16>
    %159 = vector.shape_cast %158 : vector<8x8x4xbf16> to vector<64x4xbf16>
    %c104 = arith.constant 104 : index
    %c0_185 = arith.constant 0 : index
    %160 = vector.load %arg5[%c104, %c0_185] : memref<108x128xbf16, #tpu.memory_space<vmem>>, vector<4x128xbf16>
    %cst_186 = arith.constant dense<0.000000e+00> : vector<64x128xf32>
    %161 = tpu.matmul %159, %160, %cst_186 {dimension_numbers = #tpu.dot_dimension_numbers<[1], [0], [0], [1], [0, 0, 1, 1], [], []>} : vector<64x4xbf16>, vector<4x128xbf16>, vector<64x128xf32> -> vector<64x128xf32>
    %162 = arith.addf %156, %161 : vector<64x128xf32>
    %163 = arith.truncf %162 : vector<64x128xf32> to vector<64x128xbf16>
    %c0_187 = arith.constant 0 : index
    %c0_188 = arith.constant 0 : index
    %c0_189 = arith.constant 0 : index
    %164 = vector.load %arg7[%c0_187, %c0_188, %c0_189] : memref<1x64x128xbf16, #tpu.memory_space<vmem>>, vector<1x64x128xbf16>
    %165 = vector.shape_cast %164 : vector<1x64x128xbf16> to vector<64x128xbf16>
    %166 = vector.shape_cast %163 : vector<64x128xbf16> to vector<1x64x128xbf16>
    tpu.vector_store %arg7[%c0_187, %c0_188, %c0_189], %166 {strides = array<i32>} : memref<1x64x128xbf16, #tpu.memory_space<vmem>>, vector<1x64x128xbf16>,
    %c0_190 = arith.constant 0 : index
    %c0_191 = arith.constant 0 : index
    %c1_192 = arith.constant 1 : index
    %c1_193 = arith.constant 1 : index
    %c0_194 = arith.constant 0 : index
    %167 = vector.load %arg3[%c0_190, %c0_191, %c1_192, %c1_193, %c0_194] : memref<1x1x10x10x4xbf16, #tpu.memory_space<vmem>>, vector<1x1x8x8x4xbf16>
    %168 = vector.shape_cast %167 : vector<1x1x8x8x4xbf16> to vector<8x8x4xbf16>
    %169 = vector.shape_cast %168 : vector<8x8x4xbf16> to vector<64x4xbf16>
    %c0_195 = arith.constant 0 : index
    %c0_196 = arith.constant 0 : index
    %170 = vector.load %arg6[%c0_195, %c0_196] : memref<4x128xbf16, #tpu.memory_space<vmem>>, vector<4x128xbf16>
    %cst_197 = arith.constant dense<0.000000e+00> : vector<64x128xf32>
    %171 = tpu.matmul %169, %170, %cst_197 {dimension_numbers = #tpu.dot_dimension_numbers<[1], [0], [0], [1], [0, 0, 1, 1], [], []>} : vector<64x4xbf16>, vector<4x128xbf16>, vector<64x128xf32> -> vector<64x128xf32>
    %172 = arith.truncf %171 : vector<64x128xf32> to vector<64x128xbf16>
    %c0_198 = arith.constant 0 : index
    %c0_199 = arith.constant 0 : index
    %c0_200 = arith.constant 0 : index
    %173 = vector.load %arg8[%c0_198, %c0_199, %c0_200] : memref<1x64x128xbf16, #tpu.memory_space<vmem>>, vector<1x64x128xbf16>
    %174 = vector.shape_cast %173 : vector<1x64x128xbf16> to vector<64x128xbf16>
    %175 = vector.shape_cast %172 : vector<64x128xbf16> to vector<1x64x128xbf16>
    tpu.vector_store %arg8[%c0_198, %c0_199, %c0_200], %175 {strides = array<i32>} : memref<1x64x128xbf16, #tpu.memory_space<vmem>>, vector<1x64x128xbf16>,
    %cst_201 = arith.constant dense<0.000000e+00> : vector<128xf32>
    %176 = vector.multi_reduction <add>, %162, %cst_201 [0] : vector<64x128xf32> to vector<128xf32>
    %177 = vector.shape_cast %176 : vector<128xf32> to vector<1x128xf32>
    %cst_202 = arith.constant 1.562500e-02 : f32
    %178 = vector.broadcast %cst_202 : f32 to vector<1x128xf32>
    %179 = arith.mulf %177, %178 : vector<1x128xf32>
    %180 = vector.broadcast %179 : vector<1x128xf32> to vector<64x128xf32>
    %181 = arith.subf %162, %180 : vector<64x128xf32>
    %182 = arith.mulf %181, %181 : vector<64x128xf32>
    %cst_203 = arith.constant dense<0.000000e+00> : vector<128xf32>
    %183 = vector.multi_reduction <add>, %182, %cst_203 [0] : vector<64x128xf32> to vector<128xf32>
    %184 = vector.shape_cast %183 : vector<128xf32> to vector<1x128xf32>
    %cst_204 = arith.constant 0.000000e+00 : f32
    %185 = vector.broadcast %cst_204 : f32 to vector<6x128xf32>
    %186 = tpu.concatenate %177, %184, %185 in 0 : vector<1x128xf32>, vector<1x128xf32>, vector<6x128xf32> -> vector<8x128xf32>
    %c0_205 = arith.constant 0 : index
    %c0_206 = arith.constant 0 : index
    %c0_207 = arith.constant 0 : index
    %187 = vector.load %arg9[%c0_205, %c0_206, %c0_207] : memref<1x8x128xf32, #tpu.memory_space<vmem>>, vector<1x8x128xf32>
    %188 = vector.shape_cast %187 : vector<1x8x128xf32> to vector<8x128xf32>
    %189 = vector.shape_cast %186 : vector<8x128xf32> to vector<1x8x128xf32>
    tpu.vector_store %arg9[%c0_205, %c0_206, %c0_207], %189 {strides = array<i32>} : memref<1x8x128xf32, #tpu.memory_space<vmem>>, vector<1x8x128xf32>,
    return
  }
  func.func @transform_0(%arg0: i32, %arg1: i32) -> (i32, i32, i32, i32, i32) {
    %c0_i32 = arith.constant 0 : i32
    %0 = arith.addi %arg1, %c0_i32 : i32
    %c0_i32_0 = arith.constant 0 : i32
    %c0_i32_1 = arith.constant 0 : i32
    %c0_i32_2 = arith.constant 0 : i32
    %c0_i32_3 = arith.constant 0 : i32
    return %arg0, %0, %c0_i32_0, %c0_i32_1, %c0_i32_2 : i32, i32, i32, i32, i32
  }
  func.func @transform_1(%arg0: i32, %arg1: i32) -> (i32, i32, i32, i32, i32) {
    %c1_i32 = arith.constant 1 : i32
    %0 = arith.addi %arg1, %c1_i32 : i32
    %c0_i32 = arith.constant 0 : i32
    %c0_i32_0 = arith.constant 0 : i32
    %c0_i32_1 = arith.constant 0 : i32
    %c0_i32_2 = arith.constant 0 : i32
    return %arg0, %0, %c0_i32, %c0_i32_0, %c0_i32_1 : i32, i32, i32, i32, i32
  }
  func.func @transform_2(%arg0: i32, %arg1: i32) -> (i32, i32, i32, i32, i32) {
    %c2_i32 = arith.constant 2 : i32
    %0 = arith.addi %arg1, %c2_i32 : i32
    %c0_i32 = arith.constant 0 : i32
    %c0_i32_0 = arith.constant 0 : i32
    %c0_i32_1 = arith.constant 0 : i32
    %c0_i32_2 = arith.constant 0 : i32
    return %arg0, %0, %c0_i32, %c0_i32_0, %c0_i32_1 : i32, i32, i32, i32, i32
  }
  func.func @transform_3(%arg0: i32, %arg1: i32) -> (i32, i32) {
    %c0_i32 = arith.constant 0 : i32
    %c0_i32_0 = arith.constant 0 : i32
    %c0_i32_1 = arith.constant 0 : i32
    return %c0_i32, %c0_i32_0 : i32, i32
  }
  func.func @transform_4(%arg0: i32, %arg1: i32) -> (i32, i32) {
    %c0_i32 = arith.constant 0 : i32
    %c0_i32_0 = arith.constant 0 : i32
    %c0_i32_1 = arith.constant 0 : i32
    return %c0_i32, %c0_i32_0 : i32, i32
  }
  func.func @transform_5(%arg0: i32, %arg1: i32) -> (i32, i32, i32) {
    %c8_i32 = arith.constant 8 : i32
    %0 = arith.muli %arg0, %c8_i32 : i32
    %1 = arith.addi %0, %arg1 : i32
    %c0_i32 = arith.constant 0 : i32
    %c0_i32_0 = arith.constant 0 : i32
    %c0_i32_1 = arith.constant 0 : i32
    return %1, %c0_i32, %c0_i32_0 : i32, i32, i32
  }
  func.func @transform_6(%arg0: i32, %arg1: i32) -> (i32, i32, i32) {
    %c8_i32 = arith.constant 8 : i32
    %0 = arith.muli %arg0, %c8_i32 : i32
    %1 = arith.addi %0, %arg1 : i32
    %c0_i32 = arith.constant 0 : i32
    %c0_i32_0 = arith.constant 0 : i32
    %c0_i32_1 = arith.constant 0 : i32
    return %1, %c0_i32, %c0_i32_0 : i32, i32, i32
  }
  func.func @transform_7(%arg0: i32, %arg1: i32) -> (i32, i32, i32) {
    %c8_i32 = arith.constant 8 : i32
    %0 = arith.muli %arg0, %c8_i32 : i32
    %1 = arith.addi %0, %arg1 : i32
    %c0_i32 = arith.constant 0 : i32
    %c0_i32_0 = arith.constant 0 : i32
    %c0_i32_1 = arith.constant 0 : i32
    return %1, %c0_i32, %c0_i32_0 : i32, i32, i32
  }
}

module attributes {stable_mosaic.version = 11 : i64} {
  func.func @conv2_stats_kernel(%arg0: i32, %arg1: i32, %arg2: memref<1x1x10x10x128xbf16, #tpu.memory_space<vmem>>, %arg3: memref<1x1x10x10x128xbf16, #tpu.memory_space<vmem>>, %arg4: memref<1x1x10x10x128xbf16, #tpu.memory_space<vmem>>, %arg5: memref<3456x128xbf16, #tpu.memory_space<vmem>>, %arg6: memref<1x64x128xbf16, #tpu.memory_space<vmem>>, %arg7: memref<1x8x128xf32, #tpu.memory_space<vmem>>) attributes {dimension_semantics = [#tpu.dimension_semantics<parallel>, #tpu.dimension_semantics<parallel>], iteration_bounds = array<i64: 2, 8>, scalar_prefetch = 0 : i64, scratch_operands = 0 : i64, tpu.core_type = #tpu.core_type<tc>, window_params = [{transform_indices = @transform_0, window_bounds = array<i64: 1, 1, 10, 10, 128>}, {transform_indices = @transform_1, window_bounds = array<i64: 1, 1, 10, 10, 128>}, {transform_indices = @transform_2, window_bounds = array<i64: 1, 1, 10, 10, 128>}, {pipeline_mode = #tpu.pipeline_mode<synchronous>, transform_indices = @transform_3, window_bounds = array<i64: 3456, 128>}, {transform_indices = @transform_4, window_bounds = array<i64: 1, 64, 128>}, {transform_indices = @transform_5, window_bounds = array<i64: 1, 8, 128>}]} {
    %cst = arith.constant 0.000000e+00 : f32
    %0 = vector.broadcast %cst : f32 to vector<64x128xf32>
    %c0 = arith.constant 0 : index
    %c0_0 = arith.constant 0 : index
    %c0_1 = arith.constant 0 : index
    %c0_2 = arith.constant 0 : index
    %c0_3 = arith.constant 0 : index
    %1 = vector.load %arg2[%c0, %c0_0, %c0_1, %c0_2, %c0_3] : memref<1x1x10x10x128xbf16, #tpu.memory_space<vmem>>, vector<1x1x8x8x128xbf16>
    %2 = vector.shape_cast %1 : vector<1x1x8x8x128xbf16> to vector<8x8x128xbf16>
    %3 = vector.shape_cast %2 : vector<8x8x128xbf16> to vector<64x128xbf16>
    %c0_4 = arith.constant 0 : index
    %c0_5 = arith.constant 0 : index
    %4 = vector.load %arg5[%c0_4, %c0_5] : memref<3456x128xbf16, #tpu.memory_space<vmem>>, vector<128x128xbf16>
    %cst_6 = arith.constant dense<0.000000e+00> : vector<64x128xf32>
    %5 = tpu.matmul %3, %4, %cst_6 {dimension_numbers = #tpu.dot_dimension_numbers<[1], [0], [0], [1], [0, 0, 1, 1], [], []>} : vector<64x128xbf16>, vector<128x128xbf16>, vector<64x128xf32> -> vector<64x128xf32>
    %6 = arith.addf %0, %5 : vector<64x128xf32>
    %c0_7 = arith.constant 0 : index
    %c0_8 = arith.constant 0 : index
    %c0_9 = arith.constant 0 : index
    %c1 = arith.constant 1 : index
    %c0_10 = arith.constant 0 : index
    %7 = vector.load %arg2[%c0_7, %c0_8, %c0_9, %c1, %c0_10] : memref<1x1x10x10x128xbf16, #tpu.memory_space<vmem>>, vector<1x1x8x8x128xbf16>
    %8 = vector.shape_cast %7 : vector<1x1x8x8x128xbf16> to vector<8x8x128xbf16>
    %9 = vector.shape_cast %8 : vector<8x8x128xbf16> to vector<64x128xbf16>
    %c128 = arith.constant 128 : index
    %c0_11 = arith.constant 0 : index
    %10 = vector.load %arg5[%c128, %c0_11] : memref<3456x128xbf16, #tpu.memory_space<vmem>>, vector<128x128xbf16>
    %cst_12 = arith.constant dense<0.000000e+00> : vector<64x128xf32>
    %11 = tpu.matmul %9, %10, %cst_12 {dimension_numbers = #tpu.dot_dimension_numbers<[1], [0], [0], [1], [0, 0, 1, 1], [], []>} : vector<64x128xbf16>, vector<128x128xbf16>, vector<64x128xf32> -> vector<64x128xf32>
    %12 = arith.addf %6, %11 : vector<64x128xf32>
    %c0_13 = arith.constant 0 : index
    %c0_14 = arith.constant 0 : index
    %c0_15 = arith.constant 0 : index
    %c2 = arith.constant 2 : index
    %c0_16 = arith.constant 0 : index
    %13 = vector.load %arg2[%c0_13, %c0_14, %c0_15, %c2, %c0_16] : memref<1x1x10x10x128xbf16, #tpu.memory_space<vmem>>, vector<1x1x8x8x128xbf16>
    %14 = vector.shape_cast %13 : vector<1x1x8x8x128xbf16> to vector<8x8x128xbf16>
    %15 = vector.shape_cast %14 : vector<8x8x128xbf16> to vector<64x128xbf16>
    %c256 = arith.constant 256 : index
    %c0_17 = arith.constant 0 : index
    %16 = vector.load %arg5[%c256, %c0_17] : memref<3456x128xbf16, #tpu.memory_space<vmem>>, vector<128x128xbf16>
    %cst_18 = arith.constant dense<0.000000e+00> : vector<64x128xf32>
    %17 = tpu.matmul %15, %16, %cst_18 {dimension_numbers = #tpu.dot_dimension_numbers<[1], [0], [0], [1], [0, 0, 1, 1], [], []>} : vector<64x128xbf16>, vector<128x128xbf16>, vector<64x128xf32> -> vector<64x128xf32>
    %18 = arith.addf %12, %17 : vector<64x128xf32>
    %c0_19 = arith.constant 0 : index
    %c0_20 = arith.constant 0 : index
    %c1_21 = arith.constant 1 : index
    %c0_22 = arith.constant 0 : index
    %c0_23 = arith.constant 0 : index
    %19 = vector.load %arg2[%c0_19, %c0_20, %c1_21, %c0_22, %c0_23] : memref<1x1x10x10x128xbf16, #tpu.memory_space<vmem>>, vector<1x1x8x8x128xbf16>
    %20 = vector.shape_cast %19 : vector<1x1x8x8x128xbf16> to vector<8x8x128xbf16>
    %21 = vector.shape_cast %20 : vector<8x8x128xbf16> to vector<64x128xbf16>
    %c384 = arith.constant 384 : index
    %c0_24 = arith.constant 0 : index
    %22 = vector.load %arg5[%c384, %c0_24] : memref<3456x128xbf16, #tpu.memory_space<vmem>>, vector<128x128xbf16>
    %cst_25 = arith.constant dense<0.000000e+00> : vector<64x128xf32>
    %23 = tpu.matmul %21, %22, %cst_25 {dimension_numbers = #tpu.dot_dimension_numbers<[1], [0], [0], [1], [0, 0, 1, 1], [], []>} : vector<64x128xbf16>, vector<128x128xbf16>, vector<64x128xf32> -> vector<64x128xf32>
    %24 = arith.addf %18, %23 : vector<64x128xf32>
    %c0_26 = arith.constant 0 : index
    %c0_27 = arith.constant 0 : index
    %c1_28 = arith.constant 1 : index
    %c1_29 = arith.constant 1 : index
    %c0_30 = arith.constant 0 : index
    %25 = vector.load %arg2[%c0_26, %c0_27, %c1_28, %c1_29, %c0_30] : memref<1x1x10x10x128xbf16, #tpu.memory_space<vmem>>, vector<1x1x8x8x128xbf16>
    %26 = vector.shape_cast %25 : vector<1x1x8x8x128xbf16> to vector<8x8x128xbf16>
    %27 = vector.shape_cast %26 : vector<8x8x128xbf16> to vector<64x128xbf16>
    %c512 = arith.constant 512 : index
    %c0_31 = arith.constant 0 : index
    %28 = vector.load %arg5[%c512, %c0_31] : memref<3456x128xbf16, #tpu.memory_space<vmem>>, vector<128x128xbf16>
    %cst_32 = arith.constant dense<0.000000e+00> : vector<64x128xf32>
    %29 = tpu.matmul %27, %28, %cst_32 {dimension_numbers = #tpu.dot_dimension_numbers<[1], [0], [0], [1], [0, 0, 1, 1], [], []>} : vector<64x128xbf16>, vector<128x128xbf16>, vector<64x128xf32> -> vector<64x128xf32>
    %30 = arith.addf %24, %29 : vector<64x128xf32>
    %c0_33 = arith.constant 0 : index
    %c0_34 = arith.constant 0 : index
    %c1_35 = arith.constant 1 : index
    %c2_36 = arith.constant 2 : index
    %c0_37 = arith.constant 0 : index
    %31 = vector.load %arg2[%c0_33, %c0_34, %c1_35, %c2_36, %c0_37] : memref<1x1x10x10x128xbf16, #tpu.memory_space<vmem>>, vector<1x1x8x8x128xbf16>
    %32 = vector.shape_cast %31 : vector<1x1x8x8x128xbf16> to vector<8x8x128xbf16>
    %33 = vector.shape_cast %32 : vector<8x8x128xbf16> to vector<64x128xbf16>
    %c640 = arith.constant 640 : index
    %c0_38 = arith.constant 0 : index
    %34 = vector.load %arg5[%c640, %c0_38] : memref<3456x128xbf16, #tpu.memory_space<vmem>>, vector<128x128xbf16>
    %cst_39 = arith.constant dense<0.000000e+00> : vector<64x128xf32>
    %35 = tpu.matmul %33, %34, %cst_39 {dimension_numbers = #tpu.dot_dimension_numbers<[1], [0], [0], [1], [0, 0, 1, 1], [], []>} : vector<64x128xbf16>, vector<128x128xbf16>, vector<64x128xf32> -> vector<64x128xf32>
    %36 = arith.addf %30, %35 : vector<64x128xf32>
    %c0_40 = arith.constant 0 : index
    %c0_41 = arith.constant 0 : index
    %c2_42 = arith.constant 2 : index
    %c0_43 = arith.constant 0 : index
    %c0_44 = arith.constant 0 : index
    %37 = vector.load %arg2[%c0_40, %c0_41, %c2_42, %c0_43, %c0_44] : memref<1x1x10x10x128xbf16, #tpu.memory_space<vmem>>, vector<1x1x8x8x128xbf16>
    %38 = vector.shape_cast %37 : vector<1x1x8x8x128xbf16> to vector<8x8x128xbf16>
    %39 = vector.shape_cast %38 : vector<8x8x128xbf16> to vector<64x128xbf16>
    %c768 = arith.constant 768 : index
    %c0_45 = arith.constant 0 : index
    %40 = vector.load %arg5[%c768, %c0_45] : memref<3456x128xbf16, #tpu.memory_space<vmem>>, vector<128x128xbf16>
    %cst_46 = arith.constant dense<0.000000e+00> : vector<64x128xf32>
    %41 = tpu.matmul %39, %40, %cst_46 {dimension_numbers = #tpu.dot_dimension_numbers<[1], [0], [0], [1], [0, 0, 1, 1], [], []>} : vector<64x128xbf16>, vector<128x128xbf16>, vector<64x128xf32> -> vector<64x128xf32>
    %42 = arith.addf %36, %41 : vector<64x128xf32>
    %c0_47 = arith.constant 0 : index
    %c0_48 = arith.constant 0 : index
    %c2_49 = arith.constant 2 : index
    %c1_50 = arith.constant 1 : index
    %c0_51 = arith.constant 0 : index
    %43 = vector.load %arg2[%c0_47, %c0_48, %c2_49, %c1_50, %c0_51] : memref<1x1x10x10x128xbf16, #tpu.memory_space<vmem>>, vector<1x1x8x8x128xbf16>
    %44 = vector.shape_cast %43 : vector<1x1x8x8x128xbf16> to vector<8x8x128xbf16>
    %45 = vector.shape_cast %44 : vector<8x8x128xbf16> to vector<64x128xbf16>
    %c896 = arith.constant 896 : index
    %c0_52 = arith.constant 0 : index
    %46 = vector.load %arg5[%c896, %c0_52] : memref<3456x128xbf16, #tpu.memory_space<vmem>>, vector<128x128xbf16>
    %cst_53 = arith.constant dense<0.000000e+00> : vector<64x128xf32>
    %47 = tpu.matmul %45, %46, %cst_53 {dimension_numbers = #tpu.dot_dimension_numbers<[1], [0], [0], [1], [0, 0, 1, 1], [], []>} : vector<64x128xbf16>, vector<128x128xbf16>, vector<64x128xf32> -> vector<64x128xf32>
    %48 = arith.addf %42, %47 : vector<64x128xf32>
    %c0_54 = arith.constant 0 : index
    %c0_55 = arith.constant 0 : index
    %c2_56 = arith.constant 2 : index
    %c2_57 = arith.constant 2 : index
    %c0_58 = arith.constant 0 : index
    %49 = vector.load %arg2[%c0_54, %c0_55, %c2_56, %c2_57, %c0_58] : memref<1x1x10x10x128xbf16, #tpu.memory_space<vmem>>, vector<1x1x8x8x128xbf16>
    %50 = vector.shape_cast %49 : vector<1x1x8x8x128xbf16> to vector<8x8x128xbf16>
    %51 = vector.shape_cast %50 : vector<8x8x128xbf16> to vector<64x128xbf16>
    %c1024 = arith.constant 1024 : index
    %c0_59 = arith.constant 0 : index
    %52 = vector.load %arg5[%c1024, %c0_59] : memref<3456x128xbf16, #tpu.memory_space<vmem>>, vector<128x128xbf16>
    %cst_60 = arith.constant dense<0.000000e+00> : vector<64x128xf32>
    %53 = tpu.matmul %51, %52, %cst_60 {dimension_numbers = #tpu.dot_dimension_numbers<[1], [0], [0], [1], [0, 0, 1, 1], [], []>} : vector<64x128xbf16>, vector<128x128xbf16>, vector<64x128xf32> -> vector<64x128xf32>
    %54 = arith.addf %48, %53 : vector<64x128xf32>
    %c0_61 = arith.constant 0 : index
    %c0_62 = arith.constant 0 : index
    %c0_63 = arith.constant 0 : index
    %c0_64 = arith.constant 0 : index
    %c0_65 = arith.constant 0 : index
    %55 = vector.load %arg3[%c0_61, %c0_62, %c0_63, %c0_64, %c0_65] : memref<1x1x10x10x128xbf16, #tpu.memory_space<vmem>>, vector<1x1x8x8x128xbf16>
    %56 = vector.shape_cast %55 : vector<1x1x8x8x128xbf16> to vector<8x8x128xbf16>
    %57 = vector.shape_cast %56 : vector<8x8x128xbf16> to vector<64x128xbf16>
    %c1152 = arith.constant 1152 : index
    %c0_66 = arith.constant 0 : index
    %58 = vector.load %arg5[%c1152, %c0_66] : memref<3456x128xbf16, #tpu.memory_space<vmem>>, vector<128x128xbf16>
    %cst_67 = arith.constant dense<0.000000e+00> : vector<64x128xf32>
    %59 = tpu.matmul %57, %58, %cst_67 {dimension_numbers = #tpu.dot_dimension_numbers<[1], [0], [0], [1], [0, 0, 1, 1], [], []>} : vector<64x128xbf16>, vector<128x128xbf16>, vector<64x128xf32> -> vector<64x128xf32>
    %60 = arith.addf %54, %59 : vector<64x128xf32>
    %c0_68 = arith.constant 0 : index
    %c0_69 = arith.constant 0 : index
    %c0_70 = arith.constant 0 : index
    %c1_71 = arith.constant 1 : index
    %c0_72 = arith.constant 0 : index
    %61 = vector.load %arg3[%c0_68, %c0_69, %c0_70, %c1_71, %c0_72] : memref<1x1x10x10x128xbf16, #tpu.memory_space<vmem>>, vector<1x1x8x8x128xbf16>
    %62 = vector.shape_cast %61 : vector<1x1x8x8x128xbf16> to vector<8x8x128xbf16>
    %63 = vector.shape_cast %62 : vector<8x8x128xbf16> to vector<64x128xbf16>
    %c1280 = arith.constant 1280 : index
    %c0_73 = arith.constant 0 : index
    %64 = vector.load %arg5[%c1280, %c0_73] : memref<3456x128xbf16, #tpu.memory_space<vmem>>, vector<128x128xbf16>
    %cst_74 = arith.constant dense<0.000000e+00> : vector<64x128xf32>
    %65 = tpu.matmul %63, %64, %cst_74 {dimension_numbers = #tpu.dot_dimension_numbers<[1], [0], [0], [1], [0, 0, 1, 1], [], []>} : vector<64x128xbf16>, vector<128x128xbf16>, vector<64x128xf32> -> vector<64x128xf32>
    %66 = arith.addf %60, %65 : vector<64x128xf32>
    %c0_75 = arith.constant 0 : index
    %c0_76 = arith.constant 0 : index
    %c0_77 = arith.constant 0 : index
    %c2_78 = arith.constant 2 : index
    %c0_79 = arith.constant 0 : index
    %67 = vector.load %arg3[%c0_75, %c0_76, %c0_77, %c2_78, %c0_79] : memref<1x1x10x10x128xbf16, #tpu.memory_space<vmem>>, vector<1x1x8x8x128xbf16>
    %68 = vector.shape_cast %67 : vector<1x1x8x8x128xbf16> to vector<8x8x128xbf16>
    %69 = vector.shape_cast %68 : vector<8x8x128xbf16> to vector<64x128xbf16>
    %c1408 = arith.constant 1408 : index
    %c0_80 = arith.constant 0 : index
    %70 = vector.load %arg5[%c1408, %c0_80] : memref<3456x128xbf16, #tpu.memory_space<vmem>>, vector<128x128xbf16>
    %cst_81 = arith.constant dense<0.000000e+00> : vector<64x128xf32>
    %71 = tpu.matmul %69, %70, %cst_81 {dimension_numbers = #tpu.dot_dimension_numbers<[1], [0], [0], [1], [0, 0, 1, 1], [], []>} : vector<64x128xbf16>, vector<128x128xbf16>, vector<64x128xf32> -> vector<64x128xf32>
    %72 = arith.addf %66, %71 : vector<64x128xf32>
    %c0_82 = arith.constant 0 : index
    %c0_83 = arith.constant 0 : index
    %c1_84 = arith.constant 1 : index
    %c0_85 = arith.constant 0 : index
    %c0_86 = arith.constant 0 : index
    %73 = vector.load %arg3[%c0_82, %c0_83, %c1_84, %c0_85, %c0_86] : memref<1x1x10x10x128xbf16, #tpu.memory_space<vmem>>, vector<1x1x8x8x128xbf16>
    %74 = vector.shape_cast %73 : vector<1x1x8x8x128xbf16> to vector<8x8x128xbf16>
    %75 = vector.shape_cast %74 : vector<8x8x128xbf16> to vector<64x128xbf16>
    %c1536 = arith.constant 1536 : index
    %c0_87 = arith.constant 0 : index
    %76 = vector.load %arg5[%c1536, %c0_87] : memref<3456x128xbf16, #tpu.memory_space<vmem>>, vector<128x128xbf16>
    %cst_88 = arith.constant dense<0.000000e+00> : vector<64x128xf32>
    %77 = tpu.matmul %75, %76, %cst_88 {dimension_numbers = #tpu.dot_dimension_numbers<[1], [0], [0], [1], [0, 0, 1, 1], [], []>} : vector<64x128xbf16>, vector<128x128xbf16>, vector<64x128xf32> -> vector<64x128xf32>
    %78 = arith.addf %72, %77 : vector<64x128xf32>
    %c0_89 = arith.constant 0 : index
    %c0_90 = arith.constant 0 : index
    %c1_91 = arith.constant 1 : index
    %c1_92 = arith.constant 1 : index
    %c0_93 = arith.constant 0 : index
    %79 = vector.load %arg3[%c0_89, %c0_90, %c1_91, %c1_92, %c0_93] : memref<1x1x10x10x128xbf16, #tpu.memory_space<vmem>>, vector<1x1x8x8x128xbf16>
    %80 = vector.shape_cast %79 : vector<1x1x8x8x128xbf16> to vector<8x8x128xbf16>
    %81 = vector.shape_cast %80 : vector<8x8x128xbf16> to vector<64x128xbf16>
    %c1664 = arith.constant 1664 : index
    %c0_94 = arith.constant 0 : index
    %82 = vector.load %arg5[%c1664, %c0_94] : memref<3456x128xbf16, #tpu.memory_space<vmem>>, vector<128x128xbf16>
    %cst_95 = arith.constant dense<0.000000e+00> : vector<64x128xf32>
    %83 = tpu.matmul %81, %82, %cst_95 {dimension_numbers = #tpu.dot_dimension_numbers<[1], [0], [0], [1], [0, 0, 1, 1], [], []>} : vector<64x128xbf16>, vector<128x128xbf16>, vector<64x128xf32> -> vector<64x128xf32>
    %84 = arith.addf %78, %83 : vector<64x128xf32>
    %c0_96 = arith.constant 0 : index
    %c0_97 = arith.constant 0 : index
    %c1_98 = arith.constant 1 : index
    %c2_99 = arith.constant 2 : index
    %c0_100 = arith.constant 0 : index
    %85 = vector.load %arg3[%c0_96, %c0_97, %c1_98, %c2_99, %c0_100] : memref<1x1x10x10x128xbf16, #tpu.memory_space<vmem>>, vector<1x1x8x8x128xbf16>
    %86 = vector.shape_cast %85 : vector<1x1x8x8x128xbf16> to vector<8x8x128xbf16>
    %87 = vector.shape_cast %86 : vector<8x8x128xbf16> to vector<64x128xbf16>
    %c1792 = arith.constant 1792 : index
    %c0_101 = arith.constant 0 : index
    %88 = vector.load %arg5[%c1792, %c0_101] : memref<3456x128xbf16, #tpu.memory_space<vmem>>, vector<128x128xbf16>
    %cst_102 = arith.constant dense<0.000000e+00> : vector<64x128xf32>
    %89 = tpu.matmul %87, %88, %cst_102 {dimension_numbers = #tpu.dot_dimension_numbers<[1], [0], [0], [1], [0, 0, 1, 1], [], []>} : vector<64x128xbf16>, vector<128x128xbf16>, vector<64x128xf32> -> vector<64x128xf32>
    %90 = arith.addf %84, %89 : vector<64x128xf32>
    %c0_103 = arith.constant 0 : index
    %c0_104 = arith.constant 0 : index
    %c2_105 = arith.constant 2 : index
    %c0_106 = arith.constant 0 : index
    %c0_107 = arith.constant 0 : index
    %91 = vector.load %arg3[%c0_103, %c0_104, %c2_105, %c0_106, %c0_107] : memref<1x1x10x10x128xbf16, #tpu.memory_space<vmem>>, vector<1x1x8x8x128xbf16>
    %92 = vector.shape_cast %91 : vector<1x1x8x8x128xbf16> to vector<8x8x128xbf16>
    %93 = vector.shape_cast %92 : vector<8x8x128xbf16> to vector<64x128xbf16>
    %c1920 = arith.constant 1920 : index
    %c0_108 = arith.constant 0 : index
    %94 = vector.load %arg5[%c1920, %c0_108] : memref<3456x128xbf16, #tpu.memory_space<vmem>>, vector<128x128xbf16>
    %cst_109 = arith.constant dense<0.000000e+00> : vector<64x128xf32>
    %95 = tpu.matmul %93, %94, %cst_109 {dimension_numbers = #tpu.dot_dimension_numbers<[1], [0], [0], [1], [0, 0, 1, 1], [], []>} : vector<64x128xbf16>, vector<128x128xbf16>, vector<64x128xf32> -> vector<64x128xf32>
    %96 = arith.addf %90, %95 : vector<64x128xf32>
    %c0_110 = arith.constant 0 : index
    %c0_111 = arith.constant 0 : index
    %c2_112 = arith.constant 2 : index
    %c1_113 = arith.constant 1 : index
    %c0_114 = arith.constant 0 : index
    %97 = vector.load %arg3[%c0_110, %c0_111, %c2_112, %c1_113, %c0_114] : memref<1x1x10x10x128xbf16, #tpu.memory_space<vmem>>, vector<1x1x8x8x128xbf16>
    %98 = vector.shape_cast %97 : vector<1x1x8x8x128xbf16> to vector<8x8x128xbf16>
    %99 = vector.shape_cast %98 : vector<8x8x128xbf16> to vector<64x128xbf16>
    %c2048 = arith.constant 2048 : index
    %c0_115 = arith.constant 0 : index
    %100 = vector.load %arg5[%c2048, %c0_115] : memref<3456x128xbf16, #tpu.memory_space<vmem>>, vector<128x128xbf16>
    %cst_116 = arith.constant dense<0.000000e+00> : vector<64x128xf32>
    %101 = tpu.matmul %99, %100, %cst_116 {dimension_numbers = #tpu.dot_dimension_numbers<[1], [0], [0], [1], [0, 0, 1, 1], [], []>} : vector<64x128xbf16>, vector<128x128xbf16>, vector<64x128xf32> -> vector<64x128xf32>
    %102 = arith.addf %96, %101 : vector<64x128xf32>
    %c0_117 = arith.constant 0 : index
    %c0_118 = arith.constant 0 : index
    %c2_119 = arith.constant 2 : index
    %c2_120 = arith.constant 2 : index
    %c0_121 = arith.constant 0 : index
    %103 = vector.load %arg3[%c0_117, %c0_118, %c2_119, %c2_120, %c0_121] : memref<1x1x10x10x128xbf16, #tpu.memory_space<vmem>>, vector<1x1x8x8x128xbf16>
    %104 = vector.shape_cast %103 : vector<1x1x8x8x128xbf16> to vector<8x8x128xbf16>
    %105 = vector.shape_cast %104 : vector<8x8x128xbf16> to vector<64x128xbf16>
    %c2176 = arith.constant 2176 : index
    %c0_122 = arith.constant 0 : index
    %106 = vector.load %arg5[%c2176, %c0_122] : memref<3456x128xbf16, #tpu.memory_space<vmem>>, vector<128x128xbf16>
    %cst_123 = arith.constant dense<0.000000e+00> : vector<64x128xf32>
    %107 = tpu.matmul %105, %106, %cst_123 {dimension_numbers = #tpu.dot_dimension_numbers<[1], [0], [0], [1], [0, 0, 1, 1], [], []>} : vector<64x128xbf16>, vector<128x128xbf16>, vector<64x128xf32> -> vector<64x128xf32>
    %108 = arith.addf %102, %107 : vector<64x128xf32>
    %c0_124 = arith.constant 0 : index
    %c0_125 = arith.constant 0 : index
    %c0_126 = arith.constant 0 : index
    %c0_127 = arith.constant 0 : index
    %c0_128 = arith.constant 0 : index
    %109 = vector.load %arg4[%c0_124, %c0_125, %c0_126, %c0_127, %c0_128] : memref<1x1x10x10x128xbf16, #tpu.memory_space<vmem>>, vector<1x1x8x8x128xbf16>
    %110 = vector.shape_cast %109 : vector<1x1x8x8x128xbf16> to vector<8x8x128xbf16>
    %111 = vector.shape_cast %110 : vector<8x8x128xbf16> to vector<64x128xbf16>
    %c2304 = arith.constant 2304 : index
    %c0_129 = arith.constant 0 : index
    %112 = vector.load %arg5[%c2304, %c0_129] : memref<3456x128xbf16, #tpu.memory_space<vmem>>, vector<128x128xbf16>
    %cst_130 = arith.constant dense<0.000000e+00> : vector<64x128xf32>
    %113 = tpu.matmul %111, %112, %cst_130 {dimension_numbers = #tpu.dot_dimension_numbers<[1], [0], [0], [1], [0, 0, 1, 1], [], []>} : vector<64x128xbf16>, vector<128x128xbf16>, vector<64x128xf32> -> vector<64x128xf32>
    %114 = arith.addf %108, %113 : vector<64x128xf32>
    %c0_131 = arith.constant 0 : index
    %c0_132 = arith.constant 0 : index
    %c0_133 = arith.constant 0 : index
    %c1_134 = arith.constant 1 : index
    %c0_135 = arith.constant 0 : index
    %115 = vector.load %arg4[%c0_131, %c0_132, %c0_133, %c1_134, %c0_135] : memref<1x1x10x10x128xbf16, #tpu.memory_space<vmem>>, vector<1x1x8x8x128xbf16>
    %116 = vector.shape_cast %115 : vector<1x1x8x8x128xbf16> to vector<8x8x128xbf16>
    %117 = vector.shape_cast %116 : vector<8x8x128xbf16> to vector<64x128xbf16>
    %c2432 = arith.constant 2432 : index
    %c0_136 = arith.constant 0 : index
    %118 = vector.load %arg5[%c2432, %c0_136] : memref<3456x128xbf16, #tpu.memory_space<vmem>>, vector<128x128xbf16>
    %cst_137 = arith.constant dense<0.000000e+00> : vector<64x128xf32>
    %119 = tpu.matmul %117, %118, %cst_137 {dimension_numbers = #tpu.dot_dimension_numbers<[1], [0], [0], [1], [0, 0, 1, 1], [], []>} : vector<64x128xbf16>, vector<128x128xbf16>, vector<64x128xf32> -> vector<64x128xf32>
    %120 = arith.addf %114, %119 : vector<64x128xf32>
    %c0_138 = arith.constant 0 : index
    %c0_139 = arith.constant 0 : index
    %c0_140 = arith.constant 0 : index
    %c2_141 = arith.constant 2 : index
    %c0_142 = arith.constant 0 : index
    %121 = vector.load %arg4[%c0_138, %c0_139, %c0_140, %c2_141, %c0_142] : memref<1x1x10x10x128xbf16, #tpu.memory_space<vmem>>, vector<1x1x8x8x128xbf16>
    %122 = vector.shape_cast %121 : vector<1x1x8x8x128xbf16> to vector<8x8x128xbf16>
    %123 = vector.shape_cast %122 : vector<8x8x128xbf16> to vector<64x128xbf16>
    %c2560 = arith.constant 2560 : index
    %c0_143 = arith.constant 0 : index
    %124 = vector.load %arg5[%c2560, %c0_143] : memref<3456x128xbf16, #tpu.memory_space<vmem>>, vector<128x128xbf16>
    %cst_144 = arith.constant dense<0.000000e+00> : vector<64x128xf32>
    %125 = tpu.matmul %123, %124, %cst_144 {dimension_numbers = #tpu.dot_dimension_numbers<[1], [0], [0], [1], [0, 0, 1, 1], [], []>} : vector<64x128xbf16>, vector<128x128xbf16>, vector<64x128xf32> -> vector<64x128xf32>
    %126 = arith.addf %120, %125 : vector<64x128xf32>
    %c0_145 = arith.constant 0 : index
    %c0_146 = arith.constant 0 : index
    %c1_147 = arith.constant 1 : index
    %c0_148 = arith.constant 0 : index
    %c0_149 = arith.constant 0 : index
    %127 = vector.load %arg4[%c0_145, %c0_146, %c1_147, %c0_148, %c0_149] : memref<1x1x10x10x128xbf16, #tpu.memory_space<vmem>>, vector<1x1x8x8x128xbf16>
    %128 = vector.shape_cast %127 : vector<1x1x8x8x128xbf16> to vector<8x8x128xbf16>
    %129 = vector.shape_cast %128 : vector<8x8x128xbf16> to vector<64x128xbf16>
    %c2688 = arith.constant 2688 : index
    %c0_150 = arith.constant 0 : index
    %130 = vector.load %arg5[%c2688, %c0_150] : memref<3456x128xbf16, #tpu.memory_space<vmem>>, vector<128x128xbf16>
    %cst_151 = arith.constant dense<0.000000e+00> : vector<64x128xf32>
    %131 = tpu.matmul %129, %130, %cst_151 {dimension_numbers = #tpu.dot_dimension_numbers<[1], [0], [0], [1], [0, 0, 1, 1], [], []>} : vector<64x128xbf16>, vector<128x128xbf16>, vector<64x128xf32> -> vector<64x128xf32>
    %132 = arith.addf %126, %131 : vector<64x128xf32>
    %c0_152 = arith.constant 0 : index
    %c0_153 = arith.constant 0 : index
    %c1_154 = arith.constant 1 : index
    %c1_155 = arith.constant 1 : index
    %c0_156 = arith.constant 0 : index
    %133 = vector.load %arg4[%c0_152, %c0_153, %c1_154, %c1_155, %c0_156] : memref<1x1x10x10x128xbf16, #tpu.memory_space<vmem>>, vector<1x1x8x8x128xbf16>
    %134 = vector.shape_cast %133 : vector<1x1x8x8x128xbf16> to vector<8x8x128xbf16>
    %135 = vector.shape_cast %134 : vector<8x8x128xbf16> to vector<64x128xbf16>
    %c2816 = arith.constant 2816 : index
    %c0_157 = arith.constant 0 : index
    %136 = vector.load %arg5[%c2816, %c0_157] : memref<3456x128xbf16, #tpu.memory_space<vmem>>, vector<128x128xbf16>
    %cst_158 = arith.constant dense<0.000000e+00> : vector<64x128xf32>
    %137 = tpu.matmul %135, %136, %cst_158 {dimension_numbers = #tpu.dot_dimension_numbers<[1], [0], [0], [1], [0, 0, 1, 1], [], []>} : vector<64x128xbf16>, vector<128x128xbf16>, vector<64x128xf32> -> vector<64x128xf32>
    %138 = arith.addf %132, %137 : vector<64x128xf32>
    %c0_159 = arith.constant 0 : index
    %c0_160 = arith.constant 0 : index
    %c1_161 = arith.constant 1 : index
    %c2_162 = arith.constant 2 : index
    %c0_163 = arith.constant 0 : index
    %139 = vector.load %arg4[%c0_159, %c0_160, %c1_161, %c2_162, %c0_163] : memref<1x1x10x10x128xbf16, #tpu.memory_space<vmem>>, vector<1x1x8x8x128xbf16>
    %140 = vector.shape_cast %139 : vector<1x1x8x8x128xbf16> to vector<8x8x128xbf16>
    %141 = vector.shape_cast %140 : vector<8x8x128xbf16> to vector<64x128xbf16>
    %c2944 = arith.constant 2944 : index
    %c0_164 = arith.constant 0 : index
    %142 = vector.load %arg5[%c2944, %c0_164] : memref<3456x128xbf16, #tpu.memory_space<vmem>>, vector<128x128xbf16>
    %cst_165 = arith.constant dense<0.000000e+00> : vector<64x128xf32>
    %143 = tpu.matmul %141, %142, %cst_165 {dimension_numbers = #tpu.dot_dimension_numbers<[1], [0], [0], [1], [0, 0, 1, 1], [], []>} : vector<64x128xbf16>, vector<128x128xbf16>, vector<64x128xf32> -> vector<64x128xf32>
    %144 = arith.addf %138, %143 : vector<64x128xf32>
    %c0_166 = arith.constant 0 : index
    %c0_167 = arith.constant 0 : index
    %c2_168 = arith.constant 2 : index
    %c0_169 = arith.constant 0 : index
    %c0_170 = arith.constant 0 : index
    %145 = vector.load %arg4[%c0_166, %c0_167, %c2_168, %c0_169, %c0_170] : memref<1x1x10x10x128xbf16, #tpu.memory_space<vmem>>, vector<1x1x8x8x128xbf16>
    %146 = vector.shape_cast %145 : vector<1x1x8x8x128xbf16> to vector<8x8x128xbf16>
    %147 = vector.shape_cast %146 : vector<8x8x128xbf16> to vector<64x128xbf16>
    %c3072 = arith.constant 3072 : index
    %c0_171 = arith.constant 0 : index
    %148 = vector.load %arg5[%c3072, %c0_171] : memref<3456x128xbf16, #tpu.memory_space<vmem>>, vector<128x128xbf16>
    %cst_172 = arith.constant dense<0.000000e+00> : vector<64x128xf32>
    %149 = tpu.matmul %147, %148, %cst_172 {dimension_numbers = #tpu.dot_dimension_numbers<[1], [0], [0], [1], [0, 0, 1, 1], [], []>} : vector<64x128xbf16>, vector<128x128xbf16>, vector<64x128xf32> -> vector<64x128xf32>
    %150 = arith.addf %144, %149 : vector<64x128xf32>
    %c0_173 = arith.constant 0 : index
    %c0_174 = arith.constant 0 : index
    %c2_175 = arith.constant 2 : index
    %c1_176 = arith.constant 1 : index
    %c0_177 = arith.constant 0 : index
    %151 = vector.load %arg4[%c0_173, %c0_174, %c2_175, %c1_176, %c0_177] : memref<1x1x10x10x128xbf16, #tpu.memory_space<vmem>>, vector<1x1x8x8x128xbf16>
    %152 = vector.shape_cast %151 : vector<1x1x8x8x128xbf16> to vector<8x8x128xbf16>
    %153 = vector.shape_cast %152 : vector<8x8x128xbf16> to vector<64x128xbf16>
    %c3200 = arith.constant 3200 : index
    %c0_178 = arith.constant 0 : index
    %154 = vector.load %arg5[%c3200, %c0_178] : memref<3456x128xbf16, #tpu.memory_space<vmem>>, vector<128x128xbf16>
    %cst_179 = arith.constant dense<0.000000e+00> : vector<64x128xf32>
    %155 = tpu.matmul %153, %154, %cst_179 {dimension_numbers = #tpu.dot_dimension_numbers<[1], [0], [0], [1], [0, 0, 1, 1], [], []>} : vector<64x128xbf16>, vector<128x128xbf16>, vector<64x128xf32> -> vector<64x128xf32>
    %156 = arith.addf %150, %155 : vector<64x128xf32>
    %c0_180 = arith.constant 0 : index
    %c0_181 = arith.constant 0 : index
    %c2_182 = arith.constant 2 : index
    %c2_183 = arith.constant 2 : index
    %c0_184 = arith.constant 0 : index
    %157 = vector.load %arg4[%c0_180, %c0_181, %c2_182, %c2_183, %c0_184] : memref<1x1x10x10x128xbf16, #tpu.memory_space<vmem>>, vector<1x1x8x8x128xbf16>
    %158 = vector.shape_cast %157 : vector<1x1x8x8x128xbf16> to vector<8x8x128xbf16>
    %159 = vector.shape_cast %158 : vector<8x8x128xbf16> to vector<64x128xbf16>
    %c3328 = arith.constant 3328 : index
    %c0_185 = arith.constant 0 : index
    %160 = vector.load %arg5[%c3328, %c0_185] : memref<3456x128xbf16, #tpu.memory_space<vmem>>, vector<128x128xbf16>
    %cst_186 = arith.constant dense<0.000000e+00> : vector<64x128xf32>
    %161 = tpu.matmul %159, %160, %cst_186 {dimension_numbers = #tpu.dot_dimension_numbers<[1], [0], [0], [1], [0, 0, 1, 1], [], []>} : vector<64x128xbf16>, vector<128x128xbf16>, vector<64x128xf32> -> vector<64x128xf32>
    %162 = arith.addf %156, %161 : vector<64x128xf32>
    %163 = arith.truncf %162 : vector<64x128xf32> to vector<64x128xbf16>
    %c0_187 = arith.constant 0 : index
    %c0_188 = arith.constant 0 : index
    %c0_189 = arith.constant 0 : index
    %164 = vector.load %arg6[%c0_187, %c0_188, %c0_189] : memref<1x64x128xbf16, #tpu.memory_space<vmem>>, vector<1x64x128xbf16>
    %165 = vector.shape_cast %164 : vector<1x64x128xbf16> to vector<64x128xbf16>
    %166 = vector.shape_cast %163 : vector<64x128xbf16> to vector<1x64x128xbf16>
    tpu.vector_store %arg6[%c0_187, %c0_188, %c0_189], %166 {strides = array<i32>} : memref<1x64x128xbf16, #tpu.memory_space<vmem>>, vector<1x64x128xbf16>,
    %cst_190 = arith.constant dense<0.000000e+00> : vector<128xf32>
    %167 = vector.multi_reduction <add>, %162, %cst_190 [0] : vector<64x128xf32> to vector<128xf32>
    %168 = vector.shape_cast %167 : vector<128xf32> to vector<1x128xf32>
    %cst_191 = arith.constant 1.562500e-02 : f32
    %169 = vector.broadcast %cst_191 : f32 to vector<1x128xf32>
    %170 = arith.mulf %168, %169 : vector<1x128xf32>
    %171 = vector.broadcast %170 : vector<1x128xf32> to vector<64x128xf32>
    %172 = arith.subf %162, %171 : vector<64x128xf32>
    %173 = arith.mulf %172, %172 : vector<64x128xf32>
    %cst_192 = arith.constant dense<0.000000e+00> : vector<128xf32>
    %174 = vector.multi_reduction <add>, %173, %cst_192 [0] : vector<64x128xf32> to vector<128xf32>
    %175 = vector.shape_cast %174 : vector<128xf32> to vector<1x128xf32>
    %cst_193 = arith.constant 0.000000e+00 : f32
    %176 = vector.broadcast %cst_193 : f32 to vector<6x128xf32>
    %177 = tpu.concatenate %168, %175, %176 in 0 : vector<1x128xf32>, vector<1x128xf32>, vector<6x128xf32> -> vector<8x128xf32>
    %c0_194 = arith.constant 0 : index
    %c0_195 = arith.constant 0 : index
    %c0_196 = arith.constant 0 : index
    %178 = vector.load %arg7[%c0_194, %c0_195, %c0_196] : memref<1x8x128xf32, #tpu.memory_space<vmem>>, vector<1x8x128xf32>
    %179 = vector.shape_cast %178 : vector<1x8x128xf32> to vector<8x128xf32>
    %180 = vector.shape_cast %177 : vector<8x128xf32> to vector<1x8x128xf32>
    tpu.vector_store %arg7[%c0_194, %c0_195, %c0_196], %180 {strides = array<i32>} : memref<1x8x128xf32, #tpu.memory_space<vmem>>, vector<1x8x128xf32>,
    return
  }
  func.func @transform_0(%arg0: i32, %arg1: i32) -> (i32, i32, i32, i32, i32) {
    %c0_i32 = arith.constant 0 : i32
    %0 = arith.addi %arg1, %c0_i32 : i32
    %c0_i32_0 = arith.constant 0 : i32
    %c0_i32_1 = arith.constant 0 : i32
    %c0_i32_2 = arith.constant 0 : i32
    %c0_i32_3 = arith.constant 0 : i32
    return %arg0, %0, %c0_i32_0, %c0_i32_1, %c0_i32_2 : i32, i32, i32, i32, i32
  }
  func.func @transform_1(%arg0: i32, %arg1: i32) -> (i32, i32, i32, i32, i32) {
    %c1_i32 = arith.constant 1 : i32
    %0 = arith.addi %arg1, %c1_i32 : i32
    %c0_i32 = arith.constant 0 : i32
    %c0_i32_0 = arith.constant 0 : i32
    %c0_i32_1 = arith.constant 0 : i32
    %c0_i32_2 = arith.constant 0 : i32
    return %arg0, %0, %c0_i32, %c0_i32_0, %c0_i32_1 : i32, i32, i32, i32, i32
  }
  func.func @transform_2(%arg0: i32, %arg1: i32) -> (i32, i32, i32, i32, i32) {
    %c2_i32 = arith.constant 2 : i32
    %0 = arith.addi %arg1, %c2_i32 : i32
    %c0_i32 = arith.constant 0 : i32
    %c0_i32_0 = arith.constant 0 : i32
    %c0_i32_1 = arith.constant 0 : i32
    %c0_i32_2 = arith.constant 0 : i32
    return %arg0, %0, %c0_i32, %c0_i32_0, %c0_i32_1 : i32, i32, i32, i32, i32
  }
  func.func @transform_3(%arg0: i32, %arg1: i32) -> (i32, i32) {
    %c0_i32 = arith.constant 0 : i32
    %c0_i32_0 = arith.constant 0 : i32
    %c0_i32_1 = arith.constant 0 : i32
    return %c0_i32, %c0_i32_0 : i32, i32
  }
  func.func @transform_4(%arg0: i32, %arg1: i32) -> (i32, i32, i32) {
    %c8_i32 = arith.constant 8 : i32
    %0 = arith.muli %arg0, %c8_i32 : i32
    %1 = arith.addi %0, %arg1 : i32
    %c0_i32 = arith.constant 0 : i32
    %c0_i32_0 = arith.constant 0 : i32
    %c0_i32_1 = arith.constant 0 : i32
    return %1, %c0_i32, %c0_i32_0 : i32, i32, i32
  }
  func.func @transform_5(%arg0: i32, %arg1: i32) -> (i32, i32, i32) {
    %c8_i32 = arith.constant 8 : i32
    %0 = arith.muli %arg0, %c8_i32 : i32
    %1 = arith.addi %0, %arg1 : i32
    %c0_i32 = arith.constant 0 : i32
    %c0_i32_0 = arith.constant 0 : i32
    %c0_i32_1 = arith.constant 0 : i32
    return %1, %c0_i32, %c0_i32_0 : i32, i32, i32
  }
}

module attributes {stable_mosaic.version = 11 : i64} {
  func.func @bn_add_relu_kernel(%arg0: i32, %arg1: memref<1024x128xbf16, #tpu.memory_space<vmem>>, %arg2: memref<1024x128xbf16, #tpu.memory_space<vmem>>, %arg3: memref<1x128xf32, #tpu.memory_space<vmem>>, %arg4: memref<1x128xf32, #tpu.memory_space<vmem>>, %arg5: memref<1024x128xf32, #tpu.memory_space<vmem>>) attributes {dimension_semantics = [#tpu.dimension_semantics<parallel>], iteration_bounds = array<i64: 1>, scalar_prefetch = 0 : i64, scratch_operands = 0 : i64, tpu.core_type = #tpu.core_type<tc>, window_params = [{transform_indices = @transform_0, window_bounds = array<i64: 1024, 128>}, {transform_indices = @transform_1, window_bounds = array<i64: 1024, 128>}, {pipeline_mode = #tpu.pipeline_mode<synchronous>, transform_indices = @transform_2, window_bounds = array<i64: 1, 128>}, {pipeline_mode = #tpu.pipeline_mode<synchronous>, transform_indices = @transform_3, window_bounds = array<i64: 1, 128>}, {transform_indices = @transform_4, window_bounds = array<i64: 1024, 128>}]} {
    %c0 = arith.constant 0 : index
    %c0_0 = arith.constant 0 : index
    %0 = vector.load %arg1[%c0, %c0_0] : memref<1024x128xbf16, #tpu.memory_space<vmem>>, vector<1024x128xbf16>
    %1 = arith.extf %0 : vector<1024x128xbf16> to vector<1024x128xf32>
    %c0_1 = arith.constant 0 : index
    %c0_2 = arith.constant 0 : index
    %2 = vector.load %arg3[%c0_1, %c0_2] : memref<1x128xf32, #tpu.memory_space<vmem>>, vector<1x128xf32>
    %3 = vector.broadcast %2 : vector<1x128xf32> to vector<1024x128xf32>
    %4 = arith.mulf %1, %3 : vector<1024x128xf32>
    %c0_3 = arith.constant 0 : index
    %c0_4 = arith.constant 0 : index
    %5 = vector.load %arg4[%c0_3, %c0_4] : memref<1x128xf32, #tpu.memory_space<vmem>>, vector<1x128xf32>
    %6 = vector.broadcast %5 : vector<1x128xf32> to vector<1024x128xf32>
    %7 = arith.addf %4, %6 : vector<1024x128xf32>
    %c0_5 = arith.constant 0 : index
    %c0_6 = arith.constant 0 : index
    %8 = vector.load %arg2[%c0_5, %c0_6] : memref<1024x128xbf16, #tpu.memory_space<vmem>>, vector<1024x128xbf16>
    %9 = arith.extf %8 : vector<1024x128xbf16> to vector<1024x128xf32>
    %10 = arith.addf %7, %9 : vector<1024x128xf32>
    %cst = arith.constant 0.000000e+00 : f32
    %11 = vector.broadcast %cst : f32 to vector<1024x128xf32>
    %12 = arith.maximumf %10, %11 : vector<1024x128xf32>
    %c0_7 = arith.constant 0 : index
    %c0_8 = arith.constant 0 : index
    %13 = vector.load %arg5[%c0_7, %c0_8] : memref<1024x128xf32, #tpu.memory_space<vmem>>, vector<1024x128xf32>
    tpu.vector_store %arg5[%c0_7, %c0_8], %12 {strides = array<i32>} : memref<1024x128xf32, #tpu.memory_space<vmem>>, vector<1024x128xf32>,
    return
  }
  func.func @transform_0(%arg0: i32) -> (i32, i32) {
    %c0_i32 = arith.constant 0 : i32
    %c0_i32_0 = arith.constant 0 : i32
    return %arg0, %c0_i32 : i32, i32
  }
  func.func @transform_1(%arg0: i32) -> (i32, i32) {
    %c0_i32 = arith.constant 0 : i32
    %c0_i32_0 = arith.constant 0 : i32
    return %arg0, %c0_i32 : i32, i32
  }
  func.func @transform_2(%arg0: i32) -> (i32, i32) {
    %c0_i32 = arith.constant 0 : i32
    %c0_i32_0 = arith.constant 0 : i32
    %c0_i32_1 = arith.constant 0 : i32
    return %c0_i32, %c0_i32_0 : i32, i32
  }
  func.func @transform_3(%arg0: i32) -> (i32, i32) {
    %c0_i32 = arith.constant 0 : i32
    %c0_i32_0 = arith.constant 0 : i32
    %c0_i32_1 = arith.constant 0 : i32
    return %c0_i32, %c0_i32_0 : i32, i32
  }
  func.func @transform_4(%arg0: i32) -> (i32, i32) {
    %c0_i32 = arith.constant 0 : i32
    %c0_i32_0 = arith.constant 0 : i32
    return %arg0, %c0_i32 : i32, i32
  }
}

</mosaic_0001>

<bundles_post_ra>
// kernel: res_block_forward.3
= control target key start
LH: loop header
LB: loop body
LE: loop exit
PB: predicated region body
PF: predicated region fallthrough
CT: control target
= control target key end

     0   :  { %s6800_s24 = smov 0   ;;  %s6802_s25 = smov 0   ;;  %s8462_s0 = inlined_call_operand.vmem [shape: bf16[2,10,10,10,4], index: 0, kind: input, shape index: {}, may-alias: {0,1,2}]   ;;  %s8463_s1 = inlined_call_operand.vmem [shape: bf16[2,10,10,10,4], index: 1, kind: input, shape index: {}, may-alias: {0,1,2}]   ;;  %s8464_s2 = inlined_call_operand.vmem [shape: bf16[2,10,10,10,4], index: 2, kind: input, shape index: {}, may-alias: {0,1,2}]   ;;  %s8465_s3 = inlined_call_operand.vmem [shape: bf16[108,128], index: 3, kind: input, shape index: {}]   ;;  %s8466_s4 = inlined_call_operand.vmem [shape: bf16[4,128], index: 4, kind: input, shape index: {}]   ;;  %s8467_s5 = inlined_call_operand.vmem [shape: bf16[16,64,128], index: 5, kind: output, shape index: {0}]   ;;  %s8468_s6 = inlined_call_operand.vmem [shape: bf16[16,64,128], index: 6, kind: output, shape index: {1}]   ;;  %s8469_s7 = inlined_call_operand.vmem [shape: f32[16,8,128], index: 7, kind: output, shape index: {2}]  }
   0x1   :  { %s6804_s26 = smov 0   ;;  %s6806_s27 = smov 0  }
   0x2   :  { %s6808_s28 = smov 0  }
   0x3 LB: > { %s27_s29 = sadd.s32 1, %s6750_s26  ;;  %s30_s30 = sadd.s32 1, %s6754_s27  ;;  %s6758_s28 = sphi %s6808_s28, %s18_s28   ;;  %s6754_s27 = sphi %s6806_s27, %s8507_s27   ;;  %s6750_s26 = sphi %s6804_s26, %s8506_s26   ;;  %s6746_s25 = sphi %s6802_s25, %s8505_s25   ;;  %s6742_s24 = sphi %s6800_s24, %s8504_s24  }
   0x4   : > { %p28_p0 = scmp.ge.s32.totalorder %s27_s29, 8  ;;  %p5568_p1 = scmp.ge.s32.totalorder %s6758_s28, 1 }
   0x5   : > { %p312_p2 = scmp.lt.s32.totalorder %s6758_s28, 17 }
   0x6   : > { %s8509_s29 = smov (%p28_p0, %s27_s29), 0  ;;  %s8511_s30 = smov (!%p28_p0, %s30_s30), %s6754_s27 }
   0x7   : > { %p313_p3 = pnand %p5568_p1, %p312_p2  ;;  %p32_p4 = scmp.ge.s32.totalorder %s8511_s30, 2 }
   0x9   : > { %s8513_s30 = smov (%p32_p4, %s8511_s30), 0  ;;  %316 = sbr.rel (%p313_p3) target bundleno = 532 (0x214), region = 40 }
   0xe   : > { %v6671_v0 = vld [vmem:[%s8465_s3] ss:$0 sps:$4 sm:$0xcc]   ;;  %vm603_vm0 = vcmask 1041408   ;;  %p383_p5 = scmp.lt.s32.totalorder %s6746_s25, 1  ;;  %p385_p6 = scmp.lt.s32.totalorder %s6742_s24, 9 }
   0xf   : > { %v449_v1 = vld [vmem:[%s8465_s3] sm:$0x3]  ;;  %v589_v2 = vrot.slane %v6671_v0, 2  ;;  %v831_v4 = vld [vmem:[%s8465_s3 + $0x4] sm:$0x3]  ;;  %vm590_vm3 = vcmask 31744  }
  0x10   : > { %6600 = vmatprep.subr.msk.bf16.mxu1 %vm603_vm0, %v449_v1  ;;  %v705_v3 = vsel %vm603_vm0, %v449_v1, 0  ;;  %s384_s12 = scalar_select %p383_p5, %s6746_s25, 1  ;;  %v6676_v6 = vld [vmem:[%s8465_s3 + $0x4] ss:$0 sps:$4 sm:$0xcc]   ;;  %v6880_v11 = vsel %vm603_vm0, %v831_v4, 0 }
  0x11   : > { %6330 = vmatpush3.bf16.msra.mxu1 %v705_v3  ;;  %6599 = vmatprep.subr.msk.bf16.mxu0 %vm603_vm0, %v589_v2  ;;  %v605_v5 = vsel %vm603_vm0, %v589_v2, 0  ;;  %s386_s15 = scalar_select %p385_p6, %s6742_s24, 9  ;;  %v965_v7 = vrot.slane %v6676_v6, 2  ;;  %v6860_v8 = vld [vmem:[%s8465_s3 + $0x8] sm:$0x3]  ;;  %vm796_vm5 = vcmask 1042432  }
  0x12   : > { %6320 = vmatpush3.bf16.msra.mxu0 %v605_v5  ;;  %s6854_s18 = smul.u32 200, %s384_s12  ;;  %v6865_v9 = vld [vmem:[%s8465_s3 + $0xc] sm:$0x3]  ;;  %vm458_vm1 = vsmask.f32 3328  ;;  %v6885_v13 = vsel %vm603_vm0, %v6860_v8, 0 }
  0x13   : > { %s6627_s19 = smul.u32 20, %s386_s15  ;;  %6601 = vmatprep.subr.msk.bf16.mxu0 %vm603_vm0, %v831_v4  ;;  %vm459_vm2 = vsmask.f32 7440  ;;  %6602 = vmatprep.subr.msk.bf16.mxu1 %vm603_vm0, %v965_v7  ;;  %v6872_v10 = vld [vmem:[%s8465_s3 + $0x8] ss:$0 sps:$4 sm:$0xcc]  }
  0x14   : > { %v979_v12 = vsel %vm603_vm0, %v965_v7, 0  ;;  %v6889_v14 = vsel %vm603_vm0, %v6865_v9, 0  ;;  %v1355_v27 = vrot.slane %v6872_v10, 2  ;;  %vm6915_vm4 = vmor %vm458_vm1, %vm459_vm2  ;;  %vm797_vm6 = vcmask 1046532   ;;  %s392_s17 = sadd.s32 1, %s6742_s24  ;;  %s403_s15 = sadd.s32 2, %s6742_s24 }
  0x15   : > { %s389_s8 = sadd.s32 %s6854_s18, %s6627_s19  ;;  %vm6972_vm7 = vmor %vm796_vm5, %vm797_vm6  ;;  %p7127_p7 = scmp.lt.s32.totalorder %s392_s17, 9  ;;  %vm5354_vm8 = vcmask 1040384  }
  0x16   : > { %s5569_s9 = sshll.u32 %s389_s8, 2  ;;  %p7526_p8 = scmp.lt.s32.totalorder %s403_s15, 9 }
  0x17   : > { %s6877_s14 = scalar_lea.vmem %s8462_s0, %s5569_s9  ;;  %s8515_s17 = smov (!%p7127_p7, %s392_s17), 9 }
  0x18   : > { %v441_v15 = vld [vmem:[%s6877_s14] sm:$0xf]  ;;  %v442_v16 = vld [vmem:[%s6877_s14 + $0x8] sm:$0xf]  ;;  %v6894_v17 = vld [vmem:[%s6877_s14 + $0x4] sm:$0x1] }
  0x19   : > { %v6897_v18 = vld [vmem:[%s6877_s14 + $0xc] sm:$0x1]  ;;  %v462_v19 = vshrl.u32 %v441_v15, 16  ;;  %v465_v20 = vshll.u32 %v441_v15, 16  ;;  %v471_v21 = vshll.u32 %v6894_v17, 16  ;;  %v5589_v22 = vcombine.low %v441_v15, %v442_v16  ;;  %s6629_s22 = smul.u32 20, %s8515_s17 }
  0x1a   : > { %v476_v23 = vshrl.u32 %v442_v16, 16  ;;  %v479_v24 = vshll.u32 %v442_v16, 16  ;;  %v485_v25 = vshll.u32 %v6897_v18, 16  ;;  %v443_v26 = vld [vmem:[%s6877_s14 + $0x10] sm:$0xf]  ;;  %v801_v31 = vrot.slane %v6894_v17, 5 }
  0x1b   : > { %v464_v28 = vrot.slane %v462_v19, 4  ;;  %v467_v29 = vrot.slane %v465_v20, 5  ;;  %v473_v30 = vrot.slane %v471_v21, 5  ;;  %6331 = vmatprep.mubr.msk.bf16.mxu1 %vm590_vm3, %v5589_v22  ;;  %v805_v34 = vrot.slane %v6897_v18, 5  ;;  %v444_v35 = vld [vmem:[%s6877_s14 + $0x18] sm:$0xf]  ;;  %s7196_s23 = sadd.s32 %s6629_s22, %s6854_s18 }
  0x1c   : > { %v478_v32 = vrot.slane %v476_v23, 4  ;;  %v481_v33 = vrot.slane %v479_v24, 5  ;;  %v490_v36 = vshrl.u32 %v443_v26, 16  ;;  %v487_v38 = vrot.slane %v485_v25, 5  ;;  %v6908_v39 = vld [vmem:[%s6877_s14 + $0x14] sm:$0x1] }
  0x1d   : > { %v468_v37 = vor.u32 %v467_v29, %v464_v28  ;;  %v6911_v40 = vld [vmem:[%s6877_s14 + $0x1c] sm:$0x1]  ;;  %v493_v41 = vshll.u32 %v443_v26, 16  ;;  %v5590_v42 = vcombine.low %v443_v26, %v444_v35  ;;  %v499_v46 = vshll.u32 %v6908_v39, 16  ;;  %v445_v52 = vld [vmem:[%s6877_s14 + $0x20] sm:$0xf] }
  0x1e   : > { %v482_v44 = vor.u32 %v481_v33, %v478_v32  ;;  %v492_v45 = vrot.slane %v490_v36, 4  ;;  %v504_v47 = vshrl.u32 %v444_v35, 16  ;;  %v507_v50 = vshll.u32 %v444_v35, 16  ;;  %v446_v61 = vld [vmem:[%s6877_s14 + $0x28] sm:$0xf]  ;;  %s5570_s8 = sshll.u32 %s7196_s23, 2 }
  0x1f   : > { %v469_v48 = vrot.slane %v468_v37, 4  ;;  %v495_v49 = vrot.slane %v493_v41, 5  ;;  %v513_v51 = vshll.u32 %v6911_v40, 16  ;;  %6332 = vmatmul.mubr.msk.bf16.vlgmr.msra.gmra.mxu1 %vm590_vm3, %v5590_v42  ;;  %v501_v54 = vrot.slane %v499_v46, 5  ;;  %v6928_v62 = vld [vmem:[%s6877_s14 + $0x24] sm:$0x1]  ;;  %s7230_s13 = scalar_lea.vmem %s8463_s1, %s5570_s8 }
  0x20   : > { %v483_v53 = vrot.slane %v482_v44, 4  ;;  %v506_v55 = vrot.slane %v504_v47, 4  ;;  %v809_v56 = vrot.slane %v6908_v39, 5  ;;  %6350 = vmatpush3.bf16.msra.mxu1 %v979_v12  ;;  %v509_v59 = vrot.slane %v507_v50, 5  ;;  %v6937_v1 = vld [vmem:[%s6877_s14 + $0x2c] sm:$0x1] }
  0x21   : > { %v474_v57 = vsel %vm6915_vm4, %v469_v48, %v473_v30  ;;  %v496_v58 = vor.u32 %v495_v49, %v492_v45  ;;  %v515_v60 = vrot.slane %v513_v51, 5  ;;  %6604 = vmatprep.subr.msk.bf16.mxu1 %vm603_vm0, %v1355_v27  ;;  %v813_v0 = vrot.slane %v6911_v40, 5  ;;  %v447_v20 = vld [vmem:[%s6877_s14 + $0x30] sm:$0xf]  ;;  %v6946_v25 = vld [vmem:[%s6877_s14 + $0x34] sm:$0x1] }
  0x22   : > { %v488_v63 = vsel %vm6915_vm4, %v483_v53, %v487_v38  ;;  %v518_v2 = vshrl.u32 %v445_v52, 16  ;;  %v521_v3 = vshll.u32 %v445_v52, 16  ;;  %v510_v6 = vor.u32 %v509_v59, %v506_v55  ;;  %v448_v32 = vld [vmem:[%s6877_s14 + $0x38] sm:$0xf]  ;;  %v6950_v33 = vld [vmem:[%s6877_s14 + $0x3c] sm:$0x1] }
  0x23   : > { %v5580_v4 = vcombine.low %v474_v57, %v488_v63  ;;  %v497_v5 = vrot.slane %v496_v58, 4  ;;  %v527_v7 = vshll.u32 %v6928_v62, 16  ;;  %v532_v16 = vshrl.u32 %v446_v61, 16  ;;  %v772_v41 = vld [vmem:[%s6877_s14] sm:$0xe]  ;;  %s8517_s15 = smov (!%p7526_p8, %s403_s15), 9 }
  0x24   : > { %v520_v12 = vrot.slane %v518_v2, 4  ;;  %v523_v15 = vrot.slane %v521_v3, 5  ;;  %v535_v19 = vshll.u32 %v446_v61, 16  ;;  %v511_v22 = vrot.slane %v510_v6, 4  ;;  %v773_v42 = vld [vmem:[%s6877_s14 + $0x8] sm:$0xe] }
  0x25   : > { %6321 = vmatprep.mubr.msk.bf16.mxu0 %vm590_vm3, %v5580_v4  ;;  %v502_v21 = vsel %vm6915_vm4, %v497_v5, %v501_v54  ;;  %v529_v23 = vrot.slane %v527_v7, 5  ;;  %v541_v24 = vshll.u32 %v6937_v1, 16  ;;  %v534_v28 = vrot.slane %v532_v16, 4  ;;  %v774_v48 = vld [vmem:[%s6877_s14 + $0x10] sm:$0xe]  ;;  %s6630_s21 = smul.u32 20, %s8517_s15 }
  0x26   : > { %v524_v26 = vor.u32 %v523_v15, %v520_v12  ;;  %v537_v29 = vrot.slane %v535_v19, 5  ;;  %v5591_v30 = vcombine.low %v445_v52, %v446_v61  ;;  %v516_v35 = vsel %vm6915_vm4, %v511_v22, %v515_v60  ;;  %v6677_v53 = vld [vmem:[%s6877_s14 + $0x8] ss:$8 sps:$4 sm:$0xff]   ;;  %v775_v4 = vld [vmem:[%s6877_s14 + $0x18] sm:$0xe] }
  0x27   : > { %v543_v36 = vrot.slane %v541_v24, 5  ;;  %v546_v37 = vshrl.u32 %v447_v20, 16  ;;  %v549_v38 = vshll.u32 %v447_v20, 16  ;;  %v5581_v44 = vcombine.low %v502_v21, %v516_v35  ;;  %v6967_v59 = vld [vmem:[%s8465_s3 + $0x10] sm:$0x3]  ;;  %s7597_s22 = sadd.s32 %s6630_s21, %s6854_s18 }
  0x28   : > { %v525_v45 = vrot.slane %v524_v26, 4  ;;  %v538_v46 = vor.u32 %v537_v29, %v534_v28  ;;  %6335 = vmatprep.mubr.msk.bf16.mxu1 %vm590_vm3, %v5591_v30  ;;  %v555_v47 = vshll.u32 %v6946_v25, 16  ;;  %v560_v51 = vshrl.u32 %v448_v32, 16  ;;  %v777_v21 = vld [vmem:[%s6877_s14 + $0x28] sm:$0xe]  ;;  %s5571_s18 = sshll.u32 %s7597_s22, 2 }
  0x29   : > { %v548_v49 = vrot.slane %v546_v37, 4  ;;  %v551_v50 = vrot.slane %v549_v38, 5  ;;  %v563_v52 = vshll.u32 %v448_v32, 16  ;;  %6322 = vmatmul.mubr.msk.bf16.vlgmr.msra.gmra.mxu0 %vm590_vm3, %v5581_v44  ;;  %v569_v58 = vshll.u32 %v6950_v33, 16  ;;  %v778_v26 = vld [vmem:[%s6877_s14 + $0x30] sm:$0xe]  ;;  %s7635_s9 = scalar_lea.vmem %s8464_s2, %s5571_s18 }
  0x2a   : > { %v530_v54 = vsel %vm6915_vm4, %v525_v45, %v529_v23  ;;  %v539_v55 = vrot.slane %v538_v46, 4  ;;  %v557_v57 = vrot.slane %v555_v47, 5  ;;  %6340 = vmatpush3.bf16.msra.mxu0 %v6880_v11  ;;  %v562_v61 = vrot.slane %v560_v51, 4  ;;  %v776_v11 = vld [vmem:[%s6877_s14 + $0x20] sm:$0xe] }
  0x2b   : > { %v552_v60 = vor.u32 %v551_v50, %v548_v49  ;;  %v565_v63 = vrot.slane %v563_v52, 5  ;;  %v5592_v2 = vcombine.low %v447_v20, %v448_v32  ;;  %v571_v6 = vrot.slane %v569_v58, 5  ;;  %6603 = vmatprep.subr.msk.bf16.mxu0 %vm603_vm0, %v6860_v8  ;;  %v7031_v44 = vld [vmem:[%s6877_s14 + $0xc] sm:$0x1]  ;;  %v7045_v49 = vld [vmem:[%s6877_s14 + $0x14] sm:$0x1] }
  0x2c   : > { %v544_v5 = vsel %vm6915_vm4, %v539_v55, %v543_v36  ;;  %v5597_v7 = vrot.slane %v772_v41, 9  ;;  %v5598_v12 = vrot.slane %v773_v42, 9  ;;  %v5599_v20 = vrot.slane %v774_v48, 9  ;;  %v6679_v41 = vld [vmem:[%s6877_s14 + $0x28] ss:$8 sps:$4 sm:$0xff]  }
  0x2d   : > { %v5582_v15 = vcombine.low %v530_v54, %v544_v5  ;;  %v553_v16 = vrot.slane %v552_v60, 4  ;;  %v566_v19 = vor.u32 %v565_v63, %v562_v61  ;;  %6336 = vmatmul.mubr.msk.bf16.gmra.mxu1 %vm590_vm3, %v5592_v2  ;;  %v5600_v23 = vrot.slane %v775_v4, 9  ;;  %v5630_v42 = vld [vmem:[%s6877_s14 + $0x8] sm:$0xf]  ;;  %v5632_v48 = vld [vmem:[%s6877_s14 + $0x10] sm:$0xf] }
  0x2e   : > { %v802_v22 = vsel %vm6972_vm7, %v5597_v7, %v801_v31  ;;  %v806_v8 = vsel %vm6972_vm7, %v5598_v12, %v805_v34  ;;  %6351 = vmatprep.mubr.msk.bf16.mxu1 %vm590_vm3, %v6677_v53  ;;  %v5601_v24 = vrot.slane %v776_v11, 9  ;;  %v7001_v18 = vsel %vm6972_vm7, %v5599_v20, %v809_v56  ;;  %v6678_v31 = vld [vmem:[%s6877_s14 + $0x18] ss:$8 sps:$4 sm:$0xff]   ;;  %v5637_v4 = vld [vmem:[%s6877_s14 + $0x24] sm:$0x1] }
  0x2f   : > { %6325 = vmatprep.mubr.msk.bf16.mxu0 %vm590_vm3, %v5582_v15  ;;  %v558_v28 = vsel %vm6915_vm4, %v553_v16, %v557_v57  ;;  %v567_v17 = vrot.slane %v566_v19, 4  ;;  %v779_v34 = vld [vmem:[%s6877_s14 + $0x38] sm:$0xe]  ;;  %v7007_v29 = vsel %vm603_vm0, %v6967_v59, 0  ;;  %v7013_v30 = vsel %vm6972_vm7, %v5600_v23, %v813_v0  ;;  %v5635_v57 = vld [vmem:[%s6877_s14 + $0x1c] sm:$0x1] }
  0x30   : > { %v817_v39 = vrot.slane %v6928_v62, 5  ;;  %v5602_v32 = vrot.slane %v777_v21, 9  ;;  %v821_v56 = vrot.slane %v6937_v1, 5  ;;  %v5605_v36 = vcombine.low %v802_v22, %v806_v8  ;;  %v5634_v54 = vld [vmem:[%s6877_s14 + $0x18] sm:$0xf] }
  0x31   : > { %v572_v35 = vsel %vm6915_vm4, %v567_v17, %v571_v6  ;;  %v5603_v37 = vrot.slane %v778_v26, 9  ;;  %v825_v38 = vrot.slane %v6946_v25, 5  ;;  %v5604_v1 = vrot.slane %v779_v34, 9  ;;  %v5636_v58 = vld [vmem:[%s6877_s14 + $0x20] sm:$0xf] }
  0x32   : > { %v5583_v40 = vcombine.low %v558_v28, %v572_v35  ;;  %v7023_v0 = vsel %vm6972_vm7, %v5601_v24, %v817_v39  ;;  %v7027_v62 = vsel %vm6972_vm7, %v5602_v32, %v821_v56  ;;  %v5606_v45 = vcombine.low %v7001_v18, %v7013_v30  ;;  %v6680_v11 = vld [vmem:[%s6877_s14 + $0x38] ss:$8 sps:$4 sm:$0xff]   ;;  %v5654_v21 = vld [vmem:[%s6877_s14 + $0x8] sm:$0xe]  ;;  %v5655_v26 = vld [vmem:[%s6877_s14 + $0x10] sm:$0xe] }
  0x33   : > { %v7037_v25 = vsel %vm6972_vm7, %v5603_v37, %v825_v38  ;;  %v829_v46 = vrot.slane %v6950_v33, 5  ;;  %v1369_v47 = vsel %vm603_vm0, %v1355_v27, 0  ;;  %v1071_v50 = vshrl.u32 %v5630_v42, 16  ;;  %v5656_v34 = vld [vmem:[%s6877_s14 + $0x18] sm:$0xe] }
  0x34   : > { %6326 = vmatmul.mubr.msk.bf16.gmra.mxu0 %vm590_vm3, %v5583_v40  ;;  %v1074_v51 = vshll.u32 %v5630_v42, 16  ;;  %v1080_v52 = vshll.u32 %v7031_v44, 16  ;;  %v1085_v53 = vshrl.u32 %v5632_v48, 16  ;;  %v5607_v10 = vcombine.low %v7023_v0, %v7027_v62  ;;  %v5638_v42 = vld [vmem:[%s6877_s14 + $0x28] sm:$0xf] }
  0x35   : > { %6341 = vmatprep.mubr.msk.bf16.mxu0 %vm590_vm3, %v5605_v36  ;;  %6352 = vmatmul.mubr.msk.bf16.vlgmr.msra.gmra.mxu1 %vm590_vm3, %v6678_v31  ;;  %v7056_v27 = vsel %vm6972_vm7, %v5604_v1, %v829_v46  ;;  %v1088_v33 = vshll.u32 %v5632_v48, 16  ;;  %v1094_v55 = vshll.u32 %v7045_v49, 16  ;;  %v1073_v61 = vrot.slane %v1071_v50, 4 }
  0x36   : > { %v5608_v60 = vcombine.low %v7037_v25, %v7056_v27  ;;  %6355 = vmatprep.mubr.msk.bf16.mxu1 %vm590_vm3, %v6679_v41  ;;  %6370 = vmatpush3.bf16.msra.mxu1 %v1369_v47  ;;  %v1076_v63 = vrot.slane %v1074_v51, 5  ;;  %v1082_v2 = vrot.slane %v1080_v52, 5  ;;  %v1087_v5 = vrot.slane %v1085_v53, 4  ;;  %v5657_v41 = vld [vmem:[%s6877_s14 + $0x20] sm:$0xe] }
  0x37   : > { %v1090_v6 = vrot.slane %v1088_v33, 5  ;;  %v1096_v7 = vrot.slane %v1094_v55, 5  ;;  %v1099_v12 = vshrl.u32 %v5634_v54, 16  ;;  %v1102_v16 = vshll.u32 %v5634_v54, 16  ;;  %v7086_v47 = vld [vmem:[%s6877_s14 + $0x2c] sm:$0x1] }
  0x38   : > { %v1077_v15 = vor.u32 %v1076_v63, %v1073_v61  ;;  %v1108_v19 = vshll.u32 %v5635_v57, 16  ;;  %v1113_v20 = vshrl.u32 %v5636_v58, 16  ;;  %v1116_v23 = vshll.u32 %v5636_v58, 16  ;;  %v5640_v52 = vld [vmem:[%s6877_s14 + $0x30] sm:$0xf] }
  0x39   : > { %v1091_v22 = vor.u32 %v1090_v6, %v1087_v5  ;;  %v1101_v8 = vrot.slane %v1099_v12, 4  ;;  %v1122_v24 = vshll.u32 %v5637_v4, 16  ;;  %v1104_v17 = vrot.slane %v1102_v16, 5  ;;  %v5642_v55 = vld [vmem:[%s6877_s14 + $0x38] sm:$0xf] }
  0x3a   : > { %v1078_v28 = vrot.slane %v1077_v15, 4  ;;  %v1110_v18 = vrot.slane %v1108_v19, 5  ;;  %v1115_v31 = vrot.slane %v1113_v20, 4  ;;  %v1118_v39 = vrot.slane %v1116_v23, 5 }
  0x3b   : > { %v1092_v30 = vrot.slane %v1091_v22, 4  ;;  %v1124_v32 = vrot.slane %v1122_v24, 5  ;;  %v5662_v56 = vrot.slane %v5654_v21, 9  ;;  %v1105_v36 = vor.u32 %v1104_v17, %v1101_v8  ;;  %v5658_v21 = vld [vmem:[%s6877_s14 + $0x28] sm:$0xe] }
  0x3c   : > { %6342 = vmatmul.mubr.msk.bf16.vlgmr.msra.gmra.mxu0 %vm590_vm3, %v5606_v45  ;;  %v1083_v35 = vsel %vm6915_vm4, %v1078_v28, %v1082_v2  ;;  %v1309_v37 = vrot.slane %v7031_v44, 5  ;;  %v5663_v38 = vrot.slane %v5655_v26, 9  ;;  %v1119_v0 = vor.u32 %v1118_v39, %v1115_v31  ;;  %v7105_v2 = vld [vmem:[%s6877_s14 + $0x3c] sm:$0x1] }
  0x3d   : > { %6360 = vmatpush3.bf16.msra.mxu0 %v6885_v13  ;;  %6345 = vmatprep.mubr.msk.bf16.mxu0 %vm590_vm3, %v5607_v10  ;;  %v1097_v40 = vsel %vm6915_vm4, %v1092_v30, %v1096_v7  ;;  %v1313_v62 = vrot.slane %v7045_v49, 5  ;;  %v5664_v1 = vrot.slane %v5656_v34, 9  ;;  %v1106_v13 = vrot.slane %v1105_v36, 4  ;;  %v7096_v10 = vld [vmem:[%s6877_s14 + $0x34] sm:$0x1] }
  0x3e   : > { %6356 = vmatmul.mubr.msk.bf16.gmra.mxu1 %vm590_vm3, %v6680_v11  ;;  %v5646_v44 = vcombine.low %v1083_v35, %v1097_v40  ;;  %6605 = vmatprep.subr.msk.bf16.mxu0 %vm603_vm0, %v6865_v9  ;;  %v1310_v45 = vsel %vm6972_vm7, %v5662_v56, %v1309_v37  ;;  %v1317_v46 = vrot.slane %v5635_v57, 5  ;;  %v1120_v48 = vrot.slane %v1119_v0, 4  ;;  %v7110_v11 = vld [vmem:[%s6877_s14 + $0x44] sm:$0x1]  ;;  %v5659_v34 = vld [vmem:[%s6877_s14 + $0x30] sm:$0xe] }
  0x3f   : > { %v1314_v49 = vsel %vm6972_vm7, %v5663_v38, %v1313_v62  ;;  %v5665_v50 = vrot.slane %v5657_v41, 9  ;;  %v1321_v51 = vrot.slane %v5637_v4, 5  ;;  %v1111_v53 = vsel %vm6915_vm4, %v1106_v13, %v1110_v18  ;;  %v5644_v4 = vld [vmem:[%s6877_s14 + $0x40] sm:$0xf]  ;;  %v5660_v35 = vld [vmem:[%s6877_s14 + $0x38] sm:$0xe] }
  0x40   : > { %v5670_v9 = vcombine.low %v1310_v45, %v1314_v49  ;;  %v1318_v54 = vsel %vm6972_vm7, %v5664_v1, %v1317_v46  ;;  %v1127_v33 = vshrl.u32 %v5638_v42, 16  ;;  %v1125_v57 = vsel %vm6915_vm4, %v1120_v48, %v1124_v32  ;;  %v5661_v40 = vld [vmem:[%s6877_s14 + $0x40] sm:$0xe]  ;;  %v5695_v48 = vld [vmem:[%s6877_s14 + $0x10] sm:$0xf] }
  0x41   : > { %v1322_v58 = vsel %vm6972_vm7, %v5665_v50, %v1321_v51  ;;  %v1130_v61 = vshll.u32 %v5638_v42, 16  ;;  %v1136_v63 = vshll.u32 %v7086_v47, 16  ;;  %v5647_v5 = vcombine.low %v1111_v53, %v1125_v57  ;;  %v7143_v49 = vld [vmem:[%s6877_s14 + $0x14] sm:$0x1]  ;;  %v7161_v57 = vld [vmem:[%s6877_s14 + $0x1c] sm:$0x1] }
  0x42   : > { %6371 = vmatprep.mubr.msk.bf16.mxu1 %vm590_vm3, %v5670_v9  ;;  %v5671_v6 = vcombine.low %v1318_v54, %v1322_v58  ;;  %v1129_v7 = vrot.slane %v1127_v33, 4  ;;  %v1141_v12 = vshrl.u32 %v5640_v52, 16  ;;  %v1144_v19 = vshll.u32 %v5640_v52, 16  ;;  %v5697_v9 = vld [vmem:[%s6877_s14 + $0x18] sm:$0xf] }
  0x43   : > { %v1132_v15 = vrot.slane %v1130_v61, 5  ;;  %v1138_v16 = vrot.slane %v1136_v63, 5  ;;  %v1150_v20 = vshll.u32 %v7096_v10, 16  ;;  %v1155_v8 = vshrl.u32 %v5642_v55, 16  ;;  %v5699_v58 = vld [vmem:[%s6877_s14 + $0x20] sm:$0xf] }
  0x44   : > { %6346 = vmatmul.mubr.msk.bf16.gmra.mxu0 %vm590_vm3, %v5608_v60  ;;  %v1143_v22 = vrot.slane %v1141_v12, 4  ;;  %v1158_v23 = vshll.u32 %v5642_v55, 16  ;;  %v1164_v24 = vshll.u32 %v7105_v2, 16  ;;  %v1146_v28 = vrot.slane %v1144_v19, 5 }
  0x45   : > { %6361 = vmatprep.mubr.msk.bf16.mxu0 %vm590_vm3, %v5646_v44  ;;  %v1133_v26 = vor.u32 %v1132_v15, %v1129_v7  ;;  %v1152_v17 = vrot.slane %v1150_v20, 5  ;;  %v1169_v18 = vshrl.u32 %v5644_v4, 16  ;;  %v1157_v25 = vrot.slane %v1155_v8, 4  ;;  %v6682_v44 = vld [vmem:[%s8465_s3 + $0xc] ss:$0 sps:$4 sm:$0xcc]  }
  0x46   : > { %6372 = vmatmul.mubr.msk.bf16.vlgmr.msra.gmra.mxu1 %vm590_vm3, %v5671_v6  ;;  %v1160_v27 = vrot.slane %v1158_v23, 5  ;;  %v1166_v60 = vrot.slane %v1164_v24, 5  ;;  %v1172_v31 = vshll.u32 %v5644_v4, 16  ;;  %v1147_v39 = vor.u32 %v1146_v28, %v1143_v22  ;;  %v5701_v15 = vld [vmem:[%s6877_s14 + $0x28] sm:$0xf] }
  0x47   : > { %v1134_v30 = vrot.slane %v1133_v26, 4  ;;  %v1171_v32 = vrot.slane %v1169_v18, 4  ;;  %v1178_v56 = vshll.u32 %v7110_v11, 16  ;;  %v5666_v38 = vrot.slane %v5658_v21, 9 }
  0x48   : > { %v1161_v36 = vor.u32 %v1160_v27, %v1157_v25  ;;  %v1174_v37 = vrot.slane %v1172_v31, 5  ;;  %v1325_v41 = vrot.slane %v7086_v47, 5  ;;  %v1148_v62 = vrot.slane %v1147_v39, 4 }
  0x49   : > { %v1139_v0 = vsel %vm6915_vm4, %v1134_v30, %v1138_v16  ;;  %v1180_v1 = vrot.slane %v1178_v56, 5  ;;  %v5667_v42 = vrot.slane %v5659_v34, 9  ;;  %v1329_v47 = vrot.slane %v7096_v10, 5  ;;  %v5703_v34 = vld [vmem:[%s6877_s14 + $0x30] sm:$0xf] }
  0x4a   : > { %v1162_v13 = vrot.slane %v1161_v36, 4  ;;  %v1175_v45 = vor.u32 %v1174_v37, %v1171_v32  ;;  %v1326_v46 = vsel %vm6972_vm7, %v5666_v38, %v1325_v41  ;;  %v1153_v50 = vsel %vm6915_vm4, %v1148_v62, %v1152_v17  ;;  %v7187_v17 = vld [vmem:[%s6877_s14 + $0x2c] sm:$0x1] }
  0x4b   : > { %v5668_v51 = vrot.slane %v5660_v35, 9  ;;  %v1333_v52 = vrot.slane %v7105_v2, 5  ;;  %v5669_v53 = vrot.slane %v5661_v40, 9  ;;  %v5648_v54 = vcombine.low %v1139_v0, %v1153_v50  ;;  %v7193_v35 = vld [vmem:[%s6877_s14 + $0x34] sm:$0x1] }
  0x4c   : > { %6362 = vmatmul.mubr.msk.bf16.vlgmr.msra.gmra.mxu0 %vm590_vm3, %v5647_v5  ;;  %v1167_v10 = vsel %vm6915_vm4, %v1162_v13, %v1166_v60  ;;  %v1176_v33 = vrot.slane %v1175_v45, 4  ;;  %v1330_v55 = vsel %vm6972_vm7, %v5667_v42, %v1329_v47  ;;  %v1337_v2 = vrot.slane %v7110_v11, 5  ;;  %v7169_v5 = vld [vmem:[%s6877_s14 + $0x24] sm:$0x1] }
  0x4d   : > { %6380 = vmatpush3.bf16.msra.mxu0 %v6889_v14  ;;  %v5672_v61 = vcombine.low %v1326_v46, %v1330_v55  ;;  %v1334_v63 = vsel %vm6972_vm7, %v5668_v51, %v1333_v52  ;;  %v1706_v4 = vrot.slane %v6682_v44, 2  ;;  %6365 = vmatprep.mubr.msk.bf16.mxu0 %vm590_vm3, %v5648_v54  ;;  %v1579_v14 = vshrl.u32 %v5695_v48, 16  ;;  %v6684_v44 = vld [vmem:[%s6877_s14 + $0x20] ss:$8 sps:$4 sm:$0xff]   ;;  %v7206_v46 = vld [vmem:[%s6877_s14 + $0x3c] sm:$0x1] }
  0x4e   : > { %v1181_v6 = vsel %vm6915_vm4, %v1176_v33, %v1180_v1  ;;  %6607 = vmatprep.subr.msk.bf16.mxu0 %vm603_vm0, %v6967_v59  ;;  %v1582_v7 = vshll.u32 %v5695_v48, 16  ;;  %v1588_v12 = vshll.u32 %v7143_v49, 16  ;;  %v1338_v11 = vsel %vm6972_vm7, %v5669_v53, %v1337_v2  ;;  %v6683_v59 = vld [vmem:[%s6877_s14 + $0x10] ss:$8 sps:$4 sm:$0xff]  }
  0x4f   : > { %v5649_v16 = vcombine.low %v1167_v10, %v1181_v6  ;;  %6375 = vmatprep.mubr.msk.bf16.mxu1 %vm590_vm3, %v5672_v61  ;;  %6606 = vmatprep.subr.msk.bf16.mxu1 %vm603_vm0, %v1706_v4  ;;  %v1720_v19 = vsel %vm603_vm0, %v1706_v4, 0  ;;  %v1593_v20 = vshrl.u32 %v5697_v9, 16  ;;  %v5673_v21 = vcombine.low %v1334_v63, %v1338_v11  ;;  %v5705_v1 = vld [vmem:[%s6877_s14 + $0x38] sm:$0xf]  ;;  %v7216_v6 = vld [vmem:[%s6877_s14 + $0x44] sm:$0x1] }
  0x50   : > { %6390 = vmatpush3.bf16.msra.mxu1 %v1720_v19  ;;  %v1581_v22 = vrot.slane %v1579_v14, 4  ;;  %v1584_v8 = vrot.slane %v1582_v7, 5  ;;  %v1590_v23 = vrot.slane %v1588_v12, 5  ;;  %v1596_v26 = vshll.u32 %v5697_v9, 16  ;;  %v6685_v53 = vld [vmem:[%s6877_s14 + $0x30] ss:$8 sps:$4 sm:$0xff]  }
  0x51   : > { %v1595_v24 = vrot.slane %v1593_v20, 4  ;;  %v1602_v28 = vshll.u32 %v7161_v57, 16  ;;  %v1607_v18 = vshrl.u32 %v5699_v58, 16  ;;  %6376 = vmatmul.mubr.msk.bf16.gmra.mxu1 %vm590_vm3, %v5673_v21  ;;  %v1610_v27 = vshll.u32 %v5699_v58, 16  ;;  %v5707_v58 = vld [vmem:[%s6877_s14 + $0x40] sm:$0xf] }
  0x52   : > { %v1585_v25 = vor.u32 %v1584_v8, %v1581_v22  ;;  %v1616_v60 = vshll.u32 %v7169_v5, 16  ;;  %v1621_v31 = vshrl.u32 %v5701_v15, 16  ;;  %v1598_v30 = vrot.slane %v1596_v26, 5  ;;  %v6687_v14 = vld [vmem:[%s8465_s3 + $0x10] ss:$0 sps:$4 sm:$0xcc]  }
  0x53   : > { %v1604_v39 = vrot.slane %v1602_v28, 5  ;;  %v1609_v32 = vrot.slane %v1607_v18, 4  ;;  %v1624_v56 = vshll.u32 %v5701_v15, 16  ;;  %v1612_v37 = vrot.slane %v1610_v27, 5  ;;  %v5709_v11 = vld [vmem:[%s6877_s14 + $0x48] sm:$0xf] }
  0x54   : > { %6366 = vmatmul.mubr.msk.bf16.gmra.mxu0 %vm590_vm3, %v5649_v16  ;;  %v1586_v36 = vrot.slane %v1585_v25, 4  ;;  %v1618_v38 = vrot.slane %v1616_v60, 5  ;;  %v1623_v41 = vrot.slane %v1621_v31, 4  ;;  %v1599_v40 = vor.u32 %v1598_v30, %v1595_v24  ;;  %v7225_v19 = vld [vmem:[%s6877_s14 + $0x4c] sm:$0x1] }
  0x55   : > { %6381 = vmatprep.mubr.msk.bf16.mxu0 %vm590_vm3, %v6683_v59  ;;  %v1626_v0 = vrot.slane %v1624_v56, 5  ;;  %v1630_v62 = vshll.u32 %v7187_v17, 16  ;;  %v1635_v42 = vshrl.u32 %v5703_v34, 16  ;;  %v1613_v45 = vor.u32 %v1612_v37, %v1609_v32  ;;  %v5720_v8 = vld [vmem:[%s6877_s14 + $0x10] sm:$0xe] }
  0x56   : > { %v1591_v13 = vsel %vm6915_vm4, %v1586_v36, %v1590_v23  ;;  %v1638_v47 = vshll.u32 %v5703_v34, 16  ;;  %v1644_v48 = vshll.u32 %v7193_v35, 16  ;;  %v1600_v50 = vrot.slane %v1599_v40, 4  ;;  %v7238_v23 = vld [vmem:[%s8465_s3 + $0x14] sm:$0x3] }
  0x57   : > { %v1627_v51 = vor.u32 %v1626_v0, %v1623_v41  ;;  %v1632_v52 = vrot.slane %v1630_v62, 5  ;;  %v1637_v9 = vrot.slane %v1635_v42, 4  ;;  %v1614_v54 = vrot.slane %v1613_v45, 4  ;;  %v5721_v25 = vld [vmem:[%s6877_s14 + $0x18] sm:$0xe] }
  0x58   : > { %v1640_v10 = vrot.slane %v1638_v47, 5  ;;  %v1646_v33 = vrot.slane %v1644_v48, 5  ;;  %v1649_v55 = vshrl.u32 %v5705_v1, 16  ;;  %v1605_v61 = vsel %vm6915_vm4, %v1600_v50, %v1604_v39  ;;  %v6686_v30 = vld [vmem:[%s6877_s14 + $0x40] ss:$8 sps:$4 sm:$0xff]  }
  0x59   : > { %v1628_v63 = vrot.slane %v1627_v51, 4  ;;  %v1652_v2 = vshll.u32 %v5705_v1, 16  ;;  %v1658_v4 = vshll.u32 %v7206_v46, 16  ;;  %v5711_v7 = vcombine.low %v1591_v13, %v1605_v61  ;;  %v5723_v37 = vld [vmem:[%s6877_s14 + $0x28] sm:$0xe] }
  0x5a   : > { %v1619_v12 = vsel %vm6915_vm4, %v1614_v54, %v1618_v38  ;;  %v1641_v15 = vor.u32 %v1640_v10, %v1637_v9  ;;  %v1651_v16 = vrot.slane %v1649_v55, 4  ;;  %v1663_v22 = vshrl.u32 %v5707_v58, 16  ;;  %v5725_v9 = vld [vmem:[%s6877_s14 + $0x38] sm:$0xe]  ;;  %v5726_v61 = vld [vmem:[%s6877_s14 + $0x40] sm:$0xe] }
  0x5b   : > { %v1633_v20 = vsel %vm6915_vm4, %v1628_v63, %v1632_v52  ;;  %v1654_v21 = vrot.slane %v1652_v2, 5  ;;  %v1660_v59 = vrot.slane %v1658_v4, 5  ;;  %6391 = vmatprep.mubr.msk.bf16.mxu1 %vm590_vm3, %v5711_v7  ;;  %v1666_v28 = vshll.u32 %v5707_v58, 16  ;;  %v6688_v58 = vld [vmem:[%s7230_s13] ss:$8 sps:$4 sm:$0xff]  }
  0x5c   : > { %6382 = vmatmul.mubr.msk.bf16.vlgmr.msra.gmra.mxu0 %vm590_vm3, %v6684_v44  ;;  %v5712_v24 = vcombine.low %v1619_v12, %v1633_v20  ;;  %v1642_v26 = vrot.slane %v1641_v15, 4  ;;  %v1672_v18 = vshll.u32 %v7216_v6, 16  ;;  %v1665_v60 = vrot.slane %v1663_v22, 4  ;;  %v5727_v12 = vld [vmem:[%s6877_s14 + $0x48] sm:$0xe] }
  0x5d   : > { %6400 = vmatpush3.bf16.msra.mxu0 %v7007_v29  ;;  %6385 = vmatprep.mubr.msk.bf16.mxu0 %vm590_vm3, %v6685_v53  ;;  %v1655_v27 = vor.u32 %v1654_v21, %v1651_v16  ;;  %v1677_v31 = vshrl.u32 %v5709_v11, 16  ;;  %v1680_v34 = vshll.u32 %v5709_v11, 16  ;;  %v1668_v32 = vrot.slane %v1666_v28, 5  ;;  %v5722_v29 = vld [vmem:[%s6877_s14 + $0x20] sm:$0xe] }
  0x5e   : > { %6392 = vmatmul.mubr.msk.bf16.vlgmr.msra.gmra.mxu1 %vm590_vm3, %v5712_v24  ;;  %v1647_v39 = vsel %vm6915_vm4, %v1642_v26, %v1646_v33  ;;  %v1674_v56 = vrot.slane %v1672_v18, 5  ;;  %v1686_v36 = vshll.u32 %v7225_v19, 16  ;;  %6609 = vmatprep.subr.msk.bf16.mxu0 %vm603_vm0, %v7238_v23  ;;  %v1984_v0 = vrot.slane %v6687_v14, 2  ;;  %v2073_v28 = vld [vmem:[%s7230_s13] sm:$0xf] }
  0x5f   : > { %v1656_v38 = vrot.slane %v1655_v27, 4  ;;  %v1679_v41 = vrot.slane %v1677_v31, 4  ;;  %v1682_v40 = vrot.slane %v1680_v34, 5  ;;  %v1669_v62 = vor.u32 %v1668_v32, %v1665_v60  ;;  %v7304_v18 = vld [vmem:[%s7230_s13 + $0x4] sm:$0x1] }
  0x60   : > { %v1688_v1 = vrot.slane %v1686_v36, 5  ;;  %v5728_v42 = vrot.slane %v5720_v8, 9  ;;  %v1821_v44 = vrot.slane %v7143_v49, 5  ;;  %6608 = vmatprep.subr.msk.bf16.mxu1 %vm603_vm0, %v1984_v0  ;;  %v1998_v47 = vsel %vm603_vm0, %v1984_v0, 0  ;;  %v5724_v49 = vld [vmem:[%s6877_s14 + $0x30] sm:$0xe] }
  0x61   : > { %v1661_v13 = vsel %vm6915_vm4, %v1656_v38, %v1660_v59  ;;  %v1683_v45 = vor.u32 %v1682_v40, %v1679_v41  ;;  %v5729_v48 = vrot.slane %v5721_v25, 9  ;;  %v1670_v51 = vrot.slane %v1669_v62, 4  ;;  %6410 = vmatpush3.bf16.msra.mxu1 %v1998_v47  ;;  %v2075_v25 = vld [vmem:[%s7230_s13 + $0x8] sm:$0xf]  ;;  %v7311_v34 = vld [vmem:[%s7230_s13 + $0xc] sm:$0x1] }
  0x62   : > { %v5713_v50 = vcombine.low %v1647_v39, %v1661_v13  ;;  %v1822_v52 = vsel %vm6972_vm7, %v5728_v42, %v1821_v44  ;;  %v1825_v53 = vrot.slane %v7161_v57, 5  ;;  %v5730_v10 = vrot.slane %v5722_v29, 9  ;;  %v2472_v39 = vld [vmem:[%s8465_s3 + $0x18] sm:$0x3]  ;;  %v2077_v38 = vld [vmem:[%s7230_s13 + $0x10] sm:$0xf] }
  0x63   : > { %v1684_v54 = vrot.slane %v1683_v45, 4  ;;  %v1829_v33 = vrot.slane %v7169_v5, 5  ;;  %v5731_v55 = vrot.slane %v5723_v37, 9  ;;  %v1675_v63 = vsel %vm6915_vm4, %v1670_v51, %v1674_v56  ;;  %v6690_v56 = vld [vmem:[%s7230_s13 + $0x20] ss:$8 sps:$4 sm:$0xff]  }
  0x64   : > { %6386 = vmatmul.mubr.msk.bf16.gmra.mxu0 %vm590_vm3, %v6686_v30  ;;  %6395 = vmatprep.mubr.msk.bf16.mxu1 %vm590_vm3, %v5713_v50  ;;  %v1826_v57 = vsel %vm6972_vm7, %v5729_v48, %v1825_v53  ;;  %v1833_v2 = vrot.slane %v7187_v17, 5  ;;  %v5732_v7 = vrot.slane %v5724_v49, 9  ;;  %v1837_v11 = vrot.slane %v7193_v35, 5  ;;  %v2079_v45 = vld [vmem:[%s7230_s13 + $0x18] sm:$0xf] }
  0x65   : > { %v1689_v4 = vsel %vm6915_vm4, %v1684_v54, %v1688_v1  ;;  %v5736_v14 = vcombine.low %v1822_v52, %v1826_v57  ;;  %v1830_v5 = vsel %vm6972_vm7, %v5730_v10, %v1829_v33  ;;  %v5733_v20 = vrot.slane %v5725_v9, 9  ;;  %v7325_v1 = vld [vmem:[%s7230_s13 + $0x14] sm:$0x1]  ;;  %v2080_v51 = vld [vmem:[%s7230_s13 + $0x1c] sm:$0x1] }
  0x66   : > { %v5714_v15 = vcombine.low %v1675_v63, %v1689_v4  ;;  %v1834_v16 = vsel %vm6972_vm7, %v5731_v55, %v1833_v2  ;;  %v2227_v17 = vsel %vm603_vm0, %v7238_v23, 0  ;;  %v1841_v21 = vrot.slane %v7206_v46, 5  ;;  %v6692_v23 = vld [vmem:[%s8465_s3 + $0x14] ss:$0 sps:$4 sm:$0xcc]  }
  0x67   : > { %6401 = vmatprep.mubr.msk.bf16.mxu0 %vm590_vm3, %v5736_v14  ;;  %v5734_v59 = vrot.slane %v5726_v61, 9  ;;  %v1845_v22 = vrot.slane %v7216_v6, 5  ;;  %v5737_v8 = vcombine.low %v1830_v5, %v1834_v16  ;;  %v1838_v35 = vsel %vm6972_vm7, %v5732_v7, %v1837_v11  ;;  %v2302_v33 = vld [vmem:[%s7230_s13] sm:$0xe]  ;;  %v2303_v57 = vld [vmem:[%s7230_s13 + $0x8] sm:$0xe] }
  0x68   : > { %6396 = vmatmul.mubr.msk.bf16.gmra.mxu1 %vm590_vm3, %v5714_v15  ;;  %v5735_v24 = vrot.slane %v5727_v12, 9  ;;  %v1849_v26 = vrot.slane %v7225_v19, 5  ;;  %v1842_v46 = vsel %vm6972_vm7, %v5733_v20, %v1841_v21  ;;  %v6689_v19 = vld [vmem:[%s7230_s13 + $0x10] ss:$8 sps:$4 sm:$0xff]   ;;  %v2374_v31 = vrot.slane %v6692_v23, 2 }
  0x69   : > { %6411 = vmatprep.mubr.msk.bf16.mxu1 %vm590_vm3, %v6688_v58  ;;  %v7300_v6 = vsel %vm6972_vm7, %v5734_v59, %v1845_v22  ;;  %v5738_v27 = vcombine.low %v1838_v35, %v1842_v46  ;;  %v2090_v30 = vshrl.u32 %v2073_v28, 16  ;;  %v2093_v36 = vshll.u32 %v2073_v28, 16  ;;  %v2304_v7 = vld [vmem:[%s7230_s13 + $0x10] sm:$0xe]  ;;  %v2081_v46 = vld [vmem:[%s7230_s13 + $0x20] sm:$0xf] }
  0x6a   : > { %v1850_v60 = vsel %vm6972_vm7, %v5735_v24, %v1849_v26  ;;  %v2099_v29 = vshll.u32 %v7304_v18, 16  ;;  %v2104_v37 = vshrl.u32 %v2075_v25, 16  ;;  %6610 = vmatprep.subr.msk.bf16.mxu1 %vm603_vm0, %v2374_v31  ;;  %v2388_v41 = vsel %vm603_vm0, %v2374_v31, 0  ;;  %v6691_v20 = vld [vmem:[%s7230_s13 + $0x30] ss:$8 sps:$4 sm:$0xff]  }
  0x6b   : > { %v5739_v32 = vcombine.low %v7300_v6, %v1850_v60  ;;  %v2092_v40 = vrot.slane %v2090_v30, 4  ;;  %v2107_v0 = vshll.u32 %v2075_v25, 16  ;;  %v2113_v62 = vshll.u32 %v7311_v34, 16  ;;  %v2083_v30 = vld [vmem:[%s7230_s13 + $0x28] sm:$0xf] }
  0x6c   : > { %6402 = vmatmul.mubr.msk.bf16.vlgmr.msra.gmra.mxu0 %vm590_vm3, %v5737_v8  ;;  %v2095_v42 = vrot.slane %v2093_v36, 5  ;;  %v2101_v44 = vrot.slane %v2099_v29, 5  ;;  %v2106_v13 = vrot.slane %v2104_v37, 4  ;;  %v2118_v47 = vshrl.u32 %v2077_v38, 16  ;;  %v2305_v8 = vld [vmem:[%s7230_s13 + $0x18] sm:$0xe] }
  0x6d   : > { %6420 = vmatpush3.bf16.msra.mxu0 %v2227_v17  ;;  %6405 = vmatprep.mubr.msk.bf16.mxu0 %vm590_vm3, %v5738_v27  ;;  %v2109_v48 = vrot.slane %v2107_v0, 5  ;;  %v2115_v50 = vrot.slane %v2113_v62, 5  ;;  %v2121_v52 = vshll.u32 %v2077_v38, 16  ;;  %v2127_v53 = vshll.u32 %v7325_v1, 16  ;;  %v2084_v36 = vld [vmem:[%s7230_s13 + $0x2c] sm:$0x1] }
  0x6e   : > { %6611 = vmatprep.subr.msk.bf16.mxu0 %vm603_vm0, %v2472_v39  ;;  %v2096_v49 = vor.u32 %v2095_v42, %v2092_v40  ;;  %v2120_v9 = vrot.slane %v2118_v47, 4  ;;  %v2132_v54 = vshrl.u32 %v2079_v45, 16  ;;  %v2135_v10 = vshll.u32 %v2079_v45, 16  ;;  %v2085_v37 = vld [vmem:[%s7230_s13 + $0x30] sm:$0xf] }
  0x6f   : > { %v2110_v55 = vor.u32 %v2109_v48, %v2106_v13  ;;  %v2123_v58 = vrot.slane %v2121_v52, 5  ;;  %v2129_v61 = vrot.slane %v2127_v53, 5  ;;  %v2141_v63 = vshll.u32 %v2080_v51, 16  ;;  %v7371_v62 = vld [vmem:[%s7230_s13 + $0x34] sm:$0x1] }
  0x70   : > { %6412 = vmatmul.mubr.msk.bf16.vlgmr.msra.gmra.mxu1 %vm590_vm3, %v6689_v19  ;;  %v2097_v2 = vrot.slane %v2096_v49, 4  ;;  %v2134_v4 = vrot.slane %v2132_v54, 4  ;;  %v2137_v14 = vrot.slane %v2135_v10, 5  ;;  %v2506_v5 = vsel %vm603_vm0, %v2472_v39, 0  ;;  %v7352_v19 = vld [vmem:[%s7230_s13 + $0x24] sm:$0x1] }
  0x71   : > { %6415 = vmatprep.mubr.msk.bf16.mxu1 %vm590_vm3, %v6690_v56  ;;  %6430 = vmatpush3.bf16.msra.mxu1 %v2388_v41  ;;  %v2111_v12 = vrot.slane %v2110_v55, 4  ;;  %v2124_v15 = vor.u32 %v2123_v58, %v2120_v9  ;;  %v2143_v16 = vrot.slane %v2141_v63, 5  ;;  %v5761_v11 = vrot.slane %v2302_v33, 9  ;;  %v7376_v47 = vld [vmem:[%s7230_s13 + $0x3c] sm:$0x1] }
  0x72   : > { %v2102_v17 = vsel %vm6915_vm4, %v2097_v2, %v2101_v44  ;;  %v2138_v21 = vor.u32 %v2137_v14, %v2134_v4  ;;  %v2328_v59 = vrot.slane %v7304_v18, 5  ;;  %v5762_v22 = vrot.slane %v2303_v57, 9  ;;  %v2306_v48 = vld [vmem:[%s7230_s13 + $0x20] sm:$0xe]  ;;  %v2307_v63 = vld [vmem:[%s7230_s13 + $0x28] sm:$0xe] }
  0x73   : > { %v2116_v35 = vsel %vm6915_vm4, %v2111_v12, %v2115_v50  ;;  %v2125_v24 = vrot.slane %v2124_v15, 4  ;;  %v2332_v26 = vrot.slane %v7311_v34, 5  ;;  %v5763_v23 = vrot.slane %v2304_v7, 9  ;;  %v2308_v7 = vld [vmem:[%s7230_s13 + $0x30] sm:$0xe] }
  0x74   : > { %6406 = vmatmul.mubr.msk.bf16.gmra.mxu0 %vm590_vm3, %v5739_v32  ;;  %v5753_v6 = vcombine.low %v2102_v17, %v2116_v35  ;;  %v2139_v28 = vrot.slane %v2138_v21, 4  ;;  %v2329_v18 = vsel %vm6972_vm7, %v5761_v11, %v2328_v59  ;;  %v2336_v25 = vrot.slane %v7325_v1, 5  ;;  %v2087_v1 = vld [vmem:[%s7230_s13 + $0x38] sm:$0xf] }
  0x75   : > { %v2130_v27 = vsel %vm6915_vm4, %v2125_v24, %v2129_v61  ;;  %v2333_v60 = vsel %vm6972_vm7, %v5762_v22, %v2332_v26  ;;  %v5764_v31 = vrot.slane %v2305_v8, 9  ;;  %v2340_v34 = vrot.slane %v2080_v51, 5  ;;  %v6693_v17 = vld [vmem:[%s8465_s3 + $0x18] ss:$0 sps:$4 sm:$0xcc]  }
  0x76   : > { %6421 = vmatprep.mubr.msk.bf16.mxu0 %vm590_vm3, %v5753_v6  ;;  %v2144_v39 = vsel %vm6915_vm4, %v2139_v28, %v2143_v16  ;;  %v5769_v32 = vcombine.low %v2329_v18, %v2333_v60  ;;  %v2337_v56 = vsel %vm6972_vm7, %v5763_v23, %v2336_v25  ;;  %v2146_v29 = vshrl.u32 %v2081_v46, 16  ;;  %v7392_v8 = vld [vmem:[%s8465_s3 + $0x1c] sm:$0x3] }
  0x77   : > { %v5754_v38 = vcombine.low %v2130_v27, %v2144_v39  ;;  %v2341_v41 = vsel %vm6972_vm7, %v5764_v31, %v2340_v34  ;;  %v2149_v40 = vshll.u32 %v2081_v46, 16  ;;  %v2155_v0 = vshll.u32 %v7352_v19, 16  ;;  %v5794_v31 = vld [vmem:[%s7230_s13 + $0x8] sm:$0xf]  ;;  %v7408_v34 = vld [vmem:[%s7230_s13 + $0xc] sm:$0x1] }
  0x78   : > { %6416 = vmatmul.mubr.msk.bf16.gmra.mxu1 %vm590_vm3, %v6691_v20  ;;  %v5770_v42 = vcombine.low %v2337_v56, %v2341_v41  ;;  %v2148_v44 = vrot.slane %v2146_v29, 4  ;;  %v2160_v13 = vshrl.u32 %v2083_v30, 16  ;;  %v2163_v45 = vshll.u32 %v2083_v30, 16  ;;  %v2309_v20 = vld [vmem:[%s7230_s13 + $0x38] sm:$0xe] }
  0x79   : > { %6431 = vmatprep.mubr.msk.bf16.mxu1 %vm590_vm3, %v5769_v32  ;;  %v2151_v50 = vrot.slane %v2149_v40, 5  ;;  %v2157_v51 = vrot.slane %v2155_v0, 5  ;;  %v2169_v52 = vshll.u32 %v2084_v36, 16  ;;  %v2174_v53 = vshrl.u32 %v2085_v37, 16  ;;  %v6694_v41 = vld [vmem:[%s7230_s13 + $0x8] ss:$8 sps:$4 sm:$0xff]  }
  0x7a   : > { %v2162_v49 = vrot.slane %v2160_v13, 4  ;;  %v2165_v9 = vrot.slane %v2163_v45, 5  ;;  %v2177_v54 = vshll.u32 %v2085_v37, 16  ;;  %v2183_v10 = vshll.u32 %v7371_v62, 16  ;;  %v7419_v40 = vld [vmem:[%s7230_s13 + $0x14] sm:$0x1] }
  0x7b   : > { %v2152_v33 = vor.u32 %v2151_v50, %v2148_v44  ;;  %v2171_v55 = vrot.slane %v2169_v52, 5  ;;  %v2176_v58 = vrot.slane %v2174_v53, 4  ;;  %v2188_v61 = vshrl.u32 %v2087_v1, 16  ;;  %v5798_v44 = vld [vmem:[%s7230_s13 + $0x18] sm:$0xf] }
  0x7c   : > { %6422 = vmatmul.mubr.msk.bf16.vlgmr.msra.gmra.mxu0 %vm590_vm3, %v5754_v38  ;;  %v2166_v57 = vor.u32 %v2165_v9, %v2162_v49  ;;  %v2179_v2 = vrot.slane %v2177_v54, 5  ;;  %v2185_v4 = vrot.slane %v2183_v10, 5  ;;  %v2191_v14 = vshll.u32 %v2087_v1, 16  ;;  %v7431_v50 = vld [vmem:[%s7230_s13 + $0x1c] sm:$0x1] }
  0x7d   : > { %6440 = vmatpush3.bf16.msra.mxu0 %v2506_v5  ;;  %v2153_v12 = vrot.slane %v2152_v33, 4  ;;  %v2190_v15 = vrot.slane %v2188_v61, 4  ;;  %v2197_v16 = vshll.u32 %v7376_v47, 16  ;;  %v5765_v11 = vrot.slane %v2306_v48, 9  ;;  %v7439_v61 = vld [vmem:[%s7230_s13 + $0x24] sm:$0x1] }
  0x7e   : > { %v2167_v21 = vrot.slane %v2166_v57, 4  ;;  %v2180_v59 = vor.u32 %v2179_v2, %v2176_v58  ;;  %v2193_v22 = vrot.slane %v2191_v14, 5  ;;  %v2344_v5 = vrot.slane %v7352_v19, 5  ;;  %6613 = vmatprep.subr.msk.bf16.mxu0 %vm603_vm0, %v7392_v8 }
  0x7f   : > { %v2158_v35 = vsel %vm6915_vm4, %v2153_v12, %v2157_v51  ;;  %v2199_v24 = vrot.slane %v2197_v16, 5  ;;  %v5766_v26 = vrot.slane %v2307_v63, 9  ;;  %v2348_v23 = vrot.slane %v2084_v36, 5  ;;  %v5796_v36 = vld [vmem:[%s7230_s13 + $0x10] sm:$0xf] }
  0x80   : > { %6432 = vmatmul.mubr.msk.bf16.vlgmr.msra.gmra.mxu1 %vm590_vm3, %v5770_v42  ;;  %v2172_v46 = vsel %vm6915_vm4, %v2167_v21, %v2171_v55  ;;  %v2181_v6 = vrot.slane %v2180_v59, 4  ;;  %v2194_v28 = vor.u32 %v2193_v22, %v2190_v15  ;;  %v2345_v18 = vsel %vm6972_vm7, %v5765_v11, %v2344_v5  ;;  %v5800_v51 = vld [vmem:[%s7230_s13 + $0x20] sm:$0xf]  ;;  %v5802_v5 = vld [vmem:[%s7230_s13 + $0x28] sm:$0xf] }
  0x81   : > { %v5755_v25 = vcombine.low %v2158_v35, %v2172_v46  ;;  %v2349_v19 = vsel %vm6972_vm7, %v5766_v26, %v2348_v23  ;;  %v5767_v27 = vrot.slane %v2308_v7, 9  ;;  %v2352_v60 = vrot.slane %v7371_v62, 5  ;;  %v7451_v46 = vld [vmem:[%s7230_s13 + $0x2c] sm:$0x1] }
  0x82   : > { %v2186_v30 = vsel %vm6915_vm4, %v2181_v6, %v2185_v4  ;;  %v2195_v39 = vrot.slane %v2194_v28, 4  ;;  %v5771_v32 = vcombine.low %v2345_v18, %v2349_v19  ;;  %v5768_v56 = vrot.slane %v2309_v20, 9  ;;  %v6695_v4 = vld [vmem:[%s7230_s13 + $0x18] ss:$8 sps:$4 sm:$0xff]   ;;  %v6696_v20 = vld [vmem:[%s7230_s13 + $0x28] ss:$8 sps:$4 sm:$0xff]  }
  0x83   : > { %6425 = vmatprep.mubr.msk.bf16.mxu0 %vm590_vm3, %v5755_v25  ;;  %v2353_v29 = vsel %vm6972_vm7, %v5767_v27, %v2352_v60  ;;  %v2356_v37 = vrot.slane %v7376_v47, 5  ;;  %v2725_v38 = vrot.slane %v6693_v17, 2  ;;  %v2598_v62 = vshrl.u32 %v5794_v31, 16  ;;  %v5804_v6 = vld [vmem:[%s7230_s13 + $0x30] sm:$0xf] }
  0x84   : > { %v2200_v0 = vsel %vm6915_vm4, %v2195_v39, %v2199_v24  ;;  %6435 = vmatprep.mubr.msk.bf16.mxu1 %vm590_vm3, %v5771_v32  ;;  %v2601_v1 = vshll.u32 %v5794_v31, 16  ;;  %v2607_v42 = vshll.u32 %v7408_v34, 16  ;;  %v2612_v48 = vshrl.u32 %v5796_v36, 16  ;;  %v7455_v19 = vld [vmem:[%s7230_s13 + $0x34] sm:$0x1] }
  0x85   : > { %v5756_v13 = vcombine.low %v2186_v30, %v2200_v0  ;;  %v2357_v45 = vsel %vm6972_vm7, %v5768_v56, %v2356_v37  ;;  %6612 = vmatprep.subr.msk.bf16.mxu1 %vm603_vm0, %v2725_v38  ;;  %v2739_v47 = vsel %vm603_vm0, %v2725_v38, 0  ;;  %v2600_v53 = vrot.slane %v2598_v62, 4  ;;  %v5806_v39 = vld [vmem:[%s7230_s13 + $0x38] sm:$0xf]  ;;  %v7463_v37 = vld [vmem:[%s7230_s13 + $0x3c] sm:$0x1] }
  0x86   : > { %v5772_v52 = vcombine.low %v2353_v29, %v2357_v45  ;;  %6450 = vmatpush3.bf16.msra.mxu1 %v2739_v47  ;;  %v2603_v49 = vrot.slane %v2601_v1, 5  ;;  %v2609_v9 = vrot.slane %v2607_v42, 5  ;;  %v2614_v54 = vrot.slane %v2612_v48, 4  ;;  %v5808_v1 = vld [vmem:[%s7230_s13 + $0x40] sm:$0xf] }
  0x87   : > { %6426 = vmatmul.mubr.msk.bf16.gmra.mxu0 %vm590_vm3, %v5756_v13  ;;  %v2615_v10 = vshll.u32 %v5796_v36, 16  ;;  %v2621_v33 = vshll.u32 %v7419_v40, 16  ;;  %v2626_v55 = vshrl.u32 %v5798_v44, 16  ;;  %v2629_v63 = vshll.u32 %v5798_v44, 16  ;;  %v6697_v44 = vld [vmem:[%s7230_s13 + $0x38] ss:$8 sps:$4 sm:$0xff]  }
  0x88   : > { %6436 = vmatmul.mubr.msk.bf16.gmra.mxu1 %vm590_vm3, %v5772_v52  ;;  %6441 = vmatprep.mubr.msk.bf16.mxu0 %vm590_vm3, %v6694_v41  ;;  %v2604_v58 = vor.u32 %v2603_v49, %v2600_v53  ;;  %v2635_v57 = vshll.u32 %v7431_v50, 16  ;;  %v2640_v2 = vshrl.u32 %v5800_v51, 16  ;;  %v2643_v12 = vshll.u32 %v5800_v51, 16  ;;  %v6698_v48 = vld [vmem:[%s8465_s3 + $0x1c] ss:$0 sps:$4 sm:$0xcc]  }
  0x89   : > { %v2617_v14 = vrot.slane %v2615_v10, 5  ;;  %v2628_v7 = vrot.slane %v2626_v55, 4  ;;  %v2631_v16 = vrot.slane %v2629_v63, 5  ;;  %v2623_v21 = vrot.slane %v2621_v33, 5  ;;  %v7478_v53 = vld [vmem:[%s7230_s13 + $0x44] sm:$0x1] }
  0x8a   : > { %v2605_v15 = vrot.slane %v2604_v58, 4  ;;  %v2642_v11 = vrot.slane %v2640_v2, 4  ;;  %v2645_v59 = vrot.slane %v2643_v12, 5  ;;  %v2649_v22 = vshll.u32 %v7439_v61, 16  ;;  %v3221_v63 = vld [vmem:[%s8465_s3 + $0x20] sm:$0x3] }
  0x8b   : > { %v2618_v17 = vor.u32 %v2617_v14, %v2614_v54  ;;  %v2896_v35 = vsel %vm603_vm0, %v7392_v8, 0  ;;  %v2632_v26 = vor.u32 %v2631_v16, %v2628_v7  ;;  %v2637_v23 = vrot.slane %v2635_v57, 5  ;;  %v5819_v54 = vld [vmem:[%s7230_s13 + $0x8] sm:$0xe]  ;;  %v5820_v7 = vld [vmem:[%s7230_s13 + $0x10] sm:$0xe] }
  0x8c   : > { %v2610_v24 = vsel %vm6915_vm4, %v2605_v15, %v2609_v9  ;;  %v2646_v18 = vor.u32 %v2645_v59, %v2642_v11  ;;  %v2651_v25 = vrot.slane %v2649_v22, 5  ;;  %v2654_v27 = vshrl.u32 %v5802_v5, 16 }
  0x8d   : > { %v2619_v28 = vrot.slane %v2618_v17, 4  ;;  %v2633_v60 = vrot.slane %v2632_v26, 4  ;;  %v2657_v31 = vshll.u32 %v5802_v5, 16  ;;  %v2663_v8 = vshll.u32 %v7451_v46, 16 }
  0x8e   : > { %v2668_v30 = vshrl.u32 %v5804_v6, 16  ;;  %v2647_v56 = vrot.slane %v2646_v18, 4  ;;  %v2656_v36 = vrot.slane %v2654_v27, 4  ;;  %v2671_v29 = vshll.u32 %v5804_v6, 16 }
  0x8f   : > { %6442 = vmatmul.mubr.msk.bf16.vlgmr.msra.gmra.mxu0 %vm590_vm3, %v6695_v4  ;;  %v2624_v32 = vsel %vm6915_vm4, %v2619_v28, %v2623_v21  ;;  %v2638_v41 = vsel %vm6915_vm4, %v2633_v60, %v2637_v23  ;;  %v2659_v0 = vrot.slane %v2657_v31, 5  ;;  %v2665_v62 = vrot.slane %v2663_v8, 5  ;;  %v5822_v23 = vld [vmem:[%s7230_s13 + $0x20] sm:$0xe] }
  0x90   : > { %6460 = vmatpush3.bf16.msra.mxu0 %v2896_v35  ;;  %v5810_v38 = vcombine.low %v2610_v24, %v2624_v32  ;;  %6445 = vmatprep.mubr.msk.bf16.mxu0 %vm590_vm3, %v6696_v20  ;;  %v2652_v42 = vsel %vm6915_vm4, %v2647_v56, %v2651_v25  ;;  %v2670_v13 = vrot.slane %v2668_v30, 4  ;;  %v2673_v45 = vrot.slane %v2671_v29, 5  ;;  %v5821_v20 = vld [vmem:[%s7230_s13 + $0x18] sm:$0xe] }
  0x91   : > { %v2677_v47 = vshll.u32 %v7455_v19, 16  ;;  %v5811_v51 = vcombine.low %v2638_v41, %v2652_v42  ;;  %v2660_v52 = vor.u32 %v2659_v0, %v2656_v36  ;;  %v2682_v49 = vshrl.u32 %v5806_v39, 16  ;;  %6615 = vmatprep.subr.msk.bf16.mxu0 %vm603_vm0, %v3221_v63  ;;  %v6699_v56 = vld [vmem:[%s7230_s13 + $0x10] ss:$8 sps:$4 sm:$0xff]   ;;  %v5823_v36 = vld [vmem:[%s7230_s13 + $0x28] sm:$0xe] }
  0x92   : > { %6451 = vmatprep.mubr.msk.bf16.mxu1 %vm590_vm3, %v5810_v38  ;;  %v2685_v9 = vshll.u32 %v5806_v39, 16  ;;  %v2674_v10 = vor.u32 %v2673_v45, %v2670_v13  ;;  %v2691_v55 = vshll.u32 %v7463_v37, 16  ;;  %v2696_v58 = vshrl.u32 %v5808_v1, 16  ;;  %v5824_v41 = vld [vmem:[%s7230_s13 + $0x30] sm:$0xe] }
  0x93   : > { %v2679_v33 = vrot.slane %v2677_v47, 5  ;;  %6452 = vmatmul.mubr.msk.bf16.vlgmr.msra.gmra.mxu1 %vm590_vm3, %v5811_v51  ;;  %v2661_v57 = vrot.slane %v2660_v52, 4  ;;  %v2684_v2 = vrot.slane %v2682_v49, 4  ;;  %v2699_v14 = vshll.u32 %v5808_v1, 16  ;;  %v5826_v13 = vld [vmem:[%s7230_s13 + $0x40] sm:$0xe] }
  0x94   : > { %v2687_v4 = vrot.slane %v2685_v9, 5  ;;  %v2675_v12 = vrot.slane %v2674_v10, 4  ;;  %v2693_v15 = vrot.slane %v2691_v55, 5  ;;  %v2698_v16 = vrot.slane %v2696_v58, 4  ;;  %v6700_v55 = vld [vmem:[%s7230_s13 + $0x20] ss:$8 sps:$4 sm:$0xff]  }
  0x95   : > { %v2705_v11 = vshll.u32 %v7478_v53, 16  ;;  %v2666_v17 = vsel %vm6915_vm4, %v2661_v57, %v2665_v62  ;;  %v2701_v59 = vrot.slane %v2699_v14, 5  ;;  %v3004_v22 = vrot.slane %v6698_v48, 2  ;;  %v5862_v57 = vld [vmem:[%s7230_s13 + $0x18] sm:$0xf] }
  0x96   : > { %v2688_v21 = vor.u32 %v2687_v4, %v2684_v2  ;;  %v2680_v5 = vsel %vm6915_vm4, %v2675_v12, %v2679_v33  ;;  %v5827_v24 = vrot.slane %v5819_v54, 9  ;;  %v2840_v26 = vrot.slane %v7408_v34, 5  ;;  %v6703_v33 = vld [vmem:[%s8465_s3 + $0x20] ss:$0 sps:$4 sm:$0xcc]  }
  0x97   : > { %6446 = vmatmul.mubr.msk.bf16.gmra.mxu0 %vm590_vm3, %v6697_v44  ;;  %v2707_v35 = vrot.slane %v2705_v11, 5  ;;  %v5812_v6 = vcombine.low %v2666_v17, %v2680_v5  ;;  %v2702_v18 = vor.u32 %v2701_v59, %v2698_v16  ;;  %6614 = vmatprep.subr.msk.bf16.mxu1 %vm603_vm0, %v3004_v22  ;;  %v3018_v25 = vsel %vm603_vm0, %v3004_v22, 0  ;;  %v5825_v44 = vld [vmem:[%s7230_s13 + $0x38] sm:$0xe] }
  0x98   : > { %v2689_v28 = vrot.slane %v2688_v21, 4  ;;  %6470 = vmatpush3.bf16.msra.mxu1 %v3018_v25  ;;  %v2841_v27 = vsel %vm6972_vm7, %v5827_v24, %v2840_v26  ;;  %v5828_v60 = vrot.slane %v5820_v7, 9  ;;  %v2844_v31 = vrot.slane %v7419_v40, 5  ;;  %v6701_v4 = vld [vmem:[%s7230_s13 + $0x30] ss:$8 sps:$4 sm:$0xff]  }
  0x99   : > { %v5829_v34 = vrot.slane %v5821_v20, 9  ;;  %6455 = vmatprep.mubr.msk.bf16.mxu1 %vm590_vm3, %v5812_v6  ;;  %v2703_v30 = vrot.slane %v2702_v18, 4  ;;  %v2848_v39 = vrot.slane %v7431_v50, 5  ;;  %v5830_v32 = vrot.slane %v5822_v23, 9  ;;  %v7562_v7 = vld [vmem:[%s7230_s13 + $0x1c] sm:$0x1] }
  0x9a   : > { %v2694_v8 = vsel %vm6915_vm4, %v2689_v28, %v2693_v15  ;;  %v2845_v29 = vsel %vm6972_vm7, %v5828_v60, %v2844_v31  ;;  %v2852_v40 = vrot.slane %v7439_v61, 5  ;;  %v3247_v38 = vsel %vm603_vm0, %v3221_v63, 0  ;;  %v5860_v63 = vld [vmem:[%s7230_s13 + $0x10] sm:$0xf]  ;;  %v3491_v21 = vld [vmem:[%s8465_s3 + $0x24] sm:$0x3] }
  0x9b   : > { %v5831_v0 = vrot.slane %v5823_v36, 9  ;;  %v2708_v62 = vsel %vm6915_vm4, %v2703_v30, %v2707_v35  ;;  %v5835_v1 = vcombine.low %v2841_v27, %v2845_v29  ;;  %v2849_v50 = vsel %vm6972_vm7, %v5829_v34, %v2848_v39  ;;  %v5864_v35 = vld [vmem:[%s7230_s13 + $0x20] sm:$0xf]  ;;  %v5865_v18 = vld [vmem:[%s7230_s13 + $0x24] sm:$0x1] }
  0x9c   : > { %v2856_v42 = vrot.slane %v7451_v46, 5  ;;  %v5813_v45 = vcombine.low %v2694_v8, %v2708_v62  ;;  %v2853_v47 = vsel %vm6972_vm7, %v5830_v32, %v2852_v40  ;;  %v5832_v61 = vrot.slane %v5824_v41, 9  ;;  %v5866_v27 = vld [vmem:[%s7230_s13 + $0x28] sm:$0xf]  ;;  %v5867_v60 = vld [vmem:[%s7230_s13 + $0x2c] sm:$0x1] }
  0x9d   : > { %v2860_v48 = vrot.slane %v7455_v19, 5  ;;  %6461 = vmatprep.mubr.msk.bf16.mxu0 %vm590_vm3, %v5835_v1  ;;  %v5836_v51 = vcombine.low %v2849_v50, %v2853_v47  ;;  %v5833_v52 = vrot.slane %v5825_v44, 9  ;;  %v2864_v49 = vrot.slane %v7463_v37, 5  ;;  %v5885_v41 = vld [vmem:[%s7230_s13 + $0x18] sm:$0xe] }
  0x9e   : > { %v2857_v46 = vsel %vm6972_vm7, %v5831_v0, %v2856_v42  ;;  %6456 = vmatmul.mubr.msk.bf16.gmra.mxu1 %vm590_vm3, %v5813_v45  ;;  %v5834_v9 = vrot.slane %v5826_v13, 9  ;;  %v2868_v54 = vrot.slane %v7478_v53, 5  ;;  %v7550_v53 = vld [vmem:[%s7230_s13 + $0x14] sm:$0x1]  ;;  %v3394_v14 = vrot.slane %v6703_v33, 2 }
  0x9f   : > { %v2861_v19 = vsel %vm6972_vm7, %v5832_v61, %v2860_v48  ;;  %6462 = vmatmul.mubr.msk.bf16.vlgmr.msra.gmra.mxu0 %vm590_vm3, %v5836_v51  ;;  %6471 = vmatprep.mubr.msk.bf16.mxu1 %vm590_vm3, %v6699_v56  ;;  %v2865_v37 = vsel %vm6972_vm7, %v5833_v52, %v2864_v49  ;;  %v3110_v12 = vshrl.u32 %v5860_v63, 16  ;;  %v3113_v15 = vshll.u32 %v5860_v63, 16  ;;  %v5884_v56 = vld [vmem:[%s7230_s13 + $0x10] sm:$0xe]  ;;  %v5886_v42 = vld [vmem:[%s7230_s13 + $0x20] sm:$0xe] }
  0xa0   : > { %v5837_v10 = vcombine.low %v2857_v46, %v2861_v19  ;;  %6480 = vmatpush3.bf16.msra.mxu0 %v3247_v38  ;;  %v2869_v58 = vsel %vm6972_vm7, %v5834_v9, %v2868_v54  ;;  %v3119_v16 = vshll.u32 %v7550_v53, 16  ;;  %v3124_v11 = vshrl.u32 %v5862_v57, 16  ;;  %6616 = vmatprep.subr.msk.bf16.mxu1 %vm603_vm0, %v3394_v14  ;;  %v5887_v61 = vld [vmem:[%s7230_s13 + $0x28] sm:$0xe]  ;;  %v5868_v19 = vld [vmem:[%s7230_s13 + $0x30] sm:$0xf] }
  0xa1   : > { %v5838_v2 = vcombine.low %v2865_v37, %v2869_v58  ;;  %v3127_v20 = vshll.u32 %v5862_v57, 16  ;;  %v3133_v17 = vshll.u32 %v7562_v7, 16  ;;  %v3408_v59 = vsel %vm603_vm0, %v3394_v14, 0  ;;  %6617 = vmatprep.subr.msk.bf16.mxu0 %vm603_vm0, %v3491_v21  ;;  %v6702_v48 = vld [vmem:[%s7230_s13 + $0x40] ss:$8 sps:$4 sm:$0xff]  }
  0xa2   : > { %6465 = vmatprep.mubr.msk.bf16.mxu0 %vm590_vm3, %v5837_v10  ;;  %v3112_v22 = vrot.slane %v3110_v12, 4  ;;  %v3115_v5 = vrot.slane %v3113_v15, 5  ;;  %v7574_v24 = vsel %vm603_vm0, %v3491_v21, 0  ;;  %v3121_v26 = vrot.slane %v3119_v16, 5  ;;  %v5870_v14 = vld [vmem:[%s7230_s13 + $0x38] sm:$0xf] }
  0xa3   : > { %v3126_v23 = vrot.slane %v3124_v11, 4  ;;  %v3129_v6 = vrot.slane %v3127_v20, 5  ;;  %v3135_v28 = vrot.slane %v3133_v17, 5  ;;  %v3138_v31 = vshrl.u32 %v5864_v35, 16  ;;  %v5871_v11 = vld [vmem:[%s7230_s13 + $0x3c] sm:$0x1] }
  0xa4   : > { %v3116_v25 = vor.u32 %v3115_v5, %v3112_v22  ;;  %v3141_v34 = vshll.u32 %v5864_v35, 16  ;;  %v3147_v30 = vshll.u32 %v5865_v18, 16  ;;  %v3152_v39 = vshrl.u32 %v5866_v27, 16  ;;  %v5872_v17 = vld [vmem:[%s7230_s13 + $0x40] sm:$0xf] }
  0xa5   : > { %v3130_v8 = vor.u32 %v3129_v6, %v3126_v23  ;;  %v3155_v32 = vshll.u32 %v5866_v27, 16  ;;  %v3140_v29 = vrot.slane %v3138_v31, 4  ;;  %v3161_v38 = vshll.u32 %v5867_v60, 16  ;;  %v7623_v35 = vld [vmem:[%s7230_s13 + $0x44] sm:$0x1] }
  0xa6   : > { %6472 = vmatmul.mubr.msk.bf16.vlgmr.msra.gmra.mxu1 %vm590_vm3, %v6700_v55  ;;  %v3117_v36 = vrot.slane %v3116_v25, 4  ;;  %v3143_v40 = vrot.slane %v3141_v34, 5  ;;  %v3149_v62 = vrot.slane %v3147_v30, 5  ;;  %v3154_v1 = vrot.slane %v3152_v39, 4  ;;  %v7628_v25 = vld [vmem:[%s7230_s13 + $0x4c] sm:$0x1] }
  0xa7   : > { %6466 = vmatmul.mubr.msk.bf16.gmra.mxu0 %vm590_vm3, %v5838_v2  ;;  %6475 = vmatprep.mubr.msk.bf16.mxu1 %vm590_vm3, %v6701_v4  ;;  %v3131_v0 = vrot.slane %v3130_v8, 4  ;;  %v3157_v50 = vrot.slane %v3155_v32, 5  ;;  %v3163_v45 = vrot.slane %v3161_v38, 5  ;;  %v5892_v47 = vrot.slane %v5884_v56, 9  ;;  %v5888_v27 = vld [vmem:[%s7230_s13 + $0x30] sm:$0xe] }
  0xa8   : > { %6490 = vmatpush3.bf16.msra.mxu1 %v3408_v59  ;;  %v3122_v44 = vsel %vm6915_vm4, %v3117_v36, %v3121_v26  ;;  %v3144_v13 = vor.u32 %v3143_v40, %v3140_v29  ;;  %v3348_v52 = vrot.slane %v7550_v53, 5  ;;  %v5893_v49 = vrot.slane %v5885_v41, 9  ;;  %v7603_v53 = vld [vmem:[%s7230_s13 + $0x34] sm:$0x1]  ;;  %v5874_v26 = vld [vmem:[%s7230_s13 + $0x48] sm:$0xf] }
  0xa9   : > { %v3136_v51 = vsel %vm6915_vm4, %v3131_v0, %v3135_v28  ;;  %v3158_v46 = vor.u32 %v3157_v50, %v3154_v1  ;;  %v3352_v10 = vrot.slane %v7562_v7, 5  ;;  %v5894_v37 = vrot.slane %v5886_v42, 9  ;;  %v5889_v36 = vld [vmem:[%s7230_s13 + $0x38] sm:$0xe]  ;;  %v5890_v0 = vld [vmem:[%s7230_s13 + $0x40] sm:$0xe] }
  0xaa   : > { %v5876_v9 = vcombine.low %v3122_v44, %v3136_v51  ;;  %v3145_v54 = vrot.slane %v3144_v13, 4  ;;  %v3349_v55 = vsel %vm6972_vm7, %v5892_v47, %v3348_v52  ;;  %v3356_v58 = vrot.slane %v5865_v18, 5  ;;  %v5891_v47 = vld [vmem:[%s7230_s13 + $0x48] sm:$0xe] }
  0xab   : > { %v3159_v33 = vrot.slane %v3158_v46, 4  ;;  %v5895_v63 = vrot.slane %v5887_v61, 9  ;;  %v3353_v2 = vsel %vm6972_vm7, %v5893_v49, %v3352_v10  ;;  %v3360_v4 = vrot.slane %v5867_v60, 5  ;;  %v6704_v61 = vld [vmem:[%s8465_s3 + $0x24] ss:$0 sps:$4 sm:$0xcc]  }
  0xac   : > { %6481 = vmatprep.mubr.msk.bf16.mxu0 %vm590_vm3, %v5876_v9  ;;  %v3150_v57 = vsel %vm6915_vm4, %v3145_v54, %v3149_v62  ;;  %v3166_v7 = vshrl.u32 %v5868_v19, 16  ;;  %v5900_v15 = vcombine.low %v3349_v55, %v3353_v2  ;;  %v3357_v16 = vsel %vm6972_vm7, %v5894_v37, %v3356_v58  ;;  %v3889_v49 = vld [vmem:[%s8465_s3 + $0x28] sm:$0x3] }
  0xad   : > { %v3164_v12 = vsel %vm6915_vm4, %v3159_v33, %v3163_v45  ;;  %v3169_v20 = vshll.u32 %v5868_v19, 16  ;;  %v3361_v59 = vsel %vm6972_vm7, %v5895_v63, %v3360_v4  ;;  %v3175_v5 = vshll.u32 %v7603_v53, 16  ;;  %v3600_v4 = vld [vmem:[%s7635_s9] sm:$0xf] }
  0xae   : > { %6476 = vmatmul.mubr.msk.bf16.gmra.mxu1 %vm590_vm3, %v6702_v48  ;;  %v5877_v21 = vcombine.low %v3150_v57, %v3164_v12  ;;  %v3168_v22 = vrot.slane %v3166_v7, 4  ;;  %v5901_v23 = vcombine.low %v3357_v16, %v3361_v59  ;;  %v3180_v28 = vshrl.u32 %v5870_v14, 16  ;;  %v7674_v59 = vld [vmem:[%s7635_s9 + $0xc] sm:$0x1] }
  0xaf   : > { %6491 = vmatprep.mubr.msk.bf16.mxu1 %vm590_vm3, %v5900_v15  ;;  %v3171_v6 = vrot.slane %v3169_v20, 5  ;;  %v3183_v18 = vshll.u32 %v5870_v14, 16  ;;  %v3177_v60 = vrot.slane %v3175_v5, 5  ;;  %v3189_v31 = vshll.u32 %v5871_v11, 16  ;;  %v7665_v14 = vld [vmem:[%s7635_s9 + $0x4] sm:$0x1] }
  0xb0   : > { %6482 = vmatmul.mubr.msk.bf16.vlgmr.msra.gmra.mxu0 %vm590_vm3, %v5877_v21  ;;  %v3194_v34 = vshrl.u32 %v5872_v17, 16  ;;  %v3197_v8 = vshll.u32 %v5872_v17, 16  ;;  %v3182_v39 = vrot.slane %v3180_v28, 4  ;;  %v3203_v56 = vshll.u32 %v7623_v35, 16  ;;  %v3602_v21 = vld [vmem:[%s7635_s9 + $0x8] sm:$0xf] }
  0xb1   : > { %6500 = vmatpush3.bf16.msra.mxu0 %v7574_v24  ;;  %v3172_v30 = vor.u32 %v3171_v6, %v3168_v22  ;;  %v3185_v32 = vrot.slane %v3183_v18, 5  ;;  %v3191_v29 = vrot.slane %v3189_v31, 5  ;;  %v3208_v41 = vshrl.u32 %v5874_v26, 16  ;;  %v3604_v6 = vld [vmem:[%s7635_s9 + $0x10] sm:$0xf] }
  0xb2   : > { %v3196_v40 = vrot.slane %v3194_v34, 4  ;;  %v3199_v38 = vrot.slane %v3197_v8, 5  ;;  %v3205_v50 = vrot.slane %v3203_v56, 5  ;;  %v3211_v42 = vshll.u32 %v5874_v26, 16  ;;  %6619 = vmatprep.subr.msk.bf16.mxu0 %vm603_vm0, %v3889_v49  ;;  %v7684_v28 = vld [vmem:[%s7635_s9 + $0x14] sm:$0x1] }
  0xb3   : > { %v3173_v62 = vrot.slane %v3172_v30, 4  ;;  %v3186_v1 = vor.u32 %v3185_v32, %v3182_v39  ;;  %v3210_v13 = vrot.slane %v3208_v41, 4  ;;  %v3217_v24 = vshll.u32 %v7628_v25, 16  ;;  %v3606_v31 = vld [vmem:[%s7635_s9 + $0x18] sm:$0xf] }
  0xb4   : > { %v3200_v44 = vor.u32 %v3199_v38, %v3196_v40  ;;  %v5896_v45 = vrot.slane %v5888_v27, 9  ;;  %v3213_v46 = vrot.slane %v3211_v42, 5  ;;  %v3364_v52 = vrot.slane %v7603_v53, 5 }
  0xb5   : > { %v3178_v48 = vsel %vm6915_vm4, %v3173_v62, %v3177_v60  ;;  %v3187_v51 = vrot.slane %v3186_v1, 4  ;;  %v3219_v9 = vrot.slane %v3217_v24, 5  ;;  %v5897_v54 = vrot.slane %v5889_v36, 9  ;;  %v6706_v1 = vld [vmem:[%s7635_s9 + $0x10] ss:$8 sps:$4 sm:$0xff]  }
  0xb6   : > { %6492 = vmatmul.mubr.msk.bf16.vlgmr.msra.gmra.mxu1 %vm590_vm3, %v5901_v23  ;;  %v3201_v19 = vrot.slane %v3200_v44, 4  ;;  %v3368_v10 = vrot.slane %v5871_v11, 5  ;;  %v3214_v33 = vor.u32 %v3213_v46, %v3210_v13  ;;  %v3365_v55 = vsel %vm6972_vm7, %v5896_v45, %v3364_v52  ;;  %v6705_v11 = vld [vmem:[%s7635_s9] ss:$8 sps:$4 sm:$0xff]  }
  0xb7   : > { %v3192_v37 = vsel %vm6915_vm4, %v3187_v51, %v3191_v29  ;;  %v5898_v58 = vrot.slane %v5890_v0, 9  ;;  %v3372_v2 = vrot.slane %v7623_v35, 5  ;;  %v5899_v15 = vrot.slane %v5891_v47, 9  ;;  %v7695_v0 = vld [vmem:[%s7635_s9 + $0x1c] sm:$0x1] }
  0xb8   : > { %v5878_v63 = vcombine.low %v3178_v48, %v3192_v37  ;;  %v3206_v53 = vsel %vm6915_vm4, %v3201_v19, %v3205_v50  ;;  %v3369_v57 = vsel %vm6972_vm7, %v5897_v54, %v3368_v10  ;;  %v3215_v7 = vrot.slane %v3214_v33, 4  ;;  %v6707_v48 = vld [vmem:[%s7635_s9 + $0x20] ss:$8 sps:$4 sm:$0xff]   ;;  %v7706_v37 = vld [vmem:[%s7635_s9 + $0x24] sm:$0x1] }
  0xb9   : > { %v5902_v12 = vcombine.low %v3365_v55, %v3369_v57  ;;  %v3376_v16 = vrot.slane %v7628_v25, 5  ;;  %v3373_v20 = vsel %vm6972_vm7, %v5898_v58, %v3372_v2  ;;  %v3744_v17 = vrot.slane %v6704_v61, 2  ;;  %v3608_v19 = vld [vmem:[%s7635_s9 + $0x20] sm:$0xf]  ;;  %v3610_v33 = vld [vmem:[%s7635_s9 + $0x28] sm:$0xf] }
  0xba   : > { %6485 = vmatprep.mubr.msk.bf16.mxu0 %vm590_vm3, %v5878_v63  ;;  %v3617_v22 = vshrl.u32 %v3600_v4, 16  ;;  %v3220_v5 = vsel %vm6915_vm4, %v3215_v7, %v3219_v9  ;;  %v3620_v26 = vshll.u32 %v3600_v4, 16  ;;  %v3626_v23 = vshll.u32 %v7665_v14, 16  ;;  %v7712_v4 = vld [vmem:[%s7635_s9 + $0x2c] sm:$0x1] }
  0xbb   : > { %6495 = vmatprep.mubr.msk.bf16.mxu1 %vm590_vm3, %v5902_v12  ;;  %v3377_v35 = vsel %vm6972_vm7, %v5899_v15, %v3376_v16  ;;  %v5879_v18 = vcombine.low %v3206_v53, %v3220_v5  ;;  %6618 = vmatprep.subr.msk.bf16.mxu1 %vm603_vm0, %v3744_v17  ;;  %v3758_v27 = vsel %vm603_vm0, %v3744_v17, 0  ;;  %v3631_v30 = vshrl.u32 %v3602_v21, 16  ;;  %v3612_v15 = vld [vmem:[%s7635_s9 + $0x30] sm:$0xf] }
  0xbc   : > { %v5903_v25 = vcombine.low %v3373_v20, %v3377_v35  ;;  %v3619_v60 = vrot.slane %v3617_v22, 4  ;;  %6510 = vmatpush3.bf16.msra.mxu1 %v3758_v27  ;;  %v3622_v34 = vrot.slane %v3620_v26, 5  ;;  %v3628_v8 = vrot.slane %v3626_v23, 5  ;;  %v3614_v22 = vld [vmem:[%s7635_s9 + $0x38] sm:$0xf] }
  0xbd   : > { %v3634_v39 = vshll.u32 %v3602_v21, 16  ;;  %6486 = vmatmul.mubr.msk.bf16.gmra.mxu0 %vm590_vm3, %v5879_v18  ;;  %v3640_v32 = vshll.u32 %v7674_v59, 16  ;;  %v3645_v56 = vshrl.u32 %v3604_v6, 16  ;;  %v3648_v36 = vshll.u32 %v3604_v6, 16  ;;  %v7720_v21 = vld [vmem:[%s7635_s9 + $0x34] sm:$0x1] }
  0xbe   : > { %6496 = vmatmul.mubr.msk.bf16.gmra.mxu1 %vm590_vm3, %v5903_v25  ;;  %v3654_v29 = vshll.u32 %v7684_v28, 16  ;;  %6501 = vmatprep.mubr.msk.bf16.mxu0 %vm590_vm3, %v6705_v11  ;;  %v3623_v40 = vor.u32 %v3622_v34, %v3619_v60  ;;  %v3633_v38 = vrot.slane %v3631_v30, 4  ;;  %v3659_v62 = vshrl.u32 %v3606_v31, 16  ;;  %v7725_v6 = vld [vmem:[%s7635_s9 + $0x3c] sm:$0x1] }
  0xbf   : > { %v3636_v41 = vrot.slane %v3634_v39, 5  ;;  %v3915_v50 = vsel %vm603_vm0, %v3889_v49, 0  ;;  %v3642_v42 = vrot.slane %v3640_v32, 5  ;;  %v3647_v44 = vrot.slane %v3645_v56, 4  ;;  %v6708_v18 = vld [vmem:[%s7635_s9 + $0x30] ss:$8 sps:$4 sm:$0xff]  }
  0xc0   : > { %v3650_v13 = vrot.slane %v3648_v36, 5  ;;  %v3624_v24 = vrot.slane %v3623_v40, 4  ;;  %v3661_v47 = vrot.slane %v3659_v62, 4  ;;  %v3662_v61 = vshll.u32 %v3606_v31, 16  ;;  %v3833_v56 = vld [vmem:[%s7635_s9] sm:$0xe] }
  0xc1   : > { %v3637_v45 = vor.u32 %v3636_v41, %v3633_v38  ;;  %v3656_v46 = vrot.slane %v3654_v29, 5  ;;  %v3668_v52 = vshll.u32 %v7695_v0, 16  ;;  %v3859_v9 = vrot.slane %v7665_v14, 5  ;;  %v6709_v34 = vld [vmem:[%s8465_s3 + $0x28] ss:$0 sps:$4 sm:$0xcc]  }
  0xc2   : > { %v3651_v51 = vor.u32 %v3650_v13, %v3647_v44  ;;  %v3629_v49 = vsel %vm6915_vm4, %v3624_v24, %v3628_v8  ;;  %v3664_v10 = vrot.slane %v3662_v61, 5  ;;  %v3673_v63 = vshrl.u32 %v3608_v19, 16  ;;  %v3834_v41 = vld [vmem:[%s7635_s9 + $0x8] sm:$0xe]  ;;  %v4240_v44 = vld [vmem:[%s8465_s3 + $0x2c] sm:$0x3] }
  0xc3   : > { %v3638_v54 = vrot.slane %v3637_v45, 4  ;;  %v3670_v58 = vrot.slane %v3668_v52, 5  ;;  %v3676_v53 = vshll.u32 %v3608_v19, 16  ;;  %v3682_v7 = vshll.u32 %v7706_v37, 16  ;;  %v3835_v61 = vld [vmem:[%s7635_s9 + $0x10] sm:$0xe] }
  0xc4   : > { %v3652_v55 = vrot.slane %v3651_v51, 4  ;;  %v3665_v2 = vor.u32 %v3664_v10, %v3661_v47  ;;  %v3687_v12 = vshrl.u32 %v3610_v33, 16  ;;  %v3675_v20 = vrot.slane %v3673_v63, 4  ;;  %v3836_v19 = vld [vmem:[%s7635_s9 + $0x18] sm:$0xe] }
  0xc5   : > { %v3643_v57 = vsel %vm6915_vm4, %v3638_v54, %v3642_v42  ;;  %6502 = vmatmul.mubr.msk.bf16.vlgmr.msra.gmra.mxu0 %vm590_vm3, %v6706_v1  ;;  %v3678_v17 = vrot.slane %v3676_v53, 5  ;;  %v3684_v35 = vrot.slane %v3682_v7, 5  ;;  %v3690_v23 = vshll.u32 %v3610_v33, 16 }
  0xc6   : > { %v5917_v16 = vcombine.low %v3629_v49, %v3643_v57  ;;  %v3657_v11 = vsel %vm6915_vm4, %v3652_v55, %v3656_v46  ;;  %6520 = vmatpush3.bf16.msra.mxu0 %v3915_v50  ;;  %v3666_v5 = vrot.slane %v3665_v2, 4  ;;  %6505 = vmatprep.mubr.msk.bf16.mxu0 %vm590_vm3, %v6707_v48  ;;  %v3689_v26 = vrot.slane %v3687_v12, 4 }
  0xc7   : > { %v3679_v25 = vor.u32 %v3678_v17, %v3675_v20  ;;  %v3696_v27 = vshll.u32 %v7712_v4, 16  ;;  %v3701_v60 = vshrl.u32 %v3612_v15, 16  ;;  %v3704_v31 = vshll.u32 %v3612_v15, 16  ;;  %6621 = vmatprep.subr.msk.bf16.mxu0 %vm603_vm0, %v4240_v44 }
  0xc8   : > { %6511 = vmatprep.mubr.msk.bf16.mxu1 %vm590_vm3, %v5917_v16  ;;  %v3671_v8 = vsel %vm6915_vm4, %v3666_v5, %v3670_v58  ;;  %v3692_v30 = vrot.slane %v3690_v23, 5  ;;  %v3710_v39 = vshll.u32 %v7720_v21, 16  ;;  %v3715_v32 = vshrl.u32 %v3614_v22, 16 }
  0xc9   : > { %v5918_v36 = vcombine.low %v3657_v11, %v3671_v8  ;;  %v3680_v29 = vrot.slane %v3679_v25, 4  ;;  %v3698_v40 = vrot.slane %v3696_v27, 5  ;;  %v3703_v38 = vrot.slane %v3701_v60, 4  ;;  %v3837_v11 = vld [vmem:[%s7635_s9 + $0x20] sm:$0xe] }
  0xca   : > { %v3693_v62 = vor.u32 %v3692_v30, %v3689_v26  ;;  %v3706_v1 = vrot.slane %v3704_v31, 5  ;;  %v3712_v50 = vrot.slane %v3710_v39, 5  ;;  %v3717_v42 = vrot.slane %v3715_v32, 4  ;;  %v3840_v60 = vld [vmem:[%s7635_s9 + $0x38] sm:$0xe] }
  0xcb   : > { %6512 = vmatmul.mubr.msk.bf16.vlgmr.msra.gmra.mxu1 %vm590_vm3, %v5918_v36  ;;  %v3685_v13 = vsel %vm6915_vm4, %v3680_v29, %v3684_v35  ;;  %v3718_v24 = vshll.u32 %v3614_v22, 16  ;;  %v3724_v45 = vshll.u32 %v7725_v6, 16  ;;  %v4023_v47 = vrot.slane %v6709_v34, 2  ;;  %v6710_v22 = vld [vmem:[%s7635_s9 + $0x8] ss:$8 sps:$4 sm:$0xff]  }
  0xcc   : > { %v3694_v48 = vrot.slane %v3693_v62, 4  ;;  %v3707_v51 = vor.u32 %v3706_v1, %v3703_v38  ;;  %v5926_v46 = vrot.slane %v3833_v56, 9  ;;  %v5927_v52 = vrot.slane %v3834_v41, 9  ;;  %v5959_v56 = vld [vmem:[%s7635_s9 + $0x8] sm:$0xf] }
  0xcd   : > { %6506 = vmatmul.mubr.msk.bf16.gmra.mxu0 %vm590_vm3, %v6708_v18  ;;  %v3720_v49 = vrot.slane %v3718_v24, 5  ;;  %v3726_v54 = vrot.slane %v3724_v45, 5  ;;  %6620 = vmatprep.subr.msk.bf16.mxu1 %vm603_vm0, %v4023_v47  ;;  %v4037_v10 = vsel %vm603_vm0, %v4023_v47, 0  ;;  %v3863_v33 = vrot.slane %v7674_v59, 5  ;;  %v3839_v18 = vld [vmem:[%s7635_s9 + $0x30] sm:$0xe] }
  0xce   : > { %v3699_v55 = vsel %vm6915_vm4, %v3694_v48, %v3698_v40  ;;  %v3708_v58 = vrot.slane %v3707_v51, 4  ;;  %6530 = vmatpush3.bf16.msra.mxu1 %v4037_v10  ;;  %v3860_v63 = vsel %vm6972_vm7, %v5926_v46, %v3859_v9  ;;  %v5928_v53 = vrot.slane %v3835_v61, 9  ;;  %v6714_v29 = vld [vmem:[%s8465_s3 + $0x2c] ss:$0 sps:$4 sm:$0xcc]  }
  0xcf   : > { %v5919_v57 = vcombine.low %v3685_v13, %v3699_v55  ;;  %v3721_v2 = vor.u32 %v3720_v49, %v3717_v42  ;;  %v3864_v7 = vsel %vm6972_vm7, %v5927_v52, %v3863_v33  ;;  %v3867_v59 = vrot.slane %v7684_v28, 5  ;;  %v3838_v28 = vld [vmem:[%s7635_s9 + $0x28] sm:$0xe]  ;;  %v7799_v40 = vld [vmem:[%s7635_s9 + $0xc] sm:$0x1] }
  0xd0   : > { %v3713_v12 = vsel %vm6915_vm4, %v3708_v58, %v3712_v50  ;;  %v5934_v15 = vcombine.low %v3860_v63, %v3864_v7  ;;  %v5929_v16 = vrot.slane %v3836_v19, 9  ;;  %v3871_v14 = vrot.slane %v7695_v0, 5  ;;  %v5961_v62 = vld [vmem:[%s7635_s9 + $0x10] sm:$0xf]  ;;  %v7804_v1 = vld [vmem:[%s7635_s9 + $0x14] sm:$0x1] }
  0xd1   : > { %6515 = vmatprep.mubr.msk.bf16.mxu1 %vm590_vm3, %v5919_v57  ;;  %v3722_v9 = vrot.slane %v3721_v2, 4  ;;  %v3868_v20 = vsel %vm6972_vm7, %v5928_v53, %v3867_v59  ;;  %v4266_v17 = vsel %vm603_vm0, %v4240_v44, 0  ;;  %v5930_v5 = vrot.slane %v3837_v11, 9  ;;  %v6712_v44 = vld [vmem:[%s7635_s9 + $0x28] ss:$8 sps:$4 sm:$0xff]  }
  0xd2   : > { %6521 = vmatprep.mubr.msk.bf16.mxu0 %vm590_vm3, %v5934_v15  ;;  %v3872_v35 = vsel %vm6972_vm7, %v5929_v16, %v3871_v14  ;;  %v3875_v0 = vrot.slane %v7706_v37, 5  ;;  %v5931_v26 = vrot.slane %v3838_v28, 9  ;;  %v3879_v23 = vrot.slane %v7712_v4, 5  ;;  %v4511_v61 = vld [vmem:[%s8465_s3 + $0x30] sm:$0x3] }
  0xd3   : > { %v3727_v25 = vsel %vm6915_vm4, %v3722_v9, %v3726_v54  ;;  %v5935_v27 = vcombine.low %v3868_v20, %v3872_v35  ;;  %v5932_v31 = vrot.slane %v3839_v18, 9  ;;  %v3883_v34 = vrot.slane %v7720_v21, 5  ;;  %v5963_v52 = vld [vmem:[%s7635_s9 + $0x18] sm:$0xf]  ;;  %v5964_v33 = vld [vmem:[%s7635_s9 + $0x1c] sm:$0x1] }
  0xd4   : > { %v5920_v8 = vcombine.low %v3713_v12, %v3727_v25  ;;  %v3876_v30 = vsel %vm6972_vm7, %v5930_v5, %v3875_v0  ;;  %v3880_v37 = vsel %vm6972_vm7, %v5931_v26, %v3879_v23  ;;  %v5933_v4 = vrot.slane %v3840_v60, 9  ;;  %v5965_v57 = vld [vmem:[%s7635_s9 + $0x20] sm:$0xf]  ;;  %v5966_v2 = vld [vmem:[%s7635_s9 + $0x24] sm:$0x1] }
  0xd5   : > { %6522 = vmatmul.mubr.msk.bf16.vlgmr.msra.gmra.mxu0 %vm590_vm3, %v5935_v27  ;;  %v5936_v39 = vcombine.low %v3876_v30, %v3880_v37  ;;  %v3884_v32 = vsel %vm6972_vm7, %v5932_v31, %v3883_v34  ;;  %v3887_v21 = vrot.slane %v7725_v6, 5  ;;  %v4129_v38 = vshrl.u32 %v5959_v56, 16  ;;  %v6711_v6 = vld [vmem:[%s7635_s9 + $0x18] ss:$8 sps:$4 sm:$0xff]   ;;  %v5983_v14 = vld [vmem:[%s7635_s9 + $0x8] sm:$0xe] }
  0xd6   : > { %6516 = vmatmul.mubr.msk.bf16.gmra.mxu1 %vm590_vm3, %v5920_v8  ;;  %6540 = vmatpush3.bf16.msra.mxu0 %v4266_v17  ;;  %v4132_v50 = vshll.u32 %v5959_v56, 16  ;;  %v4138_v42 = vshll.u32 %v7799_v40, 16  ;;  %v4413_v13 = vrot.slane %v6714_v29, 2  ;;  %v4143_v45 = vshrl.u32 %v5961_v62, 16  ;;  %v5984_v28 = vld [vmem:[%s7635_s9 + $0x10] sm:$0xe] }
  0xd7   : > { %6531 = vmatprep.mubr.msk.bf16.mxu1 %vm590_vm3, %v6710_v22  ;;  %6525 = vmatprep.mubr.msk.bf16.mxu0 %vm590_vm3, %v5936_v39  ;;  %v3888_v36 = vsel %vm6972_vm7, %v5933_v4, %v3887_v21  ;;  %v4131_v24 = vrot.slane %v4129_v38, 4  ;;  %v4146_v47 = vshll.u32 %v5961_v62, 16  ;;  %v4152_v46 = vshll.u32 %v7804_v1, 16  ;;  %v5985_v23 = vld [vmem:[%s7635_s9 + $0x18] sm:$0xe] }
  0xd8   : > { %v5937_v41 = vcombine.low %v3884_v32, %v3888_v36  ;;  %v4134_v48 = vrot.slane %v4132_v50, 5  ;;  %v4140_v51 = vrot.slane %v4138_v42, 5  ;;  %6623 = vmatprep.subr.msk.bf16.mxu0 %vm603_vm0, %v4511_v61  ;;  %v7815_v19 = vsel %vm603_vm0, %v4511_v61, 0  ;;  %6622 = vmatprep.subr.msk.bf16.mxu1 %vm603_vm0, %v4413_v13  ;;  %v5986_v31 = vld [vmem:[%s7635_s9 + $0x20] sm:$0xe] }
  0xd9   : > { %v4427_v49 = vsel %vm603_vm0, %v4413_v13, 0  ;;  %v4145_v54 = vrot.slane %v4143_v45, 4  ;;  %v4148_v10 = vrot.slane %v4146_v47, 5  ;;  %v4157_v55 = vshrl.u32 %v5963_v52, 16  ;;  %v6713_v34 = vld [vmem:[%s7635_s9 + $0x38] ss:$8 sps:$4 sm:$0xff]  }
  0xda   : > { %v4135_v63 = vor.u32 %v4134_v48, %v4131_v24  ;;  %v4154_v53 = vrot.slane %v4152_v46, 5  ;;  %v4160_v7 = vshll.u32 %v5963_v52, 16  ;;  %v4166_v15 = vshll.u32 %v5964_v33, 16  ;;  %v5967_v29 = vld [vmem:[%s7635_s9 + $0x28] sm:$0xf] }
  0xdb   : > { %v4149_v59 = vor.u32 %v4148_v10, %v4145_v54  ;;  %v4159_v12 = vrot.slane %v4157_v55, 4  ;;  %v4171_v16 = vshrl.u32 %v5965_v57, 16  ;;  %v4174_v17 = vshll.u32 %v5965_v57, 16  ;;  %v7844_v38 = vld [vmem:[%s7635_s9 + $0x2c] sm:$0x1] }
  0xdc   : > { %v4136_v9 = vrot.slane %v4135_v63, 4  ;;  %v4162_v20 = vrot.slane %v4160_v7, 5  ;;  %v4180_v22 = vshll.u32 %v5966_v2, 16  ;;  %v4168_v35 = vrot.slane %v4166_v15, 5  ;;  %v7855_v24 = vld [vmem:[%s7635_s9 + $0x34] sm:$0x1] }
  0xdd   : > { %6526 = vmatmul.mubr.msk.bf16.gmra.mxu0 %vm590_vm3, %v5937_v41  ;;  %v4150_v5 = vrot.slane %v4149_v59, 4  ;;  %v4173_v0 = vrot.slane %v4171_v16, 4  ;;  %v5991_v26 = vrot.slane %v5983_v14, 9  ;;  %v4176_v27 = vrot.slane %v4174_v17, 5  ;;  %v5973_v55 = vld [vmem:[%s7635_s9 + $0x40] sm:$0xf] }
  0xde   : > { %6532 = vmatmul.mubr.msk.bf16.vlgmr.msra.gmra.mxu1 %vm590_vm3, %v6711_v6  ;;  %v4141_v18 = vsel %vm6915_vm4, %v4136_v9, %v4140_v51  ;;  %v4163_v25 = vor.u32 %v4162_v20, %v4159_v12  ;;  %v4182_v60 = vrot.slane %v4180_v22, 5  ;;  %v4367_v30 = vrot.slane %v7799_v40, 5  ;;  %v5971_v51 = vld [vmem:[%s7635_s9 + $0x38] sm:$0xf]  ;;  %v7876_v59 = vld [vmem:[%s7635_s9 + $0x44] sm:$0x1] }
  0xdf   : > { %v7820_v58 = vpop.f32.mrf.mxu1  ;;  %6535 = vmatprep.mubr.msk.bf16.mxu1 %vm590_vm3, %v6712_v44  ;;  %6550 = vmatpush3.bf16.msra.mxu1 %v4427_v49  ;;  %v4155_v8 = vsel %vm6915_vm4, %v4150_v5, %v4154_v53  ;;  %v5992_v37 = vrot.slane %v5984_v28, 9  ;;  %v4371_v4 = vrot.slane %v7804_v1, 5  ;;  %v4177_v56 = vor.u32 %v4176_v27, %v4173_v0  ;;  %v5969_v1 = vld [vmem:[%s7635_s9 + $0x30] sm:$0xf]  ;;  %v5987_v9 = vld [vmem:[%s7635_s9 + $0x28] sm:$0xe] }
  0xe0   : > { %v5975_v32 = vcombine.low %v4141_v18, %v4155_v8  ;;  %v4164_v21 = vrot.slane %v4163_v25, 4  ;;  %v5993_v36 = vrot.slane %v5985_v23, 9  ;;  %v4368_v6 = vsel %vm6972_vm7, %v5991_v26, %v4367_v30  ;;  %v5989_v30 = vld [vmem:[%s7635_s9 + $0x38] sm:$0xe] }
  0xe1   : > { %v7826_v11 = vpop.f32.mrf.mxu1  ;;  %v4372_v40 = vsel %vm6972_vm7, %v5992_v37, %v4371_v4  ;;  %v4375_v41 = vrot.slane %v5964_v33, 5  ;;  %v5994_v62 = vrot.slane %v5986_v31, 9  ;;  %v4178_v42 = vrot.slane %v4177_v56, 4  ;;  %v7869_v33 = vld [vmem:[%s7635_s9 + $0x3c] sm:$0x1] }
  0xe2   : > { %6541 = vmatprep.mubr.msk.bf16.mxu0 %vm590_vm3, %v5975_v32  ;;  %v4169_v50 = vsel %vm6915_vm4, %v4164_v21, %v4168_v35  ;;  %v5999_v44 = vcombine.low %v4368_v6, %v4372_v40  ;;  %v4379_v13 = vrot.slane %v5966_v2, 5  ;;  %v4185_v47 = vshrl.u32 %v5967_v29, 16  ;;  %v5988_v35 = vld [vmem:[%s7635_s9 + $0x30] sm:$0xe]  ;;  %v5990_v37 = vld [vmem:[%s7635_s9 + $0x40] sm:$0xe] }
  0xe3   : > { %v7840_v39 = vpop.f32.mrf.mxu1  ;;  %v4376_v45 = vsel %vm6972_vm7, %v5993_v36, %v4375_v41  ;;  %v4188_v61 = vshll.u32 %v5967_v29, 16  ;;  %v4194_v48 = vshll.u32 %v7844_v38, 16  ;;  %v4183_v52 = vsel %vm6915_vm4, %v4178_v42, %v4182_v60  ;;  %v6715_v4 = vld [vmem:[%s8465_s3 + $0x30] ss:$0 sps:$4 sm:$0xcc]  }
  0xe4   : > { %v4380_v49 = vsel %vm6972_vm7, %v5994_v62, %v4379_v13  ;;  %v4199_v54 = vshrl.u32 %v5969_v1, 16  ;;  %v4202_v10 = vshll.u32 %v5969_v1, 16  ;;  %v5976_v53 = vcombine.low %v4169_v50, %v4183_v52  ;;  %v4909_v29 = vld [vmem:[%s8465_s3 + $0x34] sm:$0x3] }
  0xe5   : > { %v7861_v46 = vpop.f32.mrf.mxu1  ;;  %v6000_v57 = vcombine.low %v4376_v45, %v4380_v49  ;;  %v4187_v2 = vrot.slane %v4185_v47, 4  ;;  %v4190_v7 = vrot.slane %v4188_v61, 5  ;;  %v4196_v12 = vrot.slane %v4194_v48, 5 }
  0xe6   : > { %6536 = vmatmul.mubr.msk.bf16.gmra.mxu1 %vm590_vm3, %v6713_v34  ;;  %v4201_v15 = vrot.slane %v4199_v54, 4  ;;  %v4204_v16 = vrot.slane %v4202_v10, 5  ;;  %v4208_v14 = vshll.u32 %v7855_v24, 16  ;;  %6542 = vmatmul.mubr.msk.bf16.vlgmr.msra.gmra.mxu0 %vm590_vm3, %v5976_v53  ;;  %v4213_v22 = vshrl.u32 %v5971_v51, 16  ;;  %v6024_v53 = vld [vmem:[%s7635_s9 + $0x10] sm:$0xf] }
  0xe7   : > { %6551 = vmatprep.mubr.msk.bf16.mxu1 %vm590_vm3, %v5999_v44  ;;  %v4191_v17 = vor.u32 %v4190_v7, %v4187_v2  ;;  %v4216_v28 = vshll.u32 %v5971_v51, 16  ;;  %v4222_v5 = vshll.u32 %v7869_v33, 16  ;;  %6560 = vmatpush3.bf16.msra.mxu0 %v7815_v19  ;;  %v4227_v18 = vshrl.u32 %v5973_v55, 16 }
  0xe8   : > { %v4205_v26 = vor.u32 %v4204_v16, %v4201_v15  ;;  %v4210_v23 = vrot.slane %v4208_v14, 5  ;;  %v4230_v25 = vshll.u32 %v5973_v55, 16  ;;  %v4215_v31 = vrot.slane %v4213_v22, 4  ;;  %6625 = vmatprep.subr.msk.bf16.mxu0 %vm603_vm0, %v4909_v29  ;;  %v6716_v55 = vld [vmem:[%s7635_s9 + $0x10] ss:$8 sps:$4 sm:$0xff]  }
  0xe9   : > { %v7872_v63 = vpop.f32.mrf.mxu0  ;;  %v4192_v60 = vrot.slane %v4191_v17, 4  ;;  %v4218_v34 = vrot.slane %v4216_v28, 5  ;;  %v4224_v8 = vrot.slane %v4222_v5, 5  ;;  %v4229_v19 = vrot.slane %v4227_v18, 4  ;;  %v6026_v15 = vld [vmem:[%s7635_s9 + $0x18] sm:$0xf] }
  0xea   : > { %v4206_v21 = vrot.slane %v4205_v26, 4  ;;  %v4232_v56 = vrot.slane %v4230_v25, 5  ;;  %v4236_v36 = vshll.u32 %v7876_v59, 16  ;;  %v5995_v62 = vrot.slane %v5987_v9, 9  ;;  %v6028_v28 = vld [vmem:[%s7635_s9 + $0x20] sm:$0xf] }
  0xeb   : > { %v7880_v20 = vpop.f32.mrf.mxu0  ;;  %v4197_v40 = vsel %vm6915_vm4, %v4192_v60, %v4196_v12  ;;  %v4219_v41 = vor.u32 %v4218_v34, %v4215_v31  ;;  %v4383_v1 = vrot.slane %v7844_v38, 5  ;;  %v5996_v45 = vrot.slane %v5988_v35, 9  ;;  %v7956_v25 = vld [vmem:[%s7635_s9 + $0x24] sm:$0x1] }
  0xec   : > { %v4211_v42 = vsel %vm6915_vm4, %v4206_v21, %v4210_v23  ;;  %v4233_v44 = vor.u32 %v4232_v56, %v4229_v19  ;;  %v4238_v13 = vrot.slane %v4236_v36, 5  ;;  %v4387_v48 = vrot.slane %v7855_v24, 5 }
  0xed   : > { %v7885_v0 = vpop.f32.mrf.mxu1  ;;  %v7888_v27 = vpop.f32.mrf.mxu0  ;;  %v5977_v47 = vcombine.low %v4197_v40, %v4211_v42  ;;  %v4220_v61 = vrot.slane %v4219_v41, 4  ;;  %v4384_v38 = vsel %vm6972_vm7, %v5995_v62, %v4383_v1  ;;  %v5997_v49 = vrot.slane %v5989_v30, 9  ;;  %v7976_v41 = vld [vmem:[%s7635_s9 + $0x2c] sm:$0x1]  ;;  %v6717_v42 = vld [vmem:[%s7635_s9 + $0x20] ss:$8 sps:$4 sm:$0xff]  }
  0xee   : > { %6552 = vmatmul.mubr.msk.bf16.vlgmr.msra.gmra.mxu1 %vm590_vm3, %v6000_v57  ;;  %v4234_v52 = vrot.slane %v4233_v44, 4  ;;  %v4391_v54 = vrot.slane %v7869_v33, 5  ;;  %v5998_v10 = vrot.slane %v5990_v37, 9  ;;  %v4388_v24 = vsel %vm6972_vm7, %v5996_v45, %v4387_v48  ;;  %v7929_v33 = vld [vmem:[%s7635_s9 + $0x14] sm:$0x1] }
  0xef   : > { %v7895_v32 = vpop.f32.mrf.mxu1  ;;  %v7901_v6 = vpop.f32.mrf.mxu0  ;;  %6545 = vmatprep.mubr.msk.bf16.mxu0 %vm590_vm3, %v5977_v47  ;;  %v4225_v2 = vsel %vm6915_vm4, %v4220_v61, %v4224_v8  ;;  %v4395_v7 = vrot.slane %v7876_v59, 5  ;;  %v4764_v12 = vrot.slane %v6715_v4, 2  ;;  %v6001_v9 = vcombine.low %v4384_v38, %v4388_v24  ;;  %v7943_v59 = vld [vmem:[%s7635_s9 + $0x1c] sm:$0x1] }
  0xf0   : > { %v4239_v14 = vsel %vm6915_vm4, %v4234_v52, %v4238_v13  ;;  %v4392_v17 = vsel %vm6972_vm7, %v5997_v49, %v4391_v54  ;;  %v7940_v22 = vadd.f32 %v7820_v58, %v7872_v63  ;;  %v7953_v18 = vsel %vm603_vm0, %v4909_v29, 0  ;;  %v6030_v58 = vld [vmem:[%s7635_s9 + $0x28] sm:$0xf]  ;;  %v6718_v52 = vld [vmem:[%s7635_s9 + $0x30] ss:$8 sps:$4 sm:$0xff]  }
  0xf1   : > { %v7907_v50 = vpop.f32.mrf.mxu1  ;;  %v5978_v35 = vcombine.low %v4225_v2, %v4239_v14  ;;  %v4396_v26 = vsel %vm6972_vm7, %v5998_v10, %v4395_v7  ;;  %6624 = vmatprep.subr.msk.bf16.mxu1 %vm603_vm0, %v4764_v12  ;;  %v4778_v23 = vsel %vm603_vm0, %v4764_v12, 0  ;;  %6555 = vmatprep.mubr.msk.bf16.mxu1 %vm590_vm3, %v6001_v9  ;;  %v4637_v31 = vshrl.u32 %v6024_v53, 16  ;;  %v6032_v2 = vld [vmem:[%s7635_s9 + $0x30] sm:$0xf]  ;;  %v7994_v14 = vld [vmem:[%s7635_s9 + $0x34] sm:$0x1] }
  0xf2   : > { %v6002_v60 = vcombine.low %v4392_v17, %v4396_v26  ;;  %6570 = vmatpush3.bf16.msra.mxu1 %v4778_v23  ;;  %v4640_v34 = vshll.u32 %v6024_v53, 16  ;;  %v4646_v8 = vshll.u32 %v7929_v33, 16  ;;  %v4651_v37 = vshrl.u32 %v6026_v15, 16 }
  0xf3   : > { %v7915_v51 = vpop.f32.mrf.mxu1  ;;  %6546 = vmatmul.mubr.msk.bf16.gmra.mxu0 %vm590_vm3, %v5978_v35  ;;  %v4654_v4 = vshll.u32 %v6026_v15, 16  ;;  %v4660_v21 = vshll.u32 %v7943_v59, 16  ;;  %v7969_v19 = vadd.f32 %v7826_v11, %v7880_v20  ;;  %v4639_v36 = vrot.slane %v4637_v31, 4 }
  0xf4   : > { %v7920_v57 = vpop.f32.mrf.mxu0  ;;  %6561 = vmatprep.mubr.msk.bf16.mxu0 %vm590_vm3, %v6716_v55  ;;  %v4642_v29 = vrot.slane %v4640_v34, 5  ;;  %v4648_v40 = vrot.slane %v4646_v8, 5  ;;  %v4665_v62 = vshrl.u32 %v6028_v28, 16  ;;  %v4653_v44 = vrot.slane %v4651_v37, 4 }
  0xf5   : > { %v7932_v16 = vpop.f32.mrf.mxu1  ;;  %v4656_v11 = vrot.slane %v4654_v4, 5  ;;  %v4662_v20 = vrot.slane %v4660_v21, 5  ;;  %v4668_v13 = vshll.u32 %v6028_v28, 16  ;;  %v4674_v38 = vshll.u32 %v7956_v25, 16 }
  0xf6   : > { %v7946_v5 = vpop.f32.mrf.mxu0  ;;  %6556 = vmatmul.mubr.msk.bf16.gmra.mxu1 %vm590_vm3, %v6002_v60  ;;  %v4643_v47 = vor.u32 %v4642_v29, %v4639_v36  ;;  %v4667_v61 = vrot.slane %v4665_v62, 4  ;;  %v4679_v48 = vshrl.u32 %v6030_v58, 16  ;;  %v4682_v55 = vshll.u32 %v6030_v58, 16  ;;  %v6034_v58 = vld [vmem:[%s7635_s9 + $0x38] sm:$0xf] }
  0xf7   : > { %v7959_v63 = vpop.f32.mrf.mxu1  ;;  %v4657_v54 = vor.u32 %v4656_v11, %v4653_v44  ;;  %v4670_v10 = vrot.slane %v4668_v13, 5  ;;  %v4688_v53 = vshll.u32 %v7976_v41, 16  ;;  %v4676_v7 = vrot.slane %v4674_v38, 5  ;;  %v8032_v13 = vld [vmem:[%s7635_s9 + $0x44] sm:$0x1] }
  0xf8   : > { %v7963_v30 = vpop.f32.mrf.mxu0  ;;  %v4644_v24 = vrot.slane %v4643_v47, 4  ;;  %v4681_v12 = vrot.slane %v4679_v48, 4  ;;  %v7991_v15 = vadd.f32 %v7840_v39, %v7888_v27  ;;  %v4684_v26 = vrot.slane %v4682_v55, 5 }
  0xf9   : > { %v7971_v56 = vpop.f32.mrf.mxu1  ;;  %v4658_v28 = vrot.slane %v4657_v54, 4  ;;  %v4671_v35 = vor.u32 %v4670_v10, %v4667_v61  ;;  %v4690_v23 = vrot.slane %v4688_v53, 5  ;;  %v8005_v31 = vadd.f32 %v7861_v46, %v7901_v6  ;;  %v8019_v46 = vld [vmem:[%s7635_s9 + $0x3c] sm:$0x1]  ;;  %v6719_v53 = vld [vmem:[%s7635_s9 + $0x40] ss:$8 sps:$4 sm:$0xff]  }
  0xfa   : > { %v7978_v1 = vpop.f32.mrf.mxu0  ;;  %v4649_v60 = vsel %vm6915_vm4, %v4644_v24, %v4648_v40  ;;  %v8009_v39 = vadd.f32 %v7885_v0, %v7920_v57  ;;  %v4693_v27 = vshrl.u32 %v6032_v2, 16  ;;  %v4685_v21 = vor.u32 %v4684_v26, %v4681_v12  ;;  %v6036_v40 = vld [vmem:[%s7635_s9 + $0x40] sm:$0xf] }
  0xfb   : > { %v7981_v45 = vpop.f32.mrf.mxu1  ;;  %6562 = vmatmul.mubr.msk.bf16.vlgmr.msra.gmra.mxu0 %vm590_vm3, %v6717_v42  ;;  %v4663_v37 = vsel %vm6915_vm4, %v4658_v28, %v4662_v20  ;;  %v4672_v4 = vrot.slane %v4671_v35, 4  ;;  %v4696_v6 = vshll.u32 %v6032_v2, 16  ;;  %v4702_v36 = vshll.u32 %v7994_v14, 16 }
  0xfc   : > { %v7985_v49 = vpop.f32.mrf.mxu0  ;;  %6580 = vmatpush3.bf16.msra.mxu0 %v7953_v18  ;;  %v6040_v0 = vcombine.low %v4649_v60, %v4663_v37  ;;  %6565 = vmatprep.mubr.msk.bf16.mxu0 %vm590_vm3, %v6718_v52  ;;  %v4695_v57 = vrot.slane %v4693_v27, 4  ;;  %v4707_v29 = vshrl.u32 %v6034_v58, 16  ;;  %v4686_v11 = vrot.slane %v4685_v21, 4  ;;  %v6038_v52 = vld [vmem:[%s7635_s9 + $0x48] sm:$0xf] }
  0xfd   : > { %v4677_v44 = vsel %vm6915_vm4, %v4672_v4, %v4676_v7  ;;  %v4698_v18 = vrot.slane %v4696_v6, 5  ;;  %v4710_v20 = vshll.u32 %v6034_v58, 16  ;;  %v4704_v47 = vrot.slane %v4702_v36, 5  ;;  %v8049_v7 = vld [vmem:[%s7635_s9 + $0x4c] sm:$0x1] }
  0xfe   : > { %v7996_v9 = vpop.f32.mrf.mxu0  ;;  %v7998_v17 = vpop.f32.mrf.mxu1  ;;  %6571 = vmatprep.mubr.msk.bf16.mxu1 %vm590_vm3, %v6040_v0  ;;  %v4709_v61 = vrot.slane %v4707_v29, 4  ;;  %v4716_v38 = vshll.u32 %v8019_v46, 16  ;;  %v8038_v48 = vadd.f32 %v7895_v32, %v7946_v5  ;;  %v4691_v55 = vsel %vm6915_vm4, %v4686_v11, %v4690_v23  ;;  %v6049_v5 = vld [vmem:[%s7635_s9 + $0x10] sm:$0xe]  ;;  %v6050_v21 = vld [vmem:[%s7635_s9 + $0x18] sm:$0xe] }
  0xff   : > { %v4699_v2 = vor.u32 %v4698_v18, %v4695_v57  ;;  %v4712_v24 = vrot.slane %v4710_v20, 5  ;;  %v4721_v12 = vshrl.u32 %v6036_v40, 16  ;;  %v6041_v28 = vcombine.low %v4677_v44, %v4691_v55  ;;  %v8067_v44 = vld [vmem:[%s8466_s4] sm:$0x3] }
 0x100   : > { %v8011_v34 = vpop.f32.mrf.mxu0  ;;  %v8013_v8 = vpop.f32.mrf.mxu1  ;;  %v4718_v35 = vrot.slane %v4716_v38, 5  ;;  %v4724_v26 = vshll.u32 %v6036_v40, 16  ;;  %v4730_v32 = vshll.u32 %v8032_v13, 16  ;;  %v4735_v4 = vshrl.u32 %v6038_v52, 16  ;;  %6626 = vmatprep.subr.msk.bf16.mxu1 %vm603_vm0, %v8067_v44 }
 0x101   : > { %v4700_v27 = vrot.slane %v4699_v2, 4  ;;  %v4713_v37 = vor.u32 %v4712_v24, %v4709_v61  ;;  %v4723_v23 = vrot.slane %v4721_v12, 4  ;;  %6572 = vmatmul.mubr.msk.bf16.vlgmr.msra.gmra.mxu1 %vm590_vm3, %v6041_v28  ;;  %v4738_v57 = vshll.u32 %v6038_v52, 16 }
 0x102   : > { %v8025_v62 = vpop.f32.mrf.mxu0  ;;  %v8027_v42 = vpop.f32.mrf.mxu1  ;;  %v4726_v6 = vrot.slane %v4724_v26, 5  ;;  %v4732_v0 = vrot.slane %v4730_v32, 5  ;;  %v4744_v36 = vshll.u32 %v8049_v7, 16  ;;  %v4737_v20 = vrot.slane %v4735_v4, 4  ;;  %v6052_v26 = vld [vmem:[%s7635_s9 + $0x28] sm:$0xe] }
 0x103   : > { %6566 = vmatmul.mubr.msk.bf16.gmra.mxu0 %vm590_vm3, %v6719_v53  ;;  %v4705_v11 = vsel %vm6915_vm4, %v4700_v27, %v4704_v47  ;;  %v4714_v18 = vrot.slane %v4713_v37, 4  ;;  %v8074_v61 = vadd.f32 %v7907_v50, %v7963_v30  ;;  %v4740_v52 = vrot.slane %v4738_v57, 5  ;;  %v6051_v53 = vld [vmem:[%s7635_s9 + $0x20] sm:$0xe]  ;;  %v6053_v57 = vld [vmem:[%s7635_s9 + $0x30] sm:$0xe] }
 0x104   : > { %v8041_v54 = vpop.f32.mrf.mxu0  ;;  %v8043_v10 = vpop.f32.mrf.mxu1  ;;  %v4727_v38 = vor.u32 %v4726_v6, %v4723_v23  ;;  %v4746_v55 = vrot.slane %v4744_v36, 5  ;;  %v8080_v2 = vadd.f32 %v7915_v51, %v7978_v1  ;;  %v6057_v50 = vrot.slane %v6049_v5, 9 }
 0x105   : > { %v4719_v12 = vsel %vm6915_vm4, %v4714_v18, %v4718_v35  ;;  %v4879_v30 = vrot.slane %v7929_v33, 5  ;;  %v6058_v28 = vrot.slane %v6050_v21, 9  ;;  %v4741_v37 = vor.u32 %v4740_v52, %v4737_v20 }
 0x106   : > { %v8053_v58 = vpop.f32.mrf.mxu0  ;;  %v8055_v60 = vpop.f32.mrf.mxu1  ;;  %v6042_v32 = vcombine.low %v4705_v11, %v4719_v12  ;;  %v4728_v27 = vrot.slane %v4727_v38, 4  ;;  %v4883_v51 = vrot.slane %v7943_v59, 5  ;;  %v926_v4 = vadd.f32 %v7985_v49, %v7940_v22  ;;  %v6055_v12 = vld [vmem:[%s7635_s9 + $0x40] sm:$0xe] }
 0x107   : > { %v4880_v23 = vsel %vm6972_vm7, %v6057_v50, %v4879_v30  ;;  %v6059_v35 = vrot.slane %v6051_v53, 9  ;;  %v4887_v5 = vrot.slane %v7956_v25, 5  ;;  %v4742_v21 = vrot.slane %v4741_v37, 4 }
 0x108   : > { %v8060_v29 = vpop.f32.mrf.mxu0  ;;  %v8062_v40 = vpop.f32.mrf.mxu1  ;;  %6575 = vmatprep.mubr.msk.bf16.mxu1 %vm590_vm3, %v6042_v32  ;;  %v4733_v33 = vsel %vm6915_vm4, %v4728_v27, %v4732_v0  ;;  %v4884_v59 = vsel %vm6972_vm7, %v6058_v28, %v4883_v51  ;;  %v6060_v6 = vrot.slane %v6052_v26, 9  ;;  %v4891_v25 = vrot.slane %v7976_v41, 5  ;;  %v6054_v0 = vld [vmem:[%s7635_s9 + $0x38] sm:$0xe] }
 0x109   : > { %v6065_v18 = vcombine.low %v4880_v23, %v4884_v59  ;;  %v4888_v22 = vsel %vm6972_vm7, %v6059_v35, %v4887_v5  ;;  %v924_v49 = vadd.f32 %v7996_v9, %v7969_v19  ;;  %v4747_v20 = vsel %vm6915_vm4, %v4742_v21, %v4746_v55  ;;  %v6056_v55 = vld [vmem:[%s7635_s9 + $0x48] sm:$0xe] }
 0x10a   : > { %v8083_v24 = vpop.f32.mrf.mxu0  ;;  %v8085_v47 = vpop.f32.mrf.mxu1  ;;  %v1048_v38 = vadd.f32 %v7932_v16, %v926_v4  ;;  %v927_v52 = vadd.f32 %v8011_v34, %v7991_v15  ;;  %v925_v53 = vadd.f32 %v8025_v62, %v8005_v31  ;;  %v6043_v30 = vcombine.low %v4733_v33, %v4747_v20 }
 0x10b   : > { %6581 = vmatprep.mubr.msk.bf16.mxu0 %vm590_vm3, %v6065_v18  ;;  %v4892_v19 = vsel %vm6972_vm7, %v6060_v6, %v4891_v25  ;;  %v1046_v41 = vadd.f32 %v7959_v63, %v924_v49  ;;  %v6061_v9 = vrot.slane %v6053_v57, 9  ;;  %v4895_v15 = vrot.slane %v7994_v14, 5  ;;  %v6081_v25 = vld [vmem:[%s7230_s13 + $0x8] sm:$0xf]  ;;  %v6082_v49 = vld [vmem:[%s7230_s13 + $0xc] sm:$0x1] }
 0x10c   : > { %v6363_v1 = vpop.f32.mrf.mxu0  ;;  %v8103_v11 = vpop.f32.mrf.mxu1  ;;  %v6066_v28 = vcombine.low %v4888_v22, %v4892_v19  ;;  %v1049_v16 = vadd.f32 %v7971_v56, %v927_v52  ;;  %v6062_v34 = vrot.slane %v6054_v0, 9  ;;  %6576 = vmatmul.mubr.msk.bf16.gmra.mxu1 %vm590_vm3, %v6043_v30  ;;  %v4899_v62 = vrot.slane %v8019_v46, 5 }
 0x10d   : > { %v930_v32 = vadd.f32 %v8041_v54, %v8009_v39  ;;  %v1047_v27 = vadd.f32 %v7981_v45, %v925_v53  ;;  %v6063_v63 = vrot.slane %v6055_v12, 9  ;;  %v4896_v56 = vsel %vm6972_vm7, %v6061_v9, %v4895_v15 }
 0x10e   : > { %v1244_v36 = vpop.f32.mrf.mxu0  ;;  %6582 = vmatmul.mubr.msk.bf16.vlgmr.msra.gmra.mxu0 %vm590_vm3, %v6066_v28  ;;  %v4903_v14 = vrot.slane %v8032_v13, 5  ;;  %v6064_v37 = vrot.slane %v6056_v55, 9  ;;  %v4907_v51 = vrot.slane %v8049_v7, 5  ;;  %v4900_v46 = vsel %vm6972_vm7, %v6062_v34, %v4899_v62  ;;  %v6085_v55 = vld [vmem:[%s7230_s13 + $0x18] sm:$0xf] }
 0x10f   : > { %v928_v39 = vadd.f32 %v8053_v58, %v8038_v48  ;;  %v1052_v45 = vadd.f32 %v7998_v17, %v930_v32  ;;  %v931_v54 = vadd.f32 %v8060_v29, %v8074_v61  ;;  %v6067_v35 = vcombine.low %v4896_v56, %v4900_v46  ;;  %v6086_v28 = vld [vmem:[%s7230_s13 + $0x1c] sm:$0x1]  ;;  %v6087_v32 = vld [vmem:[%s7230_s13 + $0x20] sm:$0xf] }
 0x110   : > { %v6364_v50 = vpop.f32.mrf.mxu0  ;;  %v4904_v13 = vsel %vm6972_vm7, %v6063_v63, %v4903_v14  ;;  %v4908_v7 = vsel %vm6972_vm7, %v6064_v37, %v4907_v51  ;;  %v929_v5 = vadd.f32 %v8083_v24, %v8080_v2  ;;  %v1277_v29 = vadd.f32 %v6363_v1, %v1048_v38  ;;  %v6084_v38 = vld [vmem:[%s7230_s13 + $0x14] sm:$0x1] }
 0x111   : > { %v6377_v31 = vpop.f32.mrf.mxu1  ;;  %v6068_v48 = vcombine.low %v4904_v13, %v4908_v7  ;;  %v1050_v17 = vadd.f32 %v8013_v8, %v928_v39  ;;  %v1053_v58 = vadd.f32 %v8027_v42, %v931_v54  ;;  %6585 = vmatprep.mubr.msk.bf16.mxu0 %vm590_vm3, %v6067_v35  ;;  %v1275_v3 = vadd.f32 %v1244_v36, %v1046_v41  ;;  %v6083_v8 = vld [vmem:[%s7230_s13 + $0x10] sm:$0xf]  ;;  %v6088_v13 = vld [vmem:[%s7230_s13 + $0x24] sm:$0x1] }
 0x112   : > { %v1247_v26 = vpop.f32.mrf.mxu0  ;;  %v1051_v61 = vadd.f32 %v8043_v10, %v929_v5  ;;  %v1278_v59 = vadd.f32 %v6364_v50, %v1049_v16  ;;  %v1438_v24 = vadd.f32 %v8055_v60, %v1277_v29  ;;  %v5204_v20 = vsel %vm603_vm0, %v8067_v44, 0  ;;  %v6089_v29 = vld [vmem:[%s7230_s13 + $0x28] sm:$0xf] }
 0x113   : > { %v1421_v4 = vpop.f32.mrf.mxu1  ;;  %v1276_v6 = vadd.f32 %v1247_v26, %v1047_v27  ;;  %v1436_v42 = vadd.f32 %v8062_v40, %v1275_v3  ;;  %6590 = vmatpush3.bf16.msra.mxu1 %v5204_v20  ;;  %v5076_v50 = vshll.u32 %v6082_v49, 16  ;;  %v5081_v30 = vshrl.u32 %v6083_v8, 16  ;;  %v6090_v49 = vld [vmem:[%s7230_s13 + $0x2c] sm:$0x1] }
 0x114   : > { %v6367_v23 = vpop.f32.mrf.mxu0  ;;  %v1439_v1 = vadd.f32 %v8085_v47, %v1278_v59  ;;  %v5067_v47 = vshrl.u32 %v6081_v25, 16  ;;  %v5084_v41 = vshll.u32 %v6083_v8, 16  ;;  %v5090_v9 = vshll.u32 %v6084_v38, 16 }
 0x115   : > { %v6378_v21 = vpop.f32.mrf.mxu1  ;;  %v1281_v57 = vadd.f32 %v6367_v23, %v1052_v45  ;;  %v1437_v0 = vadd.f32 %v8103_v11, %v1276_v6  ;;  %v5070_v11 = vshll.u32 %v6081_v25, 16  ;;  %v5083_v62 = vrot.slane %v5081_v30, 4 }
 0x116   : > { %v1260_v33 = vpop.f32.mrf.mxu0  ;;  %6586 = vmatmul.mubr.msk.bf16.gmra.mxu0 %vm590_vm3, %v6068_v48  ;;  %v5069_v34 = vrot.slane %v5067_v47, 4  ;;  %v5086_v56 = vrot.slane %v5084_v41, 5  ;;  %v5092_v14 = vrot.slane %v5090_v9, 5  ;;  %v5098_v46 = vshll.u32 %v6085_v55, 16 }
 0x117   : > { %v1279_v18 = vadd.f32 %v1260_v33, %v1050_v17  ;;  %v1424_v36 = vpop.f32.mrf.mxu1  ;;  %v1442_v60 = vadd.f32 %v6377_v31, %v1281_v57  ;;  %v5072_v26 = vrot.slane %v5070_v11, 5  ;;  %v5078_v31 = vrot.slane %v5076_v50, 5  ;;  %v6092_v11 = vld [vmem:[%s7230_s13 + $0x34] sm:$0x1] }
 0x118   : > { %v6368_v2 = vpop.f32.mrf.mxu0  ;;  %v5104_v39 = vshll.u32 %v6086_v28, 16  ;;  %v5087_v35 = vor.u32 %v5086_v56, %v5083_v62  ;;  %v5109_v7 = vshrl.u32 %v6087_v32, 16  ;;  %v5100_v17 = vrot.slane %v5098_v46, 5  ;;  %v6094_v46 = vld [vmem:[%s7230_s13 + $0x3c] sm:$0x1] }
 0x119   : > { %v1282_v22 = vadd.f32 %v6368_v2, %v1053_v58  ;;  %v8163_v52 = vadd.f32 %v1421_v4, %v1279_v18  ;;  %v5073_v23 = vor.u32 %v5072_v26, %v5069_v34  ;;  %v5095_v4 = vshrl.u32 %v6085_v55, 16 }
 0x11a   : > { %v1263_v10 = vpop.f32.mrf.mxu0  ;;  %v5106_v58 = vrot.slane %v5104_v39, 5  ;;  %v5088_v59 = vrot.slane %v5087_v35, 4  ;;  %v5111_v6 = vrot.slane %v5109_v7, 4  ;;  %v5118_v25 = vshll.u32 %v6088_v13, 16 }
 0x11b   : > { %v1280_v53 = vadd.f32 %v1263_v10, %v1051_v61  ;;  %v8165_v12 = vadd.f32 %v6378_v21, %v1282_v22  ;;  %v5074_v21 = vrot.slane %v5073_v23, 4  ;;  %v5097_v48 = vrot.slane %v5095_v4, 4 }
 0x11c   : > { %v6383_v40 = vpop.f32.mrf.mxu0  ;;  %v5112_v22 = vshll.u32 %v6087_v32, 16  ;;  %v5123_v10 = vshrl.u32 %v6089_v29, 16  ;;  %v5126_v30 = vshll.u32 %v6089_v29, 16 }
 0x11d   : > { %v8168_v19 = vadd.f32 %v1424_v36, %v1280_v53  ;;  %v1556_v44 = vadd.f32 %v6383_v40, %v1438_v24  ;;  %v5079_v57 = vsel %vm6915_vm4, %v5074_v21, %v5078_v31  ;;  %v5101_v18 = vor.u32 %v5100_v17, %v5097_v48 }
 0x11e   : > { %v1523_v16 = vpop.f32.mrf.mxu0  ;;  %v6393_v15 = vpop.f32.mrf.mxu1  ;;  %v5114_v53 = vrot.slane %v5112_v22, 5  ;;  %v5120_v40 = vrot.slane %v5118_v25, 5  ;;  %v5125_v50 = vrot.slane %v5123_v10, 4  ;;  %v6096_v22 = vld [vmem:[%s7230_s13 + $0x44] sm:$0x1] }
 0x11f   : > { %v1554_v27 = vadd.f32 %v1523_v16, %v1436_v42  ;;  %v8173_v63 = vadd.f32 %v6393_v15, %v1556_v44  ;;  %v5102_v38 = vrot.slane %v5101_v18, 4  ;;  %v5132_v44 = vshll.u32 %v6090_v49, 16  ;;  %v6093_v15 = vld [vmem:[%s7230_s13 + $0x38] sm:$0xf] }
 0x120   : > { %v6384_v37 = vpop.f32.mrf.mxu0  ;;  %v1756_v51 = vpop.f32.mrf.mxu1  ;;  %v5115_v55 = vor.u32 %v5114_v53, %v5111_v6  ;;  %v5151_v39 = vshrl.u32 %v6093_v15, 16 }
 0x121   : > { %v1557_v45 = vadd.f32 %v6384_v37, %v1439_v1  ;;  %v8175_v54 = vadd.f32 %v1756_v51, %v1554_v27  ;;  %v5093_v1 = vsel %vm6915_vm4, %v5088_v59, %v5092_v14  ;;  %v5107_v9 = vsel %vm6915_vm4, %v5102_v38, %v5106_v58 }
 0x122   : > { %v1526_v5 = vpop.f32.mrf.mxu0  ;;  %v6394_v33 = vpop.f32.mrf.mxu1  ;;  %v6097_v20 = vcombine.low %v5079_v57, %v5093_v1  ;;  %v5134_v31 = vrot.slane %v5132_v44, 5  ;;  %v5116_v27 = vrot.slane %v5115_v55, 4  ;;  %v5146_v37 = vshll.u32 %v6092_v11, 16 }
 0x123   : > { %v1555_v61 = vadd.f32 %v1526_v5, %v1437_v0  ;;  %v8179_v3 = vadd.f32 %v6394_v33, %v1557_v45  ;;  %v6091_v0 = vld [vmem:[%s7230_s13 + $0x30] sm:$0xf]  ;;  %v6095_v5 = vld [vmem:[%s7230_s13 + $0x40] sm:$0xf]  ;;  %v5154_v33 = vshll.u32 %v6093_v15, 16  ;;  %v5153_v59 = vrot.slane %v5151_v39, 4 }
 0x124   : > { %v6387_v2 = vpop.f32.mrf.mxu0  ;;  %v1759_v24 = vpop.f32.mrf.mxu1  ;;  %6591 = vmatprep.mubr.msk.bf16.mxu1 %vm590_vm3, %v6097_v20  ;;  %v5137_v28 = vshrl.u32 %v6091_v0, 16  ;;  %v5140_v16 = vshll.u32 %v6091_v0, 16  ;;  %v5121_v35 = vsel %vm6915_vm4, %v5116_v27, %v5120_v40  ;;  %v5148_v7 = vrot.slane %v5146_v37, 5  ;;  %s5572_s13 = sshll.u32 %s6746_s25, 3 }
 0x125   : > { %v1560_v8 = vadd.f32 %v6387_v2, %v1442_v60  ;;  %v8184_v42 = vadd.f32 %v1759_v24, %v1555_v61  ;;  %v6098_v48 = vcombine.low %v5107_v9, %v5121_v35  ;;  %v5156_v6 = vrot.slane %v5154_v33, 5  ;;  %s415_s9 = sadd.s32 %s6742_s24, %s5572_s13 }
 0x126   : > { %v1539_v36 = vpop.f32.mrf.mxu0  ;;  %v5139_v56 = vrot.slane %v5137_v28, 4  ;;  %v5142_v14 = vrot.slane %v5140_v16, 5  ;;  %v5160_v2 = vshll.u32 %v6094_v46, 16  ;;  %v5165_v25 = vshrl.u32 %v6095_v5, 16  ;;  %p416_p9 = scmp.lt.s32.totalorder %s415_s9, 15 }
 0x127   : > { %v1558_v47 = vadd.f32 %v1539_v36, %v8163_v52  ;;  %v5128_v52 = vrot.slane %v5126_v30, 5  ;;  %6592 = vmatmul.mubr.msk.bf16.vlgmr.msra.gmra.mxu1 %vm590_vm3, %v6098_v48  ;;  %v5157_v1 = vor.u32 %v5156_v6, %v5153_v59  ;;  %v5168_v0 = vshll.u32 %v6095_v5, 16 }
 0x128   : > { %v6397_v60 = vpop.f32.mrf.mxu1  ;;  %v6388_v41 = vpop.f32.mrf.mxu0  ;;  %v5143_v13 = vor.u32 %v5142_v14, %v5139_v56  ;;  %v5167_v38 = vrot.slane %v5165_v25, 4  ;;  %s8519_s9 = smov (!%p416_p9, %s415_s9), 15 }
 0x129   : > { %v1793_v34 = vadd.f32 %v6397_v60, %v1560_v8  ;;  %v1561_v26 = vadd.f32 %v6388_v41, %v8165_v12  ;;  %v5129_v4 = vor.u32 %v5128_v52, %v5125_v50  ;;  %v5170_v11 = vrot.slane %v5168_v0, 5  ;;  %s6115_s24 = sshll.u32 %s8519_s9, 5  ;;  %s5579_s21 = sshll.u32 %s8519_s9, 3 }
 0x12a   : > { %v1772_v62 = vpop.f32.mrf.mxu1  ;;  %v1542_v32 = vpop.f32.mrf.mxu0  ;;  %v5144_v61 = vrot.slane %v5143_v13, 4  ;;  %v5174_v50 = vshll.u32 %v6096_v22, 16  ;;  %s8425_s14 = scalar_lea.vmem %s8467_s5, %s6115_s24  ;;  %s8436_s20 = scalar_lea.vmem %s8468_s6, %s6115_s24 }
 0x12b   : > { %v1791_v51 = vadd.f32 %v1772_v62, %v1558_v47  ;;  %v1559_v23 = vadd.f32 %v1542_v32, %v8168_v19  ;;  %v5130_v58 = vrot.slane %v5129_v4, 4  ;;  %v5162_v47 = vrot.slane %v5160_v2, 5  ;;  %s437_s23 = scalar_lea.vmem %s8469_s7, %s5579_s21 }
 0x12c   : > { %v6398_v45 = vpop.f32.mrf.mxu1  ;;  %v6403_v12 = vpop.f32.mrf.mxu0  ;;  %v5171_v41 = vor.u32 %v5170_v11, %v5167_v38  ;;  %v5176_v9 = vrot.slane %v5174_v50, 5 }
 0x12d   : > { %v1794_v21 = vadd.f32 %v6398_v45, %v1561_v26  ;;  %v1946_v17 = vadd.f32 %v6403_v12, %v8173_v63  ;;  %v5135_v18 = vsel %vm6915_vm4, %v5130_v58, %v5134_v31  ;;  %v5149_v63 = vsel %vm6915_vm4, %v5144_v61, %v5148_v7 }
 0x12e   : > { %v1775_v29 = vpop.f32.mrf.mxu1  ;;  %v1913_v19 = vpop.f32.mrf.mxu0  ;;  %v6099_v20 = vcombine.low %v5135_v18, %v5149_v63  ;;  %v5172_v15 = vrot.slane %v5171_v41, 4 }
 0x12f   : > { %v1792_v24 = vadd.f32 %v1775_v29, %v1559_v23  ;;  %v1944_v57 = vadd.f32 %v1913_v19, %v8175_v54  ;;  %v5158_v54 = vrot.slane %v5157_v1, 4 }
 0x130   : > { %v6413_v49 = vpop.f32.mrf.mxu1  ;;  %v6404_v8 = vpop.f32.mrf.mxu0  ;;  %6595 = vmatprep.mubr.msk.bf16.mxu1 %vm590_vm3, %v6099_v20  ;;  %v5177_v32 = vsel %vm6915_vm4, %v5172_v15, %v5176_v9 }
 0x131   : > { %v2067_v10 = vadd.f32 %v6413_v49, %v1946_v17  ;;  %v1947_v36 = vadd.f32 %v6404_v8, %v8179_v3  ;;  %v5163_v3 = vsel %vm6915_vm4, %v5158_v54, %v5162_v47 }
 0x132   : > { %v2034_v53 = vpop.f32.mrf.mxu1  ;;  %v1916_v40 = vpop.f32.mrf.mxu0 }
 0x133   : > { %v2065_v30 = vadd.f32 %v2034_v53, %v1944_v57  ;;  %v1945_v44 = vadd.f32 %v1916_v40, %v8184_v42  ;;  %v6100_v42 = vcombine.low %v5163_v3, %v5177_v32 }
 0x134   : > { %v6414_v60 = vpop.f32.mrf.mxu1  ;;  %v6407_v55 = vpop.f32.mrf.mxu0 }
 0x135   : > { %v2068_v28 = vadd.f32 %v6414_v60, %v1947_v36  ;;  %v1950_v16 = vadd.f32 %v6407_v55, %v1793_v34  ;;  %6596 = vmatmul.mubr.msk.bf16.gmra.mxu1 %vm590_vm3, %v6100_v42 }
 0x136   : > { %v2037_v26 = vpop.f32.mrf.mxu1  ;;  %v1929_v52 = vpop.f32.mrf.mxu0 }
 0x137   : > { %v2066_v31 = vadd.f32 %v2037_v26, %v1945_v44  ;;  %v1948_v62 = vadd.f32 %v1929_v52, %v1791_v51 }
 0x138   : > { %v6417_v27 = vpop.f32.mrf.mxu1  ;;  %v6408_v56 = vpop.f32.mrf.mxu0 }
 0x139   : > { %v2071_v14 = vadd.f32 %v6417_v27, %v1950_v16  ;;  %v1951_v37 = vadd.f32 %v6408_v56, %v1794_v21 }
 0x13a   : > { %v2050_v23 = vpop.f32.mrf.mxu1  ;;  %v1932_v4 = vpop.f32.mrf.mxu0 }
 0x13b   : > { %v2069_v34 = vadd.f32 %v2050_v23, %v1948_v62  ;;  %v1949_v46 = vadd.f32 %v1932_v4, %v1792_v24 }
 0x13c   : > { %v6418_v39 = vpop.f32.mrf.mxu1  ;;  %v6423_v45 = vpop.f32.mrf.mxu0 }
 0x13d   : > { %v2072_v35 = vadd.f32 %v6418_v39, %v1951_v37  ;;  %v2296_v12 = vadd.f32 %v6423_v45, %v2067_v10 }
 0x13e   : > { %v2053_v13 = vpop.f32.mrf.mxu1  ;;  %v2263_v51 = vpop.f32.mrf.mxu0 }
 0x13f   : > { %v2070_v7 = vadd.f32 %v2053_v13, %v1949_v46  ;;  %v2294_v43 = vadd.f32 %v2263_v51, %v2065_v30 }
 0x140   : > { %v6433_v5 = vpop.f32.mrf.mxu1  ;;  %v6424_v33 = vpop.f32.mrf.mxu0 }
 0x141   : > { %v2457_v48 = vadd.f32 %v6433_v5, %v2296_v12  ;;  %v2297_v17 = vadd.f32 %v6424_v33, %v2068_v28 }
 0x142   : > { %v2424_v58 = vpop.f32.mrf.mxu1  ;;  %v2266_v21 = vpop.f32.mrf.mxu0 }
 0x143   : > { %v2455_v29 = vadd.f32 %v2424_v58, %v2294_v43  ;;  %v2295_v19 = vadd.f32 %v2266_v21, %v2066_v31 }
 0x144   : > { %v6434_v61 = vpop.f32.mrf.mxu1 }
 0x145   : > { %v2458_v59 = vadd.f32 %v6434_v61, %v2297_v17 }
 0x146   : > { %v2427_v6 = vpop.f32.mrf.mxu1 }
 0x147   : > { %v2456_v2 = vadd.f32 %v2427_v6, %v2295_v19  ;;  %v6427_v24 = vpop.f32.mrf.mxu0 }
 0x148   : > { %v2300_v57 = vadd.f32 %v6427_v24, %v2071_v14  ;;  %v6437_v18 = vpop.f32.mrf.mxu1 }
 0x149   : > { %v2279_v22 = vpop.f32.mrf.mxu0 }
 0x14a   : > { %v2298_v25 = vadd.f32 %v2279_v22, %v2069_v34  ;;  %v2461_v49 = vadd.f32 %v6437_v18, %v2300_v57  ;;  %v2440_v8 = vpop.f32.mrf.mxu1 }
 0x14b   : > { %v6428_v63 = vpop.f32.mrf.mxu0 }
 0x14c   : > { %v2301_v1 = vadd.f32 %v6428_v63, %v2072_v35  ;;  %v2459_v0 = vadd.f32 %v2440_v8, %v2298_v25  ;;  %v6438_v10 = vpop.f32.mrf.mxu1 }
 0x14d   : > { %v2282_v36 = vpop.f32.mrf.mxu0 }
 0x14e   : > { %v2299_v20 = vadd.f32 %v2282_v36, %v2070_v7  ;;  %v2462_v38 = vadd.f32 %v6438_v10, %v2301_v1  ;;  %v2443_v53 = vpop.f32.mrf.mxu1 }
 0x14f   : > { %v6443_v40 = vpop.f32.mrf.mxu0 }
 0x150   : > { %v2460_v54 = vadd.f32 %v2443_v53, %v2299_v20  ;;  %v2575_v47 = vadd.f32 %v6443_v40, %v2457_v48 }
 0x151   : > { %v2542_v11 = vpop.f32.mrf.mxu0 }
 0x152   : > { %v2573_v50 = vadd.f32 %v2542_v11, %v2455_v29 }
 0x153   : > { %v6444_v30 = vpop.f32.mrf.mxu0  ;;  %v6453_v44 = vpop.f32.mrf.mxu1 }
 0x154   : > { %v2576_v60 = vadd.f32 %v6444_v30, %v2458_v59  ;;  %v2808_v41 = vadd.f32 %v6453_v44, %v2575_v47 }
 0x155   : > { %v2545_v9 = vpop.f32.mrf.mxu0  ;;  %v2775_v55 = vpop.f32.mrf.mxu1 }
 0x156   : > { %v2574_v28 = vadd.f32 %v2545_v9, %v2456_v2  ;;  %v2806_v16 = vadd.f32 %v2775_v55, %v2573_v50 }
 0x157   : > { %v6447_v3 = vpop.f32.mrf.mxu0  ;;  %v6454_v15 = vpop.f32.mrf.mxu1 }
 0x158   : > { %v2579_v26 = vadd.f32 %v6447_v3, %v2461_v49  ;;  %v2809_v52 = vadd.f32 %v6454_v15, %v2576_v60 }
 0x159   : > { %v2558_v31 = vpop.f32.mrf.mxu0  ;;  %v2778_v62 = vpop.f32.mrf.mxu1 }
 0x15a   : > { %v2577_v32 = vadd.f32 %v2558_v31, %v2459_v0  ;;  %v2807_v27 = vadd.f32 %v2778_v62, %v2574_v28 }
 0x15b   : > { %v6448_v56 = vpop.f32.mrf.mxu0 }
 0x15c   : > { %v2580_v42 = vadd.f32 %v6448_v56, %v2462_v38 }
 0x15d   : > { %v2561_v14 = vpop.f32.mrf.mxu0 }
 0x15e   : > { %v2578_v37 = vadd.f32 %v2561_v14, %v2460_v54  ;;  %v6457_v23 = vpop.f32.mrf.mxu1 }
 0x15f   : > { %v2812_v4 = vadd.f32 %v6457_v23, %v2579_v26  ;;  %v6463_v34 = vpop.f32.mrf.mxu0 }
 0x160   : > { %v2791_v46 = vpop.f32.mrf.mxu1  ;;  %v2965_v39 = vadd.f32 %v6463_v34, %v2808_v41 }
 0x161   : > { %v2810_v45 = vadd.f32 %v2791_v46, %v2577_v32  ;;  %v2932_v35 = vpop.f32.mrf.mxu0 }
 0x162   : > { %v6458_v12 = vpop.f32.mrf.mxu1  ;;  %v2963_v13 = vadd.f32 %v2932_v35, %v2806_v16 }
 0x163   : > { %v2813_v51 = vadd.f32 %v6458_v12, %v2580_v42  ;;  %v6464_v7 = vpop.f32.mrf.mxu0 }
 0x164   : > { %v2794_v43 = vpop.f32.mrf.mxu1  ;;  %v8217_v5 = vadd.f32 %v6464_v7, %v2809_v52 }
 0x165   : > { %v2811_v33 = vadd.f32 %v2794_v43, %v2578_v37  ;;  %v2935_v48 = vpop.f32.mrf.mxu0 }
 0x166   : > { %v6473_v17 = vpop.f32.mrf.mxu1  ;;  %v8219_v58 = vadd.f32 %v2935_v48, %v2807_v27 }
 0x167   : > { %v3087_v21 = vadd.f32 %v6473_v17, %v2965_v39  ;;  %v6467_v29 = vpop.f32.mrf.mxu0 }
 0x168   : > { %v3054_v19 = vpop.f32.mrf.mxu1  ;;  %v2969_v61 = vadd.f32 %v6467_v29, %v2812_v4 }
 0x169   : > { %v3085_v59 = vadd.f32 %v3054_v19, %v2963_v13  ;;  %v2948_v6 = vpop.f32.mrf.mxu0 }
 0x16a   : > { %v8221_v2 = vpop.f32.mrf.mxu1  ;;  %v8223_v24 = vadd.f32 %v2948_v6, %v2810_v45 }
 0x16b   : > { %v6468_v57 = vpop.f32.mrf.mxu0 }
 0x16c   : > { %v8225_v18 = vpop.f32.mrf.mxu1  ;;  %v8227_v22 = vadd.f32 %v6468_v57, %v2813_v51 }
 0x16d   : > { %v2951_v25 = vpop.f32.mrf.mxu0 }
 0x16e   : > { %v6477_v49 = vpop.f32.mrf.mxu1  ;;  %v8229_v8 = vadd.f32 %v2951_v25, %v2811_v33 }
 0x16f   : > { %v3091_v63 = vadd.f32 %v6477_v49, %v2969_v61 }
 0x170   : > { %v8231_v1 = vpop.f32.mrf.mxu1  ;;  %v6483_v0 = vpop.f32.mrf.mxu0 }
 0x171   : > { %v8235_v36 = vadd.f32 %v6483_v0, %v3087_v21 }
 0x172   : > { %v8233_v10 = vpop.f32.mrf.mxu1  ;;  %v3283_v20 = vpop.f32.mrf.mxu0 }
 0x173   : > { %v8239_v53 = vadd.f32 %v3283_v20, %v3085_v59 }
 0x174   : > { %v8237_v38 = vpop.f32.mrf.mxu1  ;;  %v6484_v54 = vpop.f32.mrf.mxu0 }
 0x176   : > { %v8241_v40 = vpop.f32.mrf.mxu1  ;;  %v3286_v50 = vpop.f32.mrf.mxu0 }
 0x178   : > { %v8243_v47 = vpop.f32.mrf.mxu1 }
 0x17a   : > { %v6494_v11 = vpop.f32.mrf.mxu1 }
 0x17c   : > { %v8245_v30 = vpop.f32.mrf.mxu1 }
 0x17d   : > { %v6487_v44 = vpop.f32.mrf.mxu0 }
 0x17e   : > { %v8247_v60 = vpop.f32.mrf.mxu1  ;;  %v8249_v41 = vadd.f32 %v6487_v44, %v3091_v63 }
 0x17f   : > { %v8251_v9 = vpop.f32.mrf.mxu0 }
 0x180   : > { %v8253_v55 = vpop.f32.mrf.mxu1 }
 0x181   : > { %v8255_v28 = vpop.f32.mrf.mxu0 }
 0x182   : > { %v8259_v3 = vpop.f32.mrf.mxu1 }
 0x183   : > { %v8257_v16 = vpop.f32.mrf.mxu0 }
 0x184   : > { %v8261_v26 = vpop.f32.mrf.mxu1 }
 0x185   : > { %v6503_v15 = vpop.f32.mrf.mxu0 }
 0x187   : > { %v3561_v52 = vpop.f32.mrf.mxu0 }
 0x189   : > { %v6504_v31 = vpop.f32.mrf.mxu0 }
 0x18b   : > { %v8263_v62 = vpop.f32.mrf.mxu1  ;;  %v3564_v32 = vpop.f32.mrf.mxu0 }
 0x18d   : > { %v8265_v27 = vpop.f32.mrf.mxu1  ;;  %v8267_v56 = vpop.f32.mrf.mxu0 }
 0x18f   : > { %v6514_v42 = vpop.f32.mrf.mxu1  ;;  %v8269_v14 = vpop.f32.mrf.mxu0 }
 0x191   : > { %v8271_v37 = vpop.f32.mrf.mxu0  ;;  %v8273_v23 = vpop.f32.mrf.mxu1 }
 0x193   : > { %v8275_v4 = vpop.f32.mrf.mxu0 }
 0x195   : > { %v8277_v34 = vpop.f32.mrf.mxu0 }
 0x196   : > { %v8279_v46 = vpop.f32.mrf.mxu1 }
 0x197   : > { %v8281_v39 = vpop.f32.mrf.mxu0 }
 0x198   : > { %v8283_v45 = vpop.f32.mrf.mxu1 }
 0x199   : > { %v6524_v35 = vpop.f32.mrf.mxu0 }
 0x19a   : > { %v8285_v12 = vpop.f32.mrf.mxu1 }
 0x19b   : > { %v8287_v13 = vpop.f32.mrf.mxu0 }
 0x19c   : > { %v8289_v51 = vpop.f32.mrf.mxu1 }
 0x19d   : > { %v8291_v7 = vpop.f32.mrf.mxu0 }
 0x19e   : > { %v8293_v43 = vpop.f32.mrf.mxu1 }
 0x19f   : > { %v8295_v33 = vpop.f32.mrf.mxu0 }
 0x1a0   : > { %8476 = vst [vmem:[#allocation2_spill] sm:$0xff] %v8295_v33  ;;  %v8297_v48 = vpop.f32.mrf.mxu1 }
 0x1a1   : > { %v8299_v17 = vpop.f32.mrf.mxu0 }
 0x1a2   : > { %8477 = vst [vmem:[#allocation3_spill] sm:$0xff] %v8299_v17  ;;  %v8301_v21 = vpop.f32.mrf.mxu1 }
 0x1a3   : > { %v8305_v19 = vpop.f32.mrf.mxu0 }
 0x1a4   : > { %v8303_v29 = vpop.f32.mrf.mxu1  ;;  %8478 = vst [vmem:[#allocation4_spill] sm:$0xff] %v8305_v19 }
 0x1a6   : > { %v8307_v61 = vpop.f32.mrf.mxu1  ;;  %v8311_v6 = vpop.f32.mrf.mxu0 }
 0x1a7   : > { %8479 = vst [vmem:[#allocation5_spill] sm:$0xff] %v8307_v61 }
 0x1a8   : > { %v8309_v59 = vpop.f32.mrf.mxu1  ;;  %v8315_v25 = vpop.f32.mrf.mxu0 }
 0x1a9   : > { %8480 = vst [vmem:[#allocation6_spill] sm:$0xff] %v8309_v59  ;;  %8482 = vst [vmem:[#allocation8_spill] sm:$0xff] %v8315_v25  ;;  %v3088_v59 = vadd.f32 %v8221_v2, %v8217_v5  ;;  %v3089_v2 = vadd.f32 %v8231_v1, %v8223_v24 }
 0x1aa   : > { %v8313_v57 = vpop.f32.mrf.mxu1  ;;  %v8319_v63 = vpop.f32.mrf.mxu0 }
 0x1ab   : > { %8481 = vst [vmem:[#allocation7_spill] sm:$0xff] %v8313_v57  ;;  %v3317_v17 = vadd.f32 %v6484_v54, %v3088_v59  ;;  %v3475_v54 = vadd.f32 %v8243_v47, %v8239_v53 }
 0x1ac   : > { %v8317_v49 = vpop.f32.mrf.mxu1  ;;  %v8325_v44 = vpop.f32.mrf.mxu0 }
 0x1ad   : > { %8483 = vst [vmem:[#allocation9_spill] sm:$0xff] %v8317_v49  ;;  %8486 = vst [vmem:[#allocation12_spill] sm:$0xff] %v8325_v44  ;;  %v3086_v49 = vadd.f32 %v8225_v18, %v8219_v58  ;;  %v3092_v58 = vadd.f32 %v8233_v10, %v8227_v22  ;;  %v3592_v1 = vadd.f32 %v3561_v52, %v3475_v54 }
 0x1ae   : > { %v8321_v0 = vpop.f32.mrf.mxu1 }
 0x1af   : > { %8484 = vst [vmem:[#allocation10_spill] sm:$0xff] %v8321_v0  ;;  %v3315_v44 = vadd.f32 %v3286_v50, %v3086_v49  ;;  %v3321_v24 = vadd.f32 %v8255_v28, %v3092_v58 }
 0x1b0   : > { %v8323_v20 = vpop.f32.mrf.mxu1 }
 0x1b1   : > { %8485 = vst [vmem:[#allocation11_spill] sm:$0xff] %v8323_v20  ;;  %v3476_v50 = vadd.f32 %v8245_v30, %v3315_v44 }
 0x1b2   : > { %v8327_v19 = vpop.f32.mrf.mxu1 }
 0x1b3   : > { %8487 = vst [vmem:[#allocation13_spill] sm:$0xff] %v8327_v19  ;;  %v8333_v57 = vpop.f32.mrf.mxu0  ;;  %v3478_v19 = vadd.f32 %v6494_v11, %v3317_v17  ;;  %v3593_v11 = vadd.f32 %v3564_v32, %v3476_v50 }
 0x1b4   : > { %v8329_v61 = vpop.f32.mrf.mxu1 }
 0x1b5   : > { %8488 = vst [vmem:[#allocation14_spill] sm:$0xff] %v8329_v61  ;;  %v8339_v0 = vpop.f32.mrf.mxu0  ;;  %v3477_v61 = vadd.f32 %v8241_v40, %v8235_v36  ;;  %v3595_v49 = vadd.f32 %v6504_v31, %v3478_v19  ;;  %v3090_v36 = vadd.f32 %v8237_v38, %v8229_v8  ;;  %v3318_v40 = vadd.f32 %v8251_v9, %v3089_v2 }
 0x1b6   : > { %v8335_v25 = vpop.f32.mrf.mxu1  ;;  %v3482_v38 = vadd.f32 %v8259_v3, %v3321_v24  ;;  %v3825_v9 = vadd.f32 %v8265_v27, %v3592_v1  ;;  %v3826_v28 = vadd.f32 %v8273_v23, %v3593_v11 }
 0x1b7   : > { %v8343_v33 = vpop.f32.mrf.mxu0  ;;  %v3594_v59 = vadd.f32 %v6503_v15, %v3477_v61  ;;  %v3319_v10 = vadd.f32 %v8257_v16, %v3090_v36  ;;  %v3828_v47 = vadd.f32 %v6514_v42, %v3595_v49  ;;  %v3481_v15 = vadd.f32 %v8247_v60, %v8249_v41 }
 0x1b8   : > { %v8341_v20 = vpop.f32.mrf.mxu1  ;;  %v3479_v8 = vadd.f32 %v8253_v55, %v3318_v40  ;;  %v3599_v60 = vadd.f32 %v8271_v37, %v3482_v38  ;;  %v3982_v55 = vadd.f32 %v8281_v39, %v3825_v9  ;;  %v3983_v3 = vadd.f32 %v8287_v13, %v3826_v28  ;;  %v8495_v40 = vld [vmem:[#allocation10_spill] sm:$0xff] }
 0x1b9   : > { %8489 = vst [vmem:[#allocation15_spill] sm:$0xff] %v8341_v20  ;;  %v8347_v5 = vpop.f32.mrf.mxu0  ;;  %v3827_v53 = vadd.f32 %v8263_v62, %v3594_v59  ;;  %v3985_v52 = vadd.f32 %v6524_v35, %v3828_v47  ;;  %v3480_v62 = vadd.f32 %v8261_v26, %v3319_v10  ;;  %v3598_v32 = vadd.f32 %v8267_v56, %v3481_v15  ;;  %v8493_v59 = vld [vmem:[#allocation12_spill] sm:$0xff]  ;;  %v8500_v15 = vld [vmem:[#allocation11_spill] sm:$0xff] }
 0x1ba   : > { %v8353_v18 = vpop.f32.mrf.mxu1  ;;  %v3596_v42 = vadd.f32 %v8269_v14, %v3479_v8  ;;  %v3832_v37 = vadd.f32 %v8285_v12, %v3599_v60  ;;  %v4104_v39 = vadd.f32 %v8297_v48, %v3982_v55  ;;  %v4105_v13 = vadd.f32 %v8303_v29, %v3983_v3  ;;  %v8492_v12 = vld [vmem:[#allocation8_spill] sm:$0xff]  ;;  %v8496_v24 = vld [vmem:[#allocation13_spill] sm:$0xff] }
 0x1bb   : > { %v6563_v20 = vpop.f32.mrf.mxu0  ;;  %v3984_v16 = vadd.f32 %v8277_v34, %v3827_v53  ;;  %v3597_v23 = vadd.f32 %v8275_v4, %v3480_v62  ;;  %v4107_v26 = vadd.f32 %v8301_v21, %v3985_v52  ;;  %v3831_v14 = vadd.f32 %v8279_v46, %v3598_v32  ;;  %v8490_v46 = vld [vmem:[#allocation2_spill] sm:$0xff]  ;;  %v8494_v29 = vld [vmem:[#allocation4_spill] sm:$0xff]  ;;  %v8499_v53 = vld [vmem:[#allocation7_spill] sm:$0xff] }
 0x1bc   : > { %v8365_v17 = vpop.f32.mrf.mxu1  ;;  %v3829_v19 = vadd.f32 %v8283_v45, %v3596_v42  ;;  %v8491_v45 = vld [vmem:[#allocation3_spill] sm:$0xff]  ;;  %v4333_v50 = vadd.f32 %v8492_v12, %v4104_v39  ;;  %v4334_v49 = vadd.f32 %v8493_v59, %v4105_v13  ;;  %v8501_v38 = vld [vmem:[#allocation14_spill] sm:$0xff]  ;;  %v8502_v62 = vld [vmem:[#allocation9_spill] sm:$0xff] }
 0x1bd   : > { %v8362_v22 = vpop.f32.mrf.mxu0  ;;  %v4106_v35 = vadd.f32 %v8293_v43, %v3984_v16  ;;  %v4336_v44 = vadd.f32 %v8319_v63, %v4107_v26  ;;  %v3830_v21 = vadd.f32 %v8289_v51, %v3597_v23  ;;  %v3988_v2 = vadd.f32 %v8291_v7, %v3831_v14  ;;  %v8497_v51 = vld [vmem:[#allocation5_spill] sm:$0xff]  ;;  %v8498_v7 = vld [vmem:[#allocation6_spill] sm:$0xff] }
 0x1be   : > { %v3986_v58 = vadd.f32 %v8490_v46, %v3829_v19  ;;  %v3989_v54 = vadd.f32 %v8491_v45, %v3832_v37  ;;  %v4494_v8 = vadd.f32 %v8500_v15, %v4333_v50  ;;  %v4495_v9 = vadd.f32 %v8501_v38, %v4334_v49 }
 0x1bf   : > { %v6564_v30 = vpop.f32.mrf.mxu0  ;;  %v4335_v4 = vadd.f32 %v8311_v6, %v4106_v35  ;;  %v3987_v36 = vadd.f32 %v8494_v29, %v3830_v21  ;;  %v4497_v1 = vadd.f32 %v8496_v24, %v4336_v44  ;;  %v4110_v11 = vadd.f32 %v8497_v51, %v3988_v2 }
 0x1c0   : > { %v4108_v10 = vadd.f32 %v8498_v7, %v3986_v58  ;;  %v4111_v47 = vadd.f32 %v8499_v53, %v3989_v54  ;;  %v4612_v23 = vadd.f32 %v8362_v22, %v4494_v8  ;;  %v8503_v39 = vld [vmem:[#allocation15_spill] sm:$0xff] }
 0x1c1   : > { %v4584_v31 = vpop.f32.mrf.mxu0  ;;  %v6573_v41 = vpop.f32.mrf.mxu1  ;;  %v4496_v63 = vadd.f32 %v8495_v40, %v4335_v4  ;;  %v4615_v16 = vadd.f32 %v6564_v30, %v4497_v1  ;;  %v4109_v32 = vadd.f32 %v8502_v62, %v3987_v36  ;;  %v4339_v42 = vadd.f32 %v8333_v57, %v4110_v11 }
 0x1c2   : > { %v4337_v60 = vadd.f32 %v8339_v0, %v4108_v10  ;;  %v4340_v55 = vadd.f32 %v8343_v33, %v4111_v47  ;;  %v4613_v35 = vadd.f32 %v4584_v31, %v4495_v9 }
 0x1c3   : > { %v6567_v27 = vpop.f32.mrf.mxu0  ;;  %v4814_v34 = vpop.f32.mrf.mxu1  ;;  %v4614_v28 = vadd.f32 %v6563_v20, %v4496_v63  ;;  %v4338_v20 = vadd.f32 %v8347_v5, %v4109_v32  ;;  %v4500_v37 = vadd.f32 %v8335_v25, %v4339_v42 }
 0x1c4   : > { %v4498_v57 = vadd.f32 %v8503_v39, %v4337_v60  ;;  %v4501_v0 = vadd.f32 %v8353_v18, %v4340_v55  ;;  %v4845_v33 = vadd.f32 %v4814_v34, %v4612_v23 }
 0x1c5   : > { %v4597_v56 = vpop.f32.mrf.mxu0  ;;  %v6574_v61 = vpop.f32.mrf.mxu1  ;;  %v4847_v14 = vadd.f32 %v6573_v41, %v4614_v28  ;;  %v4499_v21 = vadd.f32 %v8365_v17, %v4338_v20  ;;  %v4618_v5 = vadd.f32 %v6567_v27, %v4500_v37 }
 0x1c6   : > { %v4848_v19 = vadd.f32 %v6574_v61, %v4615_v16  ;;  %v4616_v2 = vadd.f32 %v4597_v56, %v4498_v57 }
 0x1c7   : > { %v6568_v43 = vpop.f32.mrf.mxu0  ;;  %v4817_v48 = vpop.f32.mrf.mxu1 }
 0x1c8   : > { %v4846_v4 = vadd.f32 %v4817_v48, %v4613_v35  ;;  %v4619_v18 = vadd.f32 %v6568_v43, %v4501_v0 }
 0x1c9   : > { %v4600_v6 = vpop.f32.mrf.mxu0 }
 0x1ca   : > { %v4617_v46 = vadd.f32 %v4600_v6, %v4499_v21 }
 0x1cc   : > { %v6577_v52 = vpop.f32.mrf.mxu1 }
 0x1cd   : > { %v4851_v54 = vadd.f32 %v6577_v52, %v4618_v5 }
 0x1ce   : > { %v6583_v3 = vpop.f32.mrf.mxu0  ;;  %v4830_v26 = vpop.f32.mrf.mxu1 }
 0x1cf   : > { %v5004_v22 = vadd.f32 %v6583_v3, %v4847_v14  ;;  %v4849_v12 = vadd.f32 %v4830_v26, %v4616_v2 }
 0x1d0   : > { %v4971_v30 = vpop.f32.mrf.mxu0  ;;  %v6578_v44 = vpop.f32.mrf.mxu1 }
 0x1d1   : > { %v5002_v41 = vadd.f32 %v4971_v30, %v4845_v33  ;;  %v4852_v50 = vadd.f32 %v6578_v44, %v4619_v18 }
 0x1d2   : > { %v6584_v13 = vpop.f32.mrf.mxu0  ;;  %v4833_v45 = vpop.f32.mrf.mxu1 }
 0x1d3   : > { %v5005_v31 = vadd.f32 %v6584_v13, %v4848_v19  ;;  %v4850_v49 = vadd.f32 %v4833_v45, %v4617_v46 }
 0x1d4   : > { %v4974_v25 = vpop.f32.mrf.mxu0 }
 0x1d5   : > { %v6141_v34 = vpack.c.bf16 %v5005_v31, %v5004_v22  ;;  %v5003_v61 = vadd.f32 %v4974_v25, %v4846_v4 }
 0x1d6   : > { %v6587_v58 = vpop.f32.mrf.mxu0 }
 0x1d7   : > { %6173 = vst [vmem:[%s8425_s14 + $0x8] sm:$0xff] %v6141_v34   ;;  %v6136_v17 = vpack.c.bf16 %v5003_v61, %v5002_v41  ;;  %v5311_v27 = vadd.f32 %v5003_v61, %v5002_v41  ;;  %v5008_v43 = vadd.f32 %v6587_v58, %v4851_v54 }
 0x1d8   : > { %v4987_v56 = vpop.f32.mrf.mxu0 }
 0x1d9   : > { %6137 = vst [vmem:[%s8425_s14] sm:$0xff] %v6136_v17   ;;  %v5312_v59 = vadd.f32 %v5311_v27, %v5004_v22  ;;  %v5006_v29 = vadd.f32 %v4987_v56, %v4849_v12 }
 0x1da   : > { %v6588_v48 = vpop.f32.mrf.mxu0 }
 0x1db   : > { %v5313_v36 = vadd.f32 %v5312_v59, %v5005_v31  ;;  %v5009_v40 = vadd.f32 %v6588_v48, %v4852_v50 }
 0x1dc   : > { %v4990_v6 = vpop.f32.mrf.mxu0 }
 0x1dd   : > { %v5314_v63 = vadd.f32 %v5313_v36, %v5006_v29  ;;  %v6151_v24 = vpack.c.bf16 %v5009_v40, %v5008_v43  ;;  %v5007_v1 = vadd.f32 %v4990_v6, %v4850_v49 }
 0x1df   : > { %6175 = vst [vmem:[%s8425_s14 + $0x18] sm:$0xff] %v6151_v24   ;;  %v6146_v51 = vpack.c.bf16 %v5007_v1, %v5006_v29  ;;  %v5315_v11 = vadd.f32 %v5314_v63, %v5007_v1 }
 0x1e1   : > { %6174 = vst [vmem:[%s8425_s14 + $0x10] sm:$0xff] %v6146_v51   ;;  %v5316_v7 = vadd.f32 %v5315_v11, %v5008_v43 }
 0x1e3   : > { %v5317_v10 = vadd.f32 %v5316_v7, %v5009_v40 }
 0x1e5   : > { %v5318_v53 = vrot.slane %v5317_v10, 4 }
 0x1e7   : > { %v5319_v47 = vadd.f32 %v5318_v53, %v5317_v10  ;;  %v6593_v8 = vpop.f32.mrf.mxu1 }
 0x1e9   : > { %v5320_v15 = vrot.slane %v5319_v47, 2  ;;  %v5240_v9 = vpop.f32.mrf.mxu1 }
 0x1eb   : > { %v5321_v38 = vadd.f32 %v5320_v15, %v5319_v47  ;;  %v6594_v16 = vpop.f32.mrf.mxu1 }
 0x1ec   : > { %v6161_v52 = vpack.c.bf16 %v6594_v16, %v6593_v8 }
 0x1ed   : > { %v5322_v28 = vrot.slane %v5321_v38, 1  ;;  %v5243_v32 = vpop.f32.mrf.mxu1 }
 0x1ee   : > { %6176 = vst [vmem:[%s8436_s20 + $0x8] sm:$0xff] %v6161_v52   ;;  %v6156_v42 = vpack.c.bf16 %v5243_v32, %v5240_v9 }
 0x1ef   : > { %v5323_v62 = vadd.f32 %v5322_v28, %v5321_v38 }
 0x1f0   : > { %6157 = vst [vmem:[%s8436_s20] sm:$0xff] %v6156_v42  }
 0x1f1   : > { %v5324_v60 = vmul.f32 0.015625, %v5323_v62 }
 0x1f3   : > { %v5325_v55 = vsub.f32 %v5002_v41, %v5324_v60  ;;  %v5326_v3 = vsub.f32 %v5003_v61, %v5324_v60  ;;  %v5327_v23 = vsub.f32 %v5004_v22, %v5324_v60  ;;  %v5328_v35 = vsub.f32 %v5005_v31, %v5324_v60 }
 0x1f4   : > { %v5329_v26 = vsub.f32 %v5006_v29, %v5324_v60  ;;  %v5330_v20 = vsub.f32 %v5007_v1, %v5324_v60  ;;  %v5331_v30 = vsub.f32 %v5008_v43, %v5324_v60  ;;  %v5332_v14 = vsub.f32 %v5009_v40, %v5324_v60 }
 0x1f5   : > { %v5333_v19 = vmul.f32 %v5325_v55, %v5325_v55  ;;  %v5334_v37 = vmul.f32 %v5326_v3, %v5326_v3  ;;  %v6597_v39 = vpop.f32.mrf.mxu1  ;;  %v5335_v57 = vmul.f32 %v5327_v23, %v5327_v23  ;;  %v5336_v33 = vmul.f32 %v5328_v35, %v5328_v35 }
 0x1f6   : > { %v5337_v5 = vmul.f32 %v5329_v26, %v5329_v26  ;;  %v5338_v25 = vmul.f32 %v5330_v20, %v5330_v20  ;;  %v5339_v41 = vmul.f32 %v5331_v30, %v5331_v30  ;;  %v5340_v61 = vmul.f32 %v5332_v14, %v5332_v14 }
 0x1f7   : > { %v5341_v0 = vadd.f32 %v5334_v37, %v5333_v19  ;;  %v5256_v13 = vpop.f32.mrf.mxu1 }
 0x1f9   : > { %v5342_v4 = vadd.f32 %v5341_v0, %v5335_v57  ;;  %v6598_v44 = vpop.f32.mrf.mxu1 }
 0x1fa   : > { %v6171_v21 = vpack.c.bf16 %v6598_v44, %v6597_v39 }
 0x1fb   : > { %v5343_v2 = vadd.f32 %v5342_v4, %v5336_v33  ;;  %v5259_v22 = vpop.f32.mrf.mxu1 }
 0x1fc   : > { %6178 = vst [vmem:[%s8436_s20 + $0x18] sm:$0xff] %v6171_v21   ;;  %v6166_v31 = vpack.c.bf16 %v5259_v22, %v5256_v13 }
 0x1fd   : > { %v5344_v18 = vadd.f32 %v5343_v2, %v5337_v5 }
 0x1fe   : > { %6177 = vst [vmem:[%s8436_s20 + $0x10] sm:$0xff] %v6166_v31  }
 0x1ff   : > { %v5345_v34 = vadd.f32 %v5344_v18, %v5338_v25 }
 0x201   : > { %v5346_v46 = vadd.f32 %v5345_v34, %v5339_v41 }
 0x203   : > { %v5347_v58 = vadd.f32 %v5346_v46, %v5340_v61 }
 0x205   : > { %v5348_v45 = vrot.slane %v5347_v58, 4 }
 0x207   : > { %v5349_v17 = vadd.f32 %v5348_v45, %v5347_v58 }
 0x209   : > { %v5350_v27 = vrot.slane %v5349_v17, 2 }
 0x20b   : > { %v5351_v56 = vadd.f32 %v5350_v27, %v5349_v17 }
 0x20d   : > { %v5352_v54 = vrot.slane %v5351_v56, 1 }
 0x20f   : > { %v5353_v12 = vadd.f32 %v5352_v54, %v5351_v56 }
 0x211   : > { %v5355_v50 = vsel %vm5354_vm8, %v5323_v62, %v5353_v12 }
 0x212   : > { %v5356_v59 = vsel %vm603_vm0, %v5355_v50, 0.0 }
 0x213   : > { %5357 = vst [vmem:[%s437_s23] sm:$0xff] %v5356_v59 }
 0x214 PF: > { %s18_s28 = sadd.s32 1, %s6758_s28   ;;  %s8504_s24 = smov %s6750_s26 }
 0x215   : > { %p15_p10 = scmp.ge.s32.totalorder %s18_s28, 18   ;;  %s8505_s25 = smov %s6754_s27 }
 0x216   : > { %s8506_s26 = smov %s8509_s29  ;;  %s8507_s27 = smov %s8513_s30 }
 0x217   :  { %17 = sbr.rel (!%p15_p10) target bundleno = 3 (0x3), region = 106 }

// kernel: res_block_forward.5
= control target key start
LH: loop header
LB: loop body
LE: loop exit
PB: predicated region body
PF: predicated region fallthrough
CT: control target
= control target key end

     0   :  { %s2558_s0 = inlined_call_operand.vmem [shape: bf16[1024,128], index: 0, kind: input, shape index: {}]   ;;  %s2559_s1 = inlined_call_operand.vmem [shape: bf16[1024,128], index: 1, kind: input, shape index: {}]   ;;  %s2560_s2 = inlined_call_operand.vmem [shape: f32[1,128], index: 2, kind: input, shape index: {}]   ;;  %s2561_s3 = inlined_call_operand.vmem [shape: f32[1,128], index: 3, kind: input, shape index: {}]   ;;  %s2562_s4 = inlined_call_operand.hbm [shape: f32[1024,128], index: 4, kind: output, shape index: {}]  }
   0x1   :  { %v1203_v0 = vld [vmem:[%s2558_s0] sm:$0xff]   ;;  %v1714_v5 = vld [vmem:[%s2558_s0 + $0x8] sm:$0xff]   ;;  %v1715_v12 = vld [vmem:[%s2558_s0 + $0x10] sm:$0xff]  }
   0x2   :  { %v1901_v1 = vld [vmem:[%s2560_s2] ss:$0 sm:$0xff]  ;;  %v1204_v2 = vunpack.c.l.bf16 %v1203_v0  ;;  %v1205_v4 = vunpack.c.h.bf16 %v1203_v0  ;;  %v1777_v6 = vld [vmem:[%s2559_s1 + $0x8] sm:$0xff]   ;;  %v1208_v10 = vunpack.c.l.bf16 %v1714_v5  ;;  %v1778_v13 = vld [vmem:[%s2559_s1 + $0x10] sm:$0xff]   ;;  %v1209_v16 = vunpack.c.h.bf16 %v1714_v5 }
   0x3   :  { %v1459_v3 = vld [vmem:[%s2559_s1] sm:$0xff]   ;;  %v1464_v11 = vunpack.c.l.bf16 %v1777_v6  ;;  %v1465_v17 = vunpack.c.h.bf16 %v1777_v6  ;;  %v1716_v18 = vld [vmem:[%s2558_s0 + $0x18] sm:$0xff]   ;;  %v1212_v20 = vunpack.c.l.bf16 %v1715_v12  ;;  %v1468_v21 = vunpack.c.l.bf16 %v1778_v13  ;;  %v1718_v54 = vld [vmem:[%s2558_s0 + $0x28] sm:$0xff]  }
   0x4   :  { %v1915_v7 = vld [vmem:[%s2561_s3] ss:$0 sm:$0xff]  ;;  %v1460_v8 = vunpack.c.l.bf16 %v1459_v3  ;;  %v1461_v9 = vunpack.c.h.bf16 %v1459_v3  ;;  %v281_v14 = vmul.f32 %v1204_v2, %v1901_v1  ;;  %v282_v15 = vmul.f32 %v1205_v4, %v1901_v1  ;;  %v1779_v23 = vld [vmem:[%s2559_s1 + $0x18] sm:$0xff]   ;;  %v1781_v55 = vld [vmem:[%s2559_s1 + $0x28] sm:$0xff]  }
   0x5   :  { %v283_v19 = vmul.f32 %v1208_v10, %v1901_v1  ;;  %v1213_v22 = vunpack.c.h.bf16 %v1715_v12  ;;  %v284_v26 = vmul.f32 %v1209_v16, %v1901_v1  ;;  %v1469_v27 = vunpack.c.h.bf16 %v1778_v13  ;;  %v1717_v40 = vld [vmem:[%s2558_s0 + $0x20] sm:$0xff]   ;;  %v1719_v0 = vld [vmem:[%s2558_s0 + $0x30] sm:$0xff]   ;;  %v1720_v16 = vld [vmem:[%s2558_s0 + $0x38] sm:$0xff]  }
   0x6   :  { %v416_v24 = vadd.f32 %v1915_v7, %v281_v14  ;;  %v417_v25 = vadd.f32 %v1915_v7, %v282_v15  ;;  %v285_v29 = vmul.f32 %v1212_v20, %v1901_v1  ;;  %v1216_v31 = vunpack.c.l.bf16 %v1716_v18  ;;  %v1780_v45 = vld [vmem:[%s2559_s1 + $0x20] sm:$0xff]   ;;  %v1782_v2 = vld [vmem:[%s2559_s1 + $0x30] sm:$0xff]  }
   0x7   :  { %v418_v28 = vadd.f32 %v1915_v7, %v283_v19  ;;  %v286_v30 = vmul.f32 %v1213_v22, %v1901_v1  ;;  %v419_v34 = vadd.f32 %v1915_v7, %v284_v26  ;;  %v1472_v35 = vunpack.c.l.bf16 %v1779_v23 }
   0x8   :  { %v800_v32 = vadd.f32 %v1460_v8, %v416_v24  ;;  %v801_v33 = vadd.f32 %v1461_v9, %v417_v25  ;;  %v420_v37 = vadd.f32 %v1915_v7, %v285_v29  ;;  %v287_v39 = vmul.f32 %v1216_v31, %v1901_v1 }
   0x9   :  { %v802_v36 = vadd.f32 %v1464_v11, %v418_v28  ;;  %v421_v38 = vadd.f32 %v1915_v7, %v286_v30  ;;  %v803_v43 = vadd.f32 %v1465_v17, %v419_v34  ;;  %v1217_v44 = vunpack.c.h.bf16 %v1716_v18  ;;  %v1721_v34 = vld [vmem:[%s2558_s0 + $0x40] sm:$0xff]  }
   0xa   :  { %v928_v41 = vmax.f32 %v800_v32, 0.0  ;;  %v929_v42 = vmax.f32 %v801_v33, 0.0  ;;  %v804_v47 = vadd.f32 %v1468_v21, %v420_v37  ;;  %v422_v49 = vadd.f32 %v1915_v7, %v287_v39  ;;  %v1783_v21 = vld [vmem:[%s2559_s1 + $0x38] sm:$0xff]   ;;  %v1784_v39 = vld [vmem:[%s2559_s1 + $0x40] sm:$0xff]  }
   0xb   :  { %v930_v46 = vmax.f32 %v802_v36, 0.0  ;;  %v805_v48 = vadd.f32 %v1469_v27, %v421_v38  ;;  %v931_v50 = vmax.f32 %v803_v43, 0.0  ;;  %v288_v51 = vmul.f32 %v1217_v44, %v1901_v1 }
   0xc   :  { %1056 = vst [vmem:[#allocation2] sm:$0xff] %v928_v41  ;;  %1057 = vst [vmem:[#allocation2 + $0x8] sm:$0xff] %v929_v42  ;;  %v1473_v52 = vunpack.c.h.bf16 %v1779_v23  ;;  %v1220_v53 = vunpack.c.l.bf16 %v1717_v40  ;;  %v932_v56 = vmax.f32 %v804_v47, 0.0  ;;  %v806_v58 = vadd.f32 %v1472_v35, %v422_v49  ;;  %v1785_v49 = vld [vmem:[%s2559_s1 + $0x48] sm:$0xff]  }
   0xd   :  { %1058 = vst [vmem:[#allocation2 + $0x10] sm:$0xff] %v930_v46  ;;  %v933_v57 = vmax.f32 %v805_v48, 0.0  ;;  %v1476_v59 = vunpack.c.l.bf16 %v1780_v45  ;;  %1059 = vst [vmem:[#allocation2 + $0x18] sm:$0xff] %v931_v50  ;;  %v423_v60 = vadd.f32 %v1915_v7, %v288_v51  ;;  %v1221_v62 = vunpack.c.h.bf16 %v1717_v40  ;;  %v1722_v48 = vld [vmem:[%s2558_s0 + $0x48] sm:$0xff]  }
   0xe   :  { %v289_v61 = vmul.f32 %v1220_v53, %v1901_v1  ;;  %v1477_v63 = vunpack.c.h.bf16 %v1780_v45  ;;  %1060 = vst [vmem:[#allocation2 + $0x20] sm:$0xff] %v932_v56  ;;  %v934_v3 = vmax.f32 %v806_v58, 0.0  ;;  %v1224_v4 = vunpack.c.l.bf16 %v1718_v54  ;;  %v1723_v58 = vld [vmem:[%s2558_s0 + $0x50] sm:$0xff]  }
   0xf   :  { %1061 = vst [vmem:[#allocation2 + $0x28] sm:$0xff] %v933_v57  ;;  %v1480_v5 = vunpack.c.l.bf16 %v1781_v55  ;;  %v1225_v6 = vunpack.c.h.bf16 %v1718_v54  ;;  %v807_v8 = vadd.f32 %v1473_v52, %v423_v60  ;;  %v290_v10 = vmul.f32 %v1221_v62, %v1901_v1 }
  0x10   :  { %v424_v9 = vadd.f32 %v1915_v7, %v289_v61  ;;  %v1481_v11 = vunpack.c.h.bf16 %v1781_v55  ;;  %1062 = vst [vmem:[#allocation2 + $0x30] sm:$0xff] %v934_v3  ;;  %v291_v12 = vmul.f32 %v1224_v4, %v1901_v1  ;;  %v1228_v14 = vunpack.c.l.bf16 %v1719_v0 }
  0x11   :  { %v292_v13 = vmul.f32 %v1225_v6, %v1901_v1  ;;  %v1484_v15 = vunpack.c.l.bf16 %v1782_v2  ;;  %v935_v17 = vmax.f32 %v807_v8, 0.0  ;;  %v425_v19 = vadd.f32 %v1915_v7, %v290_v10  ;;  %v1724_v10 = vld [vmem:[%s2558_s0 + $0x58] sm:$0xff]  }
  0x12   :  { %v808_v18 = vadd.f32 %v1476_v59, %v424_v9  ;;  %v1229_v20 = vunpack.c.h.bf16 %v1719_v0  ;;  %v426_v22 = vadd.f32 %v1915_v7, %v291_v12  ;;  %v293_v24 = vmul.f32 %v1228_v14, %v1901_v1 }
  0x13   :  { %v427_v23 = vadd.f32 %v1915_v7, %v292_v13  ;;  %v1485_v25 = vunpack.c.h.bf16 %v1782_v2  ;;  %1063 = vst [vmem:[#allocation2 + $0x38] sm:$0xff] %v935_v17  ;;  %v809_v27 = vadd.f32 %v1477_v63, %v425_v19  ;;  %v1232_v29 = vunpack.c.l.bf16 %v1720_v16  ;;  %v1786_v63 = vld [vmem:[%s2559_s1 + $0x50] sm:$0xff]   ;;  %v1787_v19 = vld [vmem:[%s2559_s1 + $0x58] sm:$0xff]  }
  0x14   :  { %v936_v26 = vmax.f32 %v808_v18, 0.0  ;;  %v294_v28 = vmul.f32 %v1229_v20, %v1901_v1  ;;  %v810_v30 = vadd.f32 %v1480_v5, %v426_v22  ;;  %v428_v32 = vadd.f32 %v1915_v7, %v293_v24 }
  0x15   :  { %v811_v31 = vadd.f32 %v1481_v11, %v427_v23  ;;  %v1488_v33 = vunpack.c.l.bf16 %v1783_v21  ;;  %v937_v35 = vmax.f32 %v809_v27, 0.0  ;;  %v295_v37 = vmul.f32 %v1232_v29, %v1901_v1 }
  0x16   :  { %1064 = vst [vmem:[#allocation2 + $0x40] sm:$0xff] %v936_v26  ;;  %v429_v36 = vadd.f32 %v1915_v7, %v294_v28  ;;  %v1233_v38 = vunpack.c.h.bf16 %v1720_v16  ;;  %v938_v40 = vmax.f32 %v810_v30, 0.0  ;;  %v812_v42 = vadd.f32 %v1484_v15, %v428_v32  ;;  %v1725_v28 = vld [vmem:[%s2558_s0 + $0x60] sm:$0xff]  }
  0x17   :  { %v939_v41 = vmax.f32 %v811_v31, 0.0  ;;  %v1489_v43 = vunpack.c.h.bf16 %v1783_v21  ;;  %1065 = vst [vmem:[#allocation2 + $0x48] sm:$0xff] %v937_v35  ;;  %v430_v45 = vadd.f32 %v1915_v7, %v295_v37  ;;  %v1236_v47 = vunpack.c.l.bf16 %v1721_v34 }
  0x18   :  { %v813_v44 = vadd.f32 %v1485_v25, %v429_v36  ;;  %v296_v46 = vmul.f32 %v1233_v38, %v1901_v1  ;;  %1066 = vst [vmem:[#allocation2 + $0x50] sm:$0xff] %v938_v40  ;;  %v940_v50 = vmax.f32 %v812_v42, 0.0  ;;  %v1492_v51 = vunpack.c.l.bf16 %v1784_v39  ;;  %v1726_v42 = vld [vmem:[%s2558_s0 + $0x68] sm:$0xff]  }
  0x19   :  { %1067 = vst [vmem:[#allocation2 + $0x58] sm:$0xff] %v939_v41  ;;  %v1237_v52 = vunpack.c.h.bf16 %v1721_v34  ;;  %v1493_v53 = vunpack.c.h.bf16 %v1784_v39  ;;  %v814_v55 = vadd.f32 %v1488_v33, %v430_v45  ;;  %v297_v57 = vmul.f32 %v1236_v47, %v1901_v1  ;;  %v1788_v33 = vld [vmem:[%s2559_s1 + $0x60] sm:$0xff]  }
  0x1a   :  { %v941_v54 = vmax.f32 %v813_v44, 0.0  ;;  %v431_v56 = vadd.f32 %v1915_v7, %v296_v46  ;;  %1068 = vst [vmem:[#allocation2 + $0x60] sm:$0xff] %v940_v50  ;;  %v1240_v60 = vunpack.c.l.bf16 %v1722_v48  ;;  %v1496_v61 = vunpack.c.l.bf16 %v1785_v49 }
  0x1b   :  { %v298_v59 = vmul.f32 %v1237_v52, %v1901_v1  ;;  %v1241_v62 = vunpack.c.h.bf16 %v1722_v48  ;;  %v942_v0 = vmax.f32 %v814_v55, 0.0  ;;  %v432_v3 = vadd.f32 %v1915_v7, %v297_v57  ;;  %v1727_v52 = vld [vmem:[%s2558_s0 + $0x70] sm:$0xff]  }
  0x1c   :  { %1069 = vst [vmem:[#allocation2 + $0x68] sm:$0xff] %v941_v54  ;;  %v815_v2 = vadd.f32 %v1489_v43, %v431_v56  ;;  %v1497_v4 = vunpack.c.h.bf16 %v1785_v49  ;;  %v299_v6 = vmul.f32 %v1240_v60, %v1901_v1  ;;  %v1244_v9 = vunpack.c.l.bf16 %v1723_v58  ;;  %v1789_v43 = vld [vmem:[%s2559_s1 + $0x68] sm:$0xff]   ;;  %v1790_v57 = vld [vmem:[%s2559_s1 + $0x70] sm:$0xff]  }
  0x1d   :  { %v433_v5 = vadd.f32 %v1915_v7, %v298_v59  ;;  %v300_v8 = vmul.f32 %v1241_v62, %v1901_v1  ;;  %1070 = vst [vmem:[#allocation2 + $0x70] sm:$0xff] %v942_v0  ;;  %v816_v12 = vadd.f32 %v1492_v51, %v432_v3  ;;  %v1500_v13 = vunpack.c.l.bf16 %v1786_v63 }
  0x1e   :  { %v943_v11 = vmax.f32 %v815_v2, 0.0  ;;  %v1245_v14 = vunpack.c.h.bf16 %v1723_v58  ;;  %v434_v16 = vadd.f32 %v1915_v7, %v299_v6  ;;  %v301_v18 = vmul.f32 %v1244_v9, %v1901_v1 }
  0x1f   :  { %v817_v15 = vadd.f32 %v1493_v53, %v433_v5  ;;  %v435_v17 = vadd.f32 %v1915_v7, %v300_v8  ;;  %v944_v20 = vmax.f32 %v816_v12, 0.0  ;;  %v1501_v22 = vunpack.c.h.bf16 %v1786_v63 }
  0x20   :  { %1071 = vst [vmem:[#allocation2 + $0x78] sm:$0xff] %v943_v11  ;;  %v302_v21 = vmul.f32 %v1245_v14, %v1901_v1  ;;  %v1248_v23 = vunpack.c.l.bf16 %v1724_v10  ;;  %v818_v25 = vadd.f32 %v1496_v61, %v434_v16  ;;  %v436_v27 = vadd.f32 %v1915_v7, %v301_v18 }
  0x21   :  { %v945_v24 = vmax.f32 %v817_v15, 0.0  ;;  %v819_v26 = vadd.f32 %v1497_v4, %v435_v17  ;;  %1072 = vst [vmem:[#allocation2 + $0x80] sm:$0xff] %v944_v20  ;;  %v1504_v31 = vunpack.c.l.bf16 %v1787_v19  ;;  %v1249_v32 = vunpack.c.h.bf16 %v1724_v10 }
  0x22   :  { %v437_v29 = vadd.f32 %v1915_v7, %v302_v21  ;;  %v303_v30 = vmul.f32 %v1248_v23, %v1901_v1  ;;  %v946_v34 = vmax.f32 %v818_v25, 0.0  ;;  %v820_v36 = vadd.f32 %v1500_v13, %v436_v27 }
  0x23   :  { %1073 = vst [vmem:[#allocation2 + $0x88] sm:$0xff] %v945_v24  ;;  %v947_v35 = vmax.f32 %v819_v26, 0.0  ;;  %v1505_v37 = vunpack.c.h.bf16 %v1787_v19  ;;  %v304_v40 = vmul.f32 %v1249_v32, %v1901_v1  ;;  %v1252_v41 = vunpack.c.l.bf16 %v1725_v28 }
  0x24   :  { %v821_v38 = vadd.f32 %v1501_v22, %v437_v29  ;;  %v438_v39 = vadd.f32 %v1915_v7, %v303_v30  ;;  %1074 = vst [vmem:[#allocation2 + $0x90] sm:$0xff] %v946_v34  ;;  %v948_v44 = vmax.f32 %v820_v36, 0.0  ;;  %v1508_v45 = vunpack.c.l.bf16 %v1788_v33 }
  0x25   :  { %1075 = vst [vmem:[#allocation2 + $0x98] sm:$0xff] %v947_v35  ;;  %v1253_v46 = vunpack.c.h.bf16 %v1725_v28  ;;  %v1509_v47 = vunpack.c.h.bf16 %v1788_v33  ;;  %v439_v50 = vadd.f32 %v1915_v7, %v304_v40  ;;  %v305_v51 = vmul.f32 %v1252_v41, %v1901_v1 }
  0x26   :  { %v949_v48 = vmax.f32 %v821_v38, 0.0  ;;  %v822_v49 = vadd.f32 %v1504_v31, %v438_v39  ;;  %1076 = vst [vmem:[#allocation2 + $0xa0] sm:$0xff] %v948_v44  ;;  %v1256_v54 = vunpack.c.l.bf16 %v1726_v42  ;;  %v1512_v55 = vunpack.c.l.bf16 %v1789_v43 }
  0x27   :  { %v306_v53 = vmul.f32 %v1253_v46, %v1901_v1  ;;  %v1257_v56 = vunpack.c.h.bf16 %v1726_v42 }
  0x28   :  { %9 = vsyncpa [#allocation3], 0  ;;  %1077 = vst [vmem:[#allocation2 + $0xa8] sm:$0xff] %v949_v48  ;;  %v950_v58 = vmax.f32 %v822_v49, 0.0  ;;  %v823_v59 = vadd.f32 %v1505_v37, %v439_v50  ;;  %v440_v60 = vadd.f32 %v1915_v7, %v305_v51  ;;  %v1513_v61 = vunpack.c.h.bf16 %v1789_v43  ;;  %v1728_v3 = vld [vmem:[%s2558_s0 + $0x78] sm:$0xff]   ;;  %v1729_v22 = vld [vmem:[%s2558_s0 + $0x80] sm:$0xff]  }
  0x29   :  { %v441_v62 = vadd.f32 %v1915_v7, %v306_v53  ;;  %v307_v63 = vmul.f32 %v1256_v54, %v1901_v1  ;;  %v308_v0 = vmul.f32 %v1257_v56, %v1901_v1  ;;  %v1260_v2 = vunpack.c.l.bf16 %v1727_v52  ;;  %v1791_v13 = vld [vmem:[%s2559_s1 + $0x78] sm:$0xff]   ;;  %v1792_v27 = vld [vmem:[%s2559_s1 + $0x80] sm:$0xff]   ;;  %v1730_v36 = vld [vmem:[%s2558_s0 + $0x88] sm:$0xff]  }
  0x2a   :  { %1078 = vst [vmem:[#allocation2 + $0xb0] sm:$0xff] %v950_v58  ;;  %v951_v4 = vmax.f32 %v823_v59, 0.0  ;;  %v824_v5 = vadd.f32 %v1508_v45, %v440_v60  ;;  %v1516_v6 = vunpack.c.l.bf16 %v1790_v57  ;;  %v1261_v8 = vunpack.c.h.bf16 %v1727_v52  ;;  %v1793_v37 = vld [vmem:[%s2559_s1 + $0x88] sm:$0xff]   ;;  %v1731_v46 = vld [vmem:[%s2558_s0 + $0x90] sm:$0xff]   ;;  %v1732_v60 = vld [vmem:[%s2558_s0 + $0x98] sm:$0xff]  }
  0x2b   :  { %v825_v9 = vadd.f32 %v1509_v47, %v441_v62  ;;  %v442_v10 = vadd.f32 %v1915_v7, %v307_v63  ;;  %v443_v11 = vadd.f32 %v1915_v7, %v308_v0  ;;  %v309_v12 = vmul.f32 %v1260_v2, %v1901_v1  ;;  %v1794_v51 = vld [vmem:[%s2559_s1 + $0x90] sm:$0xff]  }
  0x2c   :  { %1079 = vst [vmem:[#allocation2 + $0xb8] sm:$0xff] %v951_v4  ;;  %v952_v14 = vmax.f32 %v824_v5, 0.0  ;;  %v310_v15 = vmul.f32 %v1261_v8, %v1901_v1  ;;  %v1517_v16 = vunpack.c.h.bf16 %v1790_v57  ;;  %v1264_v17 = vunpack.c.l.bf16 %v1728_v3 }
  0x2d   :  { %v953_v18 = vmax.f32 %v825_v9, 0.0  ;;  %v826_v19 = vadd.f32 %v1512_v55, %v442_v10  ;;  %v827_v20 = vadd.f32 %v1513_v61, %v443_v11  ;;  %v444_v21 = vadd.f32 %v1915_v7, %v309_v12 }
  0x2e   :  { %1080 = vst [vmem:[#allocation2 + $0xc0] sm:$0xff] %v952_v14  ;;  %v445_v23 = vadd.f32 %v1915_v7, %v310_v15  ;;  %v311_v24 = vmul.f32 %v1264_v17, %v1901_v1  ;;  %v1520_v25 = vunpack.c.l.bf16 %v1791_v13  ;;  %v1265_v26 = vunpack.c.h.bf16 %v1728_v3 }
  0x2f   :  { %1081 = vst [vmem:[#allocation2 + $0xc8] sm:$0xff] %v953_v18  ;;  %v954_v28 = vmax.f32 %v826_v19, 0.0  ;;  %v955_v29 = vmax.f32 %v827_v20, 0.0  ;;  %v828_v30 = vadd.f32 %v1516_v6, %v444_v21  ;;  %v1521_v31 = vunpack.c.h.bf16 %v1791_v13  ;;  %v1795_v6 = vld [vmem:[%s2559_s1 + $0x98] sm:$0xff]   ;;  %v1796_v21 = vld [vmem:[%s2559_s1 + $0xa0] sm:$0xff]  }
  0x30   :  { %v829_v32 = vadd.f32 %v1517_v16, %v445_v23  ;;  %v446_v33 = vadd.f32 %v1915_v7, %v311_v24  ;;  %v312_v34 = vmul.f32 %v1265_v26, %v1901_v1  ;;  %v1268_v35 = vunpack.c.l.bf16 %v1729_v22  ;;  %v1733_v16 = vld [vmem:[%s2558_s0 + $0xa0] sm:$0xff]  }
  0x31   :  { %1082 = vst [vmem:[#allocation2 + $0xd0] sm:$0xff] %v954_v28  ;;  %1083 = vst [vmem:[#allocation2 + $0xd8] sm:$0xff] %v955_v29  ;;  %v956_v38 = vmax.f32 %v828_v30, 0.0  ;;  %v1524_v39 = vunpack.c.l.bf16 %v1792_v27  ;;  %v1269_v40 = vunpack.c.h.bf16 %v1729_v22  ;;  %v1525_v41 = vunpack.c.h.bf16 %v1792_v27  ;;  %v1734_v30 = vld [vmem:[%s2558_s0 + $0xa8] sm:$0xff]  }
  0x32   :  { %v957_v42 = vmax.f32 %v829_v32, 0.0  ;;  %v830_v43 = vadd.f32 %v1520_v25, %v446_v33  ;;  %v447_v44 = vadd.f32 %v1915_v7, %v312_v34  ;;  %v313_v45 = vmul.f32 %v1268_v35, %v1901_v1 }
  0x33   :  { %1084 = vst [vmem:[#allocation2 + $0xe0] sm:$0xff] %v956_v38  ;;  %v314_v47 = vmul.f32 %v1269_v40, %v1901_v1  ;;  %v1272_v48 = vunpack.c.l.bf16 %v1730_v36  ;;  %v1528_v49 = vunpack.c.l.bf16 %v1793_v37  ;;  %v1273_v50 = vunpack.c.h.bf16 %v1730_v36  ;;  %v1735_v40 = vld [vmem:[%s2558_s0 + $0xb0] sm:$0xff]  }
  0x34   :  { %1085 = vst [vmem:[#allocation2 + $0xe8] sm:$0xff] %v957_v42  ;;  %v958_v52 = vmax.f32 %v830_v43, 0.0  ;;  %v831_v53 = vadd.f32 %v1521_v31, %v447_v44  ;;  %v448_v54 = vadd.f32 %v1915_v7, %v313_v45  ;;  %v1529_v55 = vunpack.c.h.bf16 %v1793_v37  ;;  %v1797_v31 = vld [vmem:[%s2559_s1 + $0xa8] sm:$0xff]   ;;  %v1798_v45 = vld [vmem:[%s2559_s1 + $0xb0] sm:$0xff]  }
  0x35   :  { %v449_v56 = vadd.f32 %v1915_v7, %v314_v47  ;;  %v315_v57 = vmul.f32 %v1272_v48, %v1901_v1  ;;  %v316_v58 = vmul.f32 %v1273_v50, %v1901_v1  ;;  %v1276_v59 = vunpack.c.l.bf16 %v1731_v46 }
  0x36   :  { %1086 = vst [vmem:[#allocation2 + $0xf0] sm:$0xff] %v958_v52  ;;  %v959_v61 = vmax.f32 %v831_v53, 0.0  ;;  %v832_v62 = vadd.f32 %v1524_v39, %v448_v54  ;;  %v1532_v63 = vunpack.c.l.bf16 %v1794_v51  ;;  %v1277_v0 = vunpack.c.h.bf16 %v1731_v46  ;;  %v1736_v54 = vld [vmem:[%s2558_s0 + $0xb8] sm:$0xff]  }
  0x37   :  { %v833_v2 = vadd.f32 %v1525_v41, %v449_v56  ;;  %v450_v3 = vadd.f32 %v1915_v7, %v315_v57  ;;  %v451_v4 = vadd.f32 %v1915_v7, %v316_v58  ;;  %v317_v5 = vmul.f32 %v1276_v59, %v1901_v1 }
  0x38   :  { %1087 = vst [vmem:[#allocation2 + $0xf8] sm:$0xff] %v959_v61  ;;  %v960_v8 = vmax.f32 %v832_v62, 0.0  ;;  %v318_v9 = vmul.f32 %v1277_v0, %v1901_v1  ;;  %v1533_v10 = vunpack.c.h.bf16 %v1794_v51  ;;  %v1280_v11 = vunpack.c.l.bf16 %v1732_v60 }
  0x39   :  { %v961_v12 = vmax.f32 %v833_v2, 0.0  ;;  %v834_v13 = vadd.f32 %v1528_v49, %v450_v3  ;;  %v835_v14 = vadd.f32 %v1529_v55, %v451_v4  ;;  %v452_v15 = vadd.f32 %v1915_v7, %v317_v5 }
  0x3a   :  { %1088 = vst [vmem:[#allocation2 + $0x100] sm:$0xff] %v960_v8  ;;  %v453_v17 = vadd.f32 %v1915_v7, %v318_v9  ;;  %v319_v18 = vmul.f32 %v1280_v11, %v1901_v1  ;;  %v1536_v19 = vunpack.c.l.bf16 %v1795_v6  ;;  %v1281_v20 = vunpack.c.h.bf16 %v1732_v60 }
  0x3b   :  { %1089 = vst [vmem:[#allocation2 + $0x108] sm:$0xff] %v961_v12  ;;  %v962_v22 = vmax.f32 %v834_v13, 0.0  ;;  %v963_v23 = vmax.f32 %v835_v14, 0.0  ;;  %v836_v24 = vadd.f32 %v1532_v63, %v452_v15  ;;  %v1537_v25 = vunpack.c.h.bf16 %v1795_v6  ;;  %v1799_v63 = vld [vmem:[%s2559_s1 + $0xb8] sm:$0xff]   ;;  %v1800_v15 = vld [vmem:[%s2559_s1 + $0xc0] sm:$0xff]  }
  0x3c   :  { %v837_v26 = vadd.f32 %v1533_v10, %v453_v17  ;;  %v454_v27 = vadd.f32 %v1915_v7, %v319_v18  ;;  %v320_v28 = vmul.f32 %v1281_v20, %v1901_v1  ;;  %v1284_v29 = vunpack.c.l.bf16 %v1733_v16  ;;  %v1737_v10 = vld [vmem:[%s2558_s0 + $0xc0] sm:$0xff]  }
  0x3d   :  { %1090 = vst [vmem:[#allocation2 + $0x110] sm:$0xff] %v962_v22  ;;  %1091 = vst [vmem:[#allocation2 + $0x118] sm:$0xff] %v963_v23  ;;  %v964_v32 = vmax.f32 %v836_v24, 0.0  ;;  %v1540_v33 = vunpack.c.l.bf16 %v1796_v21  ;;  %v1285_v34 = vunpack.c.h.bf16 %v1733_v16  ;;  %v1541_v35 = vunpack.c.h.bf16 %v1796_v21  ;;  %v1738_v24 = vld [vmem:[%s2558_s0 + $0xc8] sm:$0xff]  }
  0x3e   :  { %v965_v36 = vmax.f32 %v837_v26, 0.0  ;;  %v838_v37 = vadd.f32 %v1536_v19, %v454_v27  ;;  %v455_v38 = vadd.f32 %v1915_v7, %v320_v28  ;;  %v321_v39 = vmul.f32 %v1284_v29, %v1901_v1 }
  0x3f   :  { %1092 = vst [vmem:[#allocation2 + $0x120] sm:$0xff] %v964_v32  ;;  %v322_v41 = vmul.f32 %v1285_v34, %v1901_v1  ;;  %v1288_v42 = vunpack.c.l.bf16 %v1734_v30  ;;  %v1544_v43 = vunpack.c.l.bf16 %v1797_v31  ;;  %v1289_v44 = vunpack.c.h.bf16 %v1734_v30  ;;  %v1739_v34 = vld [vmem:[%s2558_s0 + $0xd0] sm:$0xff]  }
  0x40   :  { %1093 = vst [vmem:[#allocation2 + $0x128] sm:$0xff] %v965_v36  ;;  %v966_v46 = vmax.f32 %v838_v37, 0.0  ;;  %v839_v47 = vadd.f32 %v1537_v25, %v455_v38  ;;  %v456_v48 = vadd.f32 %v1915_v7, %v321_v39  ;;  %v1545_v49 = vunpack.c.h.bf16 %v1797_v31  ;;  %v1801_v25 = vld [vmem:[%s2559_s1 + $0xc8] sm:$0xff]   ;;  %v1802_v39 = vld [vmem:[%s2559_s1 + $0xd0] sm:$0xff]  }
  0x41   :  { %v457_v50 = vadd.f32 %v1915_v7, %v322_v41  ;;  %v323_v51 = vmul.f32 %v1288_v42, %v1901_v1  ;;  %v324_v52 = vmul.f32 %v1289_v44, %v1901_v1  ;;  %v1292_v53 = vunpack.c.l.bf16 %v1735_v40 }
  0x42   :  { %1094 = vst [vmem:[#allocation2 + $0x130] sm:$0xff] %v966_v46  ;;  %v967_v55 = vmax.f32 %v839_v47, 0.0  ;;  %v840_v56 = vadd.f32 %v1540_v33, %v456_v48  ;;  %v1548_v57 = vunpack.c.l.bf16 %v1798_v45  ;;  %v1293_v58 = vunpack.c.h.bf16 %v1735_v40  ;;  %v1740_v48 = vld [vmem:[%s2558_s0 + $0xd8] sm:$0xff]  }
  0x43   :  { %v841_v59 = vadd.f32 %v1541_v35, %v457_v50  ;;  %v458_v60 = vadd.f32 %v1915_v7, %v323_v51  ;;  %v459_v61 = vadd.f32 %v1915_v7, %v324_v52  ;;  %v325_v62 = vmul.f32 %v1292_v53, %v1901_v1 }
  0x44   :  { %1095 = vst [vmem:[#allocation2 + $0x138] sm:$0xff] %v967_v55  ;;  %v968_v0 = vmax.f32 %v840_v56, 0.0  ;;  %v326_v2 = vmul.f32 %v1293_v58, %v1901_v1  ;;  %v1549_v3 = vunpack.c.h.bf16 %v1798_v45  ;;  %v1296_v4 = vunpack.c.l.bf16 %v1736_v54 }
  0x45   :  { %v969_v5 = vmax.f32 %v841_v59, 0.0  ;;  %v842_v6 = vadd.f32 %v1544_v43, %v458_v60  ;;  %v843_v8 = vadd.f32 %v1545_v49, %v459_v61  ;;  %v460_v9 = vadd.f32 %v1915_v7, %v325_v62 }
  0x46   :  { %1096 = vst [vmem:[#allocation2 + $0x140] sm:$0xff] %v968_v0  ;;  %v461_v11 = vadd.f32 %v1915_v7, %v326_v2  ;;  %v327_v12 = vmul.f32 %v1296_v4, %v1901_v1  ;;  %v1552_v13 = vunpack.c.l.bf16 %v1799_v63  ;;  %v1297_v14 = vunpack.c.h.bf16 %v1736_v54 }
  0x47   :  { %1097 = vst [vmem:[#allocation2 + $0x148] sm:$0xff] %v969_v5  ;;  %v970_v16 = vmax.f32 %v842_v6, 0.0  ;;  %v971_v17 = vmax.f32 %v843_v8, 0.0  ;;  %v844_v18 = vadd.f32 %v1548_v57, %v460_v9  ;;  %v1553_v19 = vunpack.c.h.bf16 %v1799_v63  ;;  %v1803_v57 = vld [vmem:[%s2559_s1 + $0xd8] sm:$0xff]   ;;  %v1804_v9 = vld [vmem:[%s2559_s1 + $0xe0] sm:$0xff]  }
  0x48   :  { %v845_v20 = vadd.f32 %v1549_v3, %v461_v11  ;;  %v462_v21 = vadd.f32 %v1915_v7, %v327_v12  ;;  %v328_v22 = vmul.f32 %v1297_v14, %v1901_v1  ;;  %v1300_v23 = vunpack.c.l.bf16 %v1737_v10  ;;  %v1741_v3 = vld [vmem:[%s2558_s0 + $0xe0] sm:$0xff]  }
  0x49   :  { %1098 = vst [vmem:[#allocation2 + $0x150] sm:$0xff] %v970_v16  ;;  %1099 = vst [vmem:[#allocation2 + $0x158] sm:$0xff] %v971_v17  ;;  %v972_v26 = vmax.f32 %v844_v18, 0.0  ;;  %v1556_v27 = vunpack.c.l.bf16 %v1800_v15  ;;  %v1301_v28 = vunpack.c.h.bf16 %v1737_v10  ;;  %v1557_v29 = vunpack.c.h.bf16 %v1800_v15  ;;  %v1742_v18 = vld [vmem:[%s2558_s0 + $0xe8] sm:$0xff]  }
  0x4a   :  { %v973_v30 = vmax.f32 %v845_v20, 0.0  ;;  %v846_v31 = vadd.f32 %v1552_v13, %v462_v21  ;;  %v463_v32 = vadd.f32 %v1915_v7, %v328_v22  ;;  %v329_v33 = vmul.f32 %v1300_v23, %v1901_v1 }
  0x4b   :  { %1100 = vst [vmem:[#allocation2 + $0x160] sm:$0xff] %v972_v26  ;;  %v330_v35 = vmul.f32 %v1301_v28, %v1901_v1  ;;  %v1304_v36 = vunpack.c.l.bf16 %v1738_v24  ;;  %v1560_v37 = vunpack.c.l.bf16 %v1801_v25  ;;  %v1305_v38 = vunpack.c.h.bf16 %v1738_v24  ;;  %v1743_v28 = vld [vmem:[%s2558_s0 + $0xf0] sm:$0xff]  }
  0x4c   :  { %1101 = vst [vmem:[#allocation2 + $0x168] sm:$0xff] %v973_v30  ;;  %v974_v40 = vmax.f32 %v846_v31, 0.0  ;;  %v847_v41 = vadd.f32 %v1553_v19, %v463_v32  ;;  %v464_v42 = vadd.f32 %v1915_v7, %v329_v33  ;;  %v1561_v43 = vunpack.c.h.bf16 %v1801_v25  ;;  %v1805_v19 = vld [vmem:[%s2559_s1 + $0xe8] sm:$0xff]   ;;  %v1806_v33 = vld [vmem:[%s2559_s1 + $0xf0] sm:$0xff]  }
  0x4d   :  { %v465_v44 = vadd.f32 %v1915_v7, %v330_v35  ;;  %v331_v45 = vmul.f32 %v1304_v36, %v1901_v1  ;;  %v332_v46 = vmul.f32 %v1305_v38, %v1901_v1  ;;  %v1308_v47 = vunpack.c.l.bf16 %v1739_v34 }
  0x4e   :  { %1102 = vst [vmem:[#allocation2 + $0x170] sm:$0xff] %v974_v40  ;;  %v975_v49 = vmax.f32 %v847_v41, 0.0  ;;  %v848_v50 = vadd.f32 %v1556_v27, %v464_v42  ;;  %v1564_v51 = vunpack.c.l.bf16 %v1802_v39  ;;  %v1309_v52 = vunpack.c.h.bf16 %v1739_v34  ;;  %v1744_v42 = vld [vmem:[%s2558_s0 + $0xf8] sm:$0xff]  }
  0x4f   :  { %v849_v53 = vadd.f32 %v1557_v29, %v465_v44  ;;  %v466_v54 = vadd.f32 %v1915_v7, %v331_v45  ;;  %v467_v55 = vadd.f32 %v1915_v7, %v332_v46  ;;  %v333_v56 = vmul.f32 %v1308_v47, %v1901_v1 }
  0x50   :  { %1103 = vst [vmem:[#allocation2 + $0x178] sm:$0xff] %v975_v49  ;;  %v976_v58 = vmax.f32 %v848_v50, 0.0  ;;  %v334_v59 = vmul.f32 %v1309_v52, %v1901_v1  ;;  %v1565_v60 = vunpack.c.h.bf16 %v1802_v39  ;;  %v1312_v61 = vunpack.c.l.bf16 %v1740_v48 }
  0x51   :  { %v977_v62 = vmax.f32 %v849_v53, 0.0  ;;  %v850_v63 = vadd.f32 %v1560_v37, %v466_v54  ;;  %v851_v0 = vadd.f32 %v1561_v43, %v467_v55  ;;  %v468_v2 = vadd.f32 %v1915_v7, %v333_v56 }
  0x52   :  { %1104 = vst [vmem:[#allocation2 + $0x180] sm:$0xff] %v976_v58  ;;  %v469_v4 = vadd.f32 %v1915_v7, %v334_v59  ;;  %v335_v5 = vmul.f32 %v1312_v61, %v1901_v1  ;;  %v1568_v6 = vunpack.c.l.bf16 %v1803_v57  ;;  %v1313_v8 = vunpack.c.h.bf16 %v1740_v48 }
  0x53   :  { %1105 = vst [vmem:[#allocation2 + $0x188] sm:$0xff] %v977_v62  ;;  %v978_v10 = vmax.f32 %v850_v63, 0.0  ;;  %v979_v11 = vmax.f32 %v851_v0, 0.0  ;;  %v852_v12 = vadd.f32 %v1564_v51, %v468_v2  ;;  %v1569_v13 = vunpack.c.h.bf16 %v1803_v57  ;;  %v1807_v51 = vld [vmem:[%s2559_s1 + $0xf8] sm:$0xff]   ;;  %v1808_v2 = vld [vmem:[%s2559_s1 + $0x100] sm:$0xff]  }
  0x54   :  { %v853_v14 = vadd.f32 %v1565_v60, %v469_v4  ;;  %v470_v15 = vadd.f32 %v1915_v7, %v335_v5  ;;  %v336_v16 = vmul.f32 %v1313_v8, %v1901_v1  ;;  %v1316_v17 = vunpack.c.l.bf16 %v1741_v3  ;;  %v1745_v60 = vld [vmem:[%s2558_s0 + $0x100] sm:$0xff]  }
  0x55   :  { %1106 = vst [vmem:[#allocation2 + $0x190] sm:$0xff] %v978_v10  ;;  %1107 = vst [vmem:[#allocation2 + $0x198] sm:$0xff] %v979_v11  ;;  %v980_v20 = vmax.f32 %v852_v12, 0.0  ;;  %v1572_v21 = vunpack.c.l.bf16 %v1804_v9  ;;  %v1317_v22 = vunpack.c.h.bf16 %v1741_v3  ;;  %v1573_v23 = vunpack.c.h.bf16 %v1804_v9  ;;  %v1746_v12 = vld [vmem:[%s2558_s0 + $0x108] sm:$0xff]  }
  0x56   :  { %v981_v24 = vmax.f32 %v853_v14, 0.0  ;;  %v854_v25 = vadd.f32 %v1568_v6, %v470_v15  ;;  %v471_v26 = vadd.f32 %v1915_v7, %v336_v16  ;;  %v337_v27 = vmul.f32 %v1316_v17, %v1901_v1 }
  0x57   :  { %1108 = vst [vmem:[#allocation2 + $0x1a0] sm:$0xff] %v980_v20  ;;  %v338_v29 = vmul.f32 %v1317_v22, %v1901_v1  ;;  %v1320_v30 = vunpack.c.l.bf16 %v1742_v18  ;;  %v1576_v31 = vunpack.c.l.bf16 %v1805_v19  ;;  %v1321_v32 = vunpack.c.h.bf16 %v1742_v18  ;;  %v1747_v22 = vld [vmem:[%s2558_s0 + $0x110] sm:$0xff]  }
  0x58   :  { %1109 = vst [vmem:[#allocation2 + $0x1a8] sm:$0xff] %v981_v24  ;;  %v982_v34 = vmax.f32 %v854_v25, 0.0  ;;  %v855_v35 = vadd.f32 %v1569_v13, %v471_v26  ;;  %v472_v36 = vadd.f32 %v1915_v7, %v337_v27  ;;  %v1577_v37 = vunpack.c.h.bf16 %v1805_v19  ;;  %v1809_v13 = vld [vmem:[%s2559_s1 + $0x108] sm:$0xff]  }
  0x59   :  { %v473_v38 = vadd.f32 %v1915_v7, %v338_v29  ;;  %v339_v39 = vmul.f32 %v1320_v30, %v1901_v1  ;;  %v340_v40 = vmul.f32 %v1321_v32, %v1901_v1  ;;  %v1324_v41 = vunpack.c.l.bf16 %v1743_v28  ;;  %v2253_v29 = vld [vmem:[%s2561_s3] ss:$0 sm:$0xff] }
  0x5a   :  { %1110 = vst [vmem:[#allocation2 + $0x1b0] sm:$0xff] %v982_v34  ;;  %v983_v43 = vmax.f32 %v855_v35, 0.0  ;;  %v856_v44 = vadd.f32 %v1572_v21, %v472_v36  ;;  %v1580_v45 = vunpack.c.l.bf16 %v1806_v33  ;;  %v1325_v46 = vunpack.c.h.bf16 %v1743_v28  ;;  %v1748_v36 = vld [vmem:[%s2558_s0 + $0x118] sm:$0xff]  }
  0x5b   :  { %v857_v47 = vadd.f32 %v1573_v23, %v473_v38  ;;  %v474_v48 = vadd.f32 %v1915_v7, %v339_v39  ;;  %v475_v49 = vadd.f32 %v1915_v7, %v340_v40  ;;  %v341_v50 = vmul.f32 %v1324_v41, %v1901_v1 }
  0x5c   :  { %1111 = vst [vmem:[#allocation2 + $0x1b8] sm:$0xff] %v983_v43  ;;  %v984_v52 = vmax.f32 %v856_v44, 0.0  ;;  %v342_v53 = vmul.f32 %v1325_v46, %v1901_v1  ;;  %v1581_v54 = vunpack.c.h.bf16 %v1806_v33  ;;  %v1328_v55 = vunpack.c.l.bf16 %v1744_v42 }
  0x5d   :  { %v985_v56 = vmax.f32 %v857_v47, 0.0  ;;  %v858_v57 = vadd.f32 %v1576_v31, %v474_v48  ;;  %v859_v58 = vadd.f32 %v1577_v37, %v475_v49  ;;  %v476_v59 = vadd.f32 %v1915_v7, %v341_v50 }
  0x5e   :  { %1112 = vst [vmem:[#allocation2 + $0x1c0] sm:$0xff] %v984_v52  ;;  %v477_v61 = vadd.f32 %v1915_v7, %v342_v53  ;;  %v343_v62 = vmul.f32 %v1328_v55, %v1901_v1  ;;  %v1584_v63 = vunpack.c.l.bf16 %v1807_v51  ;;  %v1329_v0 = vunpack.c.h.bf16 %v1744_v42 }
  0x5f   :  { %1113 = vst [vmem:[#allocation2 + $0x1c8] sm:$0xff] %v985_v56  ;;  %v986_v3 = vmax.f32 %v858_v57, 0.0  ;;  %v987_v4 = vmax.f32 %v859_v58, 0.0  ;;  %v860_v5 = vadd.f32 %v1580_v45, %v476_v59  ;;  %v1585_v6 = vunpack.c.h.bf16 %v1807_v51  ;;  %v1811_v45 = vld [vmem:[%s2559_s1 + $0x118] sm:$0xff]   ;;  %v1812_v59 = vld [vmem:[%s2559_s1 + $0x120] sm:$0xff]  }
  0x60   :  { %v861_v8 = vadd.f32 %v1581_v54, %v477_v61  ;;  %v478_v9 = vadd.f32 %v1915_v7, %v343_v62  ;;  %v344_v10 = vmul.f32 %v1329_v0, %v1901_v1  ;;  %v1332_v11 = vunpack.c.l.bf16 %v1745_v60  ;;  %v2240_v1 = vld [vmem:[%s2560_s2] ss:$0 sm:$0xff] }
  0x61   :  { %1114 = vst [vmem:[#allocation2 + $0x1d0] sm:$0xff] %v986_v3  ;;  %1115 = vst [vmem:[#allocation2 + $0x1d8] sm:$0xff] %v987_v4  ;;  %v988_v14 = vmax.f32 %v860_v5, 0.0  ;;  %v1588_v15 = vunpack.c.l.bf16 %v1808_v2  ;;  %v1333_v16 = vunpack.c.h.bf16 %v1745_v60  ;;  %v1589_v17 = vunpack.c.h.bf16 %v1808_v2  ;;  %v1749_v54 = vld [vmem:[%s2558_s0 + $0x120] sm:$0xff]   ;;  %v1750_v5 = vld [vmem:[%s2558_s0 + $0x128] sm:$0xff]  }
  0x62   :  { %v989_v18 = vmax.f32 %v861_v8, 0.0  ;;  %v862_v19 = vadd.f32 %v1584_v63, %v478_v9  ;;  %v479_v20 = vadd.f32 %v1915_v7, %v344_v10  ;;  %v345_v21 = vmul.f32 %v2240_v1, %v1332_v11  ;;  %v1810_v7 = vld [vmem:[%s2559_s1 + $0x110] sm:$0xff]  }
  0x63   :  { %1116 = vst [vmem:[#allocation2 + $0x1e0] sm:$0xff] %v988_v14  ;;  %v346_v23 = vmul.f32 %v2240_v1, %v1333_v16  ;;  %v1336_v24 = vunpack.c.l.bf16 %v1746_v12  ;;  %v1592_v25 = vunpack.c.l.bf16 %v1809_v13  ;;  %v1337_v26 = vunpack.c.h.bf16 %v1746_v12  ;;  %v1751_v16 = vld [vmem:[%s2558_s0 + $0x130] sm:$0xff]  }
  0x64   :  { %1117 = vst [vmem:[#allocation2 + $0x1e8] sm:$0xff] %v989_v18  ;;  %v990_v27 = vmax.f32 %v862_v19, 0.0  ;;  %v863_v28 = vadd.f32 %v1585_v6, %v479_v20  ;;  %v480_v30 = vadd.f32 %v2253_v29, %v345_v21  ;;  %v1593_v31 = vunpack.c.h.bf16 %v1809_v13  ;;  %v1813_v6 = vld [vmem:[%s2559_s1 + $0x128] sm:$0xff]   ;;  %v1814_v21 = vld [vmem:[%s2559_s1 + $0x130] sm:$0xff]  }
  0x65   :  { %v481_v32 = vadd.f32 %v2253_v29, %v346_v23  ;;  %v347_v33 = vmul.f32 %v2240_v1, %v1336_v24  ;;  %v348_v34 = vmul.f32 %v2240_v1, %v1337_v26  ;;  %v1340_v35 = vunpack.c.l.bf16 %v1747_v22 }
  0x66   :  { %1118 = vst [vmem:[#allocation2 + $0x1f0] sm:$0xff] %v990_v27  ;;  %v991_v37 = vmax.f32 %v863_v28, 0.0  ;;  %v864_v38 = vadd.f32 %v1588_v15, %v480_v30  ;;  %v1596_v39 = vunpack.c.l.bf16 %v1810_v7  ;;  %v1341_v40 = vunpack.c.h.bf16 %v1747_v22  ;;  %v1752_v30 = vld [vmem:[%s2558_s0 + $0x138] sm:$0xff]  }
  0x67   :  { %v865_v41 = vadd.f32 %v1589_v17, %v481_v32  ;;  %v482_v42 = vadd.f32 %v2253_v29, %v347_v33  ;;  %v483_v43 = vadd.f32 %v2253_v29, %v348_v34  ;;  %v349_v44 = vmul.f32 %v2240_v1, %v1340_v35 }
  0x68   :  { %1119 = vst [vmem:[#allocation2 + $0x1f8] sm:$0xff] %v991_v37  ;;  %v992_v46 = vmax.f32 %v864_v38, 0.0  ;;  %v350_v47 = vmul.f32 %v2240_v1, %v1341_v40  ;;  %v1597_v48 = vunpack.c.h.bf16 %v1810_v7  ;;  %v1344_v49 = vunpack.c.l.bf16 %v1748_v36 }
  0x69   :  { %v993_v50 = vmax.f32 %v865_v41, 0.0  ;;  %v866_v51 = vadd.f32 %v1592_v25, %v482_v42  ;;  %v867_v52 = vadd.f32 %v1593_v31, %v483_v43  ;;  %v484_v53 = vadd.f32 %v2253_v29, %v349_v44 }
  0x6a   :  { %1120 = vst [vmem:[#allocation2 + $0x200] sm:$0xff] %v992_v46  ;;  %v485_v55 = vadd.f32 %v2253_v29, %v350_v47  ;;  %v351_v56 = vmul.f32 %v2240_v1, %v1344_v49  ;;  %v1600_v57 = vunpack.c.l.bf16 %v1811_v45  ;;  %v1345_v58 = vunpack.c.h.bf16 %v1748_v36 }
  0x6b   :  { %1121 = vst [vmem:[#allocation2 + $0x208] sm:$0xff] %v993_v50  ;;  %v994_v60 = vmax.f32 %v866_v51, 0.0  ;;  %v995_v61 = vmax.f32 %v867_v52, 0.0  ;;  %v868_v62 = vadd.f32 %v1596_v39, %v484_v53  ;;  %v1601_v63 = vunpack.c.h.bf16 %v1811_v45  ;;  %v1815_v39 = vld [vmem:[%s2559_s1 + $0x138] sm:$0xff]   ;;  %v1816_v53 = vld [vmem:[%s2559_s1 + $0x140] sm:$0xff]  }
  0x6c   :  { %v869_v0 = vadd.f32 %v1597_v48, %v485_v55  ;;  %v486_v2 = vadd.f32 %v2253_v29, %v351_v56  ;;  %v352_v3 = vmul.f32 %v2240_v1, %v1345_v58  ;;  %v1348_v4 = vunpack.c.l.bf16 %v1749_v54  ;;  %v1753_v48 = vld [vmem:[%s2558_s0 + $0x140] sm:$0xff]  }
  0x6d   :  { %1122 = vst [vmem:[#allocation2 + $0x210] sm:$0xff] %v994_v60  ;;  %1123 = vst [vmem:[#allocation2 + $0x218] sm:$0xff] %v995_v61  ;;  %v996_v8 = vmax.f32 %v868_v62, 0.0  ;;  %v1604_v9 = vunpack.c.l.bf16 %v1812_v59  ;;  %v1349_v10 = vunpack.c.h.bf16 %v1749_v54  ;;  %v1605_v11 = vunpack.c.h.bf16 %v1812_v59  ;;  %v1754_v62 = vld [vmem:[%s2558_s0 + $0x148] sm:$0xff]  }
  0x6e   :  { %v997_v12 = vmax.f32 %v869_v0, 0.0  ;;  %v870_v13 = vadd.f32 %v1600_v57, %v486_v2  ;;  %v487_v14 = vadd.f32 %v2253_v29, %v352_v3  ;;  %v353_v15 = vmul.f32 %v2240_v1, %v1348_v4 }
  0x6f   :  { %1124 = vst [vmem:[#allocation2 + $0x220] sm:$0xff] %v996_v8  ;;  %v354_v17 = vmul.f32 %v2240_v1, %v1349_v10  ;;  %v1352_v18 = vunpack.c.l.bf16 %v1750_v5  ;;  %v1608_v19 = vunpack.c.l.bf16 %v1813_v6  ;;  %v1353_v20 = vunpack.c.h.bf16 %v1750_v5  ;;  %v1755_v10 = vld [vmem:[%s2558_s0 + $0x150] sm:$0xff]  }
  0x70   :  { %1125 = vst [vmem:[#allocation2 + $0x228] sm:$0xff] %v997_v12  ;;  %v998_v22 = vmax.f32 %v870_v13, 0.0  ;;  %v871_v23 = vadd.f32 %v1601_v63, %v487_v14  ;;  %v488_v24 = vadd.f32 %v2253_v29, %v353_v15  ;;  %v1609_v25 = vunpack.c.h.bf16 %v1813_v6  ;;  %v1817_v63 = vld [vmem:[%s2559_s1 + $0x148] sm:$0xff]   ;;  %v1818_v15 = vld [vmem:[%s2559_s1 + $0x150] sm:$0xff]  }
  0x71   :  { %v489_v26 = vadd.f32 %v2253_v29, %v354_v17  ;;  %v355_v7 = vmul.f32 %v2240_v1, %v1352_v18  ;;  %v356_v27 = vmul.f32 %v2240_v1, %v1353_v20  ;;  %v1356_v28 = vunpack.c.l.bf16 %v1751_v16 }
  0x72   :  { %1126 = vst [vmem:[#allocation2 + $0x230] sm:$0xff] %v998_v22  ;;  %v999_v31 = vmax.f32 %v871_v23, 0.0  ;;  %v872_v32 = vadd.f32 %v1604_v9, %v488_v24  ;;  %v1612_v33 = vunpack.c.l.bf16 %v1814_v21  ;;  %v1357_v34 = vunpack.c.h.bf16 %v1751_v16  ;;  %v1756_v24 = vld [vmem:[%s2558_s0 + $0x158] sm:$0xff]  }
  0x73   :  { %v873_v35 = vadd.f32 %v1605_v11, %v489_v26  ;;  %v490_v36 = vadd.f32 %v2253_v29, %v355_v7  ;;  %v491_v37 = vadd.f32 %v2253_v29, %v356_v27  ;;  %v357_v38 = vmul.f32 %v2240_v1, %v1356_v28 }
  0x74   :  { %1127 = vst [vmem:[#allocation2 + $0x238] sm:$0xff] %v999_v31  ;;  %v1000_v40 = vmax.f32 %v872_v32, 0.0  ;;  %v358_v41 = vmul.f32 %v2240_v1, %v1357_v34  ;;  %v1613_v42 = vunpack.c.h.bf16 %v1814_v21  ;;  %v1360_v43 = vunpack.c.l.bf16 %v1752_v30 }
  0x75   :  { %v1001_v44 = vmax.f32 %v873_v35, 0.0  ;;  %v874_v45 = vadd.f32 %v1608_v19, %v490_v36  ;;  %v875_v46 = vadd.f32 %v1609_v25, %v491_v37  ;;  %v492_v47 = vadd.f32 %v2253_v29, %v357_v38 }
  0x76   :  { %1128 = vst [vmem:[#allocation2 + $0x240] sm:$0xff] %v1000_v40  ;;  %v493_v49 = vadd.f32 %v2253_v29, %v358_v41  ;;  %v359_v50 = vmul.f32 %v2240_v1, %v1360_v43  ;;  %v1616_v51 = vunpack.c.l.bf16 %v1815_v39  ;;  %v1361_v52 = vunpack.c.h.bf16 %v1752_v30 }
  0x77   :  { %1129 = vst [vmem:[#allocation2 + $0x248] sm:$0xff] %v1001_v44  ;;  %v1002_v54 = vmax.f32 %v874_v45, 0.0  ;;  %v1003_v55 = vmax.f32 %v875_v46, 0.0  ;;  %v876_v56 = vadd.f32 %v1612_v33, %v492_v47  ;;  %v1617_v57 = vunpack.c.h.bf16 %v1815_v39  ;;  %v1819_v33 = vld [vmem:[%s2559_s1 + $0x158] sm:$0xff]   ;;  %v1820_v47 = vld [vmem:[%s2559_s1 + $0x160] sm:$0xff]  }
  0x78   :  { %v877_v58 = vadd.f32 %v1613_v42, %v493_v49  ;;  %v494_v59 = vadd.f32 %v2253_v29, %v359_v50  ;;  %v360_v60 = vmul.f32 %v2240_v1, %v1361_v52  ;;  %v1364_v61 = vunpack.c.l.bf16 %v1753_v48  ;;  %v1757_v42 = vld [vmem:[%s2558_s0 + $0x160] sm:$0xff]  }
  0x79   :  { %1130 = vst [vmem:[#allocation2 + $0x250] sm:$0xff] %v1002_v54  ;;  %1131 = vst [vmem:[#allocation2 + $0x258] sm:$0xff] %v1003_v55  ;;  %v1004_v0 = vmax.f32 %v876_v56, 0.0  ;;  %v1620_v2 = vunpack.c.l.bf16 %v1816_v53  ;;  %v1365_v3 = vunpack.c.h.bf16 %v1753_v48  ;;  %v1621_v4 = vunpack.c.h.bf16 %v1816_v53  ;;  %v1758_v56 = vld [vmem:[%s2558_s0 + $0x168] sm:$0xff]  }
  0x7a   :  { %v1005_v5 = vmax.f32 %v877_v58, 0.0  ;;  %v878_v6 = vadd.f32 %v1616_v51, %v494_v59  ;;  %v495_v8 = vadd.f32 %v2253_v29, %v360_v60  ;;  %v361_v9 = vmul.f32 %v2240_v1, %v1364_v61 }
  0x7b   :  { %1132 = vst [vmem:[#allocation2 + $0x260] sm:$0xff] %v1004_v0  ;;  %v362_v11 = vmul.f32 %v2240_v1, %v1365_v3  ;;  %v1368_v12 = vunpack.c.l.bf16 %v1754_v62  ;;  %v1624_v13 = vunpack.c.l.bf16 %v1817_v63  ;;  %v1369_v14 = vunpack.c.h.bf16 %v1754_v62  ;;  %v1759_v3 = vld [vmem:[%s2558_s0 + $0x170] sm:$0xff]  }
  0x7c   :  { %1133 = vst [vmem:[#allocation2 + $0x268] sm:$0xff] %v1005_v5  ;;  %v1006_v16 = vmax.f32 %v878_v6, 0.0  ;;  %v879_v17 = vadd.f32 %v1617_v57, %v495_v8  ;;  %v496_v18 = vadd.f32 %v2253_v29, %v361_v9  ;;  %v1625_v19 = vunpack.c.h.bf16 %v1817_v63  ;;  %v1821_v57 = vld [vmem:[%s2559_s1 + $0x168] sm:$0xff]   ;;  %v1822_v9 = vld [vmem:[%s2559_s1 + $0x170] sm:$0xff]  }
  0x7d   :  { %v497_v20 = vadd.f32 %v2253_v29, %v362_v11  ;;  %v363_v21 = vmul.f32 %v2240_v1, %v1368_v12  ;;  %v364_v22 = vmul.f32 %v2240_v1, %v1369_v14  ;;  %v1372_v23 = vunpack.c.l.bf16 %v1755_v10 }
  0x7e   :  { %1134 = vst [vmem:[#allocation2 + $0x270] sm:$0xff] %v1006_v16  ;;  %v1007_v25 = vmax.f32 %v879_v17, 0.0  ;;  %v880_v26 = vadd.f32 %v1620_v2, %v496_v18  ;;  %v1628_v7 = vunpack.c.l.bf16 %v1818_v15  ;;  %v1373_v27 = vunpack.c.h.bf16 %v1755_v10  ;;  %v1760_v18 = vld [vmem:[%s2558_s0 + $0x178] sm:$0xff]  }
  0x7f   :  { %v881_v28 = vadd.f32 %v1621_v4, %v497_v20  ;;  %v498_v30 = vadd.f32 %v2253_v29, %v363_v21  ;;  %v499_v31 = vadd.f32 %v2253_v29, %v364_v22  ;;  %v365_v32 = vmul.f32 %v2240_v1, %v1372_v23 }
  0x80   :  { %1135 = vst [vmem:[#allocation2 + $0x278] sm:$0xff] %v1007_v25  ;;  %v1008_v34 = vmax.f32 %v880_v26, 0.0  ;;  %v366_v35 = vmul.f32 %v2240_v1, %v1373_v27  ;;  %v1629_v36 = vunpack.c.h.bf16 %v1818_v15  ;;  %v1376_v37 = vunpack.c.l.bf16 %v1756_v24 }
  0x81   :  { %v1009_v38 = vmax.f32 %v881_v28, 0.0  ;;  %v882_v39 = vadd.f32 %v1624_v13, %v498_v30  ;;  %v883_v40 = vadd.f32 %v1625_v19, %v499_v31  ;;  %v500_v41 = vadd.f32 %v2253_v29, %v365_v32 }
  0x82   :  { %1136 = vst [vmem:[#allocation2 + $0x280] sm:$0xff] %v1008_v34  ;;  %v501_v43 = vadd.f32 %v2253_v29, %v366_v35  ;;  %v367_v44 = vmul.f32 %v2240_v1, %v1376_v37  ;;  %v1632_v45 = vunpack.c.l.bf16 %v1819_v33  ;;  %v1377_v46 = vunpack.c.h.bf16 %v1756_v24 }
  0x83   :  { %1137 = vst [vmem:[#allocation2 + $0x288] sm:$0xff] %v1009_v38  ;;  %v1010_v48 = vmax.f32 %v882_v39, 0.0  ;;  %v1011_v49 = vmax.f32 %v883_v40, 0.0  ;;  %v884_v50 = vadd.f32 %v1628_v7, %v500_v41  ;;  %v1633_v51 = vunpack.c.h.bf16 %v1819_v33  ;;  %v1823_v7 = vld [vmem:[%s2559_s1 + $0x178] sm:$0xff]   ;;  %v1824_v41 = vld [vmem:[%s2559_s1 + $0x180] sm:$0xff]  }
  0x84   :  { %v885_v52 = vadd.f32 %v1629_v36, %v501_v43  ;;  %v502_v53 = vadd.f32 %v2253_v29, %v367_v44  ;;  %v368_v54 = vmul.f32 %v2240_v1, %v1377_v46  ;;  %v1380_v55 = vunpack.c.l.bf16 %v1757_v42  ;;  %v1761_v36 = vld [vmem:[%s2558_s0 + $0x180] sm:$0xff]  }
  0x85   :  { %1138 = vst [vmem:[#allocation2 + $0x290] sm:$0xff] %v1010_v48  ;;  %1139 = vst [vmem:[#allocation2 + $0x298] sm:$0xff] %v1011_v49  ;;  %v1012_v58 = vmax.f32 %v884_v50, 0.0  ;;  %v1636_v59 = vunpack.c.l.bf16 %v1820_v47  ;;  %v1381_v60 = vunpack.c.h.bf16 %v1757_v42  ;;  %v1637_v61 = vunpack.c.h.bf16 %v1820_v47  ;;  %v1762_v50 = vld [vmem:[%s2558_s0 + $0x188] sm:$0xff]  }
  0x86   :  { %v1013_v62 = vmax.f32 %v885_v52, 0.0  ;;  %v886_v63 = vadd.f32 %v1632_v45, %v502_v53  ;;  %v503_v0 = vadd.f32 %v2253_v29, %v368_v54  ;;  %v369_v2 = vmul.f32 %v2240_v1, %v1380_v55 }
  0x87   :  { %1140 = vst [vmem:[#allocation2 + $0x2a0] sm:$0xff] %v1012_v58  ;;  %v370_v4 = vmul.f32 %v2240_v1, %v1381_v60  ;;  %v1384_v5 = vunpack.c.l.bf16 %v1758_v56  ;;  %v1640_v6 = vunpack.c.l.bf16 %v1821_v57  ;;  %v1385_v8 = vunpack.c.h.bf16 %v1758_v56  ;;  %v1763_v60 = vld [vmem:[%s2558_s0 + $0x190] sm:$0xff]  }
  0x88   :  { %1141 = vst [vmem:[#allocation2 + $0x2a8] sm:$0xff] %v1013_v62  ;;  %v1014_v10 = vmax.f32 %v886_v63, 0.0  ;;  %v887_v11 = vadd.f32 %v1633_v51, %v503_v0  ;;  %v504_v12 = vadd.f32 %v2253_v29, %v369_v2  ;;  %v1641_v13 = vunpack.c.h.bf16 %v1821_v57  ;;  %v1825_v51 = vld [vmem:[%s2559_s1 + $0x188] sm:$0xff]   ;;  %v1826_v2 = vld [vmem:[%s2559_s1 + $0x190] sm:$0xff]  }
  0x89   :  { %v505_v14 = vadd.f32 %v2253_v29, %v370_v4  ;;  %v371_v15 = vmul.f32 %v2240_v1, %v1384_v5  ;;  %v372_v16 = vmul.f32 %v2240_v1, %v1385_v8  ;;  %v1388_v17 = vunpack.c.l.bf16 %v1759_v3 }
  0x8a   :  { %1142 = vst [vmem:[#allocation2 + $0x2b0] sm:$0xff] %v1014_v10  ;;  %v1015_v19 = vmax.f32 %v887_v11, 0.0  ;;  %v888_v20 = vadd.f32 %v1636_v59, %v504_v12  ;;  %v1644_v21 = vunpack.c.l.bf16 %v1822_v9  ;;  %v1389_v22 = vunpack.c.h.bf16 %v1759_v3  ;;  %v1764_v12 = vld [vmem:[%s2558_s0 + $0x198] sm:$0xff]  }
  0x8b   :  { %v889_v23 = vadd.f32 %v1637_v61, %v505_v14  ;;  %v506_v24 = vadd.f32 %v2253_v29, %v371_v15  ;;  %v507_v25 = vadd.f32 %v2253_v29, %v372_v16  ;;  %v373_v26 = vmul.f32 %v2240_v1, %v1388_v17 }
  0x8c   :  { %1143 = vst [vmem:[#allocation2 + $0x2b8] sm:$0xff] %v1015_v19  ;;  %v1016_v27 = vmax.f32 %v888_v20, 0.0  ;;  %v374_v28 = vmul.f32 %v2240_v1, %v1389_v22  ;;  %v1645_v30 = vunpack.c.h.bf16 %v1822_v9  ;;  %v1392_v31 = vunpack.c.l.bf16 %v1760_v18 }
  0x8d   :  { %v1017_v32 = vmax.f32 %v889_v23, 0.0  ;;  %v890_v33 = vadd.f32 %v1640_v6, %v506_v24  ;;  %v891_v34 = vadd.f32 %v1641_v13, %v507_v25  ;;  %v508_v35 = vadd.f32 %v2253_v29, %v373_v26 }
  0x8e   :  { %1144 = vst [vmem:[#allocation2 + $0x2c0] sm:$0xff] %v1016_v27  ;;  %v509_v37 = vadd.f32 %v2253_v29, %v374_v28  ;;  %v375_v38 = vmul.f32 %v2240_v1, %v1392_v31  ;;  %v1648_v39 = vunpack.c.l.bf16 %v1823_v7  ;;  %v1393_v40 = vunpack.c.h.bf16 %v1760_v18 }
  0x8f   :  { %1145 = vst [vmem:[#allocation2 + $0x2c8] sm:$0xff] %v1017_v32  ;;  %v1018_v42 = vmax.f32 %v890_v33, 0.0  ;;  %v1019_v43 = vmax.f32 %v891_v34, 0.0  ;;  %v892_v44 = vadd.f32 %v1644_v21, %v508_v35  ;;  %v1649_v45 = vunpack.c.h.bf16 %v1823_v7  ;;  %v1827_v21 = vld [vmem:[%s2559_s1 + $0x198] sm:$0xff]   ;;  %v1828_v35 = vld [vmem:[%s2559_s1 + $0x1a0] sm:$0xff]  }
  0x90   :  { %v893_v46 = vadd.f32 %v1645_v30, %v509_v37  ;;  %v510_v47 = vadd.f32 %v2253_v29, %v375_v38  ;;  %v376_v48 = vmul.f32 %v2240_v1, %v1393_v40  ;;  %v1396_v49 = vunpack.c.l.bf16 %v1761_v36  ;;  %v1765_v30 = vld [vmem:[%s2558_s0 + $0x1a0] sm:$0xff]  }
  0x91   :  { %1146 = vst [vmem:[#allocation2 + $0x2d0] sm:$0xff] %v1018_v42  ;;  %1147 = vst [vmem:[#allocation2 + $0x2d8] sm:$0xff] %v1019_v43  ;;  %v1020_v52 = vmax.f32 %v892_v44, 0.0  ;;  %v1652_v53 = vunpack.c.l.bf16 %v1824_v41  ;;  %v1397_v54 = vunpack.c.h.bf16 %v1761_v36  ;;  %v1653_v55 = vunpack.c.h.bf16 %v1824_v41  ;;  %v1766_v44 = vld [vmem:[%s2558_s0 + $0x1a8] sm:$0xff]  }
  0x92   :  { %v1021_v56 = vmax.f32 %v893_v46, 0.0  ;;  %v894_v57 = vadd.f32 %v1648_v39, %v510_v47  ;;  %v511_v58 = vadd.f32 %v2253_v29, %v376_v48  ;;  %v377_v59 = vmul.f32 %v2240_v1, %v1396_v49 }
  0x93   :  { %1148 = vst [vmem:[#allocation2 + $0x2e0] sm:$0xff] %v1020_v52  ;;  %v378_v61 = vmul.f32 %v2240_v1, %v1397_v54  ;;  %v1400_v62 = vunpack.c.l.bf16 %v1762_v50  ;;  %v1656_v63 = vunpack.c.l.bf16 %v1825_v51  ;;  %v1401_v0 = vunpack.c.h.bf16 %v1762_v50  ;;  %v1767_v54 = vld [vmem:[%s2558_s0 + $0x1b0] sm:$0xff]  }
  0x94   :  { %1149 = vst [vmem:[#allocation2 + $0x2e8] sm:$0xff] %v1021_v56  ;;  %v1022_v3 = vmax.f32 %v894_v57, 0.0  ;;  %v895_v4 = vadd.f32 %v1649_v45, %v511_v58  ;;  %v512_v5 = vadd.f32 %v2253_v29, %v377_v59  ;;  %v1657_v6 = vunpack.c.h.bf16 %v1825_v51  ;;  %v1829_v45 = vld [vmem:[%s2559_s1 + $0x1a8] sm:$0xff]   ;;  %v1830_v59 = vld [vmem:[%s2559_s1 + $0x1b0] sm:$0xff]  }
  0x95   :  { %v513_v8 = vadd.f32 %v2253_v29, %v378_v61  ;;  %v379_v9 = vmul.f32 %v2240_v1, %v1400_v62  ;;  %v380_v10 = vmul.f32 %v2240_v1, %v1401_v0  ;;  %v1404_v11 = vunpack.c.l.bf16 %v1763_v60 }
  0x96   :  { %1150 = vst [vmem:[#allocation2 + $0x2f0] sm:$0xff] %v1022_v3  ;;  %v1023_v13 = vmax.f32 %v895_v4, 0.0  ;;  %v896_v14 = vadd.f32 %v1652_v53, %v512_v5  ;;  %v1660_v15 = vunpack.c.l.bf16 %v1826_v2  ;;  %v1405_v16 = vunpack.c.h.bf16 %v1763_v60  ;;  %v1768_v5 = vld [vmem:[%s2558_s0 + $0x1b8] sm:$0xff]  }
  0x97   :  { %v897_v17 = vadd.f32 %v1653_v55, %v513_v8  ;;  %v514_v18 = vadd.f32 %v2253_v29, %v379_v9  ;;  %v515_v19 = vadd.f32 %v2253_v29, %v380_v10  ;;  %v381_v20 = vmul.f32 %v2240_v1, %v1404_v11 }
  0x98   :  { %1151 = vst [vmem:[#allocation2 + $0x2f8] sm:$0xff] %v1023_v13  ;;  %v1024_v22 = vmax.f32 %v896_v14, 0.0  ;;  %v382_v23 = vmul.f32 %v2240_v1, %v1405_v16  ;;  %v1661_v24 = vunpack.c.h.bf16 %v1826_v2  ;;  %v1408_v25 = vunpack.c.l.bf16 %v1764_v12 }
  0x99   :  { %v1025_v26 = vmax.f32 %v897_v17, 0.0  ;;  %v898_v7 = vadd.f32 %v1656_v63, %v514_v18  ;;  %v899_v27 = vadd.f32 %v1657_v6, %v515_v19  ;;  %v516_v28 = vadd.f32 %v2253_v29, %v381_v20 }
  0x9a   :  { %1152 = vst [vmem:[#allocation2 + $0x300] sm:$0xff] %v1024_v22  ;;  %v517_v31 = vadd.f32 %v2253_v29, %v382_v23  ;;  %v383_v32 = vmul.f32 %v2240_v1, %v1408_v25  ;;  %v1664_v33 = vunpack.c.l.bf16 %v1827_v21  ;;  %v1409_v34 = vunpack.c.h.bf16 %v1764_v12 }
  0x9b   :  { %1153 = vst [vmem:[#allocation2 + $0x308] sm:$0xff] %v1025_v26  ;;  %v1026_v36 = vmax.f32 %v898_v7, 0.0  ;;  %v1027_v37 = vmax.f32 %v899_v27, 0.0  ;;  %v900_v38 = vadd.f32 %v1660_v15, %v516_v28  ;;  %v1665_v39 = vunpack.c.h.bf16 %v1827_v21  ;;  %v1831_v15 = vld [vmem:[%s2559_s1 + $0x1b8] sm:$0xff]   ;;  %v1832_v28 = vld [vmem:[%s2559_s1 + $0x1c0] sm:$0xff]  }
  0x9c   :  { %v901_v40 = vadd.f32 %v1661_v24, %v517_v31  ;;  %v518_v41 = vadd.f32 %v2253_v29, %v383_v32  ;;  %v384_v42 = vmul.f32 %v2240_v1, %v1409_v34  ;;  %v1412_v43 = vunpack.c.l.bf16 %v1765_v30  ;;  %v1769_v24 = vld [vmem:[%s2558_s0 + $0x1c0] sm:$0xff]  }
  0x9d   :  { %1154 = vst [vmem:[#allocation2 + $0x310] sm:$0xff] %v1026_v36  ;;  %1155 = vst [vmem:[#allocation2 + $0x318] sm:$0xff] %v1027_v37  ;;  %v1028_v46 = vmax.f32 %v900_v38, 0.0  ;;  %v1668_v47 = vunpack.c.l.bf16 %v1828_v35  ;;  %v1413_v48 = vunpack.c.h.bf16 %v1765_v30  ;;  %v1669_v49 = vunpack.c.h.bf16 %v1828_v35  ;;  %v1770_v38 = vld [vmem:[%s2558_s0 + $0x1c8] sm:$0xff]  }
  0x9e   :  { %v1029_v50 = vmax.f32 %v901_v40, 0.0  ;;  %v902_v51 = vadd.f32 %v1664_v33, %v518_v41  ;;  %v519_v52 = vadd.f32 %v2253_v29, %v384_v42  ;;  %v385_v53 = vmul.f32 %v2240_v1, %v1412_v43 }
  0x9f   :  { %1156 = vst [vmem:[#allocation2 + $0x320] sm:$0xff] %v1028_v46  ;;  %v386_v55 = vmul.f32 %v2240_v1, %v1413_v48  ;;  %v1416_v56 = vunpack.c.l.bf16 %v1766_v44  ;;  %v1672_v57 = vunpack.c.l.bf16 %v1829_v45  ;;  %v1417_v58 = vunpack.c.h.bf16 %v1766_v44  ;;  %v1771_v48 = vld [vmem:[%s2558_s0 + $0x1d0] sm:$0xff]  }
  0xa0   :  { %1157 = vst [vmem:[#allocation2 + $0x328] sm:$0xff] %v1029_v50  ;;  %v1030_v60 = vmax.f32 %v902_v51, 0.0  ;;  %v903_v61 = vadd.f32 %v1665_v39, %v519_v52  ;;  %v520_v62 = vadd.f32 %v2253_v29, %v385_v53  ;;  %v1673_v63 = vunpack.c.h.bf16 %v1829_v45  ;;  %v1833_v39 = vld [vmem:[%s2559_s1 + $0x1c8] sm:$0xff]   ;;  %v1834_v53 = vld [vmem:[%s2559_s1 + $0x1d0] sm:$0xff]  }
  0xa1   :  { %v521_v0 = vadd.f32 %v2253_v29, %v386_v55  ;;  %v387_v2 = vmul.f32 %v2240_v1, %v1416_v56  ;;  %v388_v3 = vmul.f32 %v2240_v1, %v1417_v58  ;;  %v1420_v4 = vunpack.c.l.bf16 %v1767_v54 }
  0xa2   :  { %1158 = vst [vmem:[#allocation2 + $0x330] sm:$0xff] %v1030_v60  ;;  %v1031_v6 = vmax.f32 %v903_v61, 0.0  ;;  %v904_v8 = vadd.f32 %v1668_v47, %v520_v62  ;;  %v1676_v9 = vunpack.c.l.bf16 %v1830_v59  ;;  %v1421_v10 = vunpack.c.h.bf16 %v1767_v54  ;;  %v1772_v62 = vld [vmem:[%s2558_s0 + $0x1d8] sm:$0xff]  }
  0xa3   :  { %v905_v11 = vadd.f32 %v1669_v49, %v521_v0  ;;  %v522_v12 = vadd.f32 %v2253_v29, %v387_v2  ;;  %v523_v13 = vadd.f32 %v2253_v29, %v388_v3  ;;  %v389_v14 = vmul.f32 %v2240_v1, %v1420_v4 }
  0xa4   :  { %1159 = vst [vmem:[#allocation2 + $0x338] sm:$0xff] %v1031_v6  ;;  %v1032_v16 = vmax.f32 %v904_v8, 0.0  ;;  %v390_v17 = vmul.f32 %v2240_v1, %v1421_v10  ;;  %v1677_v18 = vunpack.c.h.bf16 %v1830_v59  ;;  %v1424_v19 = vunpack.c.l.bf16 %v1768_v5 }
  0xa5   :  { %v1033_v20 = vmax.f32 %v905_v11, 0.0  ;;  %v906_v21 = vadd.f32 %v1672_v57, %v522_v12  ;;  %v907_v22 = vadd.f32 %v1673_v63, %v523_v13  ;;  %v524_v23 = vadd.f32 %v2253_v29, %v389_v14 }
  0xa6   :  { %1160 = vst [vmem:[#allocation2 + $0x340] sm:$0xff] %v1032_v16  ;;  %v525_v25 = vadd.f32 %v2253_v29, %v390_v17  ;;  %v391_v26 = vmul.f32 %v2240_v1, %v1424_v19  ;;  %v1680_v7 = vunpack.c.l.bf16 %v1831_v15  ;;  %v1425_v27 = vunpack.c.h.bf16 %v1768_v5 }
  0xa7   :  { %1161 = vst [vmem:[#allocation2 + $0x348] sm:$0xff] %v1033_v20  ;;  %v1034_v30 = vmax.f32 %v906_v21, 0.0  ;;  %v1035_v31 = vmax.f32 %v907_v22, 0.0  ;;  %v908_v32 = vadd.f32 %v1676_v9, %v524_v23  ;;  %v1681_v33 = vunpack.c.h.bf16 %v1831_v15  ;;  %v1835_v9 = vld [vmem:[%s2559_s1 + $0x1d8] sm:$0xff]   ;;  %v1836_v23 = vld [vmem:[%s2559_s1 + $0x1e0] sm:$0xff]  }
  0xa8   :  { %v909_v34 = vadd.f32 %v1677_v18, %v525_v25  ;;  %v526_v35 = vadd.f32 %v2253_v29, %v391_v26  ;;  %v392_v36 = vmul.f32 %v2240_v1, %v1425_v27  ;;  %v1428_v37 = vunpack.c.l.bf16 %v1769_v24  ;;  %v1773_v18 = vld [vmem:[%s2558_s0 + $0x1e0] sm:$0xff]  }
  0xa9   :  { %1162 = vst [vmem:[#allocation2 + $0x350] sm:$0xff] %v1034_v30  ;;  %1163 = vst [vmem:[#allocation2 + $0x358] sm:$0xff] %v1035_v31  ;;  %v1036_v40 = vmax.f32 %v908_v32, 0.0  ;;  %v1684_v41 = vunpack.c.l.bf16 %v1832_v28  ;;  %v1429_v42 = vunpack.c.h.bf16 %v1769_v24  ;;  %v1685_v43 = vunpack.c.h.bf16 %v1832_v28  ;;  %v1774_v32 = vld [vmem:[%s2558_s0 + $0x1e8] sm:$0xff]  }
  0xaa   :  { %v1037_v44 = vmax.f32 %v909_v34, 0.0  ;;  %v910_v45 = vadd.f32 %v1680_v7, %v526_v35  ;;  %v527_v46 = vadd.f32 %v2253_v29, %v392_v36  ;;  %v393_v47 = vmul.f32 %v2240_v1, %v1428_v37 }
  0xab   :  { %1164 = vst [vmem:[#allocation2 + $0x360] sm:$0xff] %v1036_v40  ;;  %v394_v49 = vmul.f32 %v2240_v1, %v1429_v42  ;;  %v1432_v50 = vunpack.c.l.bf16 %v1770_v38  ;;  %v1688_v51 = vunpack.c.l.bf16 %v1833_v39  ;;  %v1433_v52 = vunpack.c.h.bf16 %v1770_v38  ;;  %v1775_v42 = vld [vmem:[%s2558_s0 + $0x1f0] sm:$0xff]  }
  0xac   :  { %1165 = vst [vmem:[#allocation2 + $0x368] sm:$0xff] %v1037_v44  ;;  %v1038_v54 = vmax.f32 %v910_v45, 0.0  ;;  %v911_v55 = vadd.f32 %v1681_v33, %v527_v46  ;;  %v528_v56 = vadd.f32 %v2253_v29, %v393_v47  ;;  %v1689_v57 = vunpack.c.h.bf16 %v1833_v39  ;;  %v1837_v33 = vld [vmem:[%s2559_s1 + $0x1e8] sm:$0xff]   ;;  %v1838_v47 = vld [vmem:[%s2559_s1 + $0x1f0] sm:$0xff]  }
  0xad   :  { %v529_v58 = vadd.f32 %v2253_v29, %v394_v49  ;;  %v395_v59 = vmul.f32 %v2240_v1, %v1432_v50  ;;  %v396_v60 = vmul.f32 %v2240_v1, %v1433_v52  ;;  %v1436_v61 = vunpack.c.l.bf16 %v1771_v48 }
  0xae   :  { %1166 = vst [vmem:[#allocation2 + $0x370] sm:$0xff] %v1038_v54  ;;  %v1039_v63 = vmax.f32 %v911_v55, 0.0  ;;  %v912_v0 = vadd.f32 %v1684_v41, %v528_v56  ;;  %v1692_v2 = vunpack.c.l.bf16 %v1834_v53  ;;  %v1437_v3 = vunpack.c.h.bf16 %v1771_v48  ;;  %v1776_v56 = vld [vmem:[%s2558_s0 + $0x1f8] sm:$0xff]   ;;  %s1867_s0 = smov [#allocation2]  }
  0xaf   :  { %v913_v4 = vadd.f32 %v1685_v43, %v529_v58  ;;  %v530_v5 = vadd.f32 %v2253_v29, %v395_v59  ;;  %v531_v6 = vadd.f32 %v2253_v29, %v396_v60  ;;  %v397_v8 = vmul.f32 %v2240_v1, %v1436_v61 }
  0xb0   :  { %1167 = vst [vmem:[#allocation2 + $0x378] sm:$0xff] %v1039_v63  ;;  %v1040_v10 = vmax.f32 %v912_v0, 0.0  ;;  %v398_v11 = vmul.f32 %v2240_v1, %v1437_v3  ;;  %v1693_v12 = vunpack.c.h.bf16 %v1834_v53  ;;  %v1440_v13 = vunpack.c.l.bf16 %v1772_v62 }
  0xb1   :  { %v1041_v14 = vmax.f32 %v913_v4, 0.0  ;;  %v914_v15 = vadd.f32 %v1688_v51, %v530_v5  ;;  %v915_v16 = vadd.f32 %v1689_v57, %v531_v6  ;;  %v532_v17 = vadd.f32 %v2253_v29, %v397_v8 }
  0xb2   :  { %1168 = vst [vmem:[#allocation2 + $0x380] sm:$0xff] %v1040_v10  ;;  %v533_v19 = vadd.f32 %v2253_v29, %v398_v11  ;;  %v399_v20 = vmul.f32 %v2240_v1, %v1440_v13  ;;  %v1696_v21 = vunpack.c.l.bf16 %v1835_v9  ;;  %v1441_v22 = vunpack.c.h.bf16 %v1772_v62 }
  0xb3   :  { %1169 = vst [vmem:[#allocation2 + $0x388] sm:$0xff] %v1041_v14  ;;  %v1042_v24 = vmax.f32 %v914_v15, 0.0  ;;  %v1043_v25 = vmax.f32 %v915_v16, 0.0  ;;  %v916_v26 = vadd.f32 %v1692_v2, %v532_v17  ;;  %v1697_v7 = vunpack.c.h.bf16 %v1835_v9  ;;  %v1839_v2 = vld [vmem:[%s2559_s1 + $0x1f8] sm:$0xff]   ;;  %s1189_s1 = sshll.u32 %s1867_s0, 4  ;;  %s1190_s1 = int_to_ptr.vmem [resolvable:$true] %s1189_s1 }
  0xb4   :  { %v917_v27 = vadd.f32 %v1693_v12, %v533_v19  ;;  %v534_v28 = vadd.f32 %v2253_v29, %v399_v20  ;;  %v400_v30 = vmul.f32 %v2240_v1, %v1441_v22  ;;  %v1444_v31 = vunpack.c.l.bf16 %v1773_v18  ;;  %s1845_s9 = scalar_lea.vmem %s1190_s1, 16384  ;;  %p1850_p1 = scmp.lt.s32.totalorder %s1190_s1, %s1190_s1 }
  0xb5   :  { %1170 = vst [vmem:[#allocation2 + $0x390] sm:$0xff] %v1042_v24  ;;  %1171 = vst [vmem:[#allocation2 + $0x398] sm:$0xff] %v1043_v25  ;;  %v1044_v34 = vmax.f32 %v916_v26, 0.0  ;;  %v1700_v35 = vunpack.c.l.bf16 %v1836_v23  ;;  %v1445_v36 = vunpack.c.h.bf16 %v1773_v18  ;;  %v1701_v37 = vunpack.c.h.bf16 %v1836_v23  ;;  %p1846_p0 = scmp.ne.s32.totalorder %s1190_s1, %s1845_s9  ;;  %p1851_p2 = scmp.lt.s32.totalorder %s1845_s9, %s1845_s9 }
  0xb6   :  { %v1045_v38 = vmax.f32 %v917_v27, 0.0  ;;  %v918_v39 = vadd.f32 %v1696_v21, %v534_v28  ;;  %v535_v40 = vadd.f32 %v2253_v29, %v400_v30  ;;  %v401_v41 = vmul.f32 %v2240_v1, %v1444_v31 }
  0xb7   :  { %1172 = vst [vmem:[#allocation2 + $0x3a0] sm:$0xff] %v1044_v34  ;;  %v402_v43 = vmul.f32 %v2240_v1, %v1445_v36  ;;  %v1448_v44 = vunpack.c.l.bf16 %v1774_v32  ;;  %v1704_v45 = vunpack.c.l.bf16 %v1837_v33  ;;  %v1449_v46 = vunpack.c.h.bf16 %v1774_v32  ;;  %p1852_p3 = por %p1851_p2, %p1850_p1 }
  0xb8   :  { %1173 = vst [vmem:[#allocation2 + $0x3a8] sm:$0xff] %v1045_v38  ;;  %v1046_v48 = vmax.f32 %v918_v39, 0.0  ;;  %v919_v49 = vadd.f32 %v1697_v7, %v535_v40  ;;  %v536_v50 = vadd.f32 %v2253_v29, %v401_v41  ;;  %v1705_v51 = vunpack.c.h.bf16 %v1837_v33 }
  0xb9   :  { %v537_v52 = vadd.f32 %v2253_v29, %v402_v43  ;;  %v403_v53 = vmul.f32 %v2240_v1, %v1448_v44  ;;  %v404_v54 = vmul.f32 %v2240_v1, %v1449_v46  ;;  %v1452_v55 = vunpack.c.l.bf16 %v1775_v42  ;;  %p1853_p4 = pnand %p1852_p3, %p1846_p0 }
  0xba   :  { %1174 = vst [vmem:[#allocation2 + $0x3b0] sm:$0xff] %v1046_v48  ;;  %v1047_v57 = vmax.f32 %v919_v49, 0.0  ;;  %v920_v58 = vadd.f32 %v1700_v35, %v536_v50  ;;  %v1708_v59 = vunpack.c.l.bf16 %v1838_v47  ;;  %v1453_v60 = vunpack.c.h.bf16 %v1775_v42 }
  0xbb   :  { %v921_v61 = vadd.f32 %v1701_v37, %v537_v52  ;;  %v538_v62 = vadd.f32 %v2253_v29, %v403_v53  ;;  %v539_v63 = vadd.f32 %v2253_v29, %v404_v54  ;;  %v405_v0 = vmul.f32 %v2240_v1, %v1452_v55 }
  0xbc   :  { %1175 = vst [vmem:[#allocation2 + $0x3b8] sm:$0xff] %v1047_v57  ;;  %v1048_v3 = vmax.f32 %v920_v58, 0.0  ;;  %v406_v4 = vmul.f32 %v2240_v1, %v1453_v60  ;;  %v1709_v5 = vunpack.c.h.bf16 %v1838_v47  ;;  %v1456_v6 = vunpack.c.l.bf16 %v1776_v56 }
  0xbd   :  { %v1049_v8 = vmax.f32 %v921_v61, 0.0  ;;  %v922_v9 = vadd.f32 %v1704_v45, %v538_v62  ;;  %v923_v10 = vadd.f32 %v1705_v51, %v539_v63  ;;  %v540_v11 = vadd.f32 %v2253_v29, %v405_v0 }
  0xbe   :  { %1176 = vst [vmem:[#allocation2 + $0x3c0] sm:$0xff] %v1048_v3  ;;  %v541_v12 = vadd.f32 %v2253_v29, %v406_v4  ;;  %v407_v13 = vmul.f32 %v2240_v1, %v1456_v6  ;;  %v1712_v14 = vunpack.c.l.bf16 %v1839_v2  ;;  %v1457_v15 = vunpack.c.h.bf16 %v1776_v56 }
  0xbf   :  { %1177 = vst [vmem:[#allocation2 + $0x3c8] sm:$0xff] %v1049_v8  ;;  %v1050_v16 = vmax.f32 %v922_v9, 0.0  ;;  %v1051_v17 = vmax.f32 %v923_v10, 0.0  ;;  %v924_v18 = vadd.f32 %v1708_v59, %v540_v11  ;;  %v1713_v22 = vunpack.c.h.bf16 %v1839_v2 }
  0xc0   :  { %v925_v19 = vadd.f32 %v1709_v5, %v541_v12  ;;  %v542_v20 = vadd.f32 %v2253_v29, %v407_v13  ;;  %v408_v21 = vmul.f32 %v2240_v1, %v1457_v15 }
  0xc1   :  { %1178 = vst [vmem:[#allocation2 + $0x3d0] sm:$0xff] %v1050_v16  ;;  %1179 = vst [vmem:[#allocation2 + $0x3d8] sm:$0xff] %v1051_v17  ;;  %v1052_v23 = vmax.f32 %v924_v18, 0.0 }
  0xc2   :  { %v1053_v24 = vmax.f32 %v925_v19, 0.0  ;;  %v926_v25 = vadd.f32 %v1712_v14, %v542_v20  ;;  %v543_v26 = vadd.f32 %v2253_v29, %v408_v21 }
  0xc3   :  { %1180 = vst [vmem:[#allocation2 + $0x3e0] sm:$0xff] %v1052_v23 }
  0xc4   :  { %1181 = vst [vmem:[#allocation2 + $0x3e8] sm:$0xff] %v1053_v24  ;;  %v1054_v7 = vmax.f32 %v926_v25, 0.0  ;;  %v927_v27 = vadd.f32 %v1713_v22, %v543_v26 }
  0xc6   :  { %1182 = vst [vmem:[#allocation2 + $0x3f0] sm:$0xff] %v1054_v7  ;;  %v1055_v28 = vmax.f32 %v927_v27, 0.0 }
  0xc8   :  { %1183 = vst [vmem:[#allocation2 + $0x3f8] sm:$0xff] %v1055_v28 }
  0xc9   :  { %1856 = shalt.err (!%p1853_p4)
}
  0xca   :  { %s1868_s10 = smov 128   ;;  %s1869_s11 = smov 8  }
  0xcb   :  { %1195 = dma.vmem_to_hbm [thread:$0]  %s1190_s1, 16384, %s2562_s4, [#allocation3], %s1868_s10, %s1868_s10, %s1869_s11  }
  0xcc   :  { %1865 = dma.done.wait [#allocation3], 16384  }
  0xcd   :  { %1866 = vsyncadd [#allocation3], 4294950912 }
  0xce   :  { %1199 = vsyncpa [#allocation3], 1 }

// kernel: res_block_forward.4
= control target key start
LH: loop header
LB: loop body
LE: loop exit
PB: predicated region body
PF: predicated region fallthrough
CT: control target
= control target key end

     0   :  { %s8534_s18 = smov 0   ;;  %s8536_s19 = smov 0   ;;  %s10646_s0 = inlined_call_operand.vmem [shape: bf16[2,10,10,10,128], index: 0, kind: input, shape index: {}, may-alias: {0,1,2}]   ;;  %s10647_s1 = inlined_call_operand.vmem [shape: bf16[2,10,10,10,128], index: 1, kind: input, shape index: {}, may-alias: {0,1,2}]   ;;  %s10648_s2 = inlined_call_operand.vmem [shape: bf16[2,10,10,10,128], index: 2, kind: input, shape index: {}, may-alias: {0,1,2}]   ;;  %s10649_s3 = inlined_call_operand.vmem [shape: bf16[3456,128], index: 3, kind: input, shape index: {}]   ;;  %s10650_s4 = inlined_call_operand.vmem [shape: bf16[16,64,128], index: 4, kind: output, shape index: {0}]   ;;  %s10651_s5 = inlined_call_operand.vmem [shape: f32[16,8,128], index: 5, kind: output, shape index: {1}]  }
   0x1   :  { %s8538_s20 = smov 0   ;;  %s8540_s21 = smov 0  }
   0x2   :  { %s8542_s22 = smov 0  }
   0x3 LB: > { %s25_s23 = sadd.s32 1, %s8494_s20  ;;  %s28_s24 = sadd.s32 1, %s8498_s21  ;;  %s8502_s22 = sphi %s8542_s22, %s16_s22   ;;  %s8498_s21 = sphi %s8540_s21, %s10695_s21   ;;  %s8494_s20 = sphi %s8538_s20, %s10694_s20   ;;  %s8490_s19 = sphi %s8536_s19, %s10693_s19   ;;  %s8486_s18 = sphi %s8534_s18, %s10692_s18  }
   0x4   : > { %p26_p0 = scmp.ge.s32.totalorder %s25_s23, 8  ;;  %p6541_p1 = scmp.ge.s32.totalorder %s8502_s22, 1 }
   0x5   : > { %p256_p2 = scmp.lt.s32.totalorder %s8502_s22, 17 }
   0x6   : > { %s10697_s23 = smov (%p26_p0, %s25_s23), 0  ;;  %s10699_s24 = smov (!%p26_p0, %s28_s24), %s8498_s21 }
   0x7   : > { %p257_p3 = pnand %p6541_p1, %p256_p2  ;;  %p30_p4 = scmp.ge.s32.totalorder %s10699_s24, 2 }
   0x9   : > { %s10701_s24 = smov (%p30_p4, %s10699_s24), 0  ;;  %260 = sbr.rel (%p257_p3) target bundleno = 725 (0x2d5), region = 36 }
   0xe   : > { %v8212_v0 = vld [vmem:[%s10649_s3 + $0x78] sm:$0xff]   ;;  %p316_p5 = scmp.lt.s32.totalorder %s8490_s19, 1  ;;  %p318_p6 = scmp.lt.s32.totalorder %s8486_s18, 9  ;;  %v8214_v2 = vld [vmem:[%s10649_s3 + $0x70] sm:$0xff]   ;;  %v8216_v4 = vld [vmem:[%s10649_s3 + $0x68] sm:$0xff]   ;;  %vm818_vm3 = vcmask 1042432  }
   0xf   : > { %v8213_v1 = vld [vmem:[%s10649_s3 + $0x38] sm:$0xff]   ;;  %7504 = vmatprep.subr.bf16.mxu0 %v8212_v0  ;;  %v8215_v3 = vld [vmem:[%s10649_s3 + $0x30] sm:$0xff]   ;;  %v8217_v5 = vld [vmem:[%s10649_s3 + $0x28] sm:$0xff]   ;;  %vm397_vm0 = vsmask.f32 3328  ;;  %vm819_vm4 = vcmask 1046532  }
  0x10   : > { %s317_s6 = scalar_select %p316_p5, %s8490_s19, 1  ;;  %7528 = vmatprep.subr.bf16.mxu1 %v8213_v1  ;;  %7505 = vmatpush3.bf16.msra.mxu0 %v8212_v0  ;;  %v8218_v6 = vld [vmem:[%s10649_s3 + $0x60] sm:$0xff]   ;;  %v8220_v8 = vld [vmem:[%s10649_s3 + $0x58] sm:$0xff]   ;;  %v8222_v10 = vld [vmem:[%s10649_s3 + $0x50] sm:$0xff]   ;;  %vm398_vm1 = vsmask.f32 7440 }
  0x11   : > { %s319_s9 = scalar_select %p318_p6, %s8486_s18, 9  ;;  %7529 = vmatpush3.bf16.msra.mxu1 %v8213_v1  ;;  %7506 = vmatprep.subr.bf16.mxu0 %v8214_v2  ;;  %v8219_v7 = vld [vmem:[%s10649_s3 + $0x20] sm:$0xff]   ;;  %v8221_v9 = vld [vmem:[%s10649_s3 + $0x18] sm:$0xff]   ;;  %v8223_v13 = vld [vmem:[%s10649_s3 + $0x10] sm:$0xff]   ;;  %vm6367_vm6 = vcmask 1040384   ;;  %vm6369_vm7 = vcmask 1041408  }
  0x12   : > { %s8587_s12 = smul.u32 200, %s317_s6  ;;  %7530 = vmatprep.subr.bf16.mxu1 %v8215_v3  ;;  %v8224_v20 = vld [vmem:[%s10649_s3 + $0x48] sm:$0xff]   ;;  %v8226_v39 = vld [vmem:[%s10649_s3 + $0x40] sm:$0xff]   ;;  %vm8645_vm2 = vmor %vm397_vm0, %vm398_vm1  ;;  %s325_s25 = sadd.s32 1, %s8486_s18 }
  0x13   : > { %s8168_s15 = smul.u32 20, %s319_s9  ;;  %v8225_v24 = vld [vmem:[%s10649_s3 + $0x8] sm:$0xff]   ;;  %v8227_v49 = vld [vmem:[%s10649_s3] sm:$0xff]   ;;  %v8230_v60 = vld [vmem:[%s10649_s3 + $0xb8] sm:$0xff]   ;;  %p8948_p7 = scmp.lt.s32.totalorder %s325_s25, 9 }
  0x14   : > { %7507 = vmatpush3.bf16.msra.mxu0 %v8214_v2  ;;  %v8231_v62 = vld [vmem:[%s10649_s3 + $0xf8] sm:$0xff]   ;;  %vm8722_vm5 = vmor %vm818_vm3, %vm819_vm4  ;;  %s336_s27 = sadd.s32 2, %s8486_s18 }
  0x15   : > { %s322_s16 = sadd.s32 %s8587_s12, %s8168_s15  ;;  %7531 = vmatpush3.bf16.msra.mxu1 %v8215_v3  ;;  %7508 = vmatprep.subr.bf16.mxu0 %v8216_v4  ;;  %v8232_v3 = vld [vmem:[%s10649_s3 + $0xb0] sm:$0xff]   ;;  %s10703_s25 = smov (!%p8948_p7, %s325_s25), 9 }
  0x16   : > { %7532 = vmatprep.subr.bf16.mxu1 %v8217_v5  ;;  %s6542_s28 = sshll.u32 %s322_s16, 2  ;;  %s8170_s30 = smul.u32 20, %s10703_s25 }
  0x17   : > { %s8608_s10 = scalar_lea.vmem %s10646_s0, %s6542_s28  ;;  %p9461_p8 = scmp.lt.s32.totalorder %s336_s27, 9 }
  0x18   : > { %7509 = vmatpush3.bf16.msra.mxu0 %v8216_v4  ;;  %v365_v11 = vld [vmem:[%s8608_s10] sm:$0xf]  ;;  %v366_v12 = vld [vmem:[%s8608_s10 + $0x8] sm:$0xf]  ;;  %v8619_v14 = vld [vmem:[%s8608_s10 + $0x4] sm:$0x1]  ;;  %s9026_s13 = sadd.s32 %s8170_s30, %s8587_s12 }
  0x19   : > { %7533 = vmatpush3.bf16.msra.mxu1 %v8217_v5  ;;  %7510 = vmatprep.subr.bf16.mxu0 %v8218_v6  ;;  %v8622_v15 = vld [vmem:[%s8608_s10 + $0xc] sm:$0x1]  ;;  %v6562_v16 = vcombine.low %v365_v11, %v366_v12  ;;  %v401_v17 = vshrl.u32 %v365_v11, 16  ;;  %v404_v18 = vshll.u32 %v365_v11, 16  ;;  %v410_v19 = vshll.u32 %v8619_v14, 16  ;;  %v8233_v5 = vld [vmem:[%s10649_s3 + $0xf0] sm:$0xff]  }
  0x1a   : > { %7534 = vmatprep.subr.bf16.mxu1 %v8219_v7  ;;  %v415_v21 = vshrl.u32 %v366_v12, 16  ;;  %v418_v22 = vshll.u32 %v366_v12, 16  ;;  %v424_v23 = vshll.u32 %v8622_v15, 16  ;;  %v367_v28 = vld [vmem:[%s8608_s10 + $0x10] sm:$0xf]  ;;  %v823_v4 = vrot.slane %v8619_v14, 5 }
  0x1b   : > { %7544 = vmatprep.mubr.bf16.mxu1 %v6562_v16  ;;  %v403_v25 = vrot.slane %v401_v17, 4  ;;  %v406_v26 = vrot.slane %v404_v18, 5  ;;  %v412_v27 = vrot.slane %v410_v19, 5  ;;  %v368_v32 = vld [vmem:[%s8608_s10 + $0x18] sm:$0xf]  ;;  %v429_v33 = vshrl.u32 %v367_v28, 16 }
  0x1c   : > { %7511 = vmatpush3.bf16.msra.mxu0 %v8218_v6  ;;  %v417_v29 = vrot.slane %v415_v21, 4  ;;  %v420_v30 = vrot.slane %v418_v22, 5  ;;  %v426_v31 = vrot.slane %v424_v23, 5  ;;  %v8635_v35 = vld [vmem:[%s8608_s10 + $0x14] sm:$0x1]  ;;  %v432_v37 = vshll.u32 %v367_v28, 16 }
  0x1d   : > { %7535 = vmatpush3.bf16.msra.mxu1 %v8219_v7  ;;  %7512 = vmatprep.subr.bf16.mxu0 %v8220_v8  ;;  %v407_v34 = vor.u32 %v406_v26, %v403_v25  ;;  %v8638_v36 = vld [vmem:[%s8608_s10 + $0x1c] sm:$0x1]  ;;  %v443_v38 = vshrl.u32 %v368_v32, 16  ;;  %v431_v42 = vrot.slane %v429_v33, 4  ;;  %v438_v43 = vshll.u32 %v8635_v35, 16  ;;  %v8234_v6 = vld [vmem:[%s10649_s3 + $0xa8] sm:$0xff]  }
  0x1e   : > { %7536 = vmatprep.subr.bf16.mxu1 %v8221_v9  ;;  %v421_v41 = vor.u32 %v420_v30, %v417_v29  ;;  %v446_v44 = vshll.u32 %v368_v32, 16  ;;  %v434_v46 = vrot.slane %v432_v37, 5  ;;  %v452_v48 = vshll.u32 %v8638_v36, 16  ;;  %v369_v7 = vld [vmem:[%s8608_s10 + $0x20] sm:$0xf]  ;;  %v8244_v14 = vld [vmem:[%s10649_s3 + $0x88] sm:$0xff]  }
  0x1f   : > { %v408_v45 = vrot.slane %v407_v34, 4  ;;  %v445_v47 = vrot.slane %v443_v38, 4  ;;  %v440_v54 = vrot.slane %v438_v43, 5  ;;  %v6563_v1 = vcombine.low %v367_v28, %v368_v32  ;;  %v8687_v11 = vld [vmem:[%s8608_s10 + $0x2c] sm:$0x1]  ;;  %s6543_s16 = sshll.u32 %s9026_s13, 2 }
  0x20   : > { %7513 = vmatpush3.bf16.msra.mxu0 %v8220_v8  ;;  %v422_v50 = vrot.slane %v421_v41, 4  ;;  %v448_v51 = vrot.slane %v446_v44, 5  ;;  %v435_v53 = vor.u32 %v434_v46, %v431_v42  ;;  %v454_v55 = vrot.slane %v452_v48, 5  ;;  %v370_v8 = vld [vmem:[%s8608_s10 + $0x28] sm:$0xf]  ;;  %s9076_s14 = scalar_lea.vmem %s10647_s1, %s6543_s16  ;;  %s10705_s27 = smov (!%p9461_p8, %s336_s27), 9 }
  0x21   : > { %7537 = vmatpush3.bf16.msra.mxu1 %v8221_v9  ;;  %7514 = vmatprep.subr.bf16.mxu0 %v8222_v10  ;;  %v413_v52 = vsel %vm8645_vm2, %v408_v45, %v412_v27  ;;  %v8681_v9 = vld [vmem:[%s8608_s10 + $0x24] sm:$0x1]  ;;  %v457_v12 = vshrl.u32 %v369_v7, 16  ;;  %v471_v17 = vshrl.u32 %v370_v8, 16  ;;  %v474_v18 = vshll.u32 %v370_v8, 16  ;;  %s8171_s8 = smul.u32 20, %s10705_s27 }
  0x22   : > { %7538 = vmatprep.subr.bf16.mxu1 %v8223_v13  ;;  %v427_v56 = vsel %vm8645_vm2, %v422_v50, %v426_v31  ;;  %v449_v57 = vor.u32 %v448_v51, %v445_v47  ;;  %v436_v59 = vrot.slane %v435_v53, 4  ;;  %v466_v16 = vshll.u32 %v8681_v9, 16  ;;  %v371_v21 = vld [vmem:[%s8608_s10 + $0x30] sm:$0xf]  ;;  %v372_v22 = vld [vmem:[%s8608_s10 + $0x38] sm:$0xf] }
  0x23   : > { %v6550_v58 = vcombine.low %v413_v52, %v427_v56  ;;  %v480_v19 = vshll.u32 %v8687_v11, 16  ;;  %v459_v23 = vrot.slane %v457_v12, 4  ;;  %v473_v26 = vrot.slane %v471_v17, 4  ;;  %v8694_v27 = vld [vmem:[%s8608_s10 + $0x34] sm:$0x1]  ;;  %v8237_v45 = vld [vmem:[%s10649_s3 + $0xe0] sm:$0xff]   ;;  %s9592_s28 = sadd.s32 %s8171_s8, %s8587_s12 }
  0x24   : > { %7515 = vmatpush3.bf16.msra.mxu0 %v8222_v10  ;;  %v450_v61 = vrot.slane %v449_v57, 4  ;;  %v441_v63 = vsel %vm8645_vm2, %v436_v59, %v440_v54  ;;  %v8235_v10 = vld [vmem:[%s10649_s3 + $0xe8] sm:$0xff]   ;;  %v468_v25 = vrot.slane %v466_v16, 5  ;;  %v476_v28 = vrot.slane %v474_v18, 5  ;;  %v8697_v30 = vld [vmem:[%s8608_s10 + $0x3c] sm:$0x1] }
  0x25   : > { %7539 = vmatpush3.bf16.msra.mxu1 %v8223_v13  ;;  %7516 = vmatprep.subr.bf16.mxu0 %v8224_v20  ;;  %v460_v13 = vshll.u32 %v369_v7, 16  ;;  %v482_v29 = vrot.slane %v480_v19, 5  ;;  %v485_v31 = vshrl.u32 %v371_v21, 16  ;;  %v488_v32 = vshll.u32 %v371_v21, 16  ;;  %v8238_v56 = vld [vmem:[%s10649_s3 + $0x98] sm:$0xff]   ;;  %s6544_s12 = sshll.u32 %s9592_s28, 2 }
  0x26   : > { %7540 = vmatprep.subr.bf16.mxu1 %v8225_v24  ;;  %7520 = vmatprep.mubr.bf16.mxu0 %v6550_v58  ;;  %v455_v0 = vsel %vm8645_vm2, %v450_v61, %v454_v55  ;;  %v494_v34 = vshll.u32 %v8694_v27, 16  ;;  %v499_v37 = vshrl.u32 %v372_v22, 16  ;;  %v502_v38 = vshll.u32 %v372_v22, 16  ;;  %v8239_v59 = vld [vmem:[%s10649_s3 + $0xd8] sm:$0xff]   ;;  %v796_v12 = vld [vmem:[%s8608_s10 + $0x10] sm:$0xe]  ;;  %s9718_s25 = scalar_lea.vmem %s10648_s2, %s6544_s12 }
  0x27   : > { %v6551_v2 = vcombine.low %v441_v63, %v455_v0  ;;  %v477_v41 = vor.u32 %v476_v28, %v473_v26  ;;  %v487_v42 = vrot.slane %v485_v31, 4  ;;  %v490_v43 = vrot.slane %v488_v32, 5  ;;  %v794_v0 = vld [vmem:[%s8608_s10] sm:$0xe]  ;;  %v8248_v16 = vld [vmem:[%s8608_s10 + $0x8] ss:$8 sps:$4 sm:$0xff]  }
  0x28   : > { %7517 = vmatpush3.bf16.msra.mxu0 %v8224_v20  ;;  %v6564_v20 = vcombine.low %v369_v7, %v370_v8  ;;  %v508_v44 = vshll.u32 %v8697_v30, 16  ;;  %v501_v47 = vrot.slane %v499_v37, 4  ;;  %v504_v48 = vrot.slane %v502_v38, 5  ;;  %v8243_v7 = vld [vmem:[%s10649_s3 + $0xd0] sm:$0xff]   ;;  %v8249_v31 = vld [vmem:[%s10649_s3 + $0x138] sm:$0xff]  }
  0x29   : > { %7541 = vmatpush3.bf16.msra.mxu1 %v8225_v24  ;;  %7518 = vmatprep.subr.bf16.mxu0 %v8226_v39  ;;  %v462_v24 = vrot.slane %v460_v13, 5  ;;  %v491_v50 = vor.u32 %v490_v43, %v487_v42  ;;  %v496_v51 = vrot.slane %v494_v34, 5  ;;  %v6565_v52 = vcombine.low %v371_v21, %v372_v22  ;;  %v797_v13 = vld [vmem:[%s8608_s10 + $0x18] sm:$0xe]  ;;  %v800_v34 = vld [vmem:[%s8608_s10 + $0x30] sm:$0xe] }
  0x2a   : > { %7542 = vmatprep.subr.bf16.mxu1 %v8227_v49  ;;  %v505_v54 = vor.u32 %v504_v48, %v501_v47  ;;  %v510_v55 = vrot.slane %v508_v44, 5  ;;  %v831_v19 = vrot.slane %v8635_v35, 5  ;;  %v6576_v21 = vrot.slane %v796_v12, 9  ;;  %v8247_v35 = vld [vmem:[%s10649_s3 + $0xc0] sm:$0xff]   ;;  %v8253_v47 = vld [vmem:[%s10649_s3 + $0x170] sm:$0xff]  }
  0x2b   : > { %v463_v33 = vor.u32 %v462_v24, %v459_v23  ;;  %v492_v58 = vrot.slane %v491_v50, 4  ;;  %v6577_v22 = vrot.slane %v797_v13, 9  ;;  %v798_v23 = vld [vmem:[%s8608_s10 + $0x20] sm:$0xe]  ;;  %v799_v24 = vld [vmem:[%s8608_s10 + $0x28] sm:$0xe] }
  0x2c   : > { %7519 = vmatpush3.bf16.msra.mxu0 %v8226_v39  ;;  %v8236_v39 = vld [vmem:[%s10649_s3 + $0xa0] sm:$0xff]   ;;  %v506_v61 = vrot.slane %v505_v54, 4  ;;  %v839_v26 = vrot.slane %v8681_v9, 5  ;;  %v832_v28 = vsel %vm8722_vm5, %v6576_v21, %v831_v19  ;;  %v6578_v32 = vrot.slane %v798_v23, 9  ;;  %v8254_v50 = vld [vmem:[%s10649_s3 + $0x128] sm:$0xff]   ;;  %v8261_v21 = vld [vmem:[%s10649_s3 + $0x158] sm:$0xff]  }
  0x2d   : > { %7543 = vmatpush3.bf16.msra.mxu1 %v8227_v49  ;;  %7552 = vmatprep.subr.bf16.mxu0 %v8230_v60  ;;  %v464_v46 = vrot.slane %v463_v33, 4  ;;  %v478_v49 = vrot.slane %v477_v41, 4  ;;  %v497_v63 = vsel %vm8645_vm2, %v492_v58, %v496_v51  ;;  %v6579_v9 = vrot.slane %v799_v24, 9  ;;  %v8250_v33 = vld [vmem:[%s10649_s3 + $0x178] sm:$0xff]   ;;  %v8255_v51 = vld [vmem:[%s10649_s3 + $0x168] sm:$0xff]   ;;  %v8258_v54 = vld [vmem:[%s10649_s3 + $0x120] sm:$0xff]  }
  0x2e   : > { %7576 = vmatprep.subr.bf16.mxu1 %v8231_v62  ;;  %v8251_v38 = vld [vmem:[%s8608_s10 + $0x18] ss:$8 sps:$4 sm:$0xff]   ;;  %v847_v42 = vrot.slane %v8694_v27, 5  ;;  %v851_v43 = vrot.slane %v8697_v30, 5  ;;  %v6580_v44 = vrot.slane %v800_v34, 9 }
  0x2f   : > { %7521 = vmatmul.mubr.bf16.vlgmr.msra.gmra.mxu0 %v6551_v2  ;;  %v469_v53 = vsel %vm8645_vm2, %v464_v46, %v468_v25  ;;  %v483_v57 = vsel %vm8645_vm2, %v478_v49, %v482_v29  ;;  %v511_v2 = vsel %vm8645_vm2, %v506_v61, %v510_v55  ;;  %v8246_v25 = vld [vmem:[%s10649_s3 + $0x80] sm:$0xff]   ;;  %v8252_v46 = vld [vmem:[%s10649_s3 + $0x130] sm:$0xff]   ;;  %v6614_v55 = vld [vmem:[%s8608_s10 + $0x8] sm:$0xf] }
  0x30   : > { %7545 = vmatmul.mubr.bf16.vlgmr.msra.gmra.mxu1 %v6563_v1  ;;  %7553 = vmatpush3.bf16.msra.mxu0 %v8230_v60  ;;  %v6552_v60 = vcombine.low %v469_v53, %v483_v57  ;;  %v8256_v27 = vld [vmem:[%s8608_s10 + $0x28] ss:$8 sps:$4 sm:$0xff]   ;;  %v848_v30 = vsel %vm8722_vm5, %v6580_v44, %v847_v42  ;;  %v8259_v57 = vld [vmem:[%s10649_s3 + $0x160] sm:$0xff]   ;;  %v1196_v61 = vshll.u32 %v6614_v55, 16 }
  0x31   : > { %7577 = vmatpush3.bf16.msra.mxu1 %v8231_v62  ;;  %7554 = vmatprep.subr.bf16.mxu0 %v8232_v3  ;;  %v827_v62 = vrot.slane %v8622_v15, 5  ;;  %v6553_v15 = vcombine.low %v497_v63, %v511_v2  ;;  %v6616_v58 = vld [vmem:[%s8608_s10 + $0x10] sm:$0xf] }
  0x32   : > { %7578 = vmatprep.subr.bf16.mxu1 %v8233_v5  ;;  %7548 = vmatprep.mubr.bf16.mxu1 %v6564_v20  ;;  %v835_v20 = vrot.slane %v8638_v36, 5  ;;  %v843_v36 = vrot.slane %v8687_v11, 5  ;;  %v801_v11 = vld [vmem:[%s8608_s10 + $0x38] sm:$0xe]  ;;  %v1207_v63 = vshrl.u32 %v6616_v58, 16 }
  0x33   : > { %7524 = vmatprep.mubr.bf16.mxu0 %v6552_v60  ;;  %v1193_v60 = vshrl.u32 %v6614_v55, 16  ;;  %v8265_v55 = vld [vmem:[%s10649_s3 + $0x148] sm:$0xff]  }
  0x34   : > { %7555 = vmatpush3.bf16.msra.mxu0 %v8232_v3  ;;  %v795_v3 = vld [vmem:[%s8608_s10 + $0x8] sm:$0xe]  ;;  %v836_v29 = vsel %vm8722_vm5, %v6577_v22, %v835_v20  ;;  %v844_v41 = vsel %vm8722_vm5, %v6579_v9, %v843_v36 }
  0x35   : > { %7579 = vmatpush3.bf16.msra.mxu1 %v8233_v5  ;;  %7556 = vmatprep.subr.bf16.mxu0 %v8234_v6  ;;  %v6574_v5 = vrot.slane %v794_v0, 9  ;;  %v6575_v8 = vrot.slane %v795_v3, 9  ;;  %v6583_v37 = vcombine.low %v832_v28, %v836_v29  ;;  %v1210_v0 = vshll.u32 %v6616_v58, 16  ;;  %v6618_v3 = vld [vmem:[%s8608_s10 + $0x18] sm:$0xf] }
  0x36   : > { %7580 = vmatprep.subr.bf16.mxu1 %v8235_v10  ;;  %v6642_v20 = vld [vmem:[%s8608_s10 + $0x8] sm:$0xe] }
  0x37   : > { %7525 = vmatmul.mubr.bf16.gmra.mxu0 %v6553_v15  ;;  %v828_v17 = vsel %vm8722_vm5, %v6575_v8, %v827_v62  ;;  %v1198_v15 = vrot.slane %v1196_v61, 5  ;;  %v1212_v12 = vrot.slane %v1210_v0, 5  ;;  %v8865_v61 = vld [vmem:[%s8608_s10 + $0x2c] sm:$0x1] }
  0x38   : > { %7557 = vmatpush3.bf16.msra.mxu0 %v8234_v6  ;;  %7549 = vmatmul.mubr.bf16.gmra.mxu1 %v6565_v52  ;;  %v8242_v6 = vld [vmem:[%s10649_s3 + $0x90] sm:$0xff]   ;;  %v8257_v52 = vld [vmem:[%s8608_s10 + $0x38] ss:$8 sps:$4 sm:$0xff]  }
  0x39   : > { %7581 = vmatpush3.bf16.msra.mxu1 %v8235_v10  ;;  %7558 = vmatprep.subr.bf16.mxu0 %v8236_v39  ;;  %v824_v10 = vsel %vm8722_vm5, %v6574_v5, %v823_v4  ;;  %v8245_v4 = vld [vmem:[%s10649_s3 + $0xc8] sm:$0xff]   ;;  %v1195_v5 = vrot.slane %v1193_v60, 4 }
  0x3a   : > { %7582 = vmatprep.subr.bf16.mxu1 %v8237_v45  ;;  %v6582_v18 = vcombine.low %v824_v10, %v828_v17  ;;  %7592 = vmatprep.mubr.bf16.mxu1 %v8248_v16  ;;  %v1209_v10 = vrot.slane %v1207_v63, 4  ;;  %v8821_v16 = vld [vmem:[%s8608_s10 + $0x24] sm:$0x1]  ;;  %v8260_v17 = vld [vmem:[%s10649_s3 + $0x118] sm:$0xff]   ;;  %v8869_v63 = vld [vmem:[%s8608_s10 + $0x34] sm:$0x1] }
  0x3b   : > { %v1495_v58 = vrot.slane %v8821_v16, 5 }
  0x3c   : > { %7559 = vmatpush3.bf16.msra.mxu0 %v8236_v39  ;;  %7568 = vmatprep.mubr.bf16.mxu0 %v6582_v18  ;;  %v840_v39 = vsel %vm8722_vm5, %v6578_v32, %v839_v26  ;;  %v1199_v18 = vor.u32 %v1198_v15, %v1195_v5  ;;  %v1213_v22 = vor.u32 %v1212_v12, %v1209_v10  ;;  %v6643_v26 = vld [vmem:[%s8608_s10 + $0x10] sm:$0xe]  ;;  %v6626_v15 = vld [vmem:[%s8608_s10 + $0x38] sm:$0xf]  ;;  %v1258_v10 = vshll.u32 %v8865_v61, 16 }
  0x3d   : > { %7583 = vmatpush3.bf16.msra.mxu1 %v8237_v45  ;;  %7560 = vmatprep.subr.bf16.mxu0 %v8238_v56  ;;  %v6581_v45 = vrot.slane %v801_v11, 9  ;;  %v6584_v48 = vcombine.low %v840_v39, %v844_v41  ;;  %v8263_v11 = vld [vmem:[%s10649_s3 + $0x150] sm:$0xff]   ;;  %v6650_v39 = vrot.slane %v6642_v20, 9  ;;  %v6651_v44 = vrot.slane %v6643_v26, 9 }
  0x3e   : > { %7584 = vmatprep.subr.bf16.mxu1 %v8239_v59  ;;  %v1214_v32 = vrot.slane %v1213_v22, 4  ;;  %v1260_v20 = vrot.slane %v1258_v10, 5 }
  0x3f   : > { %v852_v49 = vsel %vm8722_vm5, %v6581_v45, %v851_v43 }
  0x40   : > { %7561 = vmatpush3.bf16.msra.mxu0 %v8238_v56  ;;  %v6585_v53 = vcombine.low %v848_v30, %v852_v49  ;;  %v8804_v56 = vld [vmem:[%s8608_s10 + $0xc] sm:$0x1] }
  0x41   : > { %7585 = vmatpush3.bf16.msra.mxu1 %v8239_v59  ;;  %7562 = vmatprep.subr.bf16.mxu0 %v8242_v6  ;;  %v8811_v59 = vld [vmem:[%s8608_s10 + $0x14] sm:$0x1]  ;;  %v1202_v62 = vshll.u32 %v8804_v56, 16  ;;  %v1483_v41 = vrot.slane %v8804_v56, 5 }
  0x42   : > { %7586 = vmatprep.subr.bf16.mxu1 %v8243_v7  ;;  %v1216_v2 = vshll.u32 %v8811_v59, 16  ;;  %v1487_v45 = vrot.slane %v8811_v59, 5  ;;  %v6622_v59 = vld [vmem:[%s8608_s10 + $0x28] sm:$0xf] }
  0x43   : > { %v1204_v8 = vrot.slane %v1202_v62, 5  ;;  %v1484_v30 = vsel %vm8722_vm5, %v6650_v39, %v1483_v41  ;;  %v6624_v62 = vld [vmem:[%s8608_s10 + $0x30] sm:$0xf]  ;;  %v1252_v5 = vshll.u32 %v6622_v59, 16 }
  0x44   : > { %7563 = vmatpush3.bf16.msra.mxu0 %v8242_v6  ;;  %v8817_v6 = vld [vmem:[%s8608_s10 + $0x1c] sm:$0x1]  ;;  %v1218_v13 = vrot.slane %v1216_v2, 5  ;;  %v1263_v12 = vshrl.u32 %v6624_v62, 16 }
  0x45   : > { %7587 = vmatpush3.bf16.msra.mxu1 %v8243_v7  ;;  %7564 = vmatprep.subr.bf16.mxu0 %v8244_v14  ;;  %v6620_v7 = vld [vmem:[%s8608_s10 + $0x20] sm:$0xf]  ;;  %v1230_v19 = vshll.u32 %v8817_v6, 16 }
  0x46   : > { %7588 = vmatprep.subr.bf16.mxu1 %v8245_v4  ;;  %v1235_v23 = vshrl.u32 %v6620_v7, 16  ;;  %v1238_v24 = vshll.u32 %v6620_v7, 16  ;;  %v1219_v42 = vsel %vm8645_vm2, %v1214_v32, %v1218_v13  ;;  %v8266_v7 = vld [vmem:[%s10649_s3 + $0x100] sm:$0xff]   ;;  %v1266_v13 = vshll.u32 %v6624_v62, 16  ;;  %v8271_v62 = vld [vmem:[%s10649_s3 + $0x1f0] sm:$0xff]  }
  0x47   : > { %v1232_v29 = vrot.slane %v1230_v19, 5  ;;  %v1277_v19 = vshrl.u32 %v6626_v15, 16 }
  0x48   : > { %7565 = vmatpush3.bf16.msra.mxu0 %v8244_v14  ;;  %v1221_v14 = vshrl.u32 %v6618_v3, 16  ;;  %v1237_v9 = vrot.slane %v1235_v23, 4  ;;  %v1268_v22 = vrot.slane %v1266_v13, 5  ;;  %v1280_v23 = vshll.u32 %v6626_v15, 16  ;;  %v8274_v13 = vld [vmem:[%s10649_s3 + $0x1a0] sm:$0xff]  }
  0x49   : > { %7589 = vmatpush3.bf16.msra.mxu1 %v8245_v4  ;;  %7566 = vmatprep.subr.bf16.mxu0 %v8246_v25  ;;  %v1224_v4 = vshll.u32 %v6618_v3, 16  ;;  %v1249_v3 = vshrl.u32 %v6622_v59, 16 }
  0x4a   : > { %7590 = vmatprep.subr.bf16.mxu1 %v8247_v35  ;;  %v1223_v36 = vrot.slane %v1221_v14, 4  ;;  %v1272_v14 = vshll.u32 %v8869_v63, 16 }
  0x4b   : > { %v1226_v28 = vrot.slane %v1224_v4, 5  ;;  %v8892_v4 = vld [vmem:[%s8608_s10 + $0x44] sm:$0x1] }
  0x4c   : > { %7567 = vmatpush3.bf16.msra.mxu0 %v8246_v25  ;;  %v1244_v25 = vshll.u32 %v8821_v16, 16  ;;  %v6628_v16 = vld [vmem:[%s8608_s10 + $0x40] sm:$0xf]  ;;  %v1274_v26 = vrot.slane %v1272_v14, 5  ;;  %v6690_v14 = vld [vmem:[%s8608_s10 + $0x10] sm:$0xf] }
  0x4d   : > { %7591 = vmatpush3.bf16.msra.mxu1 %v8247_v35  ;;  %7600 = vmatprep.subr.bf16.mxu0 %v8249_v31  ;;  %v1200_v35 = vrot.slane %v1199_v18, 4  ;;  %v1254_v18 = vrot.slane %v1252_v5, 5  ;;  %v1294_v32 = vshll.u32 %v6628_v16, 16 }
  0x4e   : > { %7624 = vmatprep.subr.bf16.mxu1 %v8250_v33  ;;  %v1246_v34 = vrot.slane %v1244_v25, 5 }
  0x4f   : > { %7569 = vmatmul.mubr.bf16.vlgmr.msra.gmra.mxu0 %v6583_v37  ;;  %v1205_v37 = vsel %vm8645_vm2, %v1200_v35, %v1204_v8  ;;  %v1279_v35 = vrot.slane %v1277_v19, 4  ;;  %v6692_v19 = vld [vmem:[%s8608_s10 + $0x18] sm:$0xf] }
  0x50   : > { %7593 = vmatmul.mubr.bf16.vlgmr.msra.gmra.mxu1 %v8251_v38  ;;  %7601 = vmatpush3.bf16.msra.mxu0 %v8249_v31  ;;  %v8262_v31 = vld [vmem:[%s10649_s3 + $0x110] sm:$0xff]   ;;  %v1227_v38 = vor.u32 %v1226_v28, %v1223_v36 }
  0x51   : > { %7625 = vmatpush3.bf16.msra.mxu1 %v8250_v33  ;;  %7602 = vmatprep.subr.bf16.mxu0 %v8252_v46  ;;  %v1240_v33 = vrot.slane %v1238_v24, 5  ;;  %v8267_v24 = vld [vmem:[%s10649_s3 + $0x140] sm:$0xff]  }
  0x52   : > { %7626 = vmatprep.subr.bf16.mxu1 %v8253_v47  ;;  %7572 = vmatprep.mubr.bf16.mxu0 %v6584_v48  ;;  %v6630_v48 = vcombine.low %v1205_v37, %v1219_v42  ;;  %v8268_v37 = vld [vmem:[%s10649_s3 + $0x1b8] sm:$0xff]   ;;  %v1296_v42 = vrot.slane %v1294_v32, 5 }
  0x53   : > { %7596 = vmatprep.mubr.bf16.mxu1 %v8256_v27  ;;  %v1241_v43 = vor.u32 %v1240_v33, %v1237_v9  ;;  %v1228_v27 = vrot.slane %v1227_v38, 4 }
  0x54   : > { %7603 = vmatpush3.bf16.msra.mxu0 %v8252_v46  ;;  %v6644_v46 = vld [vmem:[%s8608_s10 + $0x18] sm:$0xe] }
  0x55   : > { %7627 = vmatpush3.bf16.msra.mxu1 %v8253_v47  ;;  %7604 = vmatprep.subr.bf16.mxu0 %v8254_v50  ;;  %v6645_v47 = vld [vmem:[%s8608_s10 + $0x20] sm:$0xe]  ;;  %v6652_v49 = vrot.slane %v6644_v46, 9  ;;  %v1233_v56 = vsel %vm8645_vm2, %v1228_v27, %v1232_v29  ;;  %v1282_v29 = vrot.slane %v1280_v23, 5  ;;  %v1503_v27 = vrot.slane %v8869_v63, 5 }
  0x56   : > { %7628 = vmatprep.subr.bf16.mxu1 %v8255_v51 }
  0x57   : > { %7573 = vmatmul.mubr.bf16.gmra.mxu0 %v6585_v53  ;;  %v1491_v53 = vrot.slane %v8817_v6, 5  ;;  %v8879_v6 = vld [vmem:[%s8608_s10 + $0x3c] sm:$0x1]  ;;  %v1283_v39 = vor.u32 %v1282_v29, %v1279_v35 }
  0x58   : > { %7605 = vmatpush3.bf16.msra.mxu0 %v8254_v50  ;;  %7597 = vmatmul.mubr.bf16.gmra.mxu1 %v8257_v52  ;;  %v8264_v50 = vld [vmem:[%s10649_s3 + $0x108] sm:$0xff]   ;;  %v1488_v52 = vsel %vm8722_vm5, %v6651_v44, %v1487_v45  ;;  %v1286_v36 = vshll.u32 %v8879_v6, 16  ;;  %v8269_v44 = vld [vmem:[%s10649_s3 + $0x1f8] sm:$0xff]  }
  0x59   : > { %7629 = vmatpush3.bf16.msra.mxu1 %v8255_v51  ;;  %7606 = vmatprep.subr.bf16.mxu0 %v8258_v54  ;;  %v1242_v51 = vrot.slane %v1241_v43, 4  ;;  %v8875_v2 = vsel %vm8722_vm5, %v6652_v49, %v1491_v53  ;;  %v6646_v43 = vld [vmem:[%s8608_s10 + $0x28] sm:$0xe]  ;;  %v6648_v53 = vld [vmem:[%s8608_s10 + $0x38] sm:$0xe] }
  0x5a   : > { %7630 = vmatprep.subr.bf16.mxu1 %v8259_v57  ;;  %7616 = vmatprep.mubr.bf16.mxu0 %v6630_v48  ;;  %v1288_v33 = vrot.slane %v1286_v36, 5  ;;  %v6654_v48 = vrot.slane %v6646_v43, 9  ;;  %v8278_v36 = vld [vmem:[%s10649_s3 + $0x190] sm:$0xff]  }
  0x5b   : > { %v1247_v60 = vsel %vm8645_vm2, %v1242_v51, %v1246_v34  ;;  %v1300_v34 = vshll.u32 %v8892_v4, 16 }
  0x5c   : > { %7607 = vmatpush3.bf16.msra.mxu0 %v8258_v54  ;;  %v6653_v54 = vrot.slane %v6645_v47, 9  ;;  %v8871_v0 = vcombine.low %v1233_v56, %v1247_v60  ;;  %v6647_v47 = vld [vmem:[%s8608_s10 + $0x30] sm:$0xe] }
  0x5d   : > { %7631 = vmatpush3.bf16.msra.mxu1 %v8259_v57  ;;  %7608 = vmatprep.subr.bf16.mxu0 %v8260_v17  ;;  %v6658_v57 = vcombine.low %v1484_v30, %v1488_v52  ;;  %v1302_v46 = vrot.slane %v1300_v34, 5  ;;  %v8270_v30 = vld [vmem:[%s10649_s3 + $0x1b0] sm:$0xff]   ;;  %v6655_v52 = vrot.slane %v6647_v47, 9  ;;  %v6694_v34 = vld [vmem:[%s8608_s10 + $0x20] sm:$0xf] }
  0x5e   : > { %7632 = vmatprep.subr.bf16.mxu1 %v8261_v21  ;;  %v8886_v8 = vsel %vm8722_vm5, %v6653_v54, %v1495_v58  ;;  %v6649_v54 = vld [vmem:[%s8608_s10 + $0x40] sm:$0xe]  ;;  %v1507_v58 = vrot.slane %v8879_v6, 5  ;;  %v8272_v6 = vld [vmem:[%s10649_s3 + $0x1a8] sm:$0xff]   ;;  %v1881_v43 = vshrl.u32 %v6694_v34, 16 }
  0x5f   : > { %7640 = vmatprep.mubr.bf16.mxu1 %v6658_v57  ;;  %v6656_v57 = vrot.slane %v6648_v53, 9  ;;  %v1504_v60 = vsel %vm8722_vm5, %v6655_v52, %v1503_v27 }
  0x60   : > { %7609 = vmatpush3.bf16.msra.mxu0 %v8260_v17  ;;  %v1251_v17 = vrot.slane %v1249_v3, 4 }
  0x61   : > { %7633 = vmatpush3.bf16.msra.mxu1 %v8261_v21  ;;  %7610 = vmatprep.subr.bf16.mxu0 %v8262_v31  ;;  %v1265_v21 = vrot.slane %v1263_v12, 4 }
  0x62   : > { %7634 = vmatprep.subr.bf16.mxu1 %v8263_v11  ;;  %v1255_v25 = vor.u32 %v1254_v18, %v1251_v17  ;;  %v8284_v17 = vld [vmem:[%s8608_s10 + $0x10] ss:$8 sps:$4 sm:$0xff]  }
  0x63   : > { %v1269_v28 = vor.u32 %v1268_v22, %v1265_v21  ;;  %v8276_v18 = vld [vmem:[%s10649_s3 + $0x198] sm:$0xff]   ;;  %v1853_v21 = vshrl.u32 %v6690_v14, 16  ;;  %v1856_v22 = vshll.u32 %v6690_v14, 16 }
  0x64   : > { %7611 = vmatpush3.bf16.msra.mxu0 %v8262_v31  ;;  %v1291_v31 = vshrl.u32 %v6628_v16, 16  ;;  %v1256_v9 = vrot.slane %v1255_v25, 4  ;;  %v8275_v16 = vld [vmem:[%s10649_s3 + $0x1e0] sm:$0xff]   ;;  %v8277_v25 = vld [vmem:[%s10649_s3 + $0x1d8] sm:$0xff]  }
  0x65   : > { %7635 = vmatpush3.bf16.msra.mxu1 %v8263_v11  ;;  %7612 = vmatprep.subr.bf16.mxu0 %v8264_v50  ;;  %v1499_v11 = vrot.slane %v8865_v61, 5  ;;  %v1270_v38 = vrot.slane %v1269_v28, 4  ;;  %v6657_v61 = vrot.slane %v6649_v54, 9  ;;  %v1855_v28 = vrot.slane %v1853_v21, 4 }
  0x66   : > { %7636 = vmatprep.subr.bf16.mxu1 %v8265_v55  ;;  %v1293_v41 = vrot.slane %v1291_v31, 4  ;;  %v1261_v45 = vsel %vm8645_vm2, %v1256_v9, %v1260_v20  ;;  %v8965_v20 = vld [vmem:[%s8608_s10 + $0x1c] sm:$0x1]  ;;  %v1858_v29 = vrot.slane %v1856_v22, 5  ;;  %v6702_v22 = vld [vmem:[%s8608_s10 + $0x40] sm:$0xf] }
  0x67   : > { %v1275_v49 = vsel %vm8645_vm2, %v1270_v38, %v1274_v26  ;;  %v1500_v56 = vsel %vm8722_vm5, %v6654_v48, %v1499_v11  ;;  %v1870_v26 = vshll.u32 %v6692_v19, 16  ;;  %v1876_v35 = vshll.u32 %v8965_v20, 16  ;;  %v6696_v38 = vld [vmem:[%s8608_s10 + $0x28] sm:$0xf] }
  0x68   : > { %7613 = vmatpush3.bf16.msra.mxu0 %v8264_v50  ;;  %v1284_v50 = vrot.slane %v1283_v39, 4  ;;  %v1297_v51 = vor.u32 %v1296_v42, %v1293_v41  ;;  %v6632_v63 = vcombine.low %v1261_v45, %v1275_v49  ;;  %v6660_v3 = vcombine.low %v1500_v56, %v1504_v60  ;;  %v8985_v39 = vld [vmem:[%s8608_s10 + $0x2c] sm:$0x1]  ;;  %v8279_v41 = vld [vmem:[%s10649_s3 + $0x1d0] sm:$0xff]  }
  0x69   : > { %7637 = vmatpush3.bf16.msra.mxu1 %v8265_v55  ;;  %7614 = vmatprep.subr.bf16.mxu0 %v8266_v7  ;;  %v6659_v55 = vcombine.low %v8875_v2, %v8886_v8  ;;  %v1511_v2 = vrot.slane %v8892_v4, 5  ;;  %v8273_v8 = vld [vmem:[%s10649_s3 + $0x1e8] sm:$0xff]   ;;  %v8961_v4 = vld [vmem:[%s8608_s10 + $0x14] sm:$0x1]  ;;  %v1872_v9 = vrot.slane %v1870_v26, 5  ;;  %v1859_v11 = vor.u32 %v1858_v29, %v1855_v28 }
  0x6a   : > { %7638 = vmatprep.subr.bf16.mxu1 %v8267_v24  ;;  %v1298_v59 = vrot.slane %v1297_v51, 4  ;;  %v1289_v5 = vsel %vm8645_vm2, %v1284_v50, %v1288_v33  ;;  %v1862_v23 = vshll.u32 %v8961_v4, 16  ;;  %v1878_v33 = vrot.slane %v1876_v35, 5  ;;  %v8280_v51 = vld [vmem:[%s10649_s3 + $0x188] sm:$0xff]   ;;  %v9035_v35 = vld [vmem:[%s8608_s10 + $0x44] sm:$0x1] }
  0x6b   : > { %v1895_v47 = vshrl.u32 %v6696_v38, 16  ;;  %v1898_v48 = vshll.u32 %v6696_v38, 16  ;;  %v1904_v27 = vshll.u32 %v8985_v39, 16  ;;  %v1883_v49 = vrot.slane %v1881_v43, 4 }
  0x6c   : > { %7615 = vmatpush3.bf16.msra.mxu0 %v8266_v7  ;;  %v1303_v15 = vsel %vm8645_vm2, %v1298_v59, %v1302_v46  ;;  %v1508_v7 = vsel %vm8722_vm5, %v6656_v57, %v1507_v58  ;;  %v1864_v31 = vrot.slane %v1862_v23, 5  ;;  %v1860_v46 = vrot.slane %v1859_v11, 4  ;;  %v8285_v23 = vld [vmem:[%s8608_s10 + $0x20] ss:$8 sps:$4 sm:$0xff]  }
  0x6d   : > { %7639 = vmatpush3.bf16.msra.mxu1 %v8267_v24  ;;  %7648 = vmatprep.subr.bf16.mxu0 %v8268_v37  ;;  %v6633_v10 = vcombine.low %v1289_v5, %v1303_v15  ;;  %v1867_v24 = vshrl.u32 %v6692_v19, 16  ;;  %v1897_v53 = vrot.slane %v1895_v47, 4  ;;  %v1900_v54 = vrot.slane %v1898_v48, 5  ;;  %v6698_v15 = vld [vmem:[%s8608_s10 + $0x30] sm:$0xf] }
  0x6e   : > { %7672 = vmatprep.subr.bf16.mxu1 %v8269_v44  ;;  %v1865_v52 = vsel %vm8645_vm2, %v1860_v46, %v1864_v31  ;;  %v1946_v38 = vshll.u32 %v9035_v35, 16  ;;  %v8290_v47 = vld [vmem:[%s8608_s10 + $0x30] ss:$8 sps:$4 sm:$0xff]  }
  0x6f   : > { %7617 = vmatmul.mubr.bf16.vlgmr.msra.gmra.mxu0 %v8871_v0  ;;  %v1512_v0 = vsel %vm8722_vm5, %v6657_v61, %v1511_v2  ;;  %v1869_v32 = vrot.slane %v1867_v24, 4  ;;  %v1901_v60 = vor.u32 %v1900_v54, %v1897_v53  ;;  %v1906_v61 = vrot.slane %v1904_v27, 5  ;;  %v8283_v2 = vld [vmem:[%s10649_s3 + $0x1c0] sm:$0xff]   ;;  %v8292_v53 = vld [vmem:[%s10649_s3 + $0x228] sm:$0xff]  }
  0x70   : > { %7641 = vmatmul.mubr.bf16.vlgmr.msra.gmra.mxu1 %v6659_v55  ;;  %7649 = vmatpush3.bf16.msra.mxu0 %v8268_v37  ;;  %v6661_v12 = vcombine.low %v1508_v7, %v1512_v0  ;;  %v8981_v37 = vld [vmem:[%s8608_s10 + $0x24] sm:$0x1]  ;;  %v8281_v55 = vld [vmem:[%s10649_s3 + $0x1c8] sm:$0xff]   ;;  %v6700_v7 = vld [vmem:[%s8608_s10 + $0x38] sm:$0xf] }
  0x71   : > { %7673 = vmatpush3.bf16.msra.mxu1 %v8269_v44  ;;  %7650 = vmatprep.subr.bf16.mxu0 %v8270_v30  ;;  %v1873_v42 = vor.u32 %v1872_v9, %v1869_v32  ;;  %v1884_v44 = vshll.u32 %v6694_v34, 16  ;;  %v1890_v45 = vshll.u32 %v8981_v37, 16  ;;  %v8286_v0 = vld [vmem:[%s10649_s3 + $0x238] sm:$0xff]   ;;  %v1923_v14 = vshrl.u32 %v6700_v7, 16  ;;  %v6704_v32 = vld [vmem:[%s8608_s10 + $0x48] sm:$0xf] }
  0x72   : > { %7674 = vmatprep.subr.bf16.mxu1 %v8271_v62  ;;  %7620 = vmatprep.mubr.bf16.mxu0 %v6632_v63  ;;  %v1926_v19 = vshll.u32 %v6700_v7, 16  ;;  %v1940_v9 = vshll.u32 %v6702_v22, 16  ;;  %v9040_v34 = vld [vmem:[%s8608_s10 + $0x4c] sm:$0x1]  ;;  %v2147_v7 = vrot.slane %v8965_v20, 5 }
  0x73   : > { %7644 = vmatprep.mubr.bf16.mxu1 %v6660_v3  ;;  %v1886_v50 = vrot.slane %v1884_v44, 5  ;;  %v1892_v58 = vrot.slane %v1890_v45, 5  ;;  %v1902_v3 = vrot.slane %v1901_v60, 4  ;;  %v1925_v28 = vrot.slane %v1923_v14, 4  ;;  %v8297_v14 = vld [vmem:[%s10649_s3 + $0x258] sm:$0xff]  }
  0x74   : > { %7651 = vmatpush3.bf16.msra.mxu0 %v8270_v30  ;;  %v1874_v30 = vrot.slane %v1873_v42, 4  ;;  %v1928_v29 = vrot.slane %v1926_v19, 5  ;;  %v8288_v42 = vld [vmem:[%s10649_s3 + $0x230] sm:$0xff]   ;;  %v1942_v44 = vrot.slane %v1940_v9, 5  ;;  %v1954_v45 = vshll.u32 %v6704_v32, 16  ;;  %v8302_v9 = vld [vmem:[%s10649_s3 + $0x200] sm:$0xff]  }
  0x75   : > { %7675 = vmatpush3.bf16.msra.mxu1 %v8271_v62  ;;  %7652 = vmatprep.subr.bf16.mxu0 %v8272_v6  ;;  %v1887_v57 = vor.u32 %v1886_v50, %v1883_v49  ;;  %v8282_v62 = vld [vmem:[%s10649_s3 + $0x180] sm:$0xff]   ;;  %v1960_v46 = vshll.u32 %v9040_v34, 16 }
  0x76   : > { %7676 = vmatprep.subr.bf16.mxu1 %v8273_v8  ;;  %v1879_v56 = vsel %vm8645_vm2, %v1874_v30, %v1878_v33  ;;  %v1929_v43 = vor.u32 %v1928_v29, %v1925_v28  ;;  %v8289_v30 = vld [vmem:[%s10649_s3 + $0x270] sm:$0xff]   ;;  %v2151_v28 = vrot.slane %v8981_v37, 5 }
  0x77   : > { %7621 = vmatmul.mubr.bf16.gmra.mxu0 %v6633_v10  ;;  %v6706_v59 = vcombine.low %v1865_v52, %v1879_v56  ;;  %v1888_v63 = vrot.slane %v1887_v57, 4  ;;  %v9022_v10 = vld [vmem:[%s8608_s10 + $0x3c] sm:$0x1]  ;;  %v1956_v52 = vrot.slane %v1954_v45, 5  ;;  %v6724_v45 = vld [vmem:[%s8608_s10 + $0x40] sm:$0xe] }
  0x78   : > { %7653 = vmatpush3.bf16.msra.mxu0 %v8272_v6  ;;  %7645 = vmatmul.mubr.bf16.gmra.mxu1 %v6661_v12  ;;  %v9013_v6 = vld [vmem:[%s8608_s10 + $0x34] sm:$0x1]  ;;  %v1909_v12 = vshrl.u32 %v6698_v15, 16  ;;  %v1932_v21 = vshll.u32 %v9022_v10, 16  ;;  %v1930_v49 = vrot.slane %v1929_v43, 4 }
  0x79   : > { %7677 = vmatpush3.bf16.msra.mxu1 %v8273_v8  ;;  %7654 = vmatprep.subr.bf16.mxu0 %v8274_v13  ;;  %v1893_v5 = vsel %vm8645_vm2, %v1888_v63, %v1892_v58  ;;  %v1907_v8 = vsel %vm8645_vm2, %v1902_v3, %v1906_v61  ;;  %v1962_v58 = vrot.slane %v1960_v46, 5  ;;  %v8293_v61 = vld [vmem:[%s10649_s3 + $0x268] sm:$0xff]   ;;  %v8294_v3 = vld [vmem:[%s10649_s3 + $0x220] sm:$0xff]   ;;  %v2159_v37 = vrot.slane %v9013_v6, 5 }
  0x7a   : > { %7678 = vmatprep.subr.bf16.mxu1 %v8275_v16  ;;  %7664 = vmatprep.mubr.bf16.mxu0 %v8284_v17  ;;  %v8287_v17 = vld [vmem:[%s10649_s3 + $0x278] sm:$0xff]   ;;  %v1911_v24 = vrot.slane %v1909_v12, 4  ;;  %v1934_v31 = vrot.slane %v1932_v21, 5  ;;  %v8298_v21 = vld [vmem:[%s10649_s3 + $0x210] sm:$0xff]   ;;  %v6725_v46 = vld [vmem:[%s8608_s10 + $0x48] sm:$0xe] }
  0x7b   : > { %7688 = vmatprep.mubr.bf16.mxu1 %v6706_v59  ;;  %v8291_v59 = vld [vmem:[%s8608_s10 + $0x40] ss:$8 sps:$4 sm:$0xff]   ;;  %v6719_v12 = vld [vmem:[%s8608_s10 + $0x18] sm:$0xe] }
  0x7c   : > { %7655 = vmatpush3.bf16.msra.mxu0 %v8274_v13  ;;  %v1912_v13 = vshll.u32 %v6698_v15, 16  ;;  %v2143_v15 = vrot.slane %v8961_v4, 5  ;;  %v8296_v4 = vld [vmem:[%s10649_s3 + $0x218] sm:$0xff]  }
  0x7d   : > { %7679 = vmatpush3.bf16.msra.mxu1 %v8275_v16  ;;  %7656 = vmatprep.subr.bf16.mxu0 %v8276_v18  ;;  %v1918_v16 = vshll.u32 %v9013_v6, 16  ;;  %v8306_v6 = vld [vmem:[%s10649_s3 + $0x2f8] sm:$0xff]  }
  0x7e   : > { %7680 = vmatprep.subr.bf16.mxu1 %v8277_v25 }
  0x7f   : > { %v1920_v26 = vrot.slane %v1918_v16, 5  ;;  %v6727_v16 = vrot.slane %v6719_v12, 9 }
  0x80   : > { %7657 = vmatpush3.bf16.msra.mxu0 %v8276_v18  ;;  %v6707_v18 = vcombine.low %v1893_v5, %v1907_v8  ;;  %v6718_v8 = vld [vmem:[%s8608_s10 + $0x10] sm:$0xe] }
  0x81   : > { %7681 = vmatpush3.bf16.msra.mxu1 %v8277_v25  ;;  %7658 = vmatprep.subr.bf16.mxu0 %v8278_v36  ;;  %v1914_v25 = vrot.slane %v1912_v13, 5  ;;  %v6726_v13 = vrot.slane %v6718_v8, 9  ;;  %v2501_v8 = vld [vmem:[%s9076_s14 + $0x18] sm:$0xf] }
  0x82   : > { %7682 = vmatprep.subr.bf16.mxu1 %v8279_v41 }
  0x83   : > { %v1915_v33 = vor.u32 %v1914_v25, %v1911_v24  ;;  %v2144_v20 = vsel %vm8722_vm5, %v6726_v13, %v2143_v15  ;;  %v6721_v24 = vld [vmem:[%s8608_s10 + $0x28] sm:$0xe] }
  0x84   : > { %7659 = vmatpush3.bf16.msra.mxu0 %v8278_v36  ;;  %v1937_v36 = vshrl.u32 %v6702_v22, 16  ;;  %v6720_v22 = vld [vmem:[%s8608_s10 + $0x20] sm:$0xe]  ;;  %v8300_v25 = vld [vmem:[%s10649_s3 + $0x208] sm:$0xff]   ;;  %v6729_v29 = vrot.slane %v6721_v24, 9 }
  0x85   : > { %7683 = vmatpush3.bf16.msra.mxu1 %v8279_v41  ;;  %7660 = vmatprep.subr.bf16.mxu0 %v8280_v51  ;;  %v1951_v41 = vshrl.u32 %v6704_v32, 16  ;;  %v1916_v48 = vrot.slane %v1915_v33, 4  ;;  %v6722_v32 = vld [vmem:[%s8608_s10 + $0x30] sm:$0xe]  ;;  %v6723_v33 = vld [vmem:[%s8608_s10 + $0x38] sm:$0xe] }
  0x86   : > { %7684 = vmatprep.subr.bf16.mxu1 %v8281_v55  ;;  %v1939_v11 = vrot.slane %v1937_v36, 4  ;;  %v6728_v36 = vrot.slane %v6720_v22, 9  ;;  %v8310_v15 = vld [vmem:[%s10649_s3 + $0x2a8] sm:$0xff]   ;;  %v9176_v22 = vld [vmem:[%s9076_s14 + $0x1c] sm:$0x1] }
  0x87   : > { %v1953_v27 = vrot.slane %v1951_v41, 4  ;;  %v1921_v54 = vsel %vm8645_vm2, %v1916_v48, %v1920_v26  ;;  %v8301_v26 = vld [vmem:[%s10649_s3 + $0x248] sm:$0xff]   ;;  %v6731_v41 = vrot.slane %v6723_v33, 9  ;;  %v2167_v48 = vrot.slane %v9035_v35, 5  ;;  %v8309_v35 = vld [vmem:[%s10649_s3 + $0x2f0] sm:$0xff]  }
  0x88   : > { %7661 = vmatpush3.bf16.msra.mxu0 %v8280_v51  ;;  %v1943_v50 = vor.u32 %v1942_v44, %v1939_v11  ;;  %v1948_v51 = vrot.slane %v1946_v38, 5  ;;  %v8303_v11 = vld [vmem:[%s10649_s3 + $0x240] sm:$0xff]   ;;  %v6730_v38 = vrot.slane %v6722_v32, 9  ;;  %v8305_v44 = vld [vmem:[%s10649_s3 + $0x2b8] sm:$0xff]   ;;  %v8311_v13 = vld [vmem:[%s10649_s3 + $0x2e8] sm:$0xff]  }
  0x89   : > { %7685 = vmatpush3.bf16.msra.mxu1 %v8281_v55  ;;  %7662 = vmatprep.subr.bf16.mxu0 %v8282_v62  ;;  %v1935_v55 = vsel %vm8645_vm2, %v1930_v49, %v1934_v31  ;;  %v1957_v57 = vor.u32 %v1956_v52, %v1953_v27  ;;  %v2155_v31 = vrot.slane %v8985_v39, 5  ;;  %v2163_v39 = vrot.slane %v9022_v10, 5  ;;  %v8308_v52 = vld [vmem:[%s10649_s3 + $0x2b0] sm:$0xff]  }
  0x8a   : > { %7686 = vmatprep.subr.bf16.mxu1 %v8283_v2  ;;  %v1944_v56 = vrot.slane %v1943_v50, 4  ;;  %v6708_v60 = vcombine.low %v1921_v54, %v1935_v55  ;;  %v2171_v27 = vrot.slane %v9040_v34, 5  ;;  %v6732_v50 = vrot.slane %v6724_v45, 9  ;;  %v2495_v54 = vld [vmem:[%s9076_s14] sm:$0xf] }
  0x8b   : > { %v1958_v63 = vrot.slane %v1957_v57, 4  ;;  %v2156_v43 = vsel %vm8722_vm5, %v6729_v29, %v2155_v31  ;;  %v2164_v49 = vsel %vm8722_vm5, %v6731_v41, %v2163_v39  ;;  %v9148_v55 = vld [vmem:[%s9076_s14 + $0x4] sm:$0x1]  ;;  %v2776_v29 = vld [vmem:[%s9076_s14] sm:$0xe]  ;;  %v2563_v41 = vshll.u32 %v9176_v22, 16 }
  0x8c   : > { %7663 = vmatpush3.bf16.msra.mxu0 %v8282_v62  ;;  %v1949_v62 = vsel %vm8645_vm2, %v1944_v56, %v1948_v51  ;;  %v6733_v51 = vrot.slane %v6725_v46, 9  ;;  %v2168_v56 = vsel %vm8722_vm5, %v6732_v50, %v2167_v48  ;;  %v2777_v31 = vld [vmem:[%s9076_s14 + $0x8] sm:$0xe]  ;;  %v2802_v45 = vrot.slane %v9148_v55, 5  ;;  %v8316_v46 = vld [vmem:[%s10649_s3 + $0x298] sm:$0xff]  }
  0x8d   : > { %7687 = vmatpush3.bf16.msra.mxu1 %v8283_v2  ;;  %7696 = vmatprep.subr.bf16.mxu0 %v8286_v0  ;;  %v1963_v2 = vsel %vm8645_vm2, %v1958_v63, %v1962_v58  ;;  %v2497_v58 = vld [vmem:[%s9076_s14 + $0x8] sm:$0xf] }
  0x8e   : > { %7720 = vmatprep.subr.bf16.mxu1 %v8287_v17  ;;  %v6709_v5 = vcombine.low %v1949_v62, %v1963_v2  ;;  %v2172_v57 = vsel %vm8722_vm5, %v6733_v51, %v2171_v27  ;;  %v2521_v62 = vshll.u32 %v9148_v55, 16  ;;  %v2526_v63 = vshrl.u32 %v2497_v58, 16  ;;  %v9195_v27 = vld [vmem:[%s9076_s14 + $0x10] sm:$0xe] }
  0x8f   : > { %7665 = vmatmul.mubr.bf16.vlgmr.msra.gmra.mxu0 %v8285_v23  ;;  %v8299_v23 = vld [vmem:[%s10649_s3 + $0x250] sm:$0xff]   ;;  %v2529_v2 = vshll.u32 %v2497_v58, 16  ;;  %v6737_v12 = vcombine.low %v2168_v56, %v2172_v57  ;;  %v6772_v56 = vrot.slane %v9195_v27, 9  ;;  %v2503_v57 = vld [vmem:[%s9076_s14 + $0x20] sm:$0xf] }
  0x90   : > { %7689 = vmatmul.mubr.bf16.vlgmr.msra.gmra.mxu1 %v6707_v18  ;;  %7697 = vmatpush3.bf16.msra.mxu0 %v8286_v0  ;;  %v8295_v0 = vld [vmem:[%s10649_s3 + $0x260] sm:$0xff]   ;;  %v8319_v58 = vld [vmem:[%s10649_s3 + $0x2d0] sm:$0xff]  }
  0x91   : > { %7721 = vmatpush3.bf16.msra.mxu1 %v8287_v17  ;;  %7698 = vmatprep.subr.bf16.mxu0 %v8288_v42  ;;  %v2148_v17 = vsel %vm8722_vm5, %v6727_v16, %v2147_v7  ;;  %v8304_v18 = vld [vmem:[%s9076_s14] ss:$8 sps:$4 sm:$0xff]   ;;  %v8313_v16 = vld [vmem:[%s9076_s14 + $0x30] ss:$8 sps:$4 sm:$0xff]  }
  0x92   : > { %7722 = vmatprep.subr.bf16.mxu1 %v8289_v30  ;;  %7668 = vmatprep.mubr.bf16.mxu0 %v8290_v47  ;;  %v6734_v19 = vcombine.low %v2144_v20, %v2148_v17  ;;  %v8307_v47 = vld [vmem:[%s9076_s14 + $0x10] ss:$8 sps:$4 sm:$0xff]   ;;  %v2528_v20 = vrot.slane %v2526_v63, 4  ;;  %v2531_v17 = vrot.slane %v2529_v2, 5  ;;  %v9229_v63 = vld [vmem:[%s9076_s14 + $0x2c] sm:$0x1] }
  0x93   : > { %7692 = vmatprep.mubr.bf16.mxu1 %v6708_v60  ;;  %v2512_v60 = vshrl.u32 %v2495_v54, 16  ;;  %v2568_v2 = vshrl.u32 %v2503_v57, 16 }
  0x94   : > { %7699 = vmatpush3.bf16.msra.mxu0 %v8288_v42  ;;  %v2152_v42 = vsel %vm8722_vm5, %v6728_v36, %v2151_v28  ;;  %v2554_v36 = vshrl.u32 %v2501_v8, 16  ;;  %v2557_v28 = vshll.u32 %v2501_v8, 16  ;;  %v2509_v8 = vld [vmem:[%s9076_s14 + $0x38] sm:$0xf] }
  0x95   : > { %7723 = vmatpush3.bf16.msra.mxu1 %v8289_v30  ;;  %7700 = vmatprep.subr.bf16.mxu0 %v8292_v53  ;;  %v6735_v10 = vcombine.low %v2152_v42, %v2156_v43  ;;  %v2160_v30 = vsel %vm8722_vm5, %v6730_v38, %v2159_v37  ;;  %v2514_v7 = vrot.slane %v2512_v60, 4 }
  0x96   : > { %7724 = vmatprep.subr.bf16.mxu1 %v8293_v61  ;;  %v6736_v34 = vcombine.low %v2160_v30, %v2164_v49  ;;  %v2556_v39 = vrot.slane %v2554_v36, 4  ;;  %v2559_v38 = vrot.slane %v2557_v28, 5  ;;  %v8317_v30 = vld [vmem:[%s10649_s3 + $0x2d8] sm:$0xff]   ;;  %v8321_v36 = vld [vmem:[%s10649_s3 + $0x2c8] sm:$0xff]  }
  0x97   : > { %7669 = vmatmul.mubr.bf16.gmra.mxu0 %v8291_v59  ;;  %v9156_v59 = vld [vmem:[%s9076_s14 + $0xc] sm:$0x1] }
  0x98   : > { %7701 = vmatpush3.bf16.msra.mxu0 %v8292_v53  ;;  %7693 = vmatmul.mubr.bf16.gmra.mxu1 %v6709_v5  ;;  %v8312_v53 = vld [vmem:[%s9076_s14 + $0x20] ss:$8 sps:$4 sm:$0xff]   ;;  %v2499_v5 = vld [vmem:[%s9076_s14 + $0x10] sm:$0xf]  ;;  %v2806_v48 = vrot.slane %v9156_v59, 5 }
  0x99   : > { %7725 = vmatpush3.bf16.msra.mxu1 %v8293_v61  ;;  %7702 = vmatprep.subr.bf16.mxu0 %v8294_v3  ;;  %v2515_v61 = vshll.u32 %v2495_v54, 16  ;;  %v2543_v24 = vshll.u32 %v2499_v5, 16 }
  0x9a   : > { %7726 = vmatprep.subr.bf16.mxu1 %v8295_v0  ;;  %7736 = vmatprep.mubr.bf16.mxu1 %v8304_v18  ;;  %v9170_v18 = vld [vmem:[%s9076_s14 + $0x14] sm:$0x1] }
  0x9b   : > { %7712 = vmatprep.mubr.bf16.mxu0 %v6734_v19  ;;  %v2545_v33 = vrot.slane %v2543_v24, 5  ;;  %v2810_v60 = vrot.slane %v9170_v18, 5  ;;  %v2591_v24 = vshll.u32 %v9229_v63, 16 }
  0x9c   : > { %7703 = vmatpush3.bf16.msra.mxu0 %v8294_v3  ;;  %v2535_v3 = vshll.u32 %v9156_v59, 16 }
  0x9d   : > { %7727 = vmatpush3.bf16.msra.mxu1 %v8295_v0  ;;  %7704 = vmatprep.subr.bf16.mxu0 %v8296_v4  ;;  %v2517_v0 = vrot.slane %v2515_v61, 5  ;;  %v9225_v61 = vld [vmem:[%s9076_s14 + $0x24] sm:$0x1] }
  0x9e   : > { %7728 = vmatprep.subr.bf16.mxu1 %v8297_v14 }
  0x9f   : > { %v2518_v19 = vor.u32 %v2517_v0, %v2514_v7  ;;  %v9233_v0 = vld [vmem:[%s9076_s14 + $0x34] sm:$0x1] }
  0xa0   : > { %7705 = vmatpush3.bf16.msra.mxu0 %v8296_v4  ;;  %v2523_v4 = vrot.slane %v2521_v62, 5  ;;  %v2505_v62 = vld [vmem:[%s9076_s14 + $0x28] sm:$0xf] }
  0xa1   : > { %7729 = vmatpush3.bf16.msra.mxu1 %v8297_v14  ;;  %7706 = vmatprep.subr.bf16.mxu0 %v8298_v21  ;;  %v8314_v14 = vld [vmem:[%s10649_s3 + $0x2a0] sm:$0xff]   ;;  %v2519_v32 = vrot.slane %v2518_v19, 4  ;;  %v2585_v7 = vshll.u32 %v2505_v62, 16 }
  0xa2   : > { %7730 = vmatprep.subr.bf16.mxu1 %v8299_v23 }
  0xa3   : > { %v2524_v42 = vsel %vm8645_vm2, %v2519_v32, %v2523_v4  ;;  %v9238_v4 = vld [vmem:[%s9076_s14 + $0x3c] sm:$0x1]  ;;  %v2613_v32 = vshll.u32 %v2509_v8, 16 }
  0xa4   : > { %7707 = vmatpush3.bf16.msra.mxu0 %v8298_v21  ;;  %v2537_v21 = vrot.slane %v2535_v3, 5  ;;  %v2571_v3 = vshll.u32 %v2503_v57, 16 }
  0xa5   : > { %7731 = vmatpush3.bf16.msra.mxu1 %v8299_v23  ;;  %7708 = vmatprep.subr.bf16.mxu0 %v8300_v25  ;;  %v2540_v23 = vshrl.u32 %v2499_v5, 16  ;;  %v2507_v5 = vld [vmem:[%s9076_s14 + $0x30] sm:$0xf] }
  0xa6   : > { %7732 = vmatprep.subr.bf16.mxu1 %v8301_v26  ;;  %v2599_v19 = vshll.u32 %v2507_v5, 16 }
  0xa8   : > { %7709 = vmatpush3.bf16.msra.mxu0 %v8300_v25  ;;  %v8315_v25 = vld [vmem:[%s10649_s3 + $0x2e0] sm:$0xff]  }
  0xa9   : > { %7733 = vmatpush3.bf16.msra.mxu1 %v8301_v26  ;;  %7710 = vmatprep.subr.bf16.mxu0 %v8302_v9  ;;  %v2532_v26 = vor.u32 %v2531_v17, %v2528_v20  ;;  %v2596_v20 = vshrl.u32 %v2507_v5, 16  ;;  %v2577_v17 = vshll.u32 %v9225_v61, 16 }
  0xaa   : > { %7734 = vmatprep.subr.bf16.mxu1 %v8303_v11 }
  0xab   : > { %v2533_v37 = vrot.slane %v2532_v26, 4  ;;  %v2605_v26 = vshll.u32 %v9233_v0, 16 }
  0xac   : > { %7711 = vmatpush3.bf16.msra.mxu0 %v8302_v9  ;;  %v2542_v9 = vrot.slane %v2540_v23, 4 }
  0xad   : > { %7735 = vmatpush3.bf16.msra.mxu1 %v8303_v11  ;;  %7744 = vmatprep.subr.bf16.mxu0 %v8305_v44  ;;  %v2549_v11 = vshll.u32 %v9170_v18, 16 }
  0xae   : > { %7768 = vmatprep.subr.bf16.mxu1 %v8306_v6  ;;  %v2546_v43 = vor.u32 %v2545_v33, %v2542_v9 }
  0xaf   : > { %7713 = vmatmul.mubr.bf16.vlgmr.msra.gmra.mxu0 %v6735_v10  ;;  %v2560_v10 = vor.u32 %v2559_v38, %v2556_v39  ;;  %v9202_v51 = vrot.slane %v2549_v11, 5  ;;  %v2814_v11 = vrot.slane %v9176_v22, 5  ;;  %v8322_v39 = vld [vmem:[%s10649_s3 + $0x280] sm:$0xff]   ;;  %v2811_v38 = vsel %vm8722_vm5, %v6772_v56, %v2810_v60 }
  0xb0   : > { %7737 = vmatmul.mubr.bf16.vlgmr.msra.gmra.mxu1 %v8307_v47  ;;  %7745 = vmatpush3.bf16.msra.mxu0 %v8305_v44  ;;  %v6770_v44 = vrot.slane %v2776_v29, 9  ;;  %v6771_v47 = vrot.slane %v2777_v31, 9  ;;  %v9214_v54 = vrot.slane %v2546_v43, 4  ;;  %v2601_v29 = vrot.slane %v2599_v19, 5  ;;  %v8323_v22 = vld [vmem:[%s10649_s3 + $0x2c0] sm:$0xff]  }
  0xb1   : > { %7769 = vmatpush3.bf16.msra.mxu1 %v8306_v6  ;;  %7746 = vmatprep.subr.bf16.mxu0 %v8308_v52  ;;  %v2538_v6 = vsel %vm8645_vm2, %v2533_v37, %v2537_v21  ;;  %v9221_v59 = vrot.slane %v2560_v10, 4  ;;  %v8320_v21 = vld [vmem:[%s10649_s3 + $0x288] sm:$0xff]   ;;  %v2610_v31 = vshrl.u32 %v2509_v8, 16  ;;  %v2619_v37 = vshll.u32 %v9238_v4, 16 }
  0xb2   : > { %7770 = vmatprep.subr.bf16.mxu1 %v8309_v35  ;;  %7716 = vmatprep.mubr.bf16.mxu0 %v6736_v34  ;;  %v6758_v49 = vcombine.low %v2524_v42, %v2538_v6  ;;  %v2803_v50 = vsel %vm8722_vm5, %v6770_v44, %v2802_v45  ;;  %v9209_v34 = vld [vmem:[%s9076_s14 + $0x18] sm:$0xe]  ;;  %v2552_v9 = vsel %vm8645_vm2, %v9214_v54, %v9202_v51  ;;  %v2615_v43 = vrot.slane %v2613_v32, 5  ;;  %v2780_v44 = vld [vmem:[%s9076_s14 + $0x20] sm:$0xe] }
  0xb3   : > { %7740 = vmatprep.mubr.bf16.mxu1 %v8312_v53  ;;  %v8318_v53 = vld [vmem:[%s10649_s3 + $0x290] sm:$0xff]   ;;  %v2612_v42 = vrot.slane %v2610_v31, 4  ;;  %v2607_v10 = vrot.slane %v2605_v26, 5  ;;  %v2621_v27 = vrot.slane %v2619_v37, 5  ;;  %v8324_v51 = vld [vmem:[%s10649_s3 + $0x338] sm:$0xff]  }
  0xb4   : > { %7747 = vmatpush3.bf16.msra.mxu0 %v8308_v52  ;;  %v9204_v52 = vrot.slane %v2563_v41, 5  ;;  %v2579_v41 = vrot.slane %v2577_v17, 5  ;;  %v8325_v54 = vld [vmem:[%s10649_s3 + $0x378] sm:$0xff]   ;;  %v8328_v17 = vld [vmem:[%s10649_s3 + $0x328] sm:$0xff]   ;;  %v9320_v26 = vld [vmem:[%s9076_s14 + $0x14] sm:$0x1] }
  0xb5   : > { %7771 = vmatpush3.bf16.msra.mxu1 %v8309_v35  ;;  %7748 = vmatprep.subr.bf16.mxu0 %v8310_v15  ;;  %v2807_v35 = vsel %vm8722_vm5, %v6771_v47, %v2806_v48  ;;  %v2781_v47 = vld [vmem:[%s9076_s14 + $0x28] sm:$0xe] }
  0xb6   : > { %7772 = vmatprep.subr.bf16.mxu1 %v8311_v13  ;;  %v6778_v55 = vcombine.low %v2803_v50, %v2807_v35  ;;  %v2566_v33 = vsel %vm8645_vm2, %v9221_v59, %v9204_v52  ;;  %v2782_v50 = vld [vmem:[%s9076_s14 + $0x30] sm:$0xe]  ;;  %v2616_v35 = vor.u32 %v2615_v43, %v2612_v42  ;;  %v6814_v43 = vld [vmem:[%s9076_s14 + $0x18] sm:$0xf] }
  0xb7   : > { %7717 = vmatmul.mubr.bf16.gmra.mxu0 %v6737_v12  ;;  %v6773_v12 = vrot.slane %v9209_v34, 9  ;;  %v6775_v34 = vrot.slane %v2781_v47, 9  ;;  %v6776_v57 = vrot.slane %v2782_v50, 9  ;;  %v8340_v32 = vld [vmem:[%s9076_s14 + $0x8] ss:$8 sps:$4 sm:$0xff]  }
  0xb8   : > { %7749 = vmatpush3.bf16.msra.mxu0 %v8310_v15  ;;  %7741 = vmatmul.mubr.bf16.gmra.mxu1 %v8313_v16  ;;  %v2582_v15 = vshrl.u32 %v2505_v62, 16  ;;  %v2573_v16 = vrot.slane %v2571_v3, 5  ;;  %v2617_v62 = vrot.slane %v2616_v35, 4  ;;  %v9337_v47 = vld [vmem:[%s9076_s14 + $0x24] sm:$0x1] }
  0xb9   : > { %7773 = vmatpush3.bf16.msra.mxu1 %v8311_v13  ;;  %7750 = vmatprep.subr.bf16.mxu0 %v8314_v14  ;;  %v2570_v13 = vrot.slane %v2568_v2, 4  ;;  %v2815_v52 = vsel %vm8722_vm5, %v6773_v12, %v2814_v11  ;;  %v8331_v11 = vld [vmem:[%s10649_s3 + $0x360] sm:$0xff]  }
  0xba   : > { %7774 = vmatprep.subr.bf16.mxu1 %v8315_v25  ;;  %7760 = vmatprep.mubr.bf16.mxu0 %v6758_v49  ;;  %v2584_v18 = vrot.slane %v2582_v15, 4  ;;  %v2818_v49 = vrot.slane %v9225_v61, 5  ;;  %v6779_v59 = vcombine.low %v2811_v38, %v2815_v52  ;;  %v2830_v15 = vrot.slane %v9238_v4, 5 }
  0xbb   : > { %7784 = vmatprep.mubr.bf16.mxu1 %v6778_v55  ;;  %v2574_v23 = vor.u32 %v2573_v16, %v2570_v13  ;;  %v2783_v55 = vld [vmem:[%s9076_s14 + $0x38] sm:$0xe]  ;;  %v2622_v16 = vsel %vm8645_vm2, %v2617_v62, %v2621_v27  ;;  %v3203_v27 = vshll.u32 %v6814_v43, 16  ;;  %v3223_v62 = vshll.u32 %v9337_v47, 16 }
  0xbc   : > { %7751 = vmatpush3.bf16.msra.mxu0 %v8314_v14  ;;  %v2587_v14 = vrot.slane %v2585_v7, 5  ;;  %v6777_v5 = vrot.slane %v2783_v55, 9  ;;  %v8326_v7 = vld [vmem:[%s10649_s3 + $0x330] sm:$0xff]  }
  0xbd   : > { %7775 = vmatpush3.bf16.msra.mxu1 %v8315_v25  ;;  %7752 = vmatprep.subr.bf16.mxu0 %v8316_v46  ;;  %v2598_v25 = vrot.slane %v2596_v20, 4  ;;  %v2575_v45 = vrot.slane %v2574_v23, 4  ;;  %v8330_v23 = vld [vmem:[%s10649_s3 + $0x320] sm:$0xff]  }
  0xbe   : > { %7776 = vmatprep.subr.bf16.mxu1 %v8317_v30  ;;  %v2588_v28 = vor.u32 %v2587_v14, %v2584_v18  ;;  %v2831_v20 = vsel %vm8722_vm5, %v6777_v5, %v2830_v15  ;;  %v8329_v18 = vld [vmem:[%s10649_s3 + $0x368] sm:$0xff]  }
  0xbf   : > { %v2602_v6 = vor.u32 %v2601_v29, %v2598_v25  ;;  %v2580_v60 = vsel %vm8645_vm2, %v2575_v45, %v2579_v41  ;;  %v6810_v14 = vld [vmem:[%s9076_s14 + $0x8] sm:$0xf]  ;;  %v6812_v25 = vld [vmem:[%s9076_s14 + $0x10] sm:$0xf]  ;;  %v8332_v41 = vld [vmem:[%s10649_s3 + $0x318] sm:$0xff]  }
  0xc0   : > { %7753 = vmatpush3.bf16.msra.mxu0 %v8316_v46  ;;  %v2593_v46 = vrot.slane %v2591_v24, 5  ;;  %v2589_v48 = vrot.slane %v2588_v28, 4  ;;  %v9316_v24 = vld [vmem:[%s9076_s14 + $0xc] sm:$0x1]  ;;  %v3175_v28 = vshll.u32 %v6810_v14, 16  ;;  %v3186_v31 = vshrl.u32 %v6812_v25, 16 }
  0xc1   : > { %7777 = vmatpush3.bf16.msra.mxu1 %v8317_v30  ;;  %7754 = vmatprep.subr.bf16.mxu0 %v8318_v53  ;;  %v6774_v30 = vrot.slane %v2780_v44, 9  ;;  %v2603_v56 = vrot.slane %v2602_v6, 4  ;;  %v3181_v29 = vshll.u32 %v9316_v24, 16  ;;  %v6816_v6 = vld [vmem:[%s9076_s14 + $0x20] sm:$0xf] }
  0xc2   : > { %7778 = vmatprep.subr.bf16.mxu1 %v8319_v58  ;;  %v2594_v61 = vsel %vm8645_vm2, %v2589_v48, %v2593_v46  ;;  %v3188_v38 = vrot.slane %v3186_v31, 4  ;;  %v9333_v46 = vld [vmem:[%s9076_s14 + $0x1c] sm:$0x1]  ;;  %v3200_v48 = vshrl.u32 %v6814_v43, 16  ;;  %v3214_v50 = vshrl.u32 %v6816_v6, 16 }
  0xc3   : > { %v2819_v2 = vsel %vm8722_vm5, %v6774_v30, %v2818_v49  ;;  %v6760_v8 = vcombine.low %v2580_v60, %v2594_v61  ;;  %v2608_v12 = vsel %vm8645_vm2, %v2603_v56, %v2607_v10  ;;  %v8333_v30 = vld [vmem:[%s10649_s3 + $0x358] sm:$0xff]   ;;  %v8335_v60 = vld [vmem:[%s10649_s3 + $0x350] sm:$0xff]   ;;  %v6818_v15 = vld [vmem:[%s9076_s14 + $0x28] sm:$0xf] }
  0xc4   : > { %7755 = vmatpush3.bf16.msra.mxu0 %v8318_v53  ;;  %v2822_v53 = vrot.slane %v9229_v63, 5  ;;  %v2826_v63 = vrot.slane %v9233_v0, 5  ;;  %v8327_v0 = vld [vmem:[%s10649_s3 + $0x370] sm:$0xff]   ;;  %v6761_v19 = vcombine.low %v2608_v12, %v2622_v16  ;;  %v3202_v35 = vrot.slane %v3200_v48, 4 }
  0xc5   : > { %7779 = vmatpush3.bf16.msra.mxu1 %v8319_v58  ;;  %7756 = vmatprep.subr.bf16.mxu0 %v8320_v21  ;;  %v6759_v58 = vcombine.low %v2552_v9, %v2566_v33  ;;  %v3189_v9 = vshll.u32 %v6812_v25, 16  ;;  %v3195_v33 = vshll.u32 %v9320_v26, 16  ;;  %v3216_v55 = vrot.slane %v3214_v50, 4  ;;  %v8342_v50 = vld [vmem:[%s10649_s3 + $0x3b8] sm:$0xff]  }
  0xc6   : > { %7780 = vmatprep.subr.bf16.mxu1 %v8321_v36  ;;  %v2823_v3 = vsel %vm8722_vm5, %v6775_v34, %v2822_v53  ;;  %v2827_v4 = vsel %vm8722_vm5, %v6776_v57, %v2826_v63  ;;  %v3205_v34 = vrot.slane %v3203_v27, 5  ;;  %v8334_v57 = vld [vmem:[%s10649_s3 + $0x310] sm:$0xff]   ;;  %v8336_v63 = vld [vmem:[%s10649_s3 + $0x308] sm:$0xff]   ;;  %v3225_v12 = vrot.slane %v3223_v62, 5 }
  0xc7   : > { %v6780_v13 = vcombine.low %v2819_v2, %v2823_v3  ;;  %v3191_v42 = vrot.slane %v3189_v9, 5  ;;  %v3197_v45 = vrot.slane %v3195_v33, 5  ;;  %v3228_v16 = vshrl.u32 %v6818_v15, 16  ;;  %v6824_v33 = vld [vmem:[%s9076_s14 + $0x40] sm:$0xf] }
  0xc8   : > { %7757 = vmatpush3.bf16.msra.mxu0 %v8320_v21  ;;  %v6781_v21 = vcombine.low %v2827_v4, %v2831_v20  ;;  %v3231_v4 = vshll.u32 %v6818_v15, 16  ;;  %v3270_v43 = vshrl.u32 %v6824_v33, 16 }
  0xc9   : > { %7781 = vmatpush3.bf16.msra.mxu1 %v8321_v36  ;;  %7758 = vmatprep.subr.bf16.mxu0 %v8322_v39  ;;  %v3172_v36 = vshrl.u32 %v6810_v14, 16  ;;  %v3192_v10 = vor.u32 %v3191_v42, %v3188_v38  ;;  %v9390_v38 = vld [vmem:[%s9076_s14 + $0x44] sm:$0x1] }
  0xca   : > { %7782 = vmatprep.subr.bf16.mxu1 %v8323_v22 }
  0xcb   : > { %v3174_v37 = vrot.slane %v3172_v36, 4  ;;  %v3193_v52 = vrot.slane %v3192_v10, 4  ;;  %v9376_v36 = vld [vmem:[%s9076_s14 + $0x3c] sm:$0x1] }
  0xcc   : > { %7759 = vmatpush3.bf16.msra.mxu0 %v8322_v39  ;;  %v3177_v39 = vrot.slane %v3175_v28, 5  ;;  %v3265_v42 = vshll.u32 %v9376_v36, 16 }
  0xcd   : > { %7783 = vmatpush3.bf16.msra.mxu1 %v8323_v22  ;;  %7792 = vmatprep.subr.bf16.mxu0 %v8324_v51  ;;  %v3183_v22 = vrot.slane %v3181_v29, 5  ;;  %v8338_v29 = vld [vmem:[%s10649_s3 + $0x300] sm:$0xff]  }
  0xce   : > { %7816 = vmatprep.subr.bf16.mxu1 %v8325_v54  ;;  %v3178_v44 = vor.u32 %v3177_v39, %v3174_v37  ;;  %v8339_v37 = vld [vmem:[%s10649_s3 + $0x340] sm:$0xff]  }
  0xcf   : > { %7761 = vmatmul.mubr.bf16.vlgmr.msra.gmra.mxu0 %v6759_v58  ;;  %v3198_v58 = vsel %vm8645_vm2, %v3193_v52, %v3197_v45  ;;  %v3273_v45 = vshll.u32 %v6824_v33, 16 }
  0xd0   : > { %7785 = vmatmul.mubr.bf16.vlgmr.msra.gmra.mxu1 %v6779_v59  ;;  %7793 = vmatpush3.bf16.msra.mxu0 %v8324_v51  ;;  %v3179_v49 = vrot.slane %v3178_v44, 4  ;;  %v3217_v51 = vshll.u32 %v6816_v6, 16  ;;  %v3206_v59 = vor.u32 %v3205_v34, %v3202_v35  ;;  %v3279_v6 = vshll.u32 %v9390_v38, 16 }
  0xd1   : > { %7817 = vmatpush3.bf16.msra.mxu1 %v8325_v54  ;;  %7794 = vmatprep.subr.bf16.mxu0 %v8326_v7  ;;  %v3209_v54 = vshll.u32 %v9333_v46, 16 }
  0xd2   : > { %7818 = vmatprep.subr.bf16.mxu1 %v8327_v0  ;;  %7764 = vmatprep.mubr.bf16.mxu0 %v6760_v8  ;;  %v3184_v53 = vsel %vm8645_vm2, %v3179_v49, %v3183_v22  ;;  %v3219_v56 = vrot.slane %v3217_v51, 5  ;;  %v9357_v3 = vrot.slane %v3206_v59, 4  ;;  %v8337_v8 = vld [vmem:[%s10649_s3 + $0x348] sm:$0xff]   ;;  %v8341_v49 = vld [vmem:[%s9076_s14 + $0x18] ss:$8 sps:$4 sm:$0xff]   ;;  %v8345_v59 = vld [vmem:[%s10649_s3 + $0x3f0] sm:$0xff]  }
  0xd3   : > { %7788 = vmatprep.mubr.bf16.mxu1 %v6780_v13  ;;  %v6826_v61 = vcombine.low %v3184_v53, %v3198_v58  ;;  %v9359_v5 = vrot.slane %v3209_v54, 5  ;;  %v9370_v13 = vld [vmem:[%s9076_s14 + $0x34] sm:$0x1]  ;;  %v8343_v51 = vld [vmem:[%s10649_s3 + $0x3f8] sm:$0xff]   ;;  %v3275_v53 = vrot.slane %v3273_v45, 5 }
  0xd4   : > { %7795 = vmatpush3.bf16.msra.mxu0 %v8326_v7  ;;  %v3220_v2 = vor.u32 %v3219_v56, %v3216_v55  ;;  %v9363_v7 = vld [vmem:[%s9076_s14 + $0x2c] sm:$0x1]  ;;  %v3251_v25 = vshll.u32 %v9370_v13, 16  ;;  %v8344_v54 = vld [vmem:[%s10649_s3 + $0x3b0] sm:$0xff]   ;;  %v3267_v55 = vrot.slane %v3265_v42, 5  ;;  %v8353_v45 = vld [vmem:[%s10649_s3 + $0x3d8] sm:$0xff]  }
  0xd5   : > { %7819 = vmatpush3.bf16.msra.mxu1 %v8327_v0  ;;  %7796 = vmatprep.subr.bf16.mxu0 %v8328_v17  ;;  %v6820_v0 = vld [vmem:[%s9076_s14 + $0x30] sm:$0xf]  ;;  %v3212_v31 = vsel %vm8645_vm2, %v9357_v3, %v9359_v5 }
  0xd6   : > { %7820 = vmatprep.subr.bf16.mxu1 %v8329_v18  ;;  %v3221_v20 = vrot.slane %v3220_v2, 4  ;;  %v3245_v14 = vshll.u32 %v6820_v0, 16  ;;  %v3253_v27 = vrot.slane %v3251_v25, 5 }
  0xd7   : > { %7765 = vmatmul.mubr.bf16.gmra.mxu0 %v6761_v19  ;;  %v6822_v19 = vld [vmem:[%s9076_s14 + $0x38] sm:$0xf] }
  0xd8   : > { %7797 = vmatpush3.bf16.msra.mxu0 %v8328_v17  ;;  %7789 = vmatmul.mubr.bf16.gmra.mxu1 %v6781_v21  ;;  %v3237_v17 = vshll.u32 %v9363_v7, 16  ;;  %v3230_v21 = vrot.slane %v3228_v16, 4  ;;  %v3256_v28 = vshrl.u32 %v6822_v19, 16  ;;  %v3247_v9 = vrot.slane %v3245_v14, 5 }
  0xd9   : > { %7821 = vmatpush3.bf16.msra.mxu1 %v8329_v18  ;;  %7798 = vmatprep.subr.bf16.mxu0 %v8330_v23  ;;  %v3242_v18 = vshrl.u32 %v6820_v0, 16  ;;  %v3226_v52 = vsel %vm8645_vm2, %v3221_v20, %v3225_v12  ;;  %v3462_v0 = vrot.slane %v9316_v24, 5  ;;  %v6839_v24 = vld [vmem:[%s9076_s14 + $0x10] sm:$0xe] }
  0xda   : > { %7822 = vmatprep.subr.bf16.mxu1 %v8331_v11  ;;  %7808 = vmatprep.mubr.bf16.mxu0 %v8340_v32  ;;  %v3239_v48 = vrot.slane %v3237_v17, 5  ;;  %v6827_v58 = vcombine.low %v3212_v31, %v3226_v52  ;;  %v8356_v52 = vld [vmem:[%s10649_s3 + $0x388] sm:$0xff]  }
  0xdb   : > { %7832 = vmatprep.mubr.bf16.mxu1 %v6826_v61  ;;  %v3244_v32 = vrot.slane %v3242_v18, 4  ;;  %v6838_v18 = vld [vmem:[%s9076_s14 + $0x8] sm:$0xe] }
  0xdc   : > { %7799 = vmatpush3.bf16.msra.mxu0 %v8330_v23  ;;  %v3233_v23 = vrot.slane %v3231_v4, 5  ;;  %v8348_v4 = vld [vmem:[%s10649_s3 + $0x3a8] sm:$0xff]  }
  0xdd   : > { %7823 = vmatpush3.bf16.msra.mxu1 %v8331_v11  ;;  %7800 = vmatprep.subr.bf16.mxu0 %v8332_v41  ;;  %v3259_v11 = vshll.u32 %v6822_v19, 16  ;;  %v3248_v44 = vor.u32 %v3247_v9, %v3244_v32  ;;  %v6846_v19 = vrot.slane %v6838_v18, 9  ;;  %v3486_v18 = vrot.slane %v9376_v36, 5  ;;  %v6888_v36 = vld [vmem:[%s9076_s14 + $0x18] sm:$0xf] }
  0xde   : > { %7824 = vmatprep.subr.bf16.mxu1 %v8333_v30  ;;  %v3234_v39 = vor.u32 %v3233_v23, %v3230_v21  ;;  %v6847_v21 = vrot.slane %v6839_v24, 9  ;;  %v3490_v24 = vrot.slane %v9390_v38, 5 }
  0xdf   : > { %v3261_v22 = vrot.slane %v3259_v11, 5  ;;  %v3249_v35 = vrot.slane %v3248_v44, 4  ;;  %v3463_v32 = vsel %vm8722_vm5, %v6846_v19, %v3462_v0  ;;  %v8360_v44 = vld [vmem:[%s9076_s14 + $0x10] ss:$8 sps:$4 sm:$0xff]  }
  0xe0   : > { %7801 = vmatpush3.bf16.msra.mxu0 %v8332_v41  ;;  %v3258_v41 = vrot.slane %v3256_v28, 4  ;;  %v3235_v10 = vrot.slane %v3234_v39, 4  ;;  %v8347_v28 = vld [vmem:[%s9076_s14 + $0x38] ss:$8 sps:$4 sm:$0xff]  }
  0xe1   : > { %7825 = vmatpush3.bf16.msra.mxu1 %v8333_v30  ;;  %7802 = vmatprep.subr.bf16.mxu0 %v8334_v57  ;;  %v3272_v30 = vrot.slane %v3270_v43, 4  ;;  %v3254_v62 = vsel %vm8645_vm2, %v3249_v35, %v3253_v27  ;;  %v6840_v27 = vld [vmem:[%s9076_s14 + $0x18] sm:$0xe] }
  0xe2   : > { %7826 = vmatprep.subr.bf16.mxu1 %v8335_v60  ;;  %v3262_v34 = vor.u32 %v3261_v22, %v3258_v41  ;;  %v3240_v61 = vsel %vm8645_vm2, %v3235_v10, %v3239_v48  ;;  %v8351_v41 = vld [vmem:[%s10649_s3 + $0x3e0] sm:$0xff]   ;;  %v8352_v22 = vld [vmem:[%s10649_s3 + $0x398] sm:$0xff]   ;;  %v8354_v10 = vld [vmem:[%s10649_s3 + $0x390] sm:$0xff]   ;;  %v6848_v35 = vrot.slane %v6840_v27, 9 }
  0xe3   : > { %v3276_v56 = vor.u32 %v3275_v53, %v3272_v30  ;;  %v6828_v5 = vcombine.low %v3240_v61, %v3254_v62  ;;  %v8355_v30 = vld [vmem:[%s10649_s3 + $0x3d0] sm:$0xff]   ;;  %v8358_v62 = vld [vmem:[%s10649_s3 + $0x380] sm:$0xff]  }
  0xe4   : > { %7803 = vmatpush3.bf16.msra.mxu0 %v8334_v57  ;;  %v3281_v57 = vrot.slane %v3279_v6, 5 }
  0xe5   : > { %7827 = vmatpush3.bf16.msra.mxu1 %v8335_v60  ;;  %7804 = vmatprep.subr.bf16.mxu0 %v8336_v63  ;;  %v8346_v60 = vld [vmem:[%s9076_s14 + $0x28] ss:$8 sps:$4 sm:$0xff]   ;;  %v3277_v2 = vrot.slane %v3276_v56, 4 }
  0xe6   : > { %7828 = vmatprep.subr.bf16.mxu1 %v8337_v8 }
  0xe7   : > { %v3282_v17 = vsel %vm8645_vm2, %v3277_v2, %v3281_v57  ;;  %v6843_v57 = vld [vmem:[%s9076_s14 + $0x30] sm:$0xe]  ;;  %v3482_v2 = vrot.slane %v9370_v13, 5 }
  0xe8   : > { %7805 = vmatpush3.bf16.msra.mxu0 %v8336_v63  ;;  %v3263_v63 = vrot.slane %v3262_v34, 4  ;;  %v3470_v34 = vrot.slane %v9333_v46, 5 }
  0xe9   : > { %7829 = vmatpush3.bf16.msra.mxu1 %v8337_v8  ;;  %7806 = vmatprep.subr.bf16.mxu0 %v8338_v29  ;;  %v3466_v8 = vrot.slane %v9320_v26, 5  ;;  %v8349_v26 = vld [vmem:[%s10649_s3 + $0x3e8] sm:$0xff]  }
  0xea   : > { %7830 = vmatprep.subr.bf16.mxu1 %v8339_v37  ;;  %v3268_v20 = vsel %vm8645_vm2, %v3263_v63, %v3267_v55  ;;  %v6842_v55 = vld [vmem:[%s9076_s14 + $0x28] sm:$0xe]  ;;  %v3478_v63 = vrot.slane %v9363_v7, 5  ;;  %v3471_v13 = vsel %vm8722_vm5, %v6848_v35, %v3470_v34 }
  0xeb   : > { %v6829_v31 = vcombine.low %v3268_v20, %v3282_v17  ;;  %v3467_v9 = vsel %vm8722_vm5, %v6847_v21, %v3466_v8  ;;  %v6844_v8 = vld [vmem:[%s9076_s14 + $0x38] sm:$0xe]  ;;  %v6886_v21 = vld [vmem:[%s9076_s14 + $0x10] sm:$0xf]  ;;  %v9553_v34 = vld [vmem:[%s10649_s3 + $0x428] sm:$0xff]  }
  0xec   : > { %7807 = vmatpush3.bf16.msra.mxu0 %v8338_v29  ;;  %v6854_v42 = vcombine.low %v3463_v32, %v3467_v9  ;;  %v8361_v20 = vld [vmem:[%s10649_s3 + $0x438] sm:$0xff]   ;;  %v3832_v38 = vshrl.u32 %v6886_v21, 16  ;;  %v3835_v32 = vshll.u32 %v6886_v21, 16 }
  0xed   : > { %7831 = vmatpush3.bf16.msra.mxu1 %v8339_v37  ;;  %7840 = vmatprep.subr.bf16.mxu0 %v8342_v50  ;;  %v8350_v37 = vld [vmem:[%s10649_s3 + $0x3a0] sm:$0xff]   ;;  %v8362_v17 = vld [vmem:[%s10649_s3 + $0x478] sm:$0xff]  }
  0xee   : > { %7864 = vmatprep.subr.bf16.mxu1 %v8343_v51 }
  0xef   : > { %v7522_v3 = vpop.f32.mrf.mxu0  ;;  %7809 = vmatmul.mubr.bf16.vlgmr.msra.gmra.mxu0 %v8341_v49  ;;  %v6841_v49 = vld [vmem:[%s9076_s14 + $0x20] sm:$0xe] }
  0xf0   : > { %v7546_v15 = vpop.f32.mrf.mxu1  ;;  %7833 = vmatmul.mubr.bf16.vlgmr.msra.gmra.mxu1 %v6827_v58  ;;  %7841 = vmatpush3.bf16.msra.mxu0 %v8342_v50 }
  0xf1   : > { %v9416_v12 = vadd.f32 %v7546_v15, %v7522_v3  ;;  %7865 = vmatpush3.bf16.msra.mxu1 %v8343_v51  ;;  %v626_v16 = vpop.f32.mrf.mxu0  ;;  %7842 = vmatprep.subr.bf16.mxu0 %v8344_v54  ;;  %v6851_v15 = vrot.slane %v6843_v57, 9 }
  0xf2   : > { %v763_v14 = vpop.f32.mrf.mxu1  ;;  %7866 = vmatprep.subr.bf16.mxu1 %v8345_v59  ;;  %7812 = vmatprep.mubr.bf16.mxu0 %v8346_v60  ;;  %v3474_v60 = vrot.slane %v9337_v47, 5  ;;  %v8359_v47 = vld [vmem:[%s10649_s3 + $0x3c0] sm:$0xff]  }
  0xf3   : > { %v9430_v23 = vadd.f32 %v763_v14, %v626_v16  ;;  %v7523_v25 = vpop.f32.mrf.mxu0  ;;  %7836 = vmatprep.mubr.bf16.mxu1 %v6828_v5  ;;  %v6850_v5 = vrot.slane %v6842_v55, 9 }
  0xf4   : > { %v7547_v29 = vpop.f32.mrf.mxu1  ;;  %7843 = vmatpush3.bf16.msra.mxu0 %v8344_v54  ;;  %v8357_v54 = vld [vmem:[%s10649_s3 + $0x3c8] sm:$0xff]  }
  0xf5   : > { %v9437_v33 = vadd.f32 %v7547_v29, %v7523_v25  ;;  %7867 = vmatpush3.bf16.msra.mxu1 %v8345_v59  ;;  %v629_v11 = vpop.f32.mrf.mxu0  ;;  %7844 = vmatprep.subr.bf16.mxu0 %v8348_v4  ;;  %v6849_v59 = vrot.slane %v6841_v49, 9  ;;  %v9517_v25 = vld [vmem:[%s9076_s14 + $0x14] sm:$0x1]  ;;  %v3483_v29 = vsel %vm8722_vm5, %v6851_v15, %v3482_v2  ;;  %v6914_v2 = vld [vmem:[%s9076_s14 + $0x10] sm:$0xe] }
  0xf6   : > { %v766_v39 = vpop.f32.mrf.mxu1  ;;  %7868 = vmatprep.subr.bf16.mxu1 %v8349_v26  ;;  %v3841_v9 = vshll.u32 %v9517_v25, 16  ;;  %v6922_v21 = vrot.slane %v6914_v2, 9  ;;  %v6898_v2 = vld [vmem:[%s9076_s14 + $0x40] sm:$0xf] }
  0xf7   : > { %v9445_v43 = vadd.f32 %v766_v39, %v629_v11  ;;  %7813 = vmatmul.mubr.bf16.gmra.mxu0 %v8347_v28  ;;  %v7526_v50 = vpop.f32.mrf.mxu0  ;;  %v3475_v16 = vsel %vm8722_vm5, %v6849_v59, %v3474_v60  ;;  %v3479_v28 = vsel %vm8722_vm5, %v6850_v5, %v3478_v63  ;;  %v3846_v11 = vshrl.u32 %v6888_v36, 16 }
  0xf8   : > { %7845 = vmatpush3.bf16.msra.mxu0 %v8348_v4  ;;  %7837 = vmatmul.mubr.bf16.gmra.mxu1 %v6829_v31  ;;  %v7550_v6 = vpop.f32.mrf.mxu1  ;;  %v6845_v4 = vld [vmem:[%s9076_s14 + $0x40] sm:$0xe]  ;;  %v6855_v14 = vcombine.low %v3471_v13, %v3475_v16  ;;  %v9525_v31 = vld [vmem:[%s9076_s14 + $0x1c] sm:$0x1]  ;;  %v6856_v27 = vcombine.low %v3479_v28, %v3483_v29  ;;  %v3843_v55 = vrot.slane %v3841_v9, 5 }
  0xf9   : > { %7869 = vmatpush3.bf16.msra.mxu1 %v8349_v26  ;;  %7846 = vmatprep.subr.bf16.mxu0 %v8350_v37  ;;  %v9473_v53 = vadd.f32 %v7550_v6, %v7526_v50  ;;  %v642_v56 = vpop.f32.mrf.mxu0  ;;  %v6852_v26 = vrot.slane %v6844_v8, 9  ;;  %v6853_v19 = vrot.slane %v6845_v4, 9  ;;  %v3855_v39 = vshll.u32 %v9525_v31, 16 }
  0xfa   : > { %7870 = vmatprep.subr.bf16.mxu1 %v8351_v41  ;;  %7856 = vmatprep.mubr.bf16.mxu0 %v6854_v42  ;;  %v779_v48 = vpop.f32.mrf.mxu1  ;;  %v3834_v42 = vrot.slane %v3832_v38, 4  ;;  %v3848_v6 = vrot.slane %v3846_v11, 4 }
  0xfb   : > { %7880 = vmatprep.mubr.bf16.mxu1 %v8360_v44  ;;  %v9480_v58 = vadd.f32 %v779_v48, %v642_v56  ;;  %v7527_v46 = vpop.f32.mrf.mxu0  ;;  %v3837_v44 = vrot.slane %v3835_v32, 5  ;;  %v8365_v48 = vld [vmem:[%s10649_s3 + $0x470] sm:$0xff]   ;;  %v9544_v49 = vsel %vm8722_vm5, %v6853_v19, %v3490_v24  ;;  %v3857_v57 = vrot.slane %v3855_v39, 5  ;;  %v9572_v24 = vld [vmem:[%s10649_s3 + $0x420] sm:$0xff]  }
  0xfc   : > { %7847 = vmatpush3.bf16.msra.mxu0 %v8350_v37  ;;  %v7551_v51 = vpop.f32.mrf.mxu1  ;;  %v3849_v37 = vshll.u32 %v6888_v36, 16  ;;  %v4122_v32 = vrot.slane %v9517_v25, 5  ;;  %v8371_v25 = vld [vmem:[%s10649_s3 + $0x460] sm:$0xff]  }
  0xfd   : > { %7871 = vmatpush3.bf16.msra.mxu1 %v8351_v41  ;;  %7848 = vmatprep.subr.bf16.mxu0 %v8352_v22  ;;  %v9488_v3 = vadd.f32 %v7551_v51, %v7527_v46  ;;  %v645_v0 = vpop.f32.mrf.mxu0  ;;  %v8363_v41 = vld [vmem:[%s9076_s14 + $0x20] ss:$8 sps:$4 sm:$0xff]   ;;  %v3838_v50 = vor.u32 %v3837_v44, %v3834_v42  ;;  %v9547_v51 = vld [vmem:[%s9076_s14 + $0x24] sm:$0x1] }
  0xfe   : > { %7872 = vmatprep.subr.bf16.mxu1 %v8353_v45  ;;  %v782_v61 = vpop.f32.mrf.mxu1  ;;  %v3869_v15 = vshll.u32 %v9547_v51, 16 }
  0xff   : > { %v9494_v7 = vadd.f32 %v782_v61, %v645_v0  ;;  %v8367_v61 = vld [vmem:[%s10649_s3 + $0x468] sm:$0xff]  }
 0x100   : > { %7849 = vmatpush3.bf16.msra.mxu0 %v8352_v22  ;;  %v6890_v22 = vld [vmem:[%s9076_s14 + $0x20] sm:$0xf] }
 0x101   : > { %7873 = vmatpush3.bf16.msra.mxu1 %v8353_v45  ;;  %7850 = vmatprep.subr.bf16.mxu0 %v8354_v10  ;;  %v8364_v45 = vld [vmem:[%s10649_s3 + $0x430] sm:$0xff]   ;;  %v3860_v59 = vshrl.u32 %v6890_v22, 16  ;;  %v3863_v63 = vshll.u32 %v6890_v22, 16 }
 0x102   : > { %7874 = vmatprep.subr.bf16.mxu1 %v8355_v30 }
 0x103   : > { %v9581_v19 = vrot.slane %v3860_v59, 4  ;;  %v3865_v38 = vrot.slane %v3863_v63, 5 }
 0x104   : > { %7851 = vmatpush3.bf16.msra.mxu0 %v8354_v10  ;;  %v3851_v10 = vrot.slane %v3849_v37, 5 }
 0x105   : > { %7875 = vmatpush3.bf16.msra.mxu1 %v8355_v30  ;;  %7852 = vmatprep.subr.bf16.mxu0 %v8356_v52  ;;  %v9540_v30 = vsel %vm8722_vm5, %v6852_v26, %v3486_v18  ;;  %v9579_v26 = vld [vmem:[%s9076_s14 + $0x2c] sm:$0x1] }
 0x106   : > { %7876 = vmatprep.subr.bf16.mxu1 %v8357_v54  ;;  %v3852_v56 = vor.u32 %v3851_v10, %v3848_v6  ;;  %v6857_v4 = vcombine.low %v9540_v30, %v9544_v49  ;;  %v3883_v10 = vshll.u32 %v9579_v26, 16  ;;  %v3866_v49 = vor.u32 %v3865_v38, %v9581_v19 }
 0x108   : > { %7853 = vmatpush3.bf16.msra.mxu0 %v8356_v52  ;;  %v6892_v52 = vld [vmem:[%s9076_s14 + $0x28] sm:$0xf]  ;;  %v3853_v5 = vrot.slane %v3852_v56, 4 }
 0x109   : > { %7877 = vmatpush3.bf16.msra.mxu1 %v8357_v54  ;;  %7854 = vmatprep.subr.bf16.mxu0 %v8358_v62  ;;  %v8368_v54 = vld [vmem:[%s9076_s14 + $0x30] ss:$8 sps:$4 sm:$0xff]   ;;  %v3877_v0 = vshll.u32 %v6892_v52, 16 }
 0x10a   : > { %7878 = vmatprep.subr.bf16.mxu1 %v8359_v47 }
 0x10b   : > { %v3879_v37 = vrot.slane %v3877_v0, 5 }
 0x10c   : > { %7855 = vmatpush3.bf16.msra.mxu0 %v8358_v62  ;;  %v3839_v62 = vrot.slane %v3838_v50, 4  ;;  %v6896_v50 = vld [vmem:[%s9076_s14 + $0x38] sm:$0xf] }
 0x10d   : > { %7879 = vmatpush3.bf16.msra.mxu1 %v8359_v47  ;;  %7888 = vmatprep.subr.bf16.mxu0 %v8361_v20  ;;  %v3902_v0 = vshrl.u32 %v6896_v50, 16 }
 0x10e   : > { %7912 = vmatprep.subr.bf16.mxu1 %v8362_v17 }
 0x10f   : > { %v7570_v35 = vpop.f32.mrf.mxu0  ;;  %7857 = vmatmul.mubr.bf16.vlgmr.msra.gmra.mxu0 %v6855_v14  ;;  %v3858_v14 = vsel %vm8645_vm2, %v3853_v5, %v3857_v57  ;;  %v9640_v5 = vrot.slane %v3883_v10, 5  ;;  %v3904_v19 = vrot.slane %v3902_v0, 4  ;;  %v6918_v10 = vld [vmem:[%s9076_s14 + $0x30] sm:$0xe] }
 0x110   : > { %v1000_v60 = vadd.f32 %v7570_v35, %v9416_v12  ;;  %7881 = vmatmul.mubr.bf16.vlgmr.msra.gmra.mxu1 %v8363_v41  ;;  %7889 = vmatpush3.bf16.msra.mxu0 %v8361_v20  ;;  %v7594_v46 = vpop.f32.mrf.mxu1  ;;  %v3874_v12 = vshrl.u32 %v6892_v52, 16  ;;  %v8369_v20 = vld [vmem:[%s9076_s14 + $0x40] ss:$8 sps:$4 sm:$0xff]   ;;  %v4126_v41 = vrot.slane %v9525_v31, 5  ;;  %v6894_v31 = vld [vmem:[%s9076_s14 + $0x30] sm:$0xf] }
 0x111   : > { %7913 = vmatpush3.bf16.msra.mxu1 %v8362_v17  ;;  %v967_v47 = vpop.f32.mrf.mxu0  ;;  %7890 = vmatprep.subr.bf16.mxu0 %v8364_v45  ;;  %v6915_v17 = vld [vmem:[%s9076_s14 + $0x18] sm:$0xe]  ;;  %v3888_v56 = vshrl.u32 %v6894_v31, 16  ;;  %v3891_v63 = vshll.u32 %v6894_v31, 16 }
 0x112   : > { %v998_v8 = vadd.f32 %v967_v47, %v9430_v23  ;;  %v9563_v13 = vadd.f32 %v7594_v46, %v1000_v60  ;;  %v1137_v16 = vpop.f32.mrf.mxu1  ;;  %7914 = vmatprep.subr.bf16.mxu1 %v8365_v48  ;;  %7860 = vmatprep.mubr.bf16.mxu0 %v6856_v27  ;;  %v3844_v23 = vsel %vm8645_vm2, %v3839_v62, %v3843_v55  ;;  %v3876_v11 = vrot.slane %v3874_v12, 4  ;;  %v8373_v35 = vld [vmem:[%s10649_s3 + $0x458] sm:$0xff]   ;;  %v9621_v55 = vld [vmem:[%s9076_s14 + $0x20] sm:$0xe] }
 0x113   : > { %v7571_v18 = vpop.f32.mrf.mxu0  ;;  %7884 = vmatprep.mubr.bf16.mxu1 %v8368_v54  ;;  %v6923_v39 = vrot.slane %v6915_v17, 9  ;;  %v6902_v22 = vcombine.low %v3844_v23, %v3858_v14  ;;  %v9628_v46 = vrot.slane %v3869_v15, 5  ;;  %v9634_v62 = vld [vmem:[%s9076_s14 + $0x3c] sm:$0x1]  ;;  %v3890_v12 = vrot.slane %v3888_v56, 4 }
 0x114   : > { %v1001_v28 = vadd.f32 %v7571_v18, %v9437_v33  ;;  %v9584_v29 = vadd.f32 %v1137_v16, %v998_v8  ;;  %7891 = vmatpush3.bf16.msra.mxu0 %v8364_v45  ;;  %v7595_v36 = vpop.f32.mrf.mxu1  ;;  %v4123_v45 = vsel %vm8722_vm5, %v6922_v21, %v4122_v32  ;;  %v3905_v8 = vshll.u32 %v6896_v50, 16  ;;  %v6900_v21 = vld [vmem:[%s9076_s14 + $0x48] sm:$0xf] }
 0x115   : > { %7915 = vmatpush3.bf16.msra.mxu1 %v8365_v48  ;;  %v970_v9 = vpop.f32.mrf.mxu0  ;;  %7892 = vmatprep.subr.bf16.mxu0 %v9553_v34  ;;  %v9649_v17 = vrot.slane %v3866_v49, 4  ;;  %v3893_v18 = vrot.slane %v3891_v63, 5  ;;  %v6917_v32 = vld [vmem:[%s9076_s14 + $0x28] sm:$0xe]  ;;  %v3933_v49 = vshll.u32 %v6900_v21, 16 }
 0x116   : > { %v999_v33 = vadd.f32 %v970_v9, %v9445_v43  ;;  %v9595_v42 = vadd.f32 %v7595_v36, %v1001_v28  ;;  %v1140_v44 = vpop.f32.mrf.mxu1  ;;  %7916 = vmatprep.subr.bf16.mxu1 %v8367_v61  ;;  %v4127_v43 = vsel %vm8722_vm5, %v6923_v39, %v4126_v41  ;;  %v4130_v9 = vrot.slane %v9547_v51, 5  ;;  %v8376_v39 = vld [vmem:[%s10649_s3 + $0x408] sm:$0xff]  }
 0x117   : > { %v7574_v6 = vpop.f32.mrf.mxu0  ;;  %7861 = vmatmul.mubr.bf16.gmra.mxu0 %v6857_v4  ;;  %v6930_v54 = vcombine.low %v4123_v45, %v4127_v43  ;;  %v3894_v41 = vor.u32 %v3893_v18, %v3890_v12  ;;  %v8377_v51 = vld [vmem:[%s10649_s3 + $0x448] sm:$0xff]   ;;  %v6925_v43 = vrot.slane %v6917_v32, 9  ;;  %v6920_v18 = vld [vmem:[%s9076_s14 + $0x40] sm:$0xe] }
 0x118   : > { %v1004_v48 = vadd.f32 %v7574_v6, %v9473_v53  ;;  %v9607_v27 = vadd.f32 %v1140_v44, %v999_v33  ;;  %7893 = vmatpush3.bf16.msra.mxu0 %v9553_v34  ;;  %v7598_v30 = vpop.f32.mrf.mxu1  ;;  %7885 = vmatmul.mubr.bf16.gmra.mxu1 %v8369_v20  ;;  %v8372_v53 = vld [vmem:[%s10649_s3 + $0x418] sm:$0xff]   ;;  %v3880_v34 = vor.u32 %v3879_v37, %v3876_v11  ;;  %v8375_v20 = vld [vmem:[%s10649_s3 + $0x450] sm:$0xff]   ;;  %v9661_v11 = vld [vmem:[%s9076_s14 + $0x44] sm:$0x1]  ;;  %v3916_v37 = vshrl.u32 %v6898_v2, 16 }
 0x119   : > { %7917 = vmatpush3.bf16.msra.mxu1 %v8367_v61  ;;  %v983_v52 = vpop.f32.mrf.mxu0  ;;  %7894 = vmatprep.subr.bf16.mxu0 %v9572_v24  ;;  %v9631_v61 = vld [vmem:[%s9076_s14 + $0x34] sm:$0x1]  ;;  %v9669_v44 = vld [vmem:[%s9076_s14 + $0x4c] sm:$0x1]  ;;  %v3930_v6 = vshrl.u32 %v6900_v21, 16  ;;  %v3872_v21 = vsel %vm8645_vm2, %v9649_v17, %v9628_v46  ;;  %v4146_v32 = vrot.slane %v9661_v11, 5 }
 0x11a   : > { %v1002_v57 = vadd.f32 %v983_v52, %v9480_v58  ;;  %v9624_v59 = vadd.f32 %v7598_v30, %v1004_v48  ;;  %v1153_v60 = vpop.f32.mrf.mxu1  ;;  %7918 = vmatprep.subr.bf16.mxu1 %v8371_v25  ;;  %7904 = vmatprep.mubr.bf16.mxu0 %v6902_v22  ;;  %v8374_v58 = vld [vmem:[%s10649_s3 + $0x410] sm:$0xff]   ;;  %v9651_v14 = vrot.slane %v3880_v34, 4  ;;  %v3897_v33 = vshll.u32 %v9631_v61, 16  ;;  %v8378_v34 = vld [vmem:[%s10649_s3 + $0x400] sm:$0xff]  }
 0x11b   : > { %v7575_v47 = vpop.f32.mrf.mxu0  ;;  %7928 = vmatprep.mubr.bf16.mxu1 %v6930_v54  ;;  %v3918_v31 = vrot.slane %v3916_v37, 4  ;;  %v3925_v30 = vshll.u32 %v9661_v11, 16  ;;  %v3932_v50 = vrot.slane %v3930_v6, 4  ;;  %v3939_v52 = vshll.u32 %v9669_v44, 16  ;;  %v9751_v6 = vld [vmem:[%s9718_s25 + $0xc] sm:$0x1] }
 0x11c   : > { %v1005_v15 = vadd.f32 %v7575_v47, %v9488_v3  ;;  %v9643_v16 = vadd.f32 %v1153_v60, %v1002_v57  ;;  %7895 = vmatpush3.bf16.msra.mxu0 %v9572_v24  ;;  %v7599_v4 = vpop.f32.mrf.mxu1  ;;  %v6924_v3 = vrot.slane %v9621_v55, 9  ;;  %v3907_v24 = vrot.slane %v3905_v8, 5 }
 0x11d   : > { %7919 = vmatpush3.bf16.msra.mxu1 %v8371_v25  ;;  %v986_v23 = vpop.f32.mrf.mxu0  ;;  %7896 = vmatprep.subr.bf16.mxu0 %v8372_v53  ;;  %v3919_v25 = vshll.u32 %v6898_v2, 16  ;;  %v4134_v54 = vrot.slane %v9579_v26, 5  ;;  %v3935_v57 = vrot.slane %v3933_v49, 5  ;;  %v3895_v60 = vrot.slane %v3894_v41, 4 }
 0x11e   : > { %v1003_v28 = vadd.f32 %v986_v23, %v9494_v7  ;;  %v9656_v36 = vadd.f32 %v7599_v4, %v1005_v15  ;;  %v1156_v38 = vpop.f32.mrf.mxu1  ;;  %7920 = vmatprep.subr.bf16.mxu1 %v8373_v35  ;;  %v3911_v7 = vshll.u32 %v9634_v62, 16  ;;  %v3908_v45 = vor.u32 %v3907_v24, %v3904_v19  ;;  %v8380_v23 = vld [vmem:[%s10649_s3 + $0x4b8] sm:$0xff]   ;;  %v6921_v24 = vld [vmem:[%s9076_s14 + $0x48] sm:$0xe] }
 0x11f   : > { %v3921_v48 = vrot.slane %v3919_v25, 5  ;;  %v3899_v63 = vrot.slane %v3897_v33, 5  ;;  %v9687_v12 = vrot.slane %v3925_v30, 5  ;;  %v3936_v0 = vor.u32 %v3935_v57, %v3932_v50 }
 0x120   : > { %v9671_v22 = vadd.f32 %v1156_v38, %v1003_v28  ;;  %7897 = vmatpush3.bf16.msra.mxu0 %v8372_v53  ;;  %v6919_v53 = vld [vmem:[%s9076_s14 + $0x38] sm:$0xe]  ;;  %v3909_v2 = vrot.slane %v3908_v45, 4  ;;  %v3913_v47 = vrot.slane %v3911_v7, 5  ;;  %v6926_v8 = vrot.slane %v6918_v10, 9 }
 0x121   : > { %7921 = vmatpush3.bf16.msra.mxu1 %v8373_v35  ;;  %7898 = vmatprep.subr.bf16.mxu0 %v8374_v58  ;;  %v3922_v56 = vor.u32 %v3921_v48, %v3918_v31  ;;  %v8379_v35 = vld [vmem:[%s10649_s3 + $0x440] sm:$0xff]   ;;  %v3941_v26 = vrot.slane %v3939_v52, 5  ;;  %v6927_v15 = vrot.slane %v6919_v53, 9  ;;  %v4142_v4 = vrot.slane %v9634_v62, 5  ;;  %v8381_v62 = vld [vmem:[%s10649_s3 + $0x4f8] sm:$0xff]  }
 0x122   : > { %7922 = vmatprep.subr.bf16.mxu1 %v8375_v20  ;;  %v4131_v28 = vsel %vm8722_vm5, %v6924_v3, %v4130_v9  ;;  %v4135_v38 = vsel %vm8722_vm5, %v6925_v43, %v4134_v54  ;;  %v3900_v46 = vsel %vm8645_vm2, %v3895_v60, %v3899_v63  ;;  %v3914_v55 = vsel %vm8645_vm2, %v3909_v2, %v3913_v47  ;;  %v9733_v9 = vld [vmem:[%s10649_s3 + $0x4f0] sm:$0xff]   ;;  %v9747_v45 = vld [vmem:[%s9718_s25 + $0x4] sm:$0x1]  ;;  %v4476_v31 = vld [vmem:[%s9718_s25 + $0x8] sm:$0xf] }
 0x123   : > { %v3923_v19 = vrot.slane %v3922_v56, 4  ;;  %v6931_v17 = vcombine.low %v4131_v28, %v4135_v38  ;;  %v6928_v3 = vrot.slane %v6920_v18, 9  ;;  %v6929_v41 = vrot.slane %v6921_v24, 9  ;;  %v8384_v63 = vld [vmem:[%s10649_s3 + $0x4a8] sm:$0xff]   ;;  %v9773_v18 = vld [vmem:[%s9718_s25 + $0x14] sm:$0x1] }
 0x124   : > { %7899 = vmatpush3.bf16.msra.mxu0 %v8374_v58  ;;  %v4138_v58 = vrot.slane %v9631_v61, 5  ;;  %v3886_v61 = vsel %vm8645_vm2, %v9651_v14, %v9640_v5  ;;  %v9727_v14 = vld [vmem:[%s10649_s3 + $0x4b0] sm:$0xff]   ;;  %v4150_v33 = vrot.slane %v9669_v44, 5  ;;  %v6904_v7 = vcombine.low %v3900_v46, %v3914_v55  ;;  %v4480_v24 = vld [vmem:[%s9718_s25 + $0x18] sm:$0xf]  ;;  %v8387_v55 = vld [vmem:[%s10649_s3 + $0x4e0] sm:$0xff]  }
 0x125   : > { %7923 = vmatpush3.bf16.msra.mxu1 %v8375_v20  ;;  %7900 = vmatprep.subr.bf16.mxu0 %v8376_v39  ;;  %v3937_v20 = vrot.slane %v3936_v0, 4  ;;  %v6903_v5 = vcombine.low %v3872_v21, %v3886_v61  ;;  %v3928_v11 = vsel %vm8645_vm2, %v3923_v19, %v9687_v12  ;;  %v4500_v44 = vshll.u32 %v9747_v45, 16 }
 0x126   : > { %7924 = vmatprep.subr.bf16.mxu1 %v8377_v51  ;;  %v4139_v37 = vsel %vm8722_vm5, %v6926_v8, %v4138_v58  ;;  %v4505_v48 = vshrl.u32 %v4476_v31, 16  ;;  %v4508_v50 = vshll.u32 %v4476_v31, 16  ;;  %v4514_v52 = vshll.u32 %v9751_v6, 16 }
 0x127   : > { %v3942_v25 = vsel %vm8645_vm2, %v3937_v20, %v3941_v26  ;;  %v4147_v54 = vsel %vm8722_vm5, %v6928_v3, %v4146_v32  ;;  %v8385_v26 = vld [vmem:[%s10649_s3 + $0x4e8] sm:$0xff]  }
 0x128   : > { %7901 = vmatpush3.bf16.msra.mxu0 %v8376_v39  ;;  %v4143_v39 = vsel %vm8722_vm5, %v6927_v15, %v4142_v4  ;;  %v6905_v60 = vcombine.low %v3928_v11, %v3942_v25  ;;  %v4507_v2 = vrot.slane %v4505_v48, 4  ;;  %v4510_v47 = vrot.slane %v4508_v50, 5  ;;  %v4478_v4 = vld [vmem:[%s9718_s25 + $0x10] sm:$0xf] }
 0x129   : > { %7925 = vmatpush3.bf16.msra.mxu1 %v8377_v51  ;;  %7902 = vmatprep.subr.bf16.mxu0 %v8378_v34  ;;  %v4474_v51 = vld [vmem:[%s9718_s25] sm:$0xf]  ;;  %v6932_v49 = vcombine.low %v4139_v37, %v4143_v39  ;;  %v4502_v15 = vrot.slane %v4500_v44, 5  ;;  %v4516_v20 = vrot.slane %v4514_v52, 5  ;;  %v4519_v21 = vshrl.u32 %v4478_v4, 16 }
 0x12a   : > { %7926 = vmatprep.subr.bf16.mxu1 %v8379_v35  ;;  %v4491_v10 = vshrl.u32 %v4474_v51, 16  ;;  %v4494_v43 = vshll.u32 %v4474_v51, 16  ;;  %v4511_v19 = vor.u32 %v4510_v47, %v4507_v2  ;;  %v4522_v61 = vshll.u32 %v4478_v4, 16 }
 0x12b   : > { %v4521_v32 = vrot.slane %v4519_v21, 4  ;;  %v4533_v25 = vshrl.u32 %v4480_v24, 16  ;;  %v4536_v51 = vshll.u32 %v4480_v24, 16 }
 0x12c   : > { %7903 = vmatpush3.bf16.msra.mxu0 %v8378_v34  ;;  %v4493_v56 = vrot.slane %v4491_v10, 4  ;;  %v4496_v57 = vrot.slane %v4494_v43, 5  ;;  %v4512_v3 = vrot.slane %v4511_v19, 4  ;;  %v4524_v37 = vrot.slane %v4522_v61, 5  ;;  %v8388_v43 = vld [vmem:[%s10649_s3 + $0x498] sm:$0xff]  }
 0x12d   : > { %7927 = vmatpush3.bf16.msra.mxu1 %v8379_v35  ;;  %7936 = vmatprep.subr.bf16.mxu0 %v8380_v23  ;;  %v4486_v61 = vld [vmem:[%s9718_s25 + $0x30] sm:$0xf] }
 0x12e   : > { %7960 = vmatprep.subr.bf16.mxu1 %v8381_v62  ;;  %v4497_v58 = vor.u32 %v4496_v57, %v4493_v56  ;;  %v4535_v56 = vrot.slane %v4533_v25, 4  ;;  %v4538_v57 = vrot.slane %v4536_v51, 5 }
 0x12f   : > { %v7618_v30 = vpop.f32.mrf.mxu0  ;;  %7905 = vmatmul.mubr.bf16.vlgmr.msra.gmra.mxu0 %v6903_v5 }
 0x130   : > { %v1451_v53 = vadd.f32 %v7618_v30, %v9563_v13  ;;  %7929 = vmatmul.mubr.bf16.vlgmr.msra.gmra.mxu1 %v6931_v17  ;;  %7937 = vmatpush3.bf16.msra.mxu0 %v8380_v23  ;;  %v7642_v34 = vpop.f32.mrf.mxu1  ;;  %v4151_v13 = vsel %vm8722_vm5, %v6929_v41, %v4150_v33  ;;  %v4498_v5 = vrot.slane %v4497_v58, 4  ;;  %v8396_v33 = vld [vmem:[%s9718_s25] ss:$8 sps:$4 sm:$0xff]   ;;  %v8389_v30 = vld [vmem:[%s10649_s3 + $0x4d8] sm:$0xff]  }
 0x131   : > { %7961 = vmatpush3.bf16.msra.mxu1 %v8381_v62  ;;  %v1418_v35 = vpop.f32.mrf.mxu0  ;;  %7938 = vmatprep.subr.bf16.mxu0 %v9727_v14  ;;  %v6933_v46 = vcombine.low %v4147_v54, %v4151_v13 }
 0x132   : > { %v1449_v12 = vadd.f32 %v1418_v35, %v9584_v29  ;;  %v9765_v0 = vadd.f32 %v7642_v34, %v1451_v53  ;;  %v1627_v8 = vpop.f32.mrf.mxu1  ;;  %7962 = vmatprep.subr.bf16.mxu1 %v9733_v9  ;;  %7908 = vmatprep.mubr.bf16.mxu0 %v6904_v7  ;;  %v8386_v29 = vld [vmem:[%s10649_s3 + $0x4a0] sm:$0xff]   ;;  %v4503_v7 = vsel %vm8645_vm2, %v4498_v5, %v4502_v15  ;;  %v4488_v5 = vld [vmem:[%s9718_s25 + $0x38] sm:$0xf] }
 0x133   : > { %v7619_v23 = vpop.f32.mrf.mxu0  ;;  %7932 = vmatprep.mubr.bf16.mxu1 %v6932_v49  ;;  %v4525_v49 = vor.u32 %v4524_v37, %v4521_v32  ;;  %v4482_v35 = vld [vmem:[%s9718_s25 + $0x20] sm:$0xf] }
 0x134   : > { %v1452_v62 = vadd.f32 %v7619_v23, %v9595_v42  ;;  %v9780_v28 = vadd.f32 %v1627_v8, %v1449_v12  ;;  %7939 = vmatpush3.bf16.msra.mxu0 %v9727_v14  ;;  %v7643_v38 = vpop.f32.mrf.mxu1  ;;  %v4528_v42 = vshll.u32 %v9773_v18, 16  ;;  %v4547_v47 = vshrl.u32 %v4482_v35, 16  ;;  %v8390_v8 = vld [vmem:[%s10649_s3 + $0x490] sm:$0xff]  }
 0x135   : > { %7963 = vmatpush3.bf16.msra.mxu1 %v9733_v9  ;;  %v1421_v17 = vpop.f32.mrf.mxu0  ;;  %7940 = vmatprep.subr.bf16.mxu0 %v8384_v63  ;;  %v4517_v9 = vsel %vm8645_vm2, %v4512_v3, %v4516_v20  ;;  %v9831_v20 = vld [vmem:[%s9718_s25 + $0x24] sm:$0x1]  ;;  %v9844_v3 = vld [vmem:[%s9718_s25 + $0x2c] sm:$0x1] }
 0x136   : > { %v1450_v39 = vadd.f32 %v1421_v17, %v9607_v27  ;;  %v9789_v14 = vadd.f32 %v7643_v38, %v1452_v62  ;;  %v1630_v41 = vpop.f32.mrf.mxu1  ;;  %7964 = vmatprep.subr.bf16.mxu1 %v8385_v26  ;;  %v6954_v44 = vcombine.low %v4503_v7, %v4517_v9  ;;  %v9808_v50 = vrot.slane %v4528_v42, 5  ;;  %v8392_v62 = vld [vmem:[%s10649_s3 + $0x488] sm:$0xff]  }
 0x137   : > { %v7622_v11 = vpop.f32.mrf.mxu0  ;;  %7909 = vmatmul.mubr.bf16.gmra.mxu0 %v6905_v60  ;;  %v4484_v60 = vld [vmem:[%s9718_s25 + $0x28] sm:$0xf]  ;;  %v4549_v24 = vrot.slane %v4547_v47, 4  ;;  %v4539_v38 = vor.u32 %v4538_v57, %v4535_v56  ;;  %v4556_v37 = vshll.u32 %v9831_v20, 16  ;;  %v4575_v42 = vshrl.u32 %v4486_v61, 16 }
 0x138   : > { %v1455_v31 = vadd.f32 %v7622_v11, %v9624_v59  ;;  %v9797_v10 = vadd.f32 %v1630_v41, %v1450_v39  ;;  %7941 = vmatpush3.bf16.msra.mxu0 %v8384_v63  ;;  %v7646_v27 = vpop.f32.mrf.mxu1  ;;  %7933 = vmatmul.mubr.bf16.gmra.mxu1 %v6933_v46  ;;  %v9806_v59 = vld [vmem:[%s9718_s25 + $0x1c] sm:$0x1]  ;;  %v4561_v15 = vshrl.u32 %v4484_v60, 16  ;;  %v4564_v4 = vshll.u32 %v4484_v60, 16  ;;  %v8393_v17 = vld [vmem:[%s10649_s3 + $0x4c8] sm:$0xff]   ;;  %v8394_v11 = vld [vmem:[%s10649_s3 + $0x480] sm:$0xff]  }
 0x139   : > { %7965 = vmatpush3.bf16.msra.mxu1 %v8385_v26  ;;  %v1434_v48 = vpop.f32.mrf.mxu0  ;;  %7942 = vmatprep.subr.bf16.mxu0 %v8386_v29  ;;  %v8391_v26 = vld [vmem:[%s10649_s3 + $0x4d0] sm:$0xff]   ;;  %v4542_v58 = vshll.u32 %v9806_v59, 16  ;;  %v4578_v39 = vshll.u32 %v4486_v61, 16  ;;  %v4592_v7 = vshll.u32 %v4488_v5, 16  ;;  %v4540_v9 = vrot.slane %v4539_v38, 4 }
 0x13a   : > { %v1453_v52 = vadd.f32 %v1434_v48, %v9643_v16  ;;  %v9811_v53 = vadd.f32 %v7646_v27, %v1455_v31  ;;  %v1643_v34 = vpop.f32.mrf.mxu1  ;;  %7966 = vmatprep.subr.bf16.mxu1 %v8387_v55  ;;  %7952 = vmatprep.mubr.bf16.mxu0 %v8396_v33  ;;  %v4550_v16 = vshll.u32 %v4482_v35, 16  ;;  %v4563_v46 = vrot.slane %v4561_v15, 4  ;;  %v9848_v41 = vld [vmem:[%s9718_s25 + $0x34] sm:$0x1]  ;;  %v9855_v27 = vld [vmem:[%s9718_s25 + $0x3c] sm:$0x1] }
 0x13b   : > { %v7623_v54 = vpop.f32.mrf.mxu0  ;;  %7976 = vmatprep.mubr.bf16.mxu1 %v6954_v44  ;;  %v4544_v32 = vrot.slane %v4542_v58, 5  ;;  %v4589_v33 = vshrl.u32 %v4488_v5, 16  ;;  %v4570_v31 = vshll.u32 %v9844_v3, 16  ;;  %v4577_v44 = vrot.slane %v4575_v42, 4  ;;  %v8402_v58 = vld [vmem:[%s9718_s25 + $0x20] ss:$8 sps:$4 sm:$0xff]  }
 0x13c   : > { %v1456_v63 = vadd.f32 %v7623_v54, %v9656_v36  ;;  %v9816_v13 = vadd.f32 %v1643_v34, %v1453_v52  ;;  %7943 = vmatpush3.bf16.msra.mxu0 %v8386_v29  ;;  %v7647_v2 = vpop.f32.mrf.mxu1  ;;  %v9824_v36 = vrot.slane %v4525_v49, 4  ;;  %v4552_v21 = vrot.slane %v4550_v16, 5 }
 0x13d   : > { %7967 = vmatpush3.bf16.msra.mxu1 %v8387_v55  ;;  %v1437_v12 = vpop.f32.mrf.mxu0  ;;  %7944 = vmatprep.subr.bf16.mxu0 %v8388_v43  ;;  %v4566_v55 = vrot.slane %v4564_v4, 5  ;;  %v4580_v48 = vrot.slane %v4578_v39, 5  ;;  %v4594_v49 = vrot.slane %v4592_v7, 5  ;;  %v4558_v52 = vrot.slane %v4556_v37, 5 }
 0x13e   : > { %v1454_v23 = vadd.f32 %v1437_v12, %v9671_v22  ;;  %v9828_v29 = vadd.f32 %v7647_v2, %v1456_v63  ;;  %v1646_v19 = vpop.f32.mrf.mxu1  ;;  %7968 = vmatprep.subr.bf16.mxu1 %v8389_v30  ;;  %v4553_v25 = vor.u32 %v4552_v21, %v4549_v24  ;;  %v4584_v34 = vshll.u32 %v9848_v41, 16  ;;  %v8398_v2 = vld [vmem:[%s10649_s3 + $0x538] sm:$0xff]   ;;  %v4755_v24 = vld [vmem:[%s9718_s25] sm:$0xe]  ;;  %v4756_v21 = vld [vmem:[%s9718_s25 + $0x8] sm:$0xe] }
 0x13f   : > { %v4567_v51 = vor.u32 %v4566_v55, %v4563_v46  ;;  %v4572_v56 = vrot.slane %v4570_v31, 5  ;;  %v4531_v57 = vsel %vm8645_vm2, %v9824_v36, %v9808_v50  ;;  %v4545_v35 = vsel %vm8645_vm2, %v4540_v9, %v4544_v32  ;;  %v8399_v50 = vld [vmem:[%s10649_s3 + $0x578] sm:$0xff]   ;;  %v8401_v36 = vld [vmem:[%s10649_s3 + $0x570] sm:$0xff]   ;;  %v8405_v9 = vld [vmem:[%s10649_s3 + $0x568] sm:$0xff]  }
 0x140   : > { %v9838_v22 = vadd.f32 %v1646_v19, %v1454_v23  ;;  %7945 = vmatpush3.bf16.msra.mxu0 %v8388_v43  ;;  %v8395_v43 = vld [vmem:[%s10649_s3 + $0x4c0] sm:$0xff]   ;;  %v4554_v54 = vrot.slane %v4553_v25, 4  ;;  %v4598_v63 = vshll.u32 %v9855_v27, 16  ;;  %v4581_v47 = vor.u32 %v4580_v48, %v4577_v44  ;;  %v8397_v12 = vld [vmem:[%s9718_s25 + $0x10] ss:$8 sps:$4 sm:$0xff]  }
 0x141   : > { %7969 = vmatpush3.bf16.msra.mxu1 %v8389_v30  ;;  %7946 = vmatprep.subr.bf16.mxu0 %v8390_v8  ;;  %v4591_v30 = vrot.slane %v4589_v33, 4  ;;  %v4568_v60 = vrot.slane %v4567_v51, 4  ;;  %v4586_v23 = vrot.slane %v4584_v34, 5  ;;  %v4781_v38 = vrot.slane %v9747_v45, 5  ;;  %v8404_v45 = vld [vmem:[%s10649_s3 + $0x528] sm:$0xff]  }
 0x142   : > { %7970 = vmatprep.subr.bf16.mxu1 %v8391_v26  ;;  %v4559_v15 = vsel %vm8645_vm2, %v4554_v54, %v4558_v52  ;;  %v4600_v19 = vrot.slane %v4598_v63, 5  ;;  %v4582_v61 = vrot.slane %v4581_v47, 4  ;;  %v4785_v46 = vrot.slane %v9751_v6, 5  ;;  %v8403_v51 = vld [vmem:[%s9718_s25 + $0x30] ss:$8 sps:$4 sm:$0xff]   ;;  %v8406_v52 = vld [vmem:[%s10649_s3 + $0x520] sm:$0xff]  }
 0x143   : > { %v4595_v16 = vor.u32 %v4594_v49, %v4591_v30  ;;  %v4573_v4 = vsel %vm8645_vm2, %v4568_v60, %v4572_v56  ;;  %v6967_v32 = vrot.slane %v4756_v21, 9  ;;  %v8416_v60 = vld [vmem:[%s9718_s25 + $0x8] ss:$8 sps:$4 sm:$0xff]  }
 0x144   : > { %7947 = vmatpush3.bf16.msra.mxu0 %v8390_v8  ;;  %v6955_v8 = vcombine.low %v4531_v57, %v4545_v35  ;;  %v6956_v5 = vcombine.low %v4559_v15, %v4573_v4  ;;  %v4587_v6 = vsel %vm8645_vm2, %v4582_v61, %v4586_v23  ;;  %v8410_v4 = vld [vmem:[%s10649_s3 + $0x510] sm:$0xff]  }
 0x145   : > { %7971 = vmatpush3.bf16.msra.mxu1 %v8391_v26  ;;  %7948 = vmatprep.subr.bf16.mxu0 %v8392_v62  ;;  %v8400_v26 = vld [vmem:[%s10649_s3 + $0x530] sm:$0xff]  }
 0x146   : > { %7972 = vmatprep.subr.bf16.mxu1 %v8393_v17 }
 0x148   : > { %7949 = vmatpush3.bf16.msra.mxu0 %v8392_v62  ;;  %v4596_v62 = vrot.slane %v4595_v16, 4  ;;  %v8408_v16 = vld [vmem:[%s10649_s3 + $0x518] sm:$0xff]  }
 0x149   : > { %7973 = vmatpush3.bf16.msra.mxu1 %v8393_v17  ;;  %7950 = vmatprep.subr.bf16.mxu0 %v8394_v11  ;;  %v6966_v17 = vrot.slane %v4755_v24, 9 }
 0x14a   : > { %7974 = vmatprep.subr.bf16.mxu1 %v8395_v43  ;;  %v4601_v33 = vsel %vm8645_vm2, %v4596_v62, %v4600_v19  ;;  %v4758_v19 = vld [vmem:[%s9718_s25 + $0x18] sm:$0xe] }
 0x14b   : > { %v4782_v31 = vsel %vm8722_vm5, %v6966_v17, %v4781_v38  ;;  %v6957_v30 = vcombine.low %v4587_v6, %v4601_v33  ;;  %v8412_v38 = vld [vmem:[%s10649_s3 + $0x508] sm:$0xff]   ;;  %v4789_v17 = vrot.slane %v9773_v18, 5  ;;  %v4801_v33 = vrot.slane %v9844_v3, 5  ;;  %v8415_v18 = vld [vmem:[%s10649_s3 + $0x540] sm:$0xff]   ;;  %v7010_v3 = vld [vmem:[%s9718_s25 + $0x18] sm:$0xf] }
 0x14c   : > { %7951 = vmatpush3.bf16.msra.mxu0 %v8394_v11 }
 0x14d   : > { %7975 = vmatpush3.bf16.msra.mxu1 %v8395_v43  ;;  %7984 = vmatprep.subr.bf16.mxu0 %v8398_v2  ;;  %v4786_v43 = vsel %vm8722_vm5, %v6967_v32, %v4785_v46  ;;  %v4759_v46 = vld [vmem:[%s9718_s25 + $0x20] sm:$0xe]  ;;  %v6969_v32 = vrot.slane %v4758_v19, 9  ;;  %v10005_v19 = vld [vmem:[%s9718_s25 + $0x24] sm:$0x1] }
 0x14e   : > { %8008 = vmatprep.subr.bf16.mxu1 %v8399_v50  ;;  %v6974_v57 = vcombine.low %v4782_v31, %v4786_v43 }
 0x14f   : > { %v7666_v55 = vpop.f32.mrf.mxu0  ;;  %7953 = vmatmul.mubr.bf16.vlgmr.msra.gmra.mxu0 %v8397_v12 }
 0x150   : > { %v1830_v37 = vadd.f32 %v7666_v55, %v9765_v0  ;;  %7977 = vmatmul.mubr.bf16.vlgmr.msra.gmra.mxu1 %v6955_v8  ;;  %7985 = vmatpush3.bf16.msra.mxu0 %v8398_v2  ;;  %v7690_v42 = vpop.f32.mrf.mxu1 }
 0x151   : > { %8009 = vmatpush3.bf16.msra.mxu1 %v8399_v50  ;;  %v1797_v39 = vpop.f32.mrf.mxu0  ;;  %7986 = vmatprep.subr.bf16.mxu0 %v8400_v26 }
 0x152   : > { %v1828_v7 = vadd.f32 %v1797_v39, %v9780_v28  ;;  %v9899_v0 = vadd.f32 %v7690_v42, %v1830_v37  ;;  %v2078_v11 = vpop.f32.mrf.mxu1  ;;  %8010 = vmatprep.subr.bf16.mxu1 %v8401_v36  ;;  %7956 = vmatprep.mubr.bf16.mxu0 %v8402_v58  ;;  %v4793_v37 = vrot.slane %v9806_v59, 5  ;;  %v4797_v42 = vrot.slane %v9831_v20, 5  ;;  %v8414_v39 = vld [vmem:[%s10649_s3 + $0x500] sm:$0xff]   ;;  %v4761_v59 = vld [vmem:[%s9718_s25 + $0x30] sm:$0xe] }
 0x153   : > { %v7667_v25 = vpop.f32.mrf.mxu0  ;;  %7980 = vmatprep.mubr.bf16.mxu1 %v6956_v5  ;;  %v4760_v5 = vld [vmem:[%s9718_s25 + $0x28] sm:$0xe]  ;;  %v7008_v20 = vld [vmem:[%s9718_s25 + $0x10] sm:$0xf] }
 0x154   : > { %v1831_v28 = vadd.f32 %v7667_v25, %v9789_v14  ;;  %v9910_v44 = vadd.f32 %v2078_v11, %v1828_v7  ;;  %7987 = vmatpush3.bf16.msra.mxu0 %v8400_v26  ;;  %v7691_v48 = vpop.f32.mrf.mxu1  ;;  %v8407_v14 = vld [vmem:[%s10649_s3 + $0x560] sm:$0xff]   ;;  %v6971_v6 = vrot.slane %v4760_v5, 9  ;;  %v4805_v7 = vrot.slane %v9848_v41, 5  ;;  %v7006_v11 = vld [vmem:[%s9718_s25 + $0x8] sm:$0xf] }
 0x155   : > { %8011 = vmatpush3.bf16.msra.mxu1 %v8401_v36  ;;  %v1800_v49 = vpop.f32.mrf.mxu0  ;;  %7988 = vmatprep.subr.bf16.mxu0 %v8404_v45  ;;  %v4757_v36 = vld [vmem:[%s9718_s25 + $0x10] sm:$0xe]  ;;  %v5154_v25 = vshll.u32 %v7006_v11, 16  ;;  %v5165_v31 = vshrl.u32 %v7008_v20, 16  ;;  %v5168_v43 = vshll.u32 %v7008_v20, 16 }
 0x156   : > { %v1829_v34 = vadd.f32 %v1800_v49, %v9797_v10  ;;  %v9916_v54 = vadd.f32 %v7691_v48, %v1831_v28  ;;  %v2081_v56 = vpop.f32.mrf.mxu1  ;;  %8012 = vmatprep.subr.bf16.mxu1 %v8405_v9  ;;  %v6968_v62 = vrot.slane %v4757_v36, 9  ;;  %v4794_v48 = vsel %vm8722_vm5, %v6969_v32, %v4793_v37  ;;  %v9982_v49 = vld [vmem:[%s9718_s25 + $0x14] sm:$0x1]  ;;  %v7034_v5 = vld [vmem:[%s9718_s25 + $0x8] sm:$0xe] }
 0x157   : > { %v7670_v35 = vpop.f32.mrf.mxu0  ;;  %7957 = vmatmul.mubr.bf16.gmra.mxu0 %v8403_v51  ;;  %v4762_v51 = vld [vmem:[%s9718_s25 + $0x38] sm:$0xe]  ;;  %v5174_v36 = vshll.u32 %v9982_v49, 16 }
 0x158   : > { %v1834_v63 = vadd.f32 %v7670_v35, %v9811_v53  ;;  %v9923_v2 = vadd.f32 %v2081_v56, %v1829_v34  ;;  %7989 = vmatpush3.bf16.msra.mxu0 %v8404_v45  ;;  %v7694_v47 = vpop.f32.mrf.mxu1  ;;  %7981 = vmatmul.mubr.bf16.gmra.mxu1 %v6957_v30  ;;  %v8409_v53 = vld [vmem:[%s10649_s3 + $0x558] sm:$0xff]   ;;  %v6970_v45 = vrot.slane %v4759_v46, 9  ;;  %v4790_v28 = vsel %vm8722_vm5, %v6968_v62, %v4789_v17  ;;  %v9979_v30 = vld [vmem:[%s9718_s25 + $0xc] sm:$0x1]  ;;  %v8421_v46 = vld [vmem:[%s10649_s3 + $0x5f0] sm:$0xff]  }
 0x159   : > { %8013 = vmatpush3.bf16.msra.mxu1 %v8405_v9  ;;  %v1813_v10 = vpop.f32.mrf.mxu0  ;;  %7990 = vmatprep.subr.bf16.mxu0 %v8406_v52  ;;  %v5151_v9 = vshrl.u32 %v7006_v11, 16  ;;  %v5156_v34 = vrot.slane %v5154_v25, 5  ;;  %v6972_v56 = vrot.slane %v4761_v59, 9  ;;  %v5170_v35 = vrot.slane %v5168_v43, 5  ;;  %v8424_v17 = vld [vmem:[%s9718_s25 + $0x28] ss:$8 sps:$4 sm:$0xff]  }
 0x15a   : > { %v1832_v50 = vadd.f32 %v1813_v10, %v9816_v13  ;;  %v9929_v12 = vadd.f32 %v7694_v47, %v1834_v63  ;;  %v2094_v8 = vpop.f32.mrf.mxu1  ;;  %8014 = vmatprep.subr.bf16.mxu1 %v8407_v14  ;;  %8000 = vmatprep.mubr.bf16.mxu0 %v6974_v57  ;;  %v5167_v57 = vrot.slane %v5165_v31, 4  ;;  %v6973_v63 = vrot.slane %v4762_v51, 9  ;;  %v7012_v47 = vld [vmem:[%s9718_s25 + $0x20] sm:$0xf] }
 0x15b   : > { %v7671_v26 = vpop.f32.mrf.mxu0  ;;  %8024 = vmatprep.mubr.bf16.mxu1 %v8416_v60  ;;  %v9987_v60 = vsel %vm8722_vm5, %v6970_v45, %v4797_v42  ;;  %v5179_v10 = vshrl.u32 %v7010_v3, 16  ;;  %v5193_v62 = vshrl.u32 %v7012_v47, 16  ;;  %v5176_v42 = vrot.slane %v5174_v36, 5 }
 0x15c   : > { %v1835_v58 = vadd.f32 %v7671_v26, %v9828_v29  ;;  %v9936_v15 = vadd.f32 %v2094_v8, %v1832_v50  ;;  %7991 = vmatpush3.bf16.msra.mxu0 %v8406_v52  ;;  %v7695_v13 = vpop.f32.mrf.mxu1  ;;  %v8411_v29 = vld [vmem:[%s10649_s3 + $0x550] sm:$0xff]   ;;  %v5153_v52 = vrot.slane %v5151_v9, 4  ;;  %v8418_v50 = vld [vmem:[%s10649_s3 + $0x5f8] sm:$0xff]   ;;  %v4802_v8 = vsel %vm8722_vm5, %v6971_v6, %v4801_v33 }
 0x15d   : > { %8015 = vmatpush3.bf16.msra.mxu1 %v8407_v14  ;;  %v1816_v23 = vpop.f32.mrf.mxu0  ;;  %7992 = vmatprep.subr.bf16.mxu0 %v8408_v16  ;;  %v4809_v14 = vrot.slane %v9855_v27, 5  ;;  %v8417_v27 = vld [vmem:[%s10649_s3 + $0x5b8] sm:$0xff]   ;;  %v5160_v26 = vshll.u32 %v9979_v30, 16  ;;  %v7035_v6 = vld [vmem:[%s9718_s25 + $0x10] sm:$0xe]  ;;  %v5195_v9 = vrot.slane %v5193_v62, 4 }
 0x15e   : > { %v1833_v24 = vadd.f32 %v1816_v23, %v9838_v22  ;;  %v9943_v21 = vadd.f32 %v7695_v13, %v1835_v58  ;;  %v2097_v61 = vpop.f32.mrf.mxu1  ;;  %8016 = vmatprep.subr.bf16.mxu1 %v8409_v53  ;;  %v8413_v22 = vld [vmem:[%s10649_s3 + $0x548] sm:$0xff]   ;;  %v6975_v58 = vcombine.low %v4790_v28, %v4794_v48  ;;  %v8419_v13 = vld [vmem:[%s9718_s25 + $0x18] ss:$8 sps:$4 sm:$0xff]   ;;  %v10002_v23 = vld [vmem:[%s9718_s25 + $0x1c] sm:$0x1]  ;;  %v7042_v51 = vrot.slane %v7034_v5, 9 }
 0x15f   : > { %v5162_v37 = vrot.slane %v5160_v26, 5  ;;  %v5188_v45 = vshll.u32 %v10002_v23, 16  ;;  %v4810_v33 = vsel %vm8722_vm5, %v6973_v63, %v4809_v14  ;;  %v7043_v43 = vrot.slane %v7035_v6, 9  ;;  %v8422_v48 = vld [vmem:[%s10649_s3 + $0x5a8] sm:$0xff]   ;;  %v8427_v26 = vld [vmem:[%s10649_s3 + $0x5e0] sm:$0xff]  }
 0x160   : > { %v9952_v55 = vadd.f32 %v2097_v61, %v1833_v24  ;;  %7993 = vmatpush3.bf16.msra.mxu0 %v8408_v16  ;;  %v5182_v16 = vshll.u32 %v7010_v3, 16  ;;  %v8420_v24 = vld [vmem:[%s10649_s3 + $0x5b0] sm:$0xff]   ;;  %v5181_v61 = vrot.slane %v5179_v10, 4  ;;  %v5445_v3 = vrot.slane %v9982_v49, 5  ;;  %v8423_v49 = vld [vmem:[%s10649_s3 + $0x5e8] sm:$0xff]  }
 0x161   : > { %8017 = vmatpush3.bf16.msra.mxu1 %v8409_v53  ;;  %7994 = vmatprep.subr.bf16.mxu0 %v8410_v4  ;;  %v5157_v53 = vor.u32 %v5156_v34, %v5153_v52 }
 0x162   : > { %8018 = vmatprep.subr.bf16.mxu1 %v8411_v29 }
 0x163   : > { %v5158_v32 = vrot.slane %v5157_v53, 4 }
 0x164   : > { %7995 = vmatpush3.bf16.msra.mxu0 %v8410_v4  ;;  %v5171_v4 = vor.u32 %v5170_v35, %v5167_v57  ;;  %v10042_v57 = vrot.slane %v5188_v45, 5  ;;  %v5449_v45 = vrot.slane %v10002_v23, 5 }
 0x165   : > { %8019 = vmatpush3.bf16.msra.mxu1 %v8411_v29  ;;  %7996 = vmatprep.subr.bf16.mxu0 %v8412_v38  ;;  %v5184_v29 = vrot.slane %v5182_v16, 5  ;;  %v5163_v52 = vsel %vm8645_vm2, %v5158_v32, %v5162_v37  ;;  %v10054_v16 = vld [vmem:[%s9718_s25 + $0x18] sm:$0xe] }
 0x166   : > { %8020 = vmatprep.subr.bf16.mxu1 %v8413_v22  ;;  %v5172_v11 = vrot.slane %v5171_v4, 4  ;;  %v10071_v4 = vld [vmem:[%s9718_s25 + $0x2c] sm:$0x1] }
 0x167   : > { %v5185_v20 = vor.u32 %v5184_v29, %v5181_v61  ;;  %v7018_v29 = vld [vmem:[%s9718_s25 + $0x38] sm:$0xf]  ;;  %v5457_v23 = vrot.slane %v10071_v4, 5 }
 0x168   : > { %7997 = vmatpush3.bf16.msra.mxu0 %v8412_v38  ;;  %v5196_v38 = vshll.u32 %v7012_v47, 16  ;;  %v5177_v14 = vsel %vm8645_vm2, %v5172_v11, %v5176_v42 }
 0x169   : > { %8021 = vmatpush3.bf16.msra.mxu1 %v8413_v22  ;;  %7998 = vmatprep.subr.bf16.mxu0 %v8414_v39  ;;  %v6976_v22 = vcombine.low %v9987_v60, %v4802_v8  ;;  %v10047_v60 = vld [vmem:[%s10649_s3 + $0x5a0] sm:$0xff]   ;;  %v10049_v63 = vrot.slane %v5185_v20, 4  ;;  %v7022_v61 = vcombine.low %v5163_v52, %v5177_v14  ;;  %v8428_v20 = vld [vmem:[%s10649_s3 + $0x598] sm:$0xff]  }
 0x16a   : > { %8022 = vmatprep.subr.bf16.mxu1 %v8415_v18  ;;  %v5198_v25 = vrot.slane %v5196_v38, 5 }
 0x16c   : > { %7999 = vmatpush3.bf16.msra.mxu0 %v8414_v39  ;;  %v4806_v39 = vsel %vm8722_vm5, %v6972_v56, %v4805_v7  ;;  %v5441_v7 = vrot.slane %v9979_v30, 5  ;;  %v8425_v56 = vld [vmem:[%s9718_s25 + $0x38] ss:$8 sps:$4 sm:$0xff]   ;;  %v5199_v47 = vor.u32 %v5198_v25, %v5195_v9  ;;  %v5216_v25 = vshll.u32 %v10071_v4, 16 }
 0x16d   : > { %8023 = vmatpush3.bf16.msra.mxu1 %v8415_v18  ;;  %8032 = vmatprep.subr.bf16.mxu0 %v8417_v27  ;;  %v5202_v18 = vshll.u32 %v10005_v19, 16 }
 0x16e   : > { %8056 = vmatprep.subr.bf16.mxu1 %v8418_v50  ;;  %v5442_v36 = vsel %vm8722_vm5, %v7042_v51, %v5441_v7  ;;  %v10078_v37 = vrot.slane %v5199_v47, 4  ;;  %v5235_v51 = vshrl.u32 %v7018_v29, 16 }
 0x16f   : > { %v7714_v59 = vpop.f32.mrf.mxu0  ;;  %8001 = vmatmul.mubr.bf16.vlgmr.msra.gmra.mxu0 %v6975_v58  ;;  %v10051_v10 = vrot.slane %v5202_v18, 5  ;;  %v5446_v58 = vsel %vm8722_vm5, %v7043_v43, %v5445_v3  ;;  %v7020_v18 = vld [vmem:[%s9718_s25 + $0x40] sm:$0xf]  ;;  %v10099_v3 = vld [vmem:[%s9718_s25 + $0x34] sm:$0x1] }
 0x170   : > { %v2320_v31 = vadd.f32 %v7714_v59, %v9899_v0  ;;  %8025 = vmatmul.mubr.bf16.vlgmr.msra.gmra.mxu1 %v8419_v13  ;;  %8033 = vmatpush3.bf16.msra.mxu0 %v8417_v27  ;;  %v7738_v41 = vpop.f32.mrf.mxu1  ;;  %v7014_v27 = vld [vmem:[%s9718_s25 + $0x28] sm:$0xf]  ;;  %v10068_v13 = vld [vmem:[%s9718_s25 + $0x20] sm:$0xe]  ;;  %v7050_v42 = vcombine.low %v5442_v36, %v5446_v58  ;;  %v5237_v36 = vrot.slane %v5235_v51, 4 }
 0x171   : > { %8057 = vmatpush3.bf16.msra.mxu1 %v8418_v50  ;;  %v2287_v28 = vpop.f32.mrf.mxu0  ;;  %8034 = vmatprep.subr.bf16.mxu0 %v8420_v24  ;;  %v5207_v5 = vshrl.u32 %v7014_v27, 16  ;;  %v7045_v9 = vrot.slane %v10068_v13, 9 }
 0x172   : > { %v2318_v0 = vadd.f32 %v2287_v28, %v9910_v44  ;;  %v10034_v34 = vadd.f32 %v7738_v41, %v2320_v31  ;;  %v2456_v30 = vpop.f32.mrf.mxu1  ;;  %8058 = vmatprep.subr.bf16.mxu1 %v8421_v46  ;;  %8004 = vmatprep.mubr.bf16.mxu0 %v6976_v22  ;;  %v6977_v44 = vcombine.low %v4806_v39, %v4810_v33  ;;  %v5238_v31 = vshll.u32 %v7018_v29, 16 }
 0x173   : > { %v7715_v35 = vpop.f32.mrf.mxu0  ;;  %8028 = vmatprep.mubr.bf16.mxu1 %v8424_v17  ;;  %v5210_v17 = vshll.u32 %v7014_v27, 16  ;;  %v5209_v28 = vrot.slane %v5207_v5, 4  ;;  %v5453_v5 = vrot.slane %v10005_v19, 5 }
 0x174   : > { %v2321_v50 = vadd.f32 %v7715_v35, %v9916_v54  ;;  %v10058_v8 = vadd.f32 %v2456_v30, %v2318_v0  ;;  %8035 = vmatpush3.bf16.msra.mxu0 %v8420_v24  ;;  %v7739_v53 = vpop.f32.mrf.mxu1  ;;  %v7016_v24 = vld [vmem:[%s9718_s25 + $0x30] sm:$0xf]  ;;  %v10105_v30 = vld [vmem:[%s9718_s25 + $0x3c] sm:$0x1]  ;;  %v5240_v58 = vrot.slane %v5238_v31, 5  ;;  %v5205_v31 = vsel %vm8645_vm2, %v10078_v37, %v10051_v10 }
 0x175   : > { %8059 = vmatpush3.bf16.msra.mxu1 %v8421_v46  ;;  %v2290_v54 = vpop.f32.mrf.mxu0  ;;  %8036 = vmatprep.subr.bf16.mxu0 %v8422_v48  ;;  %v7044_v46 = vrot.slane %v10054_v16, 9  ;;  %v5221_v33 = vshrl.u32 %v7016_v24, 16  ;;  %v5224_v11 = vshll.u32 %v7016_v24, 16  ;;  %v8430_v0 = vld [vmem:[%s10649_s3 + $0x590] sm:$0xff]   ;;  %v5230_v24 = vshll.u32 %v10099_v3, 16  ;;  %v8436_v16 = vld [vmem:[%s10649_s3 + $0x638] sm:$0xff]  }
 0x176   : > { %v2319_v62 = vadd.f32 %v2290_v54, %v9923_v2  ;;  %v10076_v38 = vadd.f32 %v7739_v53, %v2321_v50  ;;  %v2459_v22 = vpop.f32.mrf.mxu1  ;;  %8060 = vmatprep.subr.bf16.mxu1 %v8423_v49  ;;  %v10115_v53 = vld [vmem:[%s9718_s25 + $0x44] sm:$0x1]  ;;  %v7041_v37 = vld [vmem:[%s9718_s25 + $0x40] sm:$0xe] }
 0x177   : > { %v7718_v32 = vpop.f32.mrf.mxu0  ;;  %8005 = vmatmul.mubr.bf16.gmra.mxu0 %v6977_v44  ;;  %v8431_v44 = vld [vmem:[%s10649_s3 + $0x5d0] sm:$0xff]   ;;  %v5223_v47 = vrot.slane %v5221_v33, 4  ;;  %v5226_v27 = vrot.slane %v5224_v11, 5  ;;  %v7038_v33 = vld [vmem:[%s9718_s25 + $0x28] sm:$0xe] }
 0x178   : > { %v2324_v6 = vadd.f32 %v7718_v32, %v9929_v12  ;;  %v10083_v39 = vadd.f32 %v2459_v22, %v2319_v62  ;;  %8037 = vmatpush3.bf16.msra.mxu0 %v8422_v48  ;;  %v7742_v2 = vpop.f32.mrf.mxu1  ;;  %8029 = vmatmul.mubr.bf16.gmra.mxu1 %v8425_v56  ;;  %v8429_v12 = vld [vmem:[%s10649_s3 + $0x5d8] sm:$0xff]   ;;  %v5212_v48 = vrot.slane %v5210_v17, 5  ;;  %v8432_v22 = vld [vmem:[%s10649_s3 + $0x588] sm:$0xff]   ;;  %v5244_v32 = vshll.u32 %v10105_v30, 16  ;;  %v7039_v11 = vld [vmem:[%s9718_s25 + $0x30] sm:$0xe] }
 0x179   : > { %8061 = vmatpush3.bf16.msra.mxu1 %v8423_v49  ;;  %v2303_v59 = vpop.f32.mrf.mxu0  ;;  %8038 = vmatprep.subr.bf16.mxu0 %v10047_v60  ;;  %v5249_v49 = vshrl.u32 %v7020_v18, 16  ;;  %v5227_v17 = vor.u32 %v5226_v27, %v5223_v47  ;;  %v7047_v13 = vrot.slane %v7039_v11, 9  ;;  %v10192_v27 = vld [vmem:[%s9718_s25 + $0x1c] sm:$0x1] }
 0x17a   : > { %v2322_v41 = vadd.f32 %v2303_v59, %v9936_v15  ;;  %v10096_v7 = vadd.f32 %v7742_v2, %v2324_v6  ;;  %v2472_v43 = vpop.f32.mrf.mxu1  ;;  %8062 = vmatprep.subr.bf16.mxu1 %v8427_v26  ;;  %8048 = vmatprep.mubr.bf16.mxu0 %v7022_v61  ;;  %v5252_v15 = vshll.u32 %v7020_v18, 16  ;;  %v5241_v6 = vor.u32 %v5240_v58, %v5237_v36  ;;  %v10137_v18 = vld [vmem:[%s9718_s25 + $0x38] sm:$0xe]  ;;  %v8434_v59 = vld [vmem:[%s10649_s3 + $0x580] sm:$0xff]  }
 0x17b   : > { %v7719_v52 = vpop.f32.mrf.mxu0  ;;  %8072 = vmatprep.mubr.bf16.mxu1 %v7050_v42  ;;  %v5251_v29 = vrot.slane %v5249_v49, 4  ;;  %v10131_v42 = vrot.slane %v5216_v25, 5  ;;  %v5258_v2 = vshll.u32 %v10115_v53, 16  ;;  %v5191_v25 = vsel %vm8645_vm2, %v10049_v63, %v10042_v57  ;;  %v8437_v49 = vld [vmem:[%s10649_s3 + $0x678] sm:$0xff]  }
 0x17c   : > { %v2325_v56 = vadd.f32 %v7719_v52, %v9943_v21  ;;  %v10108_v14 = vadd.f32 %v2472_v43, %v2322_v41  ;;  %8039 = vmatpush3.bf16.msra.mxu0 %v10047_v60  ;;  %v7743_v35 = vpop.f32.mrf.mxu1  ;;  %v5213_v60 = vor.u32 %v5212_v48, %v5209_v28  ;;  %v5254_v62 = vrot.slane %v5252_v15, 5  ;;  %v7082_v52 = vld [vmem:[%s9718_s25 + $0x10] sm:$0xf]  ;;  %v10183_v15 = vld [vmem:[%s9718_s25 + $0x14] sm:$0x1] }
 0x17d   : > { %8063 = vmatpush3.bf16.msra.mxu1 %v8427_v26  ;;  %v2306_v50 = vpop.f32.mrf.mxu0  ;;  %8040 = vmatprep.subr.bf16.mxu0 %v8428_v20  ;;  %v5228_v41 = vrot.slane %v5227_v17, 4  ;;  %v10153_v43 = vrot.slane %v5244_v32, 5  ;;  %v5450_v28 = vsel %vm8722_vm5, %v7044_v46, %v5449_v45  ;;  %v5454_v57 = vsel %vm8722_vm5, %v7045_v9, %v5453_v5 }
 0x17e   : > { %v2323_v21 = vadd.f32 %v2306_v50, %v9952_v55  ;;  %v10118_v54 = vadd.f32 %v7743_v35, %v2325_v56  ;;  %v2475_v61 = vpop.f32.mrf.mxu1  ;;  %8064 = vmatprep.subr.bf16.mxu1 %v8429_v12  ;;  %v8433_v55 = vld [vmem:[%s10649_s3 + $0x5c8] sm:$0xff]   ;;  %v5214_v19 = vrot.slane %v5213_v60, 4  ;;  %v5255_v51 = vor.u32 %v5254_v62, %v5251_v29  ;;  %v7084_v56 = vld [vmem:[%s9718_s25 + $0x18] sm:$0xf] }
 0x17f   : > { %v10165_v63 = vrot.slane %v5241_v6, 4  ;;  %v10167_v10 = vrot.slane %v5258_v2, 5  ;;  %v7046_v48 = vrot.slane %v7038_v33, 9  ;;  %v5461_v45 = vrot.slane %v10099_v3, 5 }
 0x180   : > { %v10121_v26 = vadd.f32 %v2475_v61, %v2323_v21  ;;  %8041 = vmatpush3.bf16.msra.mxu0 %v8428_v20  ;;  %v5232_v20 = vrot.slane %v5230_v24, 5  ;;  %v10174_v46 = vrot.slane %v5255_v51, 4  ;;  %v7048_v9 = vrot.slane %v10137_v18, 9 }
 0x181   : > { %8065 = vmatpush3.bf16.msra.mxu1 %v8429_v12  ;;  %8042 = vmatprep.subr.bf16.mxu0 %v8430_v0  ;;  %v8435_v12 = vld [vmem:[%s10649_s3 + $0x5c0] sm:$0xff]   ;;  %v7051_v4 = vcombine.low %v5450_v28, %v5454_v57  ;;  %v5811_v35 = vshrl.u32 %v7082_v52, 16  ;;  %v5219_v3 = vsel %vm8645_vm2, %v5214_v19, %v10131_v42  ;;  %v5825_v50 = vshrl.u32 %v7084_v56, 16  ;;  %v8439_v42 = vld [vmem:[%s10649_s3 + $0x670] sm:$0xff]   ;;  %v8440_v28 = vld [vmem:[%s10649_s3 + $0x628] sm:$0xff]  }
 0x182   : > { %8066 = vmatprep.subr.bf16.mxu1 %v8431_v44  ;;  %v5233_v47 = vsel %vm8645_vm2, %v5228_v41, %v5232_v20  ;;  %v5828_v36 = vshll.u32 %v7084_v56, 16  ;;  %v5465_v58 = vrot.slane %v10105_v30, 5  ;;  %v7049_v21 = vrot.slane %v7041_v37, 9  ;;  %v8438_v30 = vld [vmem:[%s10649_s3 + $0x630] sm:$0xff]  }
 0x183   : > { %v5813_v61 = vrot.slane %v5811_v35, 4  ;;  %v5469_v24 = vrot.slane %v10115_v53, 5  ;;  %v5820_v29 = vshll.u32 %v10183_v15, 16  ;;  %v5827_v62 = vrot.slane %v5825_v50, 4  ;;  %v8443_v35 = vld [vmem:[%s10649_s3 + $0x660] sm:$0xff]  }
 0x184   : > { %8043 = vmatpush3.bf16.msra.mxu0 %v8430_v0  ;;  %v7023_v0 = vcombine.low %v5191_v25, %v5205_v31  ;;  %v5462_v5 = vsel %vm8722_vm5, %v7047_v13, %v5461_v45  ;;  %v5834_v32 = vshll.u32 %v10192_v27, 16  ;;  %v7024_v6 = vcombine.low %v5219_v3, %v5233_v47 }
 0x185   : > { %8067 = vmatpush3.bf16.msra.mxu1 %v8431_v44  ;;  %8044 = vmatprep.subr.bf16.mxu0 %v8432_v22  ;;  %v5814_v44 = vshll.u32 %v7082_v52, 16  ;;  %v5247_v2 = vsel %vm8645_vm2, %v10165_v63, %v10153_v43  ;;  %v5261_v33 = vsel %vm8645_vm2, %v10174_v46, %v10167_v10  ;;  %v5470_v19 = vsel %vm8722_vm5, %v7049_v21, %v5469_v24  ;;  %v8441_v10 = vld [vmem:[%s10649_s3 + $0x668] sm:$0xff]  }
 0x186   : > { %8068 = vmatprep.subr.bf16.mxu1 %v8433_v55  ;;  %v5822_v20 = vrot.slane %v5820_v29, 5  ;;  %v5836_v41 = vrot.slane %v5834_v32, 5  ;;  %v7088_v52 = vld [vmem:[%s9718_s25 + $0x28] sm:$0xf] }
 0x187   : > { %v5816_v60 = vrot.slane %v5814_v44, 5  ;;  %v8452_v44 = vld [vmem:[%s9718_s25 + $0x10] ss:$8 sps:$4 sm:$0xff]   ;;  %v5856_v21 = vshll.u32 %v7088_v52, 16 }
 0x188   : > { %8045 = vmatpush3.bf16.msra.mxu0 %v8432_v22  ;;  %v5830_v22 = vrot.slane %v5828_v36, 5  ;;  %v8444_v36 = vld [vmem:[%s10649_s3 + $0x618] sm:$0xff]  }
 0x189   : > { %8069 = vmatpush3.bf16.msra.mxu1 %v8433_v55  ;;  %8046 = vmatprep.subr.bf16.mxu0 %v8434_v59  ;;  %v5458_v55 = vsel %vm8722_vm5, %v7046_v48, %v5457_v23  ;;  %v5817_v17 = vor.u32 %v5816_v60, %v5813_v61  ;;  %v7025_v48 = vcombine.low %v5247_v2, %v5261_v33  ;;  %v7090_v61 = vld [vmem:[%s9718_s25 + $0x30] sm:$0xf] }
 0x18a   : > { %8070 = vmatprep.subr.bf16.mxu1 %v8435_v12  ;;  %v5831_v53 = vor.u32 %v5830_v22, %v5827_v62  ;;  %v7052_v18 = vcombine.low %v5458_v55, %v5462_v5  ;;  %v7092_v62 = vld [vmem:[%s9718_s25 + $0x38] sm:$0xf]  ;;  %v10261_v5 = vld [vmem:[%s9718_s25 + $0x24] sm:$0x1]  ;;  %v5867_v2 = vshrl.u32 %v7090_v61, 16  ;;  %v5870_v33 = vshll.u32 %v7090_v61, 16 }
 0x18b   : > { %v5818_v25 = vrot.slane %v5817_v17, 4  ;;  %v8445_v55 = vld [vmem:[%s10649_s3 + $0x658] sm:$0xff]   ;;  %v8450_v61 = vld [vmem:[%s10649_s3 + $0x600] sm:$0xff]  }
 0x18c   : > { %8047 = vmatpush3.bf16.msra.mxu0 %v8434_v59  ;;  %v5466_v59 = vsel %vm8722_vm5, %v7048_v9, %v5465_v58  ;;  %v5832_v31 = vrot.slane %v5831_v53, 4  ;;  %v5853_v58 = vshrl.u32 %v7088_v52, 16  ;;  %v8448_v52 = vld [vmem:[%s10649_s3 + $0x608] sm:$0xff]  }
 0x18d   : > { %8071 = vmatpush3.bf16.msra.mxu1 %v8435_v12  ;;  %8080 = vmatprep.subr.bf16.mxu0 %v8436_v16  ;;  %v7053_v23 = vcombine.low %v5466_v59, %v5470_v19  ;;  %v5823_v45 = vsel %vm8645_vm2, %v5818_v25, %v5822_v20  ;;  %v10273_v25 = vld [vmem:[%s9718_s25 + $0x2c] sm:$0x1] }
 0x18e   : > { %8104 = vmatprep.subr.bf16.mxu1 %v8437_v49  ;;  %v5837_v9 = vsel %vm8645_vm2, %v5832_v31, %v5836_v41  ;;  %v5855_v20 = vrot.slane %v5853_v58, 4 }
 0x18f   : > { %v7762_v11 = vpop.f32.mrf.mxu0  ;;  %8049 = vmatmul.mubr.bf16.vlgmr.msra.gmra.mxu0 %v7023_v0 }
 0x190   : > { %v2770_v51 = vadd.f32 %v7762_v11, %v10034_v34  ;;  %8073 = vmatmul.mubr.bf16.vlgmr.msra.gmra.mxu1 %v7051_v4  ;;  %8081 = vmatpush3.bf16.msra.mxu0 %v8436_v16  ;;  %v7786_v12 = vpop.f32.mrf.mxu1  ;;  %v7086_v16 = vld [vmem:[%s9718_s25 + $0x20] sm:$0xf]  ;;  %v5881_v11 = vshrl.u32 %v7092_v62, 16 }
 0x191   : > { %8105 = vmatpush3.bf16.msra.mxu1 %v8437_v49  ;;  %v2737_v43 = vpop.f32.mrf.mxu0  ;;  %8082 = vmatprep.subr.bf16.mxu0 %v8438_v30  ;;  %v5839_v3 = vshrl.u32 %v7086_v16, 16  ;;  %v5842_v47 = vshll.u32 %v7086_v16, 16 }
 0x192   : > { %v2768_v57 = vadd.f32 %v2737_v43, %v10058_v8  ;;  %v10225_v63 = vadd.f32 %v7786_v12, %v2770_v51  ;;  %v2946_v34 = vpop.f32.mrf.mxu1  ;;  %8106 = vmatprep.subr.bf16.mxu1 %v8439_v42  ;;  %8052 = vmatprep.mubr.bf16.mxu0 %v7024_v6  ;;  %v8446_v6 = vld [vmem:[%s10649_s3 + $0x610] sm:$0xff]   ;;  %v5858_v51 = vrot.slane %v5856_v21, 5 }
 0x193   : > { %v7763_v37 = vpop.f32.mrf.mxu0  ;;  %8076 = vmatprep.mubr.bf16.mxu1 %v7052_v18  ;;  %v5844_v53 = vrot.slane %v5842_v47, 5  ;;  %v5884_v18 = vshll.u32 %v7092_v62, 16 }
 0x194   : > { %v2771_v46 = vadd.f32 %v7763_v37, %v10076_v38  ;;  %v10232_v13 = vadd.f32 %v2946_v34, %v2768_v57  ;;  %8083 = vmatpush3.bf16.msra.mxu0 %v8438_v30  ;;  %v7787_v8 = vpop.f32.mrf.mxu1  ;;  %v8442_v38 = vld [vmem:[%s10649_s3 + $0x620] sm:$0xff]   ;;  %v5841_v30 = vrot.slane %v5839_v3, 4  ;;  %v7096_v34 = vld [vmem:[%s9718_s25 + $0x48] sm:$0xf]  ;;  %v5872_v37 = vrot.slane %v5870_v33, 5 }
 0x195   : > { %8107 = vmatpush3.bf16.msra.mxu1 %v8439_v42  ;;  %v2740_v0 = vpop.f32.mrf.mxu0  ;;  %8084 = vmatprep.subr.bf16.mxu0 %v8440_v28  ;;  %v7094_v57 = vld [vmem:[%s9718_s25 + $0x40] sm:$0xf] }
 0x196   : > { %v2769_v49 = vadd.f32 %v2740_v0, %v10083_v39  ;;  %v10243_v4 = vadd.f32 %v7787_v8, %v2771_v46  ;;  %v2949_v56 = vpop.f32.mrf.mxu1  ;;  %8108 = vmatprep.subr.bf16.mxu1 %v8441_v10  ;;  %v7098_v39 = vcombine.low %v5823_v45, %v5837_v9  ;;  %v5859_v46 = vor.u32 %v5858_v51, %v5855_v20  ;;  %v10288_v45 = vld [vmem:[%s9718_s25 + $0x34] sm:$0x1]  ;;  %v10291_v9 = vld [vmem:[%s9718_s25 + $0x3c] sm:$0x1]  ;;  %v8453_v51 = vld [vmem:[%s9718_s25 + $0x20] ss:$8 sps:$4 sm:$0xff]  }
 0x197   : > { %v7766_v50 = vpop.f32.mrf.mxu0  ;;  %8053 = vmatmul.mubr.bf16.gmra.mxu0 %v7025_v48  ;;  %v5883_v48 = vrot.slane %v5881_v11, 4  ;;  %v5862_v8 = vshll.u32 %v10273_v25, 16  ;;  %v5895_v0 = vshrl.u32 %v7094_v57, 16  ;;  %v5876_v3 = vshll.u32 %v10288_v45, 16  ;;  %v8454_v11 = vld [vmem:[%s10649_s3 + $0x6b8] sm:$0xff]  }
 0x198   : > { %v2774_v60 = vadd.f32 %v7766_v50, %v10096_v7  ;;  %v10254_v24 = vadd.f32 %v2949_v56, %v2769_v49  ;;  %8085 = vmatpush3.bf16.msra.mxu0 %v8440_v28  ;;  %v7790_v29 = vpop.f32.mrf.mxu1  ;;  %8077 = vmatmul.mubr.bf16.gmra.mxu1 %v7053_v23  ;;  %v5848_v28 = vshll.u32 %v10261_v5, 16  ;;  %v5886_v23 = vrot.slane %v5884_v18, 5 }
 0x199   : > { %8109 = vmatpush3.bf16.msra.mxu1 %v8441_v10  ;;  %v2753_v22 = vpop.f32.mrf.mxu0  ;;  %8086 = vmatprep.subr.bf16.mxu0 %v8442_v38  ;;  %v5869_v10 = vrot.slane %v5867_v2, 4  ;;  %v5909_v49 = vshrl.u32 %v7096_v34, 16  ;;  %v5912_v56 = vshll.u32 %v7096_v34, 16  ;;  %v5890_v50 = vshll.u32 %v10291_v9, 16  ;;  %v7114_v34 = vld [vmem:[%s9718_s25 + $0x30] sm:$0xe] }
 0x19a   : > { %v2772_v17 = vadd.f32 %v2753_v22, %v10108_v14  ;;  %v10264_v32 = vadd.f32 %v7790_v29, %v2774_v60  ;;  %v2962_v7 = vpop.f32.mrf.mxu1  ;;  %8110 = vmatprep.subr.bf16.mxu1 %v8443_v35  ;;  %8096 = vmatprep.mubr.bf16.mxu0 %v8452_v44  ;;  %v5887_v47 = vor.u32 %v5886_v23, %v5883_v48  ;;  %v5860_v58 = vrot.slane %v5859_v46, 4  ;;  %v8456_v46 = vld [vmem:[%s9718_s25 + $0x30] ss:$8 sps:$4 sm:$0xff]  }
 0x19b   : > { %v7767_v42 = vpop.f32.mrf.mxu0  ;;  %8120 = vmatprep.mubr.bf16.mxu1 %v7098_v39  ;;  %v5873_v44 = vor.u32 %v5872_v37, %v5869_v10  ;;  %v5850_v39 = vrot.slane %v5848_v28, 5  ;;  %v5864_v21 = vrot.slane %v5862_v8, 5  ;;  %v5897_v60 = vrot.slane %v5895_v0, 4  ;;  %v8455_v28 = vld [vmem:[%s10649_s3 + $0x6b0] sm:$0xff]  }
 0x19c   : > { %v2775_v14 = vadd.f32 %v7767_v42, %v10118_v54  ;;  %v10270_v59 = vadd.f32 %v2962_v7, %v2772_v17  ;;  %8087 = vmatpush3.bf16.msra.mxu0 %v8442_v38  ;;  %v7791_v19 = vpop.f32.mrf.mxu1  ;;  %v8447_v54 = vld [vmem:[%s10649_s3 + $0x650] sm:$0xff]   ;;  %v5898_v38 = vshll.u32 %v7094_v57, 16  ;;  %v5911_v62 = vrot.slane %v5909_v49, 4  ;;  %v10308_v17 = vld [vmem:[%s9718_s25 + $0x44] sm:$0x1] }
 0x19d   : > { %8111 = vmatpush3.bf16.msra.mxu1 %v8443_v35  ;;  %v2756_v12 = vpop.f32.mrf.mxu0  ;;  %8088 = vmatprep.subr.bf16.mxu0 %v8444_v36  ;;  %v8449_v35 = vld [vmem:[%s10649_s3 + $0x648] sm:$0xff]   ;;  %v5914_v22 = vrot.slane %v5912_v56, 5  ;;  %v5888_v42 = vrot.slane %v5887_v47, 4  ;;  %v5865_v33 = vsel %vm8645_vm2, %v5860_v58, %v5864_v21  ;;  %v7111_v57 = vld [vmem:[%s9718_s25 + $0x18] sm:$0xe]  ;;  %v6101_v0 = vrot.slane %v10183_v15, 5 }
 0x19e   : > { %v2773_v31 = vadd.f32 %v2756_v12, %v10121_v26  ;;  %v10276_v41 = vadd.f32 %v7791_v19, %v2775_v14  ;;  %v2965_v43 = vpop.f32.mrf.mxu1  ;;  %8112 = vmatprep.subr.bf16.mxu1 %v8445_v55  ;;  %v5845_v26 = vor.u32 %v5844_v53, %v5841_v30  ;;  %v5900_v29 = vrot.slane %v5898_v38, 5  ;;  %v10311_v7 = vld [vmem:[%s9718_s25 + $0x4c] sm:$0x1] }
 0x19f   : > { %v5874_v30 = vrot.slane %v5873_v44, 4  ;;  %v5878_v53 = vrot.slane %v5876_v3, 5  ;;  %v5904_v14 = vshll.u32 %v10308_v17, 16  ;;  %v5915_v19 = vor.u32 %v5914_v22, %v5911_v62  ;;  %v8458_v15 = vld [vmem:[%s10649_s3 + $0x6a8] sm:$0xff]  }
 0x1a0   : > { %v10284_v16 = vadd.f32 %v2965_v43, %v2773_v31  ;;  %8089 = vmatpush3.bf16.msra.mxu0 %v8444_v36  ;;  %v5846_v36 = vrot.slane %v5845_v26, 4  ;;  %v5901_v18 = vor.u32 %v5900_v29, %v5897_v60  ;;  %v5918_v20 = vshll.u32 %v10311_v7, 16  ;;  %v7110_v43 = vld [vmem:[%s9718_s25 + $0x10] sm:$0xe]  ;;  %v7115_v26 = vld [vmem:[%s9718_s25 + $0x38] sm:$0xe] }
 0x1a1   : > { %8113 = vmatpush3.bf16.msra.mxu1 %v8445_v55  ;;  %8090 = vmatprep.subr.bf16.mxu0 %v8446_v6  ;;  %v8451_v55 = vld [vmem:[%s10649_s3 + $0x640] sm:$0xff]   ;;  %v5879_v12 = vsel %vm8645_vm2, %v5874_v30, %v5878_v53  ;;  %v5906_v37 = vrot.slane %v5904_v14, 5  ;;  %v5916_v48 = vrot.slane %v5915_v19, 4  ;;  %v7119_v49 = vrot.slane %v7111_v57, 9 }
 0x1a2   : > { %8114 = vmatprep.subr.bf16.mxu1 %v8447_v54  ;;  %v5851_v2 = vsel %vm8645_vm2, %v5846_v36, %v5850_v39  ;;  %v5902_v10 = vrot.slane %v5901_v18, 4  ;;  %v5920_v23 = vrot.slane %v5918_v20, 5  ;;  %v6105_v56 = vrot.slane %v10192_v27, 5 }
 0x1a3   : > { %v6117_v44 = vrot.slane %v10288_v45, 5  ;;  %v6121_v36 = vrot.slane %v10291_v9, 5 }
 0x1a4   : > { %8091 = vmatpush3.bf16.msra.mxu0 %v8446_v6  ;;  %v5892_v6 = vrot.slane %v5890_v50, 5  ;;  %v7123_v50 = vrot.slane %v7115_v26, 9  ;;  %v5907_v27 = vsel %vm8645_vm2, %v5902_v10, %v5906_v37  ;;  %v6106_v29 = vsel %vm8722_vm5, %v7119_v49, %v6105_v56  ;;  %v7112_v26 = vld [vmem:[%s9718_s25 + $0x20] sm:$0xe] }
 0x1a5   : > { %8115 = vmatpush3.bf16.msra.mxu1 %v8447_v54  ;;  %8092 = vmatprep.subr.bf16.mxu0 %v8448_v52  ;;  %v7099_v54 = vcombine.low %v5851_v2, %v5865_v33  ;;  %v6113_v49 = vrot.slane %v10273_v25, 5  ;;  %v6125_v56 = vrot.slane %v10308_v17, 5 }
 0x1a6   : > { %8116 = vmatprep.subr.bf16.mxu1 %v8449_v35  ;;  %v5893_v31 = vsel %vm8645_vm2, %v5888_v42, %v5892_v6  ;;  %v6122_v30 = vsel %vm8722_vm5, %v7123_v50, %v6121_v36  ;;  %v8459_v42 = vld [vmem:[%s10649_s3 + $0x6a0] sm:$0xff]  }
 0x1a7   : > { %v7100_v8 = vcombine.low %v5879_v12, %v5893_v31 }
 0x1a8   : > { %8093 = vmatpush3.bf16.msra.mxu0 %v8448_v52  ;;  %v7118_v52 = vrot.slane %v7110_v43, 9 }
 0x1a9   : > { %8117 = vmatpush3.bf16.msra.mxu1 %v8449_v35  ;;  %8094 = vmatprep.subr.bf16.mxu0 %v8450_v61  ;;  %v7122_v35 = vrot.slane %v7114_v34, 9 }
 0x1aa   : > { %8118 = vmatprep.subr.bf16.mxu1 %v8451_v55  ;;  %v6102_v60 = vsel %vm8722_vm5, %v7118_v52, %v6101_v0  ;;  %v7117_v52 = vld [vmem:[%s9718_s25 + $0x48] sm:$0xe]  ;;  %v6109_v0 = vrot.slane %v10261_v5, 5 }
 0x1ab   : > { %v6118_v40 = vsel %vm8722_vm5, %v7122_v35, %v6117_v44  ;;  %v7126_v33 = vcombine.low %v6102_v60, %v6106_v29  ;;  %v6129_v35 = vrot.slane %v10311_v7, 5  ;;  %v8463_v44 = vld [vmem:[%s10649_s3 + $0x680] sm:$0xff]  }
 0x1ac   : > { %8095 = vmatpush3.bf16.msra.mxu0 %v8450_v61  ;;  %v8457_v61 = vld [vmem:[%s9718_s25 + $0x40] ss:$8 sps:$4 sm:$0xff]   ;;  %v7128_v18 = vcombine.low %v6118_v40, %v6122_v30 }
 0x1ad   : > { %8119 = vmatpush3.bf16.msra.mxu1 %v8451_v55  ;;  %8128 = vmatprep.subr.bf16.mxu0 %v8454_v11 }
 0x1ae   : > { %8152 = vmatprep.subr.bf16.mxu1 %v8454_v11 }
 0x1af   : > { %v7810_v38 = vpop.f32.mrf.mxu0  ;;  %8097 = vmatmul.mubr.bf16.vlgmr.msra.gmra.mxu0 %v8453_v51 }
 0x1b0   : > { %v3149_v3 = vadd.f32 %v7810_v38, %v10225_v63  ;;  %8121 = vmatmul.mubr.bf16.vlgmr.msra.gmra.mxu1 %v7099_v54  ;;  %8129 = vmatpush3.bf16.msra.mxu0 %v8454_v11  ;;  %v7834_v47 = vpop.f32.mrf.mxu1  ;;  %v5921_v63 = vsel %vm8645_vm2, %v5916_v48, %v5920_v23  ;;  %v8462_v23 = vld [vmem:[%s10649_s3 + $0x688] sm:$0xff]  }
 0x1b1   : > { %8160 = vmatpush3.bf16.msra.mxu1 %v8454_v11  ;;  %v3116_v39 = vpop.f32.mrf.mxu0  ;;  %8130 = vmatprep.subr.bf16.mxu0 %v8455_v28  ;;  %v7101_v55 = vcombine.low %v5907_v27, %v5921_v63 }
 0x1b2   : > { %v3147_v45 = vadd.f32 %v3116_v39, %v10232_v13  ;;  %v10348_v58 = vadd.f32 %v7834_v47, %v3149_v3  ;;  %v3397_v21 = vpop.f32.mrf.mxu1  ;;  %8153 = vmatprep.subr.bf16.mxu1 %v8455_v28  ;;  %8100 = vmatprep.mubr.bf16.mxu0 %v8456_v46  ;;  %v7113_v46 = vld [vmem:[%s9718_s25 + $0x28] sm:$0xe]  ;;  %v7125_v47 = vrot.slane %v7117_v52, 9 }
 0x1b3   : > { %v7811_v9 = vpop.f32.mrf.mxu0  ;;  %8124 = vmatprep.mubr.bf16.mxu1 %v7100_v8  ;;  %v7116_v8 = vld [vmem:[%s9718_s25 + $0x40] sm:$0xe]  ;;  %v7121_v38 = vrot.slane %v7113_v46, 9  ;;  %s6545_s25 = sshll.u32 %s8490_s19, 3 }
 0x1b4   : > { %v3150_v62 = vadd.f32 %v7811_v9, %v10243_v4  ;;  %v10358_v13 = vadd.f32 %v3397_v21, %v3147_v45  ;;  %8131 = vmatpush3.bf16.msra.mxu0 %v8455_v28  ;;  %v7835_v22 = vpop.f32.mrf.mxu1  ;;  %v7124_v3 = vrot.slane %v7116_v8, 9  ;;  %v6130_v7 = vsel %vm8722_vm5, %v7125_v47, %v6129_v35  ;;  %s348_s17 = sadd.s32 %s8486_s18, %s6545_s25 }
 0x1b5   : > { %8161 = vmatpush3.bf16.msra.mxu1 %v8455_v28  ;;  %v3119_v53 = vpop.f32.mrf.mxu0  ;;  %8132 = vmatprep.subr.bf16.mxu0 %v8458_v15  ;;  %v6114_v25 = vsel %vm8722_vm5, %v7121_v38, %v6113_v49  ;;  %p349_p9 = scmp.lt.s32.totalorder %s348_s17, 15 }
 0x1b6   : > { %v3148_v6 = vadd.f32 %v3119_v53, %v10254_v24  ;;  %v10366_v2 = vadd.f32 %v7835_v22, %v3150_v62  ;;  %v3400_v4 = vpop.f32.mrf.mxu1  ;;  %8154 = vmatprep.subr.bf16.mxu1 %v8458_v15  ;;  %v8460_v24 = vld [vmem:[%s10649_s3 + $0x698] sm:$0xff]   ;;  %v6126_v17 = vsel %vm8722_vm5, %v7124_v3, %v6125_v56 }
 0x1b7   : > { %v7814_v11 = vpop.f32.mrf.mxu0  ;;  %8101 = vmatmul.mubr.bf16.gmra.mxu0 %v8457_v61  ;;  %v7129_v36 = vcombine.low %v6126_v17, %v6130_v7  ;;  %s10707_s17 = smov (!%p349_p9, %s348_s17), 15 }
 0x1b8   : > { %v3153_v14 = vadd.f32 %v7814_v11, %v10264_v32  ;;  %v10369_v19 = vadd.f32 %v3400_v4, %v3148_v6  ;;  %8133 = vmatpush3.bf16.msra.mxu0 %v8458_v15  ;;  %v7838_v20 = vpop.f32.mrf.mxu1  ;;  %8125 = vmatmul.mubr.bf16.gmra.mxu1 %v7101_v55  ;;  %s7148_s18 = sshll.u32 %s10707_s17, 5  ;;  %s6549_s16 = sshll.u32 %s10707_s17, 3 }
 0x1b9   : > { %8162 = vmatpush3.bf16.msra.mxu1 %v8458_v15  ;;  %v3132_v51 = vpop.f32.mrf.mxu0  ;;  %8134 = vmatprep.subr.bf16.mxu0 %v8459_v42  ;;  %s353_s13 = scalar_lea.vmem %s10650_s4, %s7148_s18  ;;  %s361_s27 = scalar_lea.vmem %s10651_s5, %s6549_s16 }
 0x1ba   : > { %v3151_v12 = vadd.f32 %v3132_v51, %v10270_v59  ;;  %v10375_v31 = vadd.f32 %v7838_v20, %v3153_v14  ;;  %v3413_v43 = vpop.f32.mrf.mxu1  ;;  %8155 = vmatprep.subr.bf16.mxu1 %v8459_v42  ;;  %8144 = vmatprep.mubr.bf16.mxu0 %v7126_v33  ;;  %v8461_v59 = vld [vmem:[%s10649_s3 + $0x690] sm:$0xff]  }
 0x1bb   : > { %v7815_v32 = vpop.f32.mrf.mxu0  ;;  %8148 = vmatprep.mubr.bf16.mxu1 %v7128_v18 }
 0x1bc   : > { %v3154_v54 = vadd.f32 %v7815_v32, %v10276_v41  ;;  %v10378_v28 = vadd.f32 %v3413_v43, %v3151_v12  ;;  %8135 = vmatpush3.bf16.msra.mxu0 %v8459_v42  ;;  %v7839_v57 = vpop.f32.mrf.mxu1 }
 0x1bd   : > { %8163 = vmatpush3.bf16.msra.mxu1 %v8459_v42  ;;  %v3135_v34 = vpop.f32.mrf.mxu0  ;;  %8136 = vmatprep.subr.bf16.mxu0 %v8460_v24 }
 0x1be   : > { %v3152_v10 = vadd.f32 %v3135_v34, %v10284_v16  ;;  %v10384_v37 = vadd.f32 %v7839_v57, %v3154_v54  ;;  %v3416_v41 = vpop.f32.mrf.mxu1  ;;  %8156 = vmatprep.subr.bf16.mxu1 %v8460_v24  ;;  %v7120_v16 = vrot.slane %v7112_v26, 9 }
 0x1c0   : > { %v10386_v48 = vadd.f32 %v3416_v41, %v3152_v10  ;;  %8137 = vmatpush3.bf16.msra.mxu0 %v8460_v24  ;;  %v6110_v5 = vsel %vm8722_vm5, %v7120_v16, %v6109_v0 }
 0x1c1   : > { %8164 = vmatpush3.bf16.msra.mxu1 %v8460_v24  ;;  %8138 = vmatprep.subr.bf16.mxu0 %v8461_v59  ;;  %v7127_v50 = vcombine.low %v6110_v5, %v6114_v25 }
 0x1c2   : > { %8157 = vmatprep.subr.bf16.mxu1 %v8461_v59 }
 0x1c4   : > { %8139 = vmatpush3.bf16.msra.mxu0 %v8461_v59 }
 0x1c5   : > { %8165 = vmatpush3.bf16.msra.mxu1 %v8461_v59  ;;  %8140 = vmatprep.subr.bf16.mxu0 %v8462_v23 }
 0x1c6   : > { %8158 = vmatprep.subr.bf16.mxu1 %v8462_v23 }
 0x1c8   : > { %8141 = vmatpush3.bf16.msra.mxu0 %v8462_v23 }
 0x1c9   : > { %8166 = vmatpush3.bf16.msra.mxu1 %v8462_v23  ;;  %8142 = vmatprep.subr.bf16.mxu0 %v8463_v44 }
 0x1ca   : > { %8159 = vmatprep.subr.bf16.mxu1 %v8463_v44 }
 0x1cc   : > { %8143 = vmatpush3.bf16.msra.mxu0 %v8463_v44 }
 0x1cd   : > { %8167 = vmatpush3.bf16.msra.mxu1 %v8463_v44 }
 0x1cf   : > { %v7858_v39 = vpop.f32.mrf.mxu0  ;;  %8145 = vmatmul.mubr.bf16.vlgmr.msra.gmra.mxu0 %v7127_v50 }
 0x1d0   : > { %v3639_v15 = vadd.f32 %v7858_v39, %v10348_v58  ;;  %8149 = vmatmul.mubr.bf16.vlgmr.msra.gmra.mxu1 %v7129_v36  ;;  %v7882_v27 = vpop.f32.mrf.mxu1 }
 0x1d1   : > { %v3606_v63 = vpop.f32.mrf.mxu0 }
 0x1d2   : > { %v3637_v45 = vadd.f32 %v3606_v63, %v10358_v13  ;;  %v3809_v21 = vadd.f32 %v7882_v27, %v3639_v15  ;;  %v3776_v9 = vpop.f32.mrf.mxu1 }
 0x1d3   : > { %v7859_v61 = vpop.f32.mrf.mxu0 }
 0x1d4   : > { %v3640_v1 = vadd.f32 %v7859_v61, %v10366_v2  ;;  %v3807_v60 = vadd.f32 %v3776_v9, %v3637_v45  ;;  %v7883_v29 = vpop.f32.mrf.mxu1 }
 0x1d5   : > { %v3609_v40 = vpop.f32.mrf.mxu0 }
 0x1d6   : > { %v3638_v62 = vadd.f32 %v3609_v40, %v10369_v19  ;;  %v10414_v22 = vadd.f32 %v7883_v29, %v3640_v1  ;;  %v3779_v55 = vpop.f32.mrf.mxu1 }
 0x1d7   : > { %v7862_v30 = vpop.f32.mrf.mxu0 }
 0x1d8   : > { %v3643_v58 = vadd.f32 %v7862_v30, %v10375_v31  ;;  %v10417_v53 = vadd.f32 %v3779_v55, %v3638_v62  ;;  %v7886_v42 = vpop.f32.mrf.mxu1 }
 0x1d9   : > { %v3622_v13 = vpop.f32.mrf.mxu0 }
 0x1da   : > { %v3641_v6 = vadd.f32 %v3622_v13, %v10378_v28  ;;  %v10420_v4 = vadd.f32 %v7886_v42, %v3643_v58  ;;  %v3792_v2 = vpop.f32.mrf.mxu1 }
 0x1db   : > { %v7863_v33 = vpop.f32.mrf.mxu0 }
 0x1dc   : > { %v3644_v11 = vadd.f32 %v7863_v33, %v10384_v37  ;;  %v10423_v18 = vadd.f32 %v3792_v2, %v3641_v6  ;;  %v7887_v14 = vpop.f32.mrf.mxu1 }
 0x1dd   : > { %v3625_v19 = vpop.f32.mrf.mxu0 }
 0x1de   : > { %v3642_v20 = vadd.f32 %v3625_v19, %v10386_v48  ;;  %v10426_v51 = vadd.f32 %v7887_v14, %v3644_v11  ;;  %v3795_v24 = vpop.f32.mrf.mxu1 }
 0x1e0   : > { %v10428_v12 = vadd.f32 %v3795_v24, %v3642_v20 }
 0x1ef   : > { %v7906_v31 = vpop.f32.mrf.mxu0 }
 0x1f0   : > { %v4090_v43 = vadd.f32 %v7906_v31, %v3809_v21  ;;  %v7930_v32 = vpop.f32.mrf.mxu1 }
 0x1f1   : > { %v4057_v54 = vpop.f32.mrf.mxu0 }
 0x1f2   : > { %v4088_v28 = vadd.f32 %v4057_v54, %v3807_v60  ;;  %v10430_v57 = vadd.f32 %v7930_v32, %v4090_v43  ;;  %v4266_v34 = vpop.f32.mrf.mxu1 }
 0x1f3   : > { %v10434_v10 = vpop.f32.mrf.mxu0 }
 0x1f4   : > { %v10432_v59 = vadd.f32 %v4266_v34, %v4088_v28  ;;  %v10436_v37 = vpop.f32.mrf.mxu1 }
 0x1f5   : > { %v10438_v41 = vpop.f32.mrf.mxu0 }
 0x1f6   : > { %v10440_v48 = vpop.f32.mrf.mxu1 }
 0x1f7   : > { %v7910_v23 = vpop.f32.mrf.mxu0 }
 0x1f8   : > { %v10442_v26 = vpop.f32.mrf.mxu1 }
 0x1f9   : > { %v4073_v46 = vpop.f32.mrf.mxu0 }
 0x1fa   : > { %v10444_v8 = vpop.f32.mrf.mxu1 }
 0x1fb   : > { %v7911_v52 = vpop.f32.mrf.mxu0 }
 0x1fc   : > { %v10446_v16 = vpop.f32.mrf.mxu1 }
 0x1fd   : > { %v4076_v0 = vpop.f32.mrf.mxu0 }
 0x1fe   : > { %v10448_v38 = vpop.f32.mrf.mxu1 }
 0x20f   : > { %v10450_v49 = vpop.f32.mrf.mxu0 }
 0x210   : > { %v10452_v56 = vpop.f32.mrf.mxu1 }
 0x211   : > { %v10454_v35 = vpop.f32.mrf.mxu0 }
 0x212   : > { %v10456_v44 = vpop.f32.mrf.mxu1 }
 0x213   : > { %v7955_v3 = vpop.f32.mrf.mxu0 }
 0x214   : > { %v10458_v47 = vpop.f32.mrf.mxu1 }
 0x215   : > { %v10460_v5 = vpop.f32.mrf.mxu0 }
 0x216   : > { %v10462_v25 = vpop.f32.mrf.mxu1 }
 0x217   : > { %v7958_v17 = vpop.f32.mrf.mxu0 }
 0x218   : > { %v10464_v7 = vpop.f32.mrf.mxu1 }
 0x219   : > { %v10466_v50 = vpop.f32.mrf.mxu0 }
 0x21a   : > { %v10468_v36 = vpop.f32.mrf.mxu1 }
 0x21b   : > { %v7959_v39 = vpop.f32.mrf.mxu0 }
 0x21c   : > { %v10470_v15 = vpop.f32.mrf.mxu1 }
 0x21d   : > { %v4454_v27 = vpop.f32.mrf.mxu0 }
 0x21e   : > { %v10472_v63 = vpop.f32.mrf.mxu1 }
 0x22f   : > { %v10474_v45 = vpop.f32.mrf.mxu0 }
 0x230   : > { %v10476_v21 = vpop.f32.mrf.mxu1 }
 0x231   : > { %v10478_v9 = vpop.f32.mrf.mxu0 }
 0x232   : > { %v10480_v61 = vpop.f32.mrf.mxu1 }
 0x233   : > { %v10482_v1 = vpop.f32.mrf.mxu0 }
 0x234   : > { %v10484_v60 = vpop.f32.mrf.mxu1 }
 0x235   : > { %v10486_v29 = vpop.f32.mrf.mxu0 }
 0x236   : > { %v10488_v40 = vpop.f32.mrf.mxu1 }
 0x237   : > { %v10490_v62 = vpop.f32.mrf.mxu0 }
 0x238   : > { %v10492_v55 = vpop.f32.mrf.mxu1 }
 0x239   : > { %v10494_v30 = vpop.f32.mrf.mxu0 }
 0x23a   : > { %v10496_v58 = vpop.f32.mrf.mxu1 }
 0x23b   : > { %v8007_v42 = vpop.f32.mrf.mxu0 }
 0x23c   : > { %v10498_v13 = vpop.f32.mrf.mxu1 }
 0x23d   : > { %v10500_v6 = vpop.f32.mrf.mxu0 }
 0x23e   : > { %v10502_v2 = vpop.f32.mrf.mxu1 }
 0x23f   : > { %10658 = vst [vmem:[#allocation2_spill] sm:$0xff] %v10502_v2 }
 0x24f   : > { %v10504_v33 = vpop.f32.mrf.mxu0 }
 0x250   : > { %v10506_v11 = vpop.f32.mrf.mxu1 }
 0x251   : > { %10659 = vst [vmem:[#allocation3_spill] sm:$0xff] %v10506_v11  ;;  %v10508_v14 = vpop.f32.mrf.mxu0 }
 0x252   : > { %10660 = vst [vmem:[#allocation4_spill] sm:$0xff] %v10508_v14  ;;  %v10510_v19 = vpop.f32.mrf.mxu1 }
 0x253   : > { %10661 = vst [vmem:[#allocation5_spill] sm:$0xff] %v10510_v19  ;;  %v10512_v20 = vpop.f32.mrf.mxu0 }
 0x254   : > { %v10514_v24 = vpop.f32.mrf.mxu1 }
 0x255   : > { %10662 = vst [vmem:[#allocation6_spill] sm:$0xff] %v10514_v24  ;;  %v10516_v31 = vpop.f32.mrf.mxu0 }
 0x256   : > { %10663 = vst [vmem:[#allocation7_spill] sm:$0xff] %v10516_v31  ;;  %v10518_v43 = vpop.f32.mrf.mxu1 }
 0x257   : > { %10664 = vst [vmem:[#allocation8_spill] sm:$0xff] %v10518_v43  ;;  %v10520_v32 = vpop.f32.mrf.mxu0 }
 0x258   : > { %v10522_v54 = vpop.f32.mrf.mxu1 }
 0x259   : > { %10665 = vst [vmem:[#allocation9_spill] sm:$0xff] %v10522_v54  ;;  %v10524_v28 = vpop.f32.mrf.mxu0  ;;  %v4091_v54 = vadd.f32 %v10434_v10, %v10414_v22 }
 0x25a   : > { %10666 = vst [vmem:[#allocation10_spill] sm:$0xff] %v10524_v28  ;;  %v10526_v34 = vpop.f32.mrf.mxu1 }
 0x25b   : > { %10667 = vst [vmem:[#allocation11_spill] sm:$0xff] %v10526_v34  ;;  %v10528_v11 = vpop.f32.mrf.mxu0  ;;  %v4094_v34 = vadd.f32 %v7910_v23, %v10420_v4 }
 0x25c   : > { %10668 = vst [vmem:[#allocation12_spill] sm:$0xff] %v10528_v11  ;;  %v10530_v14 = vpop.f32.mrf.mxu1  ;;  %v4095_v11 = vadd.f32 %v7911_v52, %v10426_v51  ;;  %v4468_v51 = vadd.f32 %v10450_v49, %v10430_v57 }
 0x25d   : > { %10669 = vst [vmem:[#allocation13_spill] sm:$0xff] %v10530_v14  ;;  %v10532_v19 = vpop.f32.mrf.mxu0  ;;  %v4089_v14 = vadd.f32 %v10438_v41, %v10417_v53  ;;  %v4303_v22 = vadd.f32 %v10442_v26, %v4094_v34 }
 0x25e   : > { %10670 = vst [vmem:[#allocation14_spill] sm:$0xff] %v10532_v19  ;;  %v10534_v2 = vpop.f32.mrf.mxu1  ;;  %v4304_v10 = vadd.f32 %v10446_v16, %v4095_v11  ;;  %v4749_v57 = vadd.f32 %v10452_v56, %v4468_v51 }
 0x25f   : > { %10671 = vst [vmem:[#allocation15_spill] sm:$0xff] %v10534_v2  ;;  %v4092_v2 = vadd.f32 %v4073_v46, %v10423_v18  ;;  %v4298_v4 = vadd.f32 %v10440_v48, %v4089_v14  ;;  %v4472_v41 = vadd.f32 %v7958_v17, %v4303_v22 }
 0x260   : > { %v4473_v23 = vadd.f32 %v7959_v39, %v4304_v10  ;;  %v10683_v51 = vld [vmem:[#allocation9_spill] sm:$0xff] }
 0x261   : > { %v4301_v18 = vadd.f32 %v10444_v8, %v4092_v2  ;;  %v4467_v26 = vadd.f32 %v10460_v5, %v4298_v4  ;;  %v10675_v2 = vld [vmem:[#allocation2_spill] sm:$0xff] }
 0x263   : > { %v4470_v48 = vadd.f32 %v10466_v50, %v4301_v18  ;;  %v10676_v11 = vld [vmem:[#allocation12_spill] sm:$0xff] }
 0x265   : > { %v4751_v56 = vadd.f32 %v10468_v36, %v4470_v48 }
 0x26f   : > { %v10536_v24 = vpop.f32.mrf.mxu0 }
 0x270   : > { %10672 = vst [vmem:[#allocation16_spill] sm:$0xff] %v10536_v24  ;;  %v10538_v31 = vpop.f32.mrf.mxu1  ;;  %v4093_v24 = vadd.f32 %v4076_v0, %v10428_v12  ;;  %v4753_v0 = vadd.f32 %v10464_v7, %v4472_v41  ;;  %v10685_v41 = vld [vmem:[#allocation5_spill] sm:$0xff] }
 0x271   : > { %10673 = vst [vmem:[#allocation17_spill] sm:$0xff] %v10538_v31  ;;  %v10540_v43 = vpop.f32.mrf.mxu0  ;;  %v4300_v31 = vadd.f32 %v10436_v37, %v4091_v54  ;;  %v4466_v37 = vadd.f32 %v10454_v35, %v10432_v59  ;;  %v4748_v59 = vadd.f32 %v10462_v25, %v4467_v26  ;;  %v4958_v35 = vadd.f32 %v10474_v45, %v4749_v57 }
 0x272   : > { %10674 = vst [vmem:[#allocation18_spill] sm:$0xff] %v10540_v43  ;;  %v10544_v28 = vpop.f32.mrf.mxu1  ;;  %v4302_v12 = vadd.f32 %v10448_v38, %v4093_v24  ;;  %v4754_v38 = vadd.f32 %v10470_v15, %v4473_v23  ;;  %v10677_v24 = vld [vmem:[#allocation4_spill] sm:$0xff] }
 0x273   : > { %v10552_v19 = vpop.f32.mrf.mxu0  ;;  %v4469_v53 = vadd.f32 %v7955_v3, %v4300_v31  ;;  %v4747_v3 = vadd.f32 %v10456_v44, %v4466_v37  ;;  %v4957_v15 = vadd.f32 %v10486_v29, %v4748_v59  ;;  %v4960_v44 = vadd.f32 %v10494_v30, %v4751_v56  ;;  %v10678_v31 = vld [vmem:[#allocation7_spill] sm:$0xff]  ;;  %v10686_v37 = vld [vmem:[#allocation8_spill] sm:$0xff] }
 0x274   : > { %v10555_v43 = vpop.f32.mrf.mxu1  ;;  %v4471_v16 = vadd.f32 %v4454_v27, %v4302_v12  ;;  %v4963_v7 = vadd.f32 %v8007_v42, %v4754_v38  ;;  %v5128_v45 = vadd.f32 %v10476_v21, %v4958_v35 }
 0x275   : > { %v10564_v46 = vpop.f32.mrf.mxu0  ;;  %v4750_v8 = vadd.f32 %v10458_v47, %v4469_v53  ;;  %v4962_v47 = vadd.f32 %v10490_v62, %v4753_v0  ;;  %v4956_v39 = vadd.f32 %v10478_v9, %v4747_v3  ;;  %v5127_v29 = vadd.f32 %v10488_v40, %v4957_v15  ;;  %v10679_v40 = vld [vmem:[#allocation10_spill] sm:$0xff]  ;;  %v10688_v0 = vld [vmem:[#allocation11_spill] sm:$0xff] }
 0x276   : > { %v10569_v52 = vpop.f32.mrf.mxu1  ;;  %v4752_v50 = vadd.f32 %v10472_v63, %v4471_v16  ;;  %v5133_v62 = vadd.f32 %v10498_v13, %v4963_v7  ;;  %v5409_v42 = vadd.f32 %v10504_v33, %v5128_v45  ;;  %v10680_v33 = vld [vmem:[#allocation14_spill] sm:$0xff]  ;;  %v10689_v3 = vld [vmem:[#allocation15_spill] sm:$0xff] }
 0x277   : > { %v8102_v49 = vpop.f32.mrf.mxu0  ;;  %v4959_v5 = vadd.f32 %v10482_v1, %v4750_v8  ;;  %v5132_v63 = vadd.f32 %v10492_v55, %v4962_v47  ;;  %v5126_v9 = vadd.f32 %v10480_v61, %v4956_v39  ;;  %v5408_v54 = vadd.f32 %v10678_v31, %v5127_v29  ;;  %v10687_v48 = vld [vmem:[#allocation16_spill] sm:$0xff] }
 0x278   : > { %v8126_v17 = vpop.f32.mrf.mxu1  ;;  %v4961_v25 = vadd.f32 %v10500_v6, %v4752_v50  ;;  %v5130_v6 = vadd.f32 %v10496_v58, %v4960_v44  ;;  %v5414_v14 = vadd.f32 %v10676_v11, %v5133_v62  ;;  %v10682_v58 = vld [vmem:[#allocation6_spill] sm:$0xff] }
 0x279   : > { %v5771_v27 = vpop.f32.mrf.mxu0  ;;  %v5129_v1 = vadd.f32 %v10484_v60, %v4959_v5  ;;  %v5413_v60 = vadd.f32 %v10520_v32, %v5132_v63  ;;  %v5407_v13 = vadd.f32 %v10677_v24, %v5126_v9  ;;  %v10684_v32 = vld [vmem:[#allocation13_spill] sm:$0xff]  ;;  %v5617_v26 = vadd.f32 %v10686_v37, %v5408_v54  ;;  %v10690_v50 = vld [vmem:[#allocation18_spill] sm:$0xff] }
 0x27a   : > { %v6052_v36 = vpop.f32.mrf.mxu1  ;;  %v5131_v21 = vadd.f32 %v10675_v2, %v4961_v25  ;;  %v5411_v34 = vadd.f32 %v10679_v40, %v5130_v6  ;;  %v5623_v18 = vadd.f32 %v10684_v32, %v5414_v14 }
 0x27b   : > { %v5410_v30 = vadd.f32 %v10512_v20, %v5129_v1  ;;  %v8103_v55 = vpop.f32.mrf.mxu0  ;;  %v10681_v20 = vld [vmem:[#allocation3_spill] sm:$0xff]  ;;  %v5622_v53 = vadd.f32 %v10683_v51, %v5413_v60  ;;  %v5616_v23 = vadd.f32 %v10685_v41, %v5407_v13  ;;  %v5787_v7 = vadd.f32 %v10564_v46, %v5617_v26 }
 0x27c   : > { %v8127_v61 = vpop.f32.mrf.mxu1  ;;  %v5412_v22 = vadd.f32 %v10680_v33, %v5131_v21  ;;  %v5618_v10 = vadd.f32 %v10681_v20, %v5409_v42  ;;  %v5620_v38 = vadd.f32 %v10688_v0, %v5411_v34  ;;  %v5793_v5 = vadd.f32 %v8103_v55, %v5623_v18 }
 0x27d   : > { %v5619_v4 = vadd.f32 %v10682_v58, %v5410_v30  ;;  %v5774_v12 = vpop.f32.mrf.mxu0  ;;  %v5792_v35 = vadd.f32 %v8102_v49, %v5622_v53  ;;  %v5786_v47 = vadd.f32 %v10690_v50, %v5616_v23  ;;  %v6068_v42 = vadd.f32 %v10569_v52, %v5787_v7 }
 0x27e   : > { %v5788_v16 = vadd.f32 %v10687_v48, %v5618_v10  ;;  %v6055_v8 = vpop.f32.mrf.mxu1  ;;  %v5621_v59 = vadd.f32 %v10689_v3, %v5412_v22  ;;  %v5790_v15 = vadd.f32 %v5771_v27, %v5620_v38  ;;  %v6074_v9 = vadd.f32 %v8127_v61, %v5793_v5 }
 0x27f   : > { %v5789_v57 = vadd.f32 %v10552_v19, %v5619_v4  ;;  %v10691_v19 = vld [vmem:[#allocation17_spill] sm:$0xff]  ;;  %v6073_v62 = vadd.f32 %v8126_v17, %v5792_v35  ;;  %v6067_v49 = vadd.f32 %v10544_v28, %v5786_v47 }
 0x280   : > { %v5791_v44 = vadd.f32 %v5774_v12, %v5621_v59  ;;  %v6069_v45 = vadd.f32 %v10691_v19, %v5788_v16  ;;  %v6071_v2 = vadd.f32 %v6052_v36, %v5790_v15 }
 0x281   : > { %v6070_v1 = vadd.f32 %v10555_v43, %v5789_v57 }
 0x282   : > { %v6072_v27 = vadd.f32 %v6055_v8, %v5791_v44 }
 0x28f   : > { %v8146_v56 = vpop.f32.mrf.mxu0 }
 0x290   : > { %v8150_v39 = vpop.f32.mrf.mxu1  ;;  %v6278_v30 = vadd.f32 %v8146_v56, %v6069_v45 }
 0x291   : > { %v6245_v25 = vpop.f32.mrf.mxu0  ;;  %v6282_v21 = vadd.f32 %v8150_v39, %v6073_v62 }
 0x292   : > { %v6261_v63 = vpop.f32.mrf.mxu1  ;;  %v6276_v11 = vadd.f32 %v6245_v25, %v6067_v49 }
 0x293   : > { %v8147_v29 = vpop.f32.mrf.mxu0  ;;  %v6280_v24 = vadd.f32 %v6261_v63, %v6071_v2 }
 0x294   : > { %v6279_v6 = vadd.f32 %v8147_v29, %v6070_v1  ;;  %v8151_v46 = vpop.f32.mrf.mxu1 }
 0x295   : > { %v6283_v43 = vadd.f32 %v8151_v46, %v6074_v9  ;;  %v6248_v60 = vpop.f32.mrf.mxu0 }
 0x296   : > { %v7165_v17 = vpack.c.bf16 %v6279_v6, %v6278_v30  ;;  %v6277_v14 = vadd.f32 %v6248_v60, %v6068_v42  ;;  %v6264_v55 = vpop.f32.mrf.mxu1 }
 0x297   : > { %v7175_v28 = vpack.c.bf16 %v6283_v43, %v6282_v21  ;;  %v6281_v13 = vadd.f32 %v6264_v55, %v6072_v27 }
 0x298   : > { %7177 = vst [vmem:[%s353_s13 + $0x8] sm:$0xff] %v7165_v17   ;;  %v7160_v52 = vpack.c.bf16 %v6277_v14, %v6276_v11  ;;  %v6324_v31 = vadd.f32 %v6277_v14, %v6276_v11 }
 0x299   : > { %7179 = vst [vmem:[%s353_s13 + $0x18] sm:$0xff] %v7175_v28   ;;  %v7170_v36 = vpack.c.bf16 %v6281_v13, %v6280_v24 }
 0x29a   : > { %7161 = vst [vmem:[%s353_s13] sm:$0xff] %v7160_v52   ;;  %v6325_v54 = vadd.f32 %v6324_v31, %v6278_v30 }
 0x29b   : > { %7178 = vst [vmem:[%s353_s13 + $0x10] sm:$0xff] %v7170_v36  }
 0x29c   : > { %v6326_v61 = vadd.f32 %v6325_v54, %v6279_v6 }
 0x29e   : > { %v6327_v40 = vadd.f32 %v6326_v61, %v6280_v24 }
 0x2a0   : > { %v6328_v34 = vadd.f32 %v6327_v40, %v6281_v13 }
 0x2a2   : > { %v6329_v33 = vadd.f32 %v6328_v34, %v6282_v21 }
 0x2a4   : > { %v6330_v22 = vadd.f32 %v6329_v33, %v6283_v43 }
 0x2a6   : > { %v6331_v20 = vrot.slane %v6330_v22, 4 }
 0x2a8   : > { %v6332_v10 = vadd.f32 %v6331_v20, %v6330_v22 }
 0x2aa   : > { %v6333_v58 = vrot.slane %v6332_v10, 2 }
 0x2ac   : > { %v6334_v4 = vadd.f32 %v6333_v58, %v6332_v10 }
 0x2ae   : > { %v6335_v51 = vrot.slane %v6334_v4, 1 }
 0x2b0   : > { %v6336_v53 = vadd.f32 %v6335_v51, %v6334_v4 }
 0x2b2   : > { %v6337_v32 = vmul.f32 0.015625, %v6336_v53 }
 0x2b4   : > { %v6338_v18 = vsub.f32 %v6276_v11, %v6337_v32  ;;  %v6339_v12 = vsub.f32 %v6277_v14, %v6337_v32  ;;  %v6340_v41 = vsub.f32 %v6278_v30, %v6337_v32  ;;  %v6341_v23 = vsub.f32 %v6279_v6, %v6337_v32 }
 0x2b5   : > { %v6342_v37 = vsub.f32 %v6280_v24, %v6337_v32  ;;  %v6343_v26 = vsub.f32 %v6281_v13, %v6337_v32  ;;  %v6344_v48 = vsub.f32 %v6282_v21, %v6337_v32  ;;  %v6345_v16 = vsub.f32 %v6283_v43, %v6337_v32 }
 0x2b6   : > { %v6346_v57 = vmul.f32 %v6338_v18, %v6338_v18  ;;  %v6347_v8 = vmul.f32 %v6339_v12, %v6339_v12  ;;  %v6348_v0 = vmul.f32 %v6340_v41, %v6340_v41  ;;  %v6349_v3 = vmul.f32 %v6341_v23, %v6341_v23 }
 0x2b7   : > { %v6350_v35 = vmul.f32 %v6342_v37, %v6342_v37  ;;  %v6351_v56 = vmul.f32 %v6343_v26, %v6343_v26  ;;  %v6352_v47 = vmul.f32 %v6344_v48, %v6344_v48  ;;  %v6353_v39 = vmul.f32 %v6345_v16, %v6345_v16 }
 0x2b8   : > { %v6354_v38 = vadd.f32 %v6347_v8, %v6346_v57 }
 0x2ba   : > { %v6355_v59 = vadd.f32 %v6354_v38, %v6348_v0 }
 0x2bc   : > { %v6356_v5 = vadd.f32 %v6355_v59, %v6349_v3 }
 0x2be   : > { %v6357_v50 = vadd.f32 %v6356_v5, %v6350_v35 }
 0x2c0   : > { %v6358_v7 = vadd.f32 %v6357_v50, %v6351_v56 }
 0x2c2   : > { %v6359_v15 = vadd.f32 %v6358_v7, %v6352_v47 }
 0x2c4   : > { %v6360_v44 = vadd.f32 %v6359_v15, %v6353_v39 }
 0x2c6   : > { %v6361_v25 = vrot.slane %v6360_v44, 4 }
 0x2c8   : > { %v6362_v19 = vadd.f32 %v6361_v25, %v6360_v44 }
 0x2ca   : > { %v6363_v45 = vrot.slane %v6362_v19, 2 }
 0x2cc   : > { %v6364_v1 = vadd.f32 %v6363_v45, %v6362_v19 }
 0x2ce   : > { %v6365_v63 = vrot.slane %v6364_v1, 1 }
 0x2d0   : > { %v6366_v62 = vadd.f32 %v6365_v63, %v6364_v1 }
 0x2d2   : > { %v6368_v9 = vsel %vm6367_vm6, %v6336_v53, %v6366_v62 }
 0x2d3   : > { %v6370_v29 = vsel %vm6369_vm7, %v6368_v9, 0.0 }
 0x2d4   : > { %6371 = vst [vmem:[%s361_s27] sm:$0xff] %v6370_v29 }
 0x2d5 PF: > { %s16_s22 = sadd.s32 1, %s8502_s22   ;;  %s10692_s18 = smov %s8494_s20 }
 0x2d6   : > { %p13_p10 = scmp.ge.s32.totalorder %s16_s22, 18   ;;  %s10693_s19 = smov %s8498_s21 }
 0x2d7   : > { %s10694_s20 = smov %s10697_s23  ;;  %s10695_s21 = smov %s10701_s24 }
 0x2d8   :  { %15 = sbr.rel (!%p13_p10) target bundleno = 3 (0x3), region = 90 }

</bundles_post_ra>
